<compile_context>
chip_gen: v5e
topology: v5e:2x2
jax: 0.10.0
libtpu: 0.0.40
codegen_flags: <defaults>
</compile_context>

<pallas_src>
import jax
import jax.numpy as jnp
from jax.experimental import pallas as pl
from jax.experimental.pallas import tpu as pltpu

_CP = 128  # lane-padded channel count (keeps everything lane-dense)


def _triple_conv_bn_relu_kernel(x_ref, w_ref, s_ref, b_ref, o_ref,
                                xpad_ref, col_ref):
    """Fused 3x [Conv3x3(s1,p1,no-bias) + BN(scale/bias) + ReLU] for one image.

    x_ref   : (1, H, W, Cin)      unpadded NHWC input tile
    w_ref   : (3, 9*Cp, Cp)       per-layer im2col weights (channel-padded)
    s_ref   : (3, 1, Cp)          folded BN scale  = gamma / sqrt(var + eps)
    b_ref   : (3, 1, Cp)          folded BN bias   = beta - mean * scale
    o_ref   : (1, H, W, Cp)       channel-padded output (wrapper slices :Cout)
    xpad_ref: VMEM (H+2, W+2, Cp) zero-padded activation staging buffer
    col_ref : VMEM (H*W, 9*Cp)    im2col staging buffer
    """
    _, H, W, Cp = o_ref.shape
    Cin = x_ref.shape[3]

    # Zero once: border rows/cols are never written again (padding=1), and the
    # padded channel lanes of layer-0's input must be exactly zero.
    xpad_ref[...] = jnp.zeros(xpad_ref.shape, xpad_ref.dtype)
    xpad_ref[1:H + 1, 1:W + 1, :Cin] = x_ref[0]

    act = None
    for layer in range(3):            # static unroll; all weights VMEM-resident
        if layer > 0:
            # Interior fully overwritten each layer; borders stay zero.
            xpad_ref[1:H + 1, 1:W + 1, :] = act

        # im2col: tap-major (dy*3+dx) blocks of Cp lanes -> (H*W, 9*Cp).
        # Each column block is a lane-aligned (multiple-of-128) dense store.
        for k in range(9):
            dy, dx = k // 3, k % 3
            col_ref[:, k * Cp:(k + 1) * Cp] = (
                xpad_ref[dy:dy + H, dx:dx + W, :].reshape(H * W, Cp))

        # One MXU contraction per layer: (H*W, 9*Cp) @ (9*Cp, Cp), f32 acc.
        y = jnp.dot(col_ref[...], w_ref[layer],
                    preferred_element_type=jnp.float32)
        y = y * s_ref[layer] + b_ref[layer]       # folded BatchNorm (eval)
        y = jnp.maximum(y, 0.0)                   # ReLU
        act = y.reshape(H, W, Cp)

    o_ref[...] = act.reshape(1, H, W, Cp).astype(o_ref.dtype)


def _pad_layer(w_taps, scale, bias, cp):
    """Channel-pad one layer's params to the lane-dense (Cp) im2col layout."""
    _, cin, cout = w_taps.shape
    w = jnp.zeros((9, cp, cp), jnp.float32).at[:, :cin, :cout].set(w_taps)
    s = jnp.zeros((cp,), jnp.float32).at[:cout].set(scale)
    b = jnp.zeros((cp,), jnp.float32).at[:cout].set(bias)
    return w.reshape(9 * cp, cp), s.reshape(1, cp), b.reshape(1, cp)


@jax.jit
def triple_conv_encoder(x_nchw, p0, p1, p2):
    """Matches TripleConvEncoder.forward: NCHW in, NCHW out (eval-mode BN)."""
    N, _, H, W = x_nchw.shape
    cp = _CP
    cout = p2[0].shape[-1]

    padded = [_pad_layer(w, s, b, cp) for (w, s, b) in (p0, p1, p2)]
    w_all = jnp.stack([p[0] for p in padded])     # (3, 9*Cp, Cp)
    s_all = jnp.stack([p[1] for p in padded])     # (3, 1, Cp)
    b_all = jnp.stack([p[2] for p in padded])     # (3, 1, Cp)

    # Single layout change at each end; all three layers run in NHWC in VMEM.
    x_nhwc = jnp.transpose(x_nchw, (0, 2, 3, 1))
    cin = x_nhwc.shape[-1]

    grid_spec = pltpu.PrefetchScalarGridSpec(
        num_scalar_prefetch=0,
        grid=(N,),
        in_specs=[
            pl.BlockSpec((1, H, W, cin), lambda n: (n, 0, 0, 0)),
            pl.BlockSpec((3, 9 * cp, cp), lambda n: (0, 0, 0)),
            pl.BlockSpec((3, 1, cp), lambda n: (0, 0, 0)),
            pl.BlockSpec((3, 1, cp), lambda n: (0, 0, 0)),
        ],
        out_specs=pl.BlockSpec((1, H, W, cp), lambda n: (n, 0, 0, 0)),
        scratch_shapes=[
            pltpu.VMEM((H + 2, W + 2, cp), jnp.float32),   # padded activation
            pltpu.VMEM((H * W, 9 * cp), jnp.float32),      # im2col buffer
        ],
    )

    out_pad = pl.pallas_call(
        _triple_conv_bn_relu_kernel,
        out_shape=jax.ShapeDtypeStruct((N, H, W, cp), jnp.float32),
        grid_spec=grid_spec,
        compiler_params=pltpu.CompilerParams(
            dimension_semantics=("parallel",)),
    )(x_nhwc, w_all, s_all, b_all)

    return jnp.transpose(out_pad[..., :cout], (0, 3, 1, 2))


def make_params(key, in_channels, out_channels, eps=1e-5):
    """Deterministic synthetic parameters for the 3 conv+BN layers."""
    params = []
    chans = [(in_channels, in_channels),
             (in_channels, in_channels),
             (in_channels, out_channels)]
    for i, (cin, cout) in enumerate(chans):
        k_w, k_g, k_b, k_m, k_v = jax.random.split(
            jax.random.fold_in(key, i), 5)
        # conv weight, HWIO layout (3,3,Cin,Cout) -> tap-major (9,Cin,Cout)
        w = 0.1 * jax.random.normal(k_w, (3, 3, cin, cout), jnp.float32)
        w_taps = w.reshape(9, cin, cout)
        gamma = 1.0 + 0.1 * jax.random.normal(k_g, (cout,), jnp.float32)
        beta = 0.1 * jax.random.normal(k_b, (cout,), jnp.float32)
        running_mean = 0.1 * jax.random.normal(k_m, (cout,), jnp.float32)
        running_var = jnp.abs(
            1.0 + 0.1 * jax.random.normal(k_v, (cout,), jnp.float32))
        # fold BN (eval mode) into scale/bias
        scale = gamma / jnp.sqrt(running_var + eps)
        bias = beta - running_mean * scale
        params.append((w_taps, scale, bias, w))
    return params


def _reference(x_nchw, params):
    """Pure-JAX reference (lax conv) for correctness checking."""
    x = jnp.transpose(x_nchw, (0, 2, 3, 1))
    for (_, scale, bias, w_hwio) in params:
        y = jax.lax.conv_general_dilated(
            x, w_hwio, window_strides=(1, 1), padding=((1, 1), (1, 1)),
            dimension_numbers=("NHWC", "HWIO", "NHWC"))
        y = y * scale + bias
        x = jnp.maximum(y, 0.0)
    return jnp.transpose(x, (0, 3, 1, 2))


if __name__ == "__main__":
    key = jax.random.PRNGKey(0)
    k_x, k_p = jax.random.split(key)

    N, Cin, Cout, S = 2, 4, 8, 16
    x = jax.random.normal(k_x, (N, Cin, S, S), jnp.float32)

    params = make_params(k_p, Cin, Cout)
    p0, p1, p2 = [(w, s, b) for (w, s, b, _) in params]

    out = triple_conv_encoder(x, p0, p1, p2)
    out = jax.block_until_ready(out)

    ref = _reference(x, params)
    assert out.shape == (N, Cout, S, S), out.shape
    assert jnp.allclose(out, ref, atol=1e-4, rtol=1e-4), (
        float(jnp.max(jnp.abs(out - ref))))

    print("KERNEL_OK")
</pallas_src>

<mosaic_0001>
module attributes {stable_mosaic.version = 11 : i64} {
  func.func @_triple_conv_bn_relu_kernel(%arg0: i32, %arg1: memref<1x16x16x4xf32, #tpu.memory_space<vmem>>, %arg2: memref<3x1152x128xf32, #tpu.memory_space<vmem>>, %arg3: memref<3x1x128xf32, #tpu.memory_space<vmem>>, %arg4: memref<3x1x128xf32, #tpu.memory_space<vmem>>, %arg5: memref<1x16x16x128xf32, #tpu.memory_space<vmem>>, %arg6: memref<18x18x128xf32, #tpu.memory_space<vmem>>, %arg7: memref<256x1152xf32, #tpu.memory_space<vmem>>) attributes {dimension_semantics = [#tpu.dimension_semantics<parallel>], iteration_bounds = array<i64: 2>, scalar_prefetch = 0 : i64, scratch_operands = 2 : i64, tpu.core_type = #tpu.core_type<tc>, window_params = [{transform_indices = @transform_0, window_bounds = array<i64: 1, 16, 16, 4>}, {pipeline_mode = #tpu.pipeline_mode<synchronous>, transform_indices = @transform_1, window_bounds = array<i64: 3, 1152, 128>}, {pipeline_mode = #tpu.pipeline_mode<synchronous>, transform_indices = @transform_2, window_bounds = array<i64: 3, 1, 128>}, {pipeline_mode = #tpu.pipeline_mode<synchronous>, transform_indices = @transform_3, window_bounds = array<i64: 3, 1, 128>}, {transform_indices = @transform_4, window_bounds = array<i64: 1, 16, 16, 128>}]} {
    %cst = arith.constant 0.000000e+00 : f32
    %0 = vector.broadcast %cst : f32 to vector<18x18x128xf32>
    %c0 = arith.constant 0 : index
    %c0_0 = arith.constant 0 : index
    %c0_1 = arith.constant 0 : index
    %1 = vector.load %arg6[%c0, %c0_0, %c0_1] : memref<18x18x128xf32, #tpu.memory_space<vmem>>, vector<18x18x128xf32>
    tpu.vector_store %arg6[%c0, %c0_0, %c0_1], %0 {strides = array<i32>} : memref<18x18x128xf32, #tpu.memory_space<vmem>>, vector<18x18x128xf32>,
    %c0_2 = arith.constant 0 : index
    %c0_3 = arith.constant 0 : index
    %c0_4 = arith.constant 0 : index
    %c0_5 = arith.constant 0 : index
    %2 = vector.load %arg1[%c0_2, %c0_3, %c0_4, %c0_5] : memref<1x16x16x4xf32, #tpu.memory_space<vmem>>, vector<1x16x16x4xf32>
    %3 = vector.shape_cast %2 : vector<1x16x16x4xf32> to vector<16x16x4xf32>
    %c1 = arith.constant 1 : index
    %c1_6 = arith.constant 1 : index
    %c0_7 = arith.constant 0 : index
    %4 = vector.load %arg6[%c1, %c1_6, %c0_7] : memref<18x18x128xf32, #tpu.memory_space<vmem>>, vector<16x16x4xf32>
    tpu.vector_store %arg6[%c1, %c1_6, %c0_7], %3 {strides = array<i32>} : memref<18x18x128xf32, #tpu.memory_space<vmem>>, vector<16x16x4xf32>,
    %c0_8 = arith.constant 0 : index
    %c0_9 = arith.constant 0 : index
    %c0_10 = arith.constant 0 : index
    %5 = vector.load %arg6[%c0_8, %c0_9, %c0_10] : memref<18x18x128xf32, #tpu.memory_space<vmem>>, vector<16x16x128xf32>
    %6 = vector.shape_cast %5 : vector<16x16x128xf32> to vector<256x128xf32>
    %c0_11 = arith.constant 0 : index
    %c0_12 = arith.constant 0 : index
    %7 = vector.load %arg7[%c0_11, %c0_12] : memref<256x1152xf32, #tpu.memory_space<vmem>>, vector<256x128xf32>
    tpu.vector_store %arg7[%c0_11, %c0_12], %6 {strides = array<i32>} : memref<256x1152xf32, #tpu.memory_space<vmem>>, vector<256x128xf32>,
    %c0_13 = arith.constant 0 : index
    %c1_14 = arith.constant 1 : index
    %c0_15 = arith.constant 0 : index
    %8 = vector.load %arg6[%c0_13, %c1_14, %c0_15] : memref<18x18x128xf32, #tpu.memory_space<vmem>>, vector<16x16x128xf32>
    %9 = vector.shape_cast %8 : vector<16x16x128xf32> to vector<256x128xf32>
    %c0_16 = arith.constant 0 : index
    %c128 = arith.constant 128 : index
    %10 = vector.load %arg7[%c0_16, %c128] : memref<256x1152xf32, #tpu.memory_space<vmem>>, vector<256x128xf32>
    tpu.vector_store %arg7[%c0_16, %c128], %9 {strides = array<i32>} : memref<256x1152xf32, #tpu.memory_space<vmem>>, vector<256x128xf32>,
    %c0_17 = arith.constant 0 : index
    %c2 = arith.constant 2 : index
    %c0_18 = arith.constant 0 : index
    %11 = vector.load %arg6[%c0_17, %c2, %c0_18] : memref<18x18x128xf32, #tpu.memory_space<vmem>>, vector<16x16x128xf32>
    %12 = vector.shape_cast %11 : vector<16x16x128xf32> to vector<256x128xf32>
    %c0_19 = arith.constant 0 : index
    %c256 = arith.constant 256 : index
    %13 = vector.load %arg7[%c0_19, %c256] : memref<256x1152xf32, #tpu.memory_space<vmem>>, vector<256x128xf32>
    tpu.vector_store %arg7[%c0_19, %c256], %12 {strides = array<i32>} : memref<256x1152xf32, #tpu.memory_space<vmem>>, vector<256x128xf32>,
    %c1_20 = arith.constant 1 : index
    %c0_21 = arith.constant 0 : index
    %c0_22 = arith.constant 0 : index
    %14 = vector.load %arg6[%c1_20, %c0_21, %c0_22] : memref<18x18x128xf32, #tpu.memory_space<vmem>>, vector<16x16x128xf32>
    %15 = vector.shape_cast %14 : vector<16x16x128xf32> to vector<256x128xf32>
    %c0_23 = arith.constant 0 : index
    %c384 = arith.constant 384 : index
    %16 = vector.load %arg7[%c0_23, %c384] : memref<256x1152xf32, #tpu.memory_space<vmem>>, vector<256x128xf32>
    tpu.vector_store %arg7[%c0_23, %c384], %15 {strides = array<i32>} : memref<256x1152xf32, #tpu.memory_space<vmem>>, vector<256x128xf32>,
    %c1_24 = arith.constant 1 : index
    %c1_25 = arith.constant 1 : index
    %c0_26 = arith.constant 0 : index
    %17 = vector.load %arg6[%c1_24, %c1_25, %c0_26] : memref<18x18x128xf32, #tpu.memory_space<vmem>>, vector<16x16x128xf32>
    %18 = vector.shape_cast %17 : vector<16x16x128xf32> to vector<256x128xf32>
    %c0_27 = arith.constant 0 : index
    %c512 = arith.constant 512 : index
    %19 = vector.load %arg7[%c0_27, %c512] : memref<256x1152xf32, #tpu.memory_space<vmem>>, vector<256x128xf32>
    tpu.vector_store %arg7[%c0_27, %c512], %18 {strides = array<i32>} : memref<256x1152xf32, #tpu.memory_space<vmem>>, vector<256x128xf32>,
    %c1_28 = arith.constant 1 : index
    %c2_29 = arith.constant 2 : index
    %c0_30 = arith.constant 0 : index
    %20 = vector.load %arg6[%c1_28, %c2_29, %c0_30] : memref<18x18x128xf32, #tpu.memory_space<vmem>>, vector<16x16x128xf32>
    %21 = vector.shape_cast %20 : vector<16x16x128xf32> to vector<256x128xf32>
    %c0_31 = arith.constant 0 : index
    %c640 = arith.constant 640 : index
    %22 = vector.load %arg7[%c0_31, %c640] : memref<256x1152xf32, #tpu.memory_space<vmem>>, vector<256x128xf32>
    tpu.vector_store %arg7[%c0_31, %c640], %21 {strides = array<i32>} : memref<256x1152xf32, #tpu.memory_space<vmem>>, vector<256x128xf32>,
    %c2_32 = arith.constant 2 : index
    %c0_33 = arith.constant 0 : index
    %c0_34 = arith.constant 0 : index
    %23 = vector.load %arg6[%c2_32, %c0_33, %c0_34] : memref<18x18x128xf32, #tpu.memory_space<vmem>>, vector<16x16x128xf32>
    %24 = vector.shape_cast %23 : vector<16x16x128xf32> to vector<256x128xf32>
    %c0_35 = arith.constant 0 : index
    %c768 = arith.constant 768 : index
    %25 = vector.load %arg7[%c0_35, %c768] : memref<256x1152xf32, #tpu.memory_space<vmem>>, vector<256x128xf32>
    tpu.vector_store %arg7[%c0_35, %c768], %24 {strides = array<i32>} : memref<256x1152xf32, #tpu.memory_space<vmem>>, vector<256x128xf32>,
    %c2_36 = arith.constant 2 : index
    %c1_37 = arith.constant 1 : index
    %c0_38 = arith.constant 0 : index
    %26 = vector.load %arg6[%c2_36, %c1_37, %c0_38] : memref<18x18x128xf32, #tpu.memory_space<vmem>>, vector<16x16x128xf32>
    %27 = vector.shape_cast %26 : vector<16x16x128xf32> to vector<256x128xf32>
    %c0_39 = arith.constant 0 : index
    %c896 = arith.constant 896 : index
    %28 = vector.load %arg7[%c0_39, %c896] : memref<256x1152xf32, #tpu.memory_space<vmem>>, vector<256x128xf32>
    tpu.vector_store %arg7[%c0_39, %c896], %27 {strides = array<i32>} : memref<256x1152xf32, #tpu.memory_space<vmem>>, vector<256x128xf32>,
    %c2_40 = arith.constant 2 : index
    %c2_41 = arith.constant 2 : index
    %c0_42 = arith.constant 0 : index
    %29 = vector.load %arg6[%c2_40, %c2_41, %c0_42] : memref<18x18x128xf32, #tpu.memory_space<vmem>>, vector<16x16x128xf32>
    %30 = vector.shape_cast %29 : vector<16x16x128xf32> to vector<256x128xf32>
    %c0_43 = arith.constant 0 : index
    %c1024 = arith.constant 1024 : index
    %31 = vector.load %arg7[%c0_43, %c1024] : memref<256x1152xf32, #tpu.memory_space<vmem>>, vector<256x128xf32>
    tpu.vector_store %arg7[%c0_43, %c1024], %30 {strides = array<i32>} : memref<256x1152xf32, #tpu.memory_space<vmem>>, vector<256x128xf32>,
    %c0_44 = arith.constant 0 : index
    %c0_45 = arith.constant 0 : index
    %32 = vector.load %arg7[%c0_44, %c0_45] : memref<256x1152xf32, #tpu.memory_space<vmem>>, vector<256x1152xf32>
    %c0_46 = arith.constant 0 : index
    %c0_47 = arith.constant 0 : index
    %c0_48 = arith.constant 0 : index
    %33 = vector.load %arg2[%c0_46, %c0_47, %c0_48] : memref<3x1152x128xf32, #tpu.memory_space<vmem>>, vector<1x1152x128xf32>
    %34 = vector.shape_cast %33 : vector<1x1152x128xf32> to vector<1152x128xf32>
    %cst_49 = arith.constant dense<0.000000e+00> : vector<256x128xf32>
    %35 = tpu.matmul %32, %34, %cst_49 {dimension_numbers = #tpu.dot_dimension_numbers<[1], [0], [0], [1], [0, 0, 1, 1], [], []>} : vector<256x1152xf32>, vector<1152x128xf32>, vector<256x128xf32> -> vector<256x128xf32>
    %c0_50 = arith.constant 0 : index
    %c0_51 = arith.constant 0 : index
    %c0_52 = arith.constant 0 : index
    %36 = vector.load %arg3[%c0_50, %c0_51, %c0_52] : memref<3x1x128xf32, #tpu.memory_space<vmem>>, vector<1x1x128xf32>
    %37 = vector.shape_cast %36 : vector<1x1x128xf32> to vector<1x128xf32>
    %38 = vector.broadcast %37 : vector<1x128xf32> to vector<256x128xf32>
    %39 = arith.mulf %35, %38 : vector<256x128xf32>
    %c0_53 = arith.constant 0 : index
    %c0_54 = arith.constant 0 : index
    %c0_55 = arith.constant 0 : index
    %40 = vector.load %arg4[%c0_53, %c0_54, %c0_55] : memref<3x1x128xf32, #tpu.memory_space<vmem>>, vector<1x1x128xf32>
    %41 = vector.shape_cast %40 : vector<1x1x128xf32> to vector<1x128xf32>
    %42 = vector.broadcast %41 : vector<1x128xf32> to vector<256x128xf32>
    %43 = arith.addf %39, %42 : vector<256x128xf32>
    %cst_56 = arith.constant 0.000000e+00 : f32
    %44 = vector.broadcast %cst_56 : f32 to vector<256x128xf32>
    %45 = arith.maximumf %43, %44 : vector<256x128xf32>
    %46 = vector.shape_cast %45 : vector<256x128xf32> to vector<16x16x128xf32>
    %c1_57 = arith.constant 1 : index
    %c1_58 = arith.constant 1 : index
    %c0_59 = arith.constant 0 : index
    %47 = vector.load %arg6[%c1_57, %c1_58, %c0_59] : memref<18x18x128xf32, #tpu.memory_space<vmem>>, vector<16x16x128xf32>
    tpu.vector_store %arg6[%c1_57, %c1_58, %c0_59], %46 {strides = array<i32>} : memref<18x18x128xf32, #tpu.memory_space<vmem>>, vector<16x16x128xf32>,
    %c0_60 = arith.constant 0 : index
    %c0_61 = arith.constant 0 : index
    %c0_62 = arith.constant 0 : index
    %48 = vector.load %arg6[%c0_60, %c0_61, %c0_62] : memref<18x18x128xf32, #tpu.memory_space<vmem>>, vector<16x16x128xf32>
    %49 = vector.shape_cast %48 : vector<16x16x128xf32> to vector<256x128xf32>
    %c0_63 = arith.constant 0 : index
    %c0_64 = arith.constant 0 : index
    %50 = vector.load %arg7[%c0_63, %c0_64] : memref<256x1152xf32, #tpu.memory_space<vmem>>, vector<256x128xf32>
    tpu.vector_store %arg7[%c0_63, %c0_64], %49 {strides = array<i32>} : memref<256x1152xf32, #tpu.memory_space<vmem>>, vector<256x128xf32>,
    %c0_65 = arith.constant 0 : index
    %c1_66 = arith.constant 1 : index
    %c0_67 = arith.constant 0 : index
    %51 = vector.load %arg6[%c0_65, %c1_66, %c0_67] : memref<18x18x128xf32, #tpu.memory_space<vmem>>, vector<16x16x128xf32>
    %52 = vector.shape_cast %51 : vector<16x16x128xf32> to vector<256x128xf32>
    %c0_68 = arith.constant 0 : index
    %c128_69 = arith.constant 128 : index
    %53 = vector.load %arg7[%c0_68, %c128_69] : memref<256x1152xf32, #tpu.memory_space<vmem>>, vector<256x128xf32>
    tpu.vector_store %arg7[%c0_68, %c128_69], %52 {strides = array<i32>} : memref<256x1152xf32, #tpu.memory_space<vmem>>, vector<256x128xf32>,
    %c0_70 = arith.constant 0 : index
    %c2_71 = arith.constant 2 : index
    %c0_72 = arith.constant 0 : index
    %54 = vector.load %arg6[%c0_70, %c2_71, %c0_72] : memref<18x18x128xf32, #tpu.memory_space<vmem>>, vector<16x16x128xf32>
    %55 = vector.shape_cast %54 : vector<16x16x128xf32> to vector<256x128xf32>
    %c0_73 = arith.constant 0 : index
    %c256_74 = arith.constant 256 : index
    %56 = vector.load %arg7[%c0_73, %c256_74] : memref<256x1152xf32, #tpu.memory_space<vmem>>, vector<256x128xf32>
    tpu.vector_store %arg7[%c0_73, %c256_74], %55 {strides = array<i32>} : memref<256x1152xf32, #tpu.memory_space<vmem>>, vector<256x128xf32>,
    %c1_75 = arith.constant 1 : index
    %c0_76 = arith.constant 0 : index
    %c0_77 = arith.constant 0 : index
    %57 = vector.load %arg6[%c1_75, %c0_76, %c0_77] : memref<18x18x128xf32, #tpu.memory_space<vmem>>, vector<16x16x128xf32>
    %58 = vector.shape_cast %57 : vector<16x16x128xf32> to vector<256x128xf32>
    %c0_78 = arith.constant 0 : index
    %c384_79 = arith.constant 384 : index
    %59 = vector.load %arg7[%c0_78, %c384_79] : memref<256x1152xf32, #tpu.memory_space<vmem>>, vector<256x128xf32>
    tpu.vector_store %arg7[%c0_78, %c384_79], %58 {strides = array<i32>} : memref<256x1152xf32, #tpu.memory_space<vmem>>, vector<256x128xf32>,
    %c1_80 = arith.constant 1 : index
    %c1_81 = arith.constant 1 : index
    %c0_82 = arith.constant 0 : index
    %60 = vector.load %arg6[%c1_80, %c1_81, %c0_82] : memref<18x18x128xf32, #tpu.memory_space<vmem>>, vector<16x16x128xf32>
    %61 = vector.shape_cast %60 : vector<16x16x128xf32> to vector<256x128xf32>
    %c0_83 = arith.constant 0 : index
    %c512_84 = arith.constant 512 : index
    %62 = vector.load %arg7[%c0_83, %c512_84] : memref<256x1152xf32, #tpu.memory_space<vmem>>, vector<256x128xf32>
    tpu.vector_store %arg7[%c0_83, %c512_84], %61 {strides = array<i32>} : memref<256x1152xf32, #tpu.memory_space<vmem>>, vector<256x128xf32>,
    %c1_85 = arith.constant 1 : index
    %c2_86 = arith.constant 2 : index
    %c0_87 = arith.constant 0 : index
    %63 = vector.load %arg6[%c1_85, %c2_86, %c0_87] : memref<18x18x128xf32, #tpu.memory_space<vmem>>, vector<16x16x128xf32>
    %64 = vector.shape_cast %63 : vector<16x16x128xf32> to vector<256x128xf32>
    %c0_88 = arith.constant 0 : index
    %c640_89 = arith.constant 640 : index
    %65 = vector.load %arg7[%c0_88, %c640_89] : memref<256x1152xf32, #tpu.memory_space<vmem>>, vector<256x128xf32>
    tpu.vector_store %arg7[%c0_88, %c640_89], %64 {strides = array<i32>} : memref<256x1152xf32, #tpu.memory_space<vmem>>, vector<256x128xf32>,
    %c2_90 = arith.constant 2 : index
    %c0_91 = arith.constant 0 : index
    %c0_92 = arith.constant 0 : index
    %66 = vector.load %arg6[%c2_90, %c0_91, %c0_92] : memref<18x18x128xf32, #tpu.memory_space<vmem>>, vector<16x16x128xf32>
    %67 = vector.shape_cast %66 : vector<16x16x128xf32> to vector<256x128xf32>
    %c0_93 = arith.constant 0 : index
    %c768_94 = arith.constant 768 : index
    %68 = vector.load %arg7[%c0_93, %c768_94] : memref<256x1152xf32, #tpu.memory_space<vmem>>, vector<256x128xf32>
    tpu.vector_store %arg7[%c0_93, %c768_94], %67 {strides = array<i32>} : memref<256x1152xf32, #tpu.memory_space<vmem>>, vector<256x128xf32>,
    %c2_95 = arith.constant 2 : index
    %c1_96 = arith.constant 1 : index
    %c0_97 = arith.constant 0 : index
    %69 = vector.load %arg6[%c2_95, %c1_96, %c0_97] : memref<18x18x128xf32, #tpu.memory_space<vmem>>, vector<16x16x128xf32>
    %70 = vector.shape_cast %69 : vector<16x16x128xf32> to vector<256x128xf32>
    %c0_98 = arith.constant 0 : index
    %c896_99 = arith.constant 896 : index
    %71 = vector.load %arg7[%c0_98, %c896_99] : memref<256x1152xf32, #tpu.memory_space<vmem>>, vector<256x128xf32>
    tpu.vector_store %arg7[%c0_98, %c896_99], %70 {strides = array<i32>} : memref<256x1152xf32, #tpu.memory_space<vmem>>, vector<256x128xf32>,
    %c2_100 = arith.constant 2 : index
    %c2_101 = arith.constant 2 : index
    %c0_102 = arith.constant 0 : index
    %72 = vector.load %arg6[%c2_100, %c2_101, %c0_102] : memref<18x18x128xf32, #tpu.memory_space<vmem>>, vector<16x16x128xf32>
    %73 = vector.shape_cast %72 : vector<16x16x128xf32> to vector<256x128xf32>
    %c0_103 = arith.constant 0 : index
    %c1024_104 = arith.constant 1024 : index
    %74 = vector.load %arg7[%c0_103, %c1024_104] : memref<256x1152xf32, #tpu.memory_space<vmem>>, vector<256x128xf32>
    tpu.vector_store %arg7[%c0_103, %c1024_104], %73 {strides = array<i32>} : memref<256x1152xf32, #tpu.memory_space<vmem>>, vector<256x128xf32>,
    %c0_105 = arith.constant 0 : index
    %c0_106 = arith.constant 0 : index
    %75 = vector.load %arg7[%c0_105, %c0_106] : memref<256x1152xf32, #tpu.memory_space<vmem>>, vector<256x1152xf32>
    %c1_107 = arith.constant 1 : index
    %c0_108 = arith.constant 0 : index
    %c0_109 = arith.constant 0 : index
    %76 = vector.load %arg2[%c1_107, %c0_108, %c0_109] : memref<3x1152x128xf32, #tpu.memory_space<vmem>>, vector<1x1152x128xf32>
    %77 = vector.shape_cast %76 : vector<1x1152x128xf32> to vector<1152x128xf32>
    %cst_110 = arith.constant dense<0.000000e+00> : vector<256x128xf32>
    %78 = tpu.matmul %75, %77, %cst_110 {dimension_numbers = #tpu.dot_dimension_numbers<[1], [0], [0], [1], [0, 0, 1, 1], [], []>} : vector<256x1152xf32>, vector<1152x128xf32>, vector<256x128xf32> -> vector<256x128xf32>
    %c1_111 = arith.constant 1 : index
    %c0_112 = arith.constant 0 : index
    %c0_113 = arith.constant 0 : index
    %79 = vector.load %arg3[%c1_111, %c0_112, %c0_113] : memref<3x1x128xf32, #tpu.memory_space<vmem>>, vector<1x1x128xf32>
    %80 = vector.shape_cast %79 : vector<1x1x128xf32> to vector<1x128xf32>
    %81 = vector.broadcast %80 : vector<1x128xf32> to vector<256x128xf32>
    %82 = arith.mulf %78, %81 : vector<256x128xf32>
    %c1_114 = arith.constant 1 : index
    %c0_115 = arith.constant 0 : index
    %c0_116 = arith.constant 0 : index
    %83 = vector.load %arg4[%c1_114, %c0_115, %c0_116] : memref<3x1x128xf32, #tpu.memory_space<vmem>>, vector<1x1x128xf32>
    %84 = vector.shape_cast %83 : vector<1x1x128xf32> to vector<1x128xf32>
    %85 = vector.broadcast %84 : vector<1x128xf32> to vector<256x128xf32>
    %86 = arith.addf %82, %85 : vector<256x128xf32>
    %cst_117 = arith.constant 0.000000e+00 : f32
    %87 = vector.broadcast %cst_117 : f32 to vector<256x128xf32>
    %88 = arith.maximumf %86, %87 : vector<256x128xf32>
    %89 = vector.shape_cast %88 : vector<256x128xf32> to vector<16x16x128xf32>
    %c1_118 = arith.constant 1 : index
    %c1_119 = arith.constant 1 : index
    %c0_120 = arith.constant 0 : index
    %90 = vector.load %arg6[%c1_118, %c1_119, %c0_120] : memref<18x18x128xf32, #tpu.memory_space<vmem>>, vector<16x16x128xf32>
    tpu.vector_store %arg6[%c1_118, %c1_119, %c0_120], %89 {strides = array<i32>} : memref<18x18x128xf32, #tpu.memory_space<vmem>>, vector<16x16x128xf32>,
    %c0_121 = arith.constant 0 : index
    %c0_122 = arith.constant 0 : index
    %c0_123 = arith.constant 0 : index
    %91 = vector.load %arg6[%c0_121, %c0_122, %c0_123] : memref<18x18x128xf32, #tpu.memory_space<vmem>>, vector<16x16x128xf32>
    %92 = vector.shape_cast %91 : vector<16x16x128xf32> to vector<256x128xf32>
    %c0_124 = arith.constant 0 : index
    %c0_125 = arith.constant 0 : index
    %93 = vector.load %arg7[%c0_124, %c0_125] : memref<256x1152xf32, #tpu.memory_space<vmem>>, vector<256x128xf32>
    tpu.vector_store %arg7[%c0_124, %c0_125], %92 {strides = array<i32>} : memref<256x1152xf32, #tpu.memory_space<vmem>>, vector<256x128xf32>,
    %c0_126 = arith.constant 0 : index
    %c1_127 = arith.constant 1 : index
    %c0_128 = arith.constant 0 : index
    %94 = vector.load %arg6[%c0_126, %c1_127, %c0_128] : memref<18x18x128xf32, #tpu.memory_space<vmem>>, vector<16x16x128xf32>
    %95 = vector.shape_cast %94 : vector<16x16x128xf32> to vector<256x128xf32>
    %c0_129 = arith.constant 0 : index
    %c128_130 = arith.constant 128 : index
    %96 = vector.load %arg7[%c0_129, %c128_130] : memref<256x1152xf32, #tpu.memory_space<vmem>>, vector<256x128xf32>
    tpu.vector_store %arg7[%c0_129, %c128_130], %95 {strides = array<i32>} : memref<256x1152xf32, #tpu.memory_space<vmem>>, vector<256x128xf32>,
    %c0_131 = arith.constant 0 : index
    %c2_132 = arith.constant 2 : index
    %c0_133 = arith.constant 0 : index
    %97 = vector.load %arg6[%c0_131, %c2_132, %c0_133] : memref<18x18x128xf32, #tpu.memory_space<vmem>>, vector<16x16x128xf32>
    %98 = vector.shape_cast %97 : vector<16x16x128xf32> to vector<256x128xf32>
    %c0_134 = arith.constant 0 : index
    %c256_135 = arith.constant 256 : index
    %99 = vector.load %arg7[%c0_134, %c256_135] : memref<256x1152xf32, #tpu.memory_space<vmem>>, vector<256x128xf32>
    tpu.vector_store %arg7[%c0_134, %c256_135], %98 {strides = array<i32>} : memref<256x1152xf32, #tpu.memory_space<vmem>>, vector<256x128xf32>,
    %c1_136 = arith.constant 1 : index
    %c0_137 = arith.constant 0 : index
    %c0_138 = arith.constant 0 : index
    %100 = vector.load %arg6[%c1_136, %c0_137, %c0_138] : memref<18x18x128xf32, #tpu.memory_space<vmem>>, vector<16x16x128xf32>
    %101 = vector.shape_cast %100 : vector<16x16x128xf32> to vector<256x128xf32>
    %c0_139 = arith.constant 0 : index
    %c384_140 = arith.constant 384 : index
    %102 = vector.load %arg7[%c0_139, %c384_140] : memref<256x1152xf32, #tpu.memory_space<vmem>>, vector<256x128xf32>
    tpu.vector_store %arg7[%c0_139, %c384_140], %101 {strides = array<i32>} : memref<256x1152xf32, #tpu.memory_space<vmem>>, vector<256x128xf32>,
    %c1_141 = arith.constant 1 : index
    %c1_142 = arith.constant 1 : index
    %c0_143 = arith.constant 0 : index
    %103 = vector.load %arg6[%c1_141, %c1_142, %c0_143] : memref<18x18x128xf32, #tpu.memory_space<vmem>>, vector<16x16x128xf32>
    %104 = vector.shape_cast %103 : vector<16x16x128xf32> to vector<256x128xf32>
    %c0_144 = arith.constant 0 : index
    %c512_145 = arith.constant 512 : index
    %105 = vector.load %arg7[%c0_144, %c512_145] : memref<256x1152xf32, #tpu.memory_space<vmem>>, vector<256x128xf32>
    tpu.vector_store %arg7[%c0_144, %c512_145], %104 {strides = array<i32>} : memref<256x1152xf32, #tpu.memory_space<vmem>>, vector<256x128xf32>,
    %c1_146 = arith.constant 1 : index
    %c2_147 = arith.constant 2 : index
    %c0_148 = arith.constant 0 : index
    %106 = vector.load %arg6[%c1_146, %c2_147, %c0_148] : memref<18x18x128xf32, #tpu.memory_space<vmem>>, vector<16x16x128xf32>
    %107 = vector.shape_cast %106 : vector<16x16x128xf32> to vector<256x128xf32>
    %c0_149 = arith.constant 0 : index
    %c640_150 = arith.constant 640 : index
    %108 = vector.load %arg7[%c0_149, %c640_150] : memref<256x1152xf32, #tpu.memory_space<vmem>>, vector<256x128xf32>
    tpu.vector_store %arg7[%c0_149, %c640_150], %107 {strides = array<i32>} : memref<256x1152xf32, #tpu.memory_space<vmem>>, vector<256x128xf32>,
    %c2_151 = arith.constant 2 : index
    %c0_152 = arith.constant 0 : index
    %c0_153 = arith.constant 0 : index
    %109 = vector.load %arg6[%c2_151, %c0_152, %c0_153] : memref<18x18x128xf32, #tpu.memory_space<vmem>>, vector<16x16x128xf32>
    %110 = vector.shape_cast %109 : vector<16x16x128xf32> to vector<256x128xf32>
    %c0_154 = arith.constant 0 : index
    %c768_155 = arith.constant 768 : index
    %111 = vector.load %arg7[%c0_154, %c768_155] : memref<256x1152xf32, #tpu.memory_space<vmem>>, vector<256x128xf32>
    tpu.vector_store %arg7[%c0_154, %c768_155], %110 {strides = array<i32>} : memref<256x1152xf32, #tpu.memory_space<vmem>>, vector<256x128xf32>,
    %c2_156 = arith.constant 2 : index
    %c1_157 = arith.constant 1 : index
    %c0_158 = arith.constant 0 : index
    %112 = vector.load %arg6[%c2_156, %c1_157, %c0_158] : memref<18x18x128xf32, #tpu.memory_space<vmem>>, vector<16x16x128xf32>
    %113 = vector.shape_cast %112 : vector<16x16x128xf32> to vector<256x128xf32>
    %c0_159 = arith.constant 0 : index
    %c896_160 = arith.constant 896 : index
    %114 = vector.load %arg7[%c0_159, %c896_160] : memref<256x1152xf32, #tpu.memory_space<vmem>>, vector<256x128xf32>
    tpu.vector_store %arg7[%c0_159, %c896_160], %113 {strides = array<i32>} : memref<256x1152xf32, #tpu.memory_space<vmem>>, vector<256x128xf32>,
    %c2_161 = arith.constant 2 : index
    %c2_162 = arith.constant 2 : index
    %c0_163 = arith.constant 0 : index
    %115 = vector.load %arg6[%c2_161, %c2_162, %c0_163] : memref<18x18x128xf32, #tpu.memory_space<vmem>>, vector<16x16x128xf32>
    %116 = vector.shape_cast %115 : vector<16x16x128xf32> to vector<256x128xf32>
    %c0_164 = arith.constant 0 : index
    %c1024_165 = arith.constant 1024 : index
    %117 = vector.load %arg7[%c0_164, %c1024_165] : memref<256x1152xf32, #tpu.memory_space<vmem>>, vector<256x128xf32>
    tpu.vector_store %arg7[%c0_164, %c1024_165], %116 {strides = array<i32>} : memref<256x1152xf32, #tpu.memory_space<vmem>>, vector<256x128xf32>,
    %c0_166 = arith.constant 0 : index
    %c0_167 = arith.constant 0 : index
    %118 = vector.load %arg7[%c0_166, %c0_167] : memref<256x1152xf32, #tpu.memory_space<vmem>>, vector<256x1152xf32>
    %c2_168 = arith.constant 2 : index
    %c0_169 = arith.constant 0 : index
    %c0_170 = arith.constant 0 : index
    %119 = vector.load %arg2[%c2_168, %c0_169, %c0_170] : memref<3x1152x128xf32, #tpu.memory_space<vmem>>, vector<1x1152x128xf32>
    %120 = vector.shape_cast %119 : vector<1x1152x128xf32> to vector<1152x128xf32>
    %cst_171 = arith.constant dense<0.000000e+00> : vector<256x128xf32>
    %121 = tpu.matmul %118, %120, %cst_171 {dimension_numbers = #tpu.dot_dimension_numbers<[1], [0], [0], [1], [0, 0, 1, 1], [], []>} : vector<256x1152xf32>, vector<1152x128xf32>, vector<256x128xf32> -> vector<256x128xf32>
    %c2_172 = arith.constant 2 : index
    %c0_173 = arith.constant 0 : index
    %c0_174 = arith.constant 0 : index
    %122 = vector.load %arg3[%c2_172, %c0_173, %c0_174] : memref<3x1x128xf32, #tpu.memory_space<vmem>>, vector<1x1x128xf32>
    %123 = vector.shape_cast %122 : vector<1x1x128xf32> to vector<1x128xf32>
    %124 = vector.broadcast %123 : vector<1x128xf32> to vector<256x128xf32>
    %125 = arith.mulf %121, %124 : vector<256x128xf32>
    %c2_175 = arith.constant 2 : index
    %c0_176 = arith.constant 0 : index
    %c0_177 = arith.constant 0 : index
    %126 = vector.load %arg4[%c2_175, %c0_176, %c0_177] : memref<3x1x128xf32, #tpu.memory_space<vmem>>, vector<1x1x128xf32>
    %127 = vector.shape_cast %126 : vector<1x1x128xf32> to vector<1x128xf32>
    %128 = vector.broadcast %127 : vector<1x128xf32> to vector<256x128xf32>
    %129 = arith.addf %125, %128 : vector<256x128xf32>
    %cst_178 = arith.constant 0.000000e+00 : f32
    %130 = vector.broadcast %cst_178 : f32 to vector<256x128xf32>
    %131 = arith.maximumf %129, %130 : vector<256x128xf32>
    %132 = vector.shape_cast %131 : vector<256x128xf32> to vector<16x16x128xf32>
    %133 = vector.shape_cast %132 : vector<16x16x128xf32> to vector<1x16x16x128xf32>
    %c0_179 = arith.constant 0 : index
    %c0_180 = arith.constant 0 : index
    %c0_181 = arith.constant 0 : index
    %c0_182 = arith.constant 0 : index
    %134 = vector.load %arg5[%c0_179, %c0_180, %c0_181, %c0_182] : memref<1x16x16x128xf32, #tpu.memory_space<vmem>>, vector<1x16x16x128xf32>
    tpu.vector_store %arg5[%c0_179, %c0_180, %c0_181, %c0_182], %133 {strides = array<i32>} : memref<1x16x16x128xf32, #tpu.memory_space<vmem>>, vector<1x16x16x128xf32>,
    return
  }
  func.func @transform_0(%arg0: i32) -> (i32, i32, i32, i32) {
    %c0_i32 = arith.constant 0 : i32
    %c0_i32_0 = arith.constant 0 : i32
    %c0_i32_1 = arith.constant 0 : i32
    %c0_i32_2 = arith.constant 0 : i32
    return %arg0, %c0_i32, %c0_i32_0, %c0_i32_1 : i32, i32, i32, i32
  }
  func.func @transform_1(%arg0: i32) -> (i32, i32, i32) {
    %c0_i32 = arith.constant 0 : i32
    %c0_i32_0 = arith.constant 0 : i32
    %c0_i32_1 = arith.constant 0 : i32
    %c0_i32_2 = arith.constant 0 : i32
    return %c0_i32, %c0_i32_0, %c0_i32_1 : i32, i32, i32
  }
  func.func @transform_2(%arg0: i32) -> (i32, i32, i32) {
    %c0_i32 = arith.constant 0 : i32
    %c0_i32_0 = arith.constant 0 : i32
    %c0_i32_1 = arith.constant 0 : i32
    %c0_i32_2 = arith.constant 0 : i32
    return %c0_i32, %c0_i32_0, %c0_i32_1 : i32, i32, i32
  }
  func.func @transform_3(%arg0: i32) -> (i32, i32, i32) {
    %c0_i32 = arith.constant 0 : i32
    %c0_i32_0 = arith.constant 0 : i32
    %c0_i32_1 = arith.constant 0 : i32
    %c0_i32_2 = arith.constant 0 : i32
    return %c0_i32, %c0_i32_0, %c0_i32_1 : i32, i32, i32
  }
  func.func @transform_4(%arg0: i32) -> (i32, i32, i32, i32) {
    %c0_i32 = arith.constant 0 : i32
    %c0_i32_0 = arith.constant 0 : i32
    %c0_i32_1 = arith.constant 0 : i32
    %c0_i32_2 = arith.constant 0 : i32
    return %arg0, %c0_i32, %c0_i32_0, %c0_i32_1 : i32, i32, i32, i32
  }
}

</mosaic_0001>

<bundles_post_ra>
// kernel: triple_conv_encoder.1
= control target key start
LH: loop header
LB: loop body
LE: loop exit
PB: predicated region body
PF: predicated region fallthrough
CT: control target
= control target key end

     0   :  { %s7272_s15 = smov 0   ;;  %s11816_s0 = inlined_call_operand.vmem [shape: f32[2,16,16,4], index: 0, kind: input, shape index: {}]   ;;  %s11817_s1 = inlined_call_operand.vmem [shape: f32[3,1152,128], index: 1, kind: input, shape index: {}]   ;;  %s11818_s2 = inlined_call_operand.vmem [shape: f32[3,1,128], index: 2, kind: input, shape index: {}]   ;;  %s11819_s3 = inlined_call_operand.vmem [shape: f32[3,1,128], index: 3, kind: input, shape index: {}]   ;;  %s11820_s4 = inlined_call_operand.vmem [shape: f32[2,16,16,128], index: 4, kind: output, shape index: {}]  }
   0x1 LB: > { %s6863_s16 = sadd.s32 4294967295, %s7244_s15   ;;  %p6867_p0 = scmp.ge.s32.totalorder %s7244_s15, 1  ;;  %s7244_s15 = sphi %s7272_s15, %s14_s15  }
   0x2   : > { %p162_p1 = scmp.lt.s32.totalorder %s7244_s15, 3 }
   0x4   : > { %p163_p2 = pnand %p6867_p0, %p162_p1 }
   0x6   : > { %166 = sbr.rel (%p163_p2) target bundleno = 2196 (0x894), region = 36 }
   0xb   : > { %v1198_v0 = vld [vmem:[%s11817_s1 + $0x78] sm:$0xff]  ;;  %v1197_v1 = vld [vmem:[%s11817_s1 + $0x70] sm:$0xff]  ;;  %v7246_v4 = vmov 0.0   ;;  %v1196_v5 = vld [vmem:[%s11817_s1 + $0x68] sm:$0xff]  ;;  %p7563_p3 = scmp.lt.s32.totalorder %s6863_s16, 1  ;;  %vm285_vm0 = vcmask 31744  }
   0xc   : > { %1327 = vmatpush.msra.mxu0 %v1198_v0  ;;  %7168 = vmatpush.msra.mxu3 %v1198_v0  ;;  %v7289_v2 = vld [vmem:[%s11817_s1 + $0x178] sm:$0xff]  ;;  %v7294_v3 = vld [vmem:[%s11817_s1 + $0x170] sm:$0xff]  ;;  %198 = vst [vmem:[#allocation2] sm:$0xff] %v7246_v4  ;;  %v7310_v7 = vld [vmem:[%s11817_s1 + $0x168] sm:$0xff] }
   0xd   : > { %1553 = vmatpush.msra.mxu2 %v7289_v2  ;;  %v7304_v6 = vld [vmem:[%s11817_s1 + $0xf8] sm:$0xff]  ;;  %199 = vst [vmem:[#allocation2 + $0x8] sm:$0xff] %v7246_v4  ;;  %v7315_v8 = vld [vmem:[%s11817_s1 + $0xf0] sm:$0xff]  ;;  %v1195_v9 = vld [vmem:[%s11817_s1 + $0x60] sm:$0xff]  ;;  %s12316_s16 = smov (!%p7563_p3, %s6863_s16), 1 }
   0xe   : > { %1328 = vmatpush.msra.mxu0 %v1197_v1  ;;  %7169 = vmatpush.msra.mxu3 %v1197_v1  ;;  %200 = vst [vmem:[#allocation2 + $0x10] sm:$0x3] %v7246_v4  ;;  %v7327_v10 = vld [vmem:[%s11817_s1 + $0x160] sm:$0xff]  ;;  %v7332_v11 = vld [vmem:[%s11817_s1 + $0xe8] sm:$0xff]  ;;  %v1194_v12 = vld [vmem:[%s11817_s1 + $0x58] sm:$0xff]  ;;  %s7166_s20 = sshll.u32 %s12316_s16, 8 }
   0xf   : > { %1554 = vmatpush.msra.mxu2 %v7294_v3  ;;  %1440 = vmatpush.msra.mxu1 %v7304_v6  ;;  %201 = vst [vmem:[#allocation2 + $0x18] sm:$0xff] %v7246_v4  ;;  %v7344_v13 = vld [vmem:[%s11817_s1 + $0x158] sm:$0xff]  ;;  %v7349_v14 = vld [vmem:[%s11817_s1 + $0xe0] sm:$0xff]  ;;  %v1193_v15 = vld [vmem:[%s11817_s1 + $0x50] sm:$0xff]  ;;  %s7603_s25 = scalar_lea.vmem %s11816_s0, %s7166_s20  ;;  %s11649_s12 = scalar_lea.vmem %s11820_s4, %s7166_s20 }
  0x10   : > { %1329 = vmatpush.msra.mxu0 %v1196_v5  ;;  %7170 = vmatpush.msra.mxu3 %v1196_v5  ;;  %202 = vst [vmem:[#allocation2 + $0x20] sm:$0xff] %v7246_v4  ;;  %v7361_v16 = vld [vmem:[%s11817_s1 + $0x150] sm:$0xff]  ;;  %v7366_v17 = vld [vmem:[%s11817_s1 + $0xd8] sm:$0xff]  ;;  %v1192_v18 = vld [vmem:[%s11817_s1 + $0x48] sm:$0xff] }
  0x11   : > { %1555 = vmatpush.msra.mxu2 %v7310_v7  ;;  %1441 = vmatpush.msra.mxu1 %v7315_v8  ;;  %203 = vst [vmem:[#allocation2 + $0x28] sm:$0x3] %v7246_v4  ;;  %v7378_v19 = vld [vmem:[%s11817_s1 + $0x148] sm:$0xff]  ;;  %v7383_v20 = vld [vmem:[%s11817_s1 + $0xd0] sm:$0xff]  ;;  %v1191_v21 = vld [vmem:[%s11817_s1 + $0x40] sm:$0xff] }
  0x12   : > { %1330 = vmatpush.msra.mxu0 %v1195_v9  ;;  %7171 = vmatpush.msra.mxu3 %v1195_v9  ;;  %204 = vst [vmem:[#allocation2 + $0x30] sm:$0xff] %v7246_v4  ;;  %v1190_v22 = vld [vmem:[%s11817_s1 + $0x38] sm:$0xff]  ;;  %v7398_v23 = vld [vmem:[%s11817_s1 + $0x140] sm:$0xff]  ;;  %v7403_v24 = vld [vmem:[%s11817_s1 + $0xc8] sm:$0xff] }
  0x13   : > { %1556 = vmatpush.msra.mxu2 %v7327_v10  ;;  %1442 = vmatpush.msra.mxu1 %v7332_v11  ;;  %205 = vst [vmem:[#allocation2 + $0x38] sm:$0xff] %v7246_v4  ;;  %v7408_v25 = vld [vmem:[%s11817_s1 + $0x138] sm:$0xff]  ;;  %v7416_v26 = vld [vmem:[%s11817_s1 + $0xc0] sm:$0xff]  ;;  %v1189_v27 = vld [vmem:[%s11817_s1 + $0x30] sm:$0xff] }
  0x14   : > { %1331 = vmatpush.msra.mxu0 %v1194_v12  ;;  %7172 = vmatpush.msra.mxu3 %v1194_v12  ;;  %206 = vst [vmem:[#allocation2 + $0x40] sm:$0x3] %v7246_v4  ;;  %v7429_v28 = vld [vmem:[%s11817_s1 + $0x130] sm:$0xff]  ;;  %v7434_v29 = vld [vmem:[%s11817_s1 + $0xb8] sm:$0xff]  ;;  %v1188_v30 = vld [vmem:[%s11817_s1 + $0x28] sm:$0xff] }
  0x15   : > { %1557 = vmatpush.msra.mxu2 %v7344_v13  ;;  %1443 = vmatpush.msra.mxu1 %v7349_v14  ;;  %207 = vst [vmem:[#allocation2 + $0x48] sm:$0xff] %v7246_v4  ;;  %v7446_v31 = vld [vmem:[%s11817_s1 + $0x128] sm:$0xff]  ;;  %v7451_v32 = vld [vmem:[%s11817_s1 + $0xb0] sm:$0xff]  ;;  %v1187_v33 = vld [vmem:[%s11817_s1 + $0x20] sm:$0xff] }
  0x16   : > { %1332 = vmatpush.msra.mxu0 %v1193_v15  ;;  %7173 = vmatpush.msra.mxu3 %v1193_v15  ;;  %208 = vst [vmem:[#allocation2 + $0x50] sm:$0xff] %v7246_v4  ;;  %v7463_v34 = vld [vmem:[%s11817_s1 + $0x120] sm:$0xff]  ;;  %v7468_v35 = vld [vmem:[%s11817_s1 + $0xa8] sm:$0xff]  ;;  %v1186_v36 = vld [vmem:[%s11817_s1 + $0x18] sm:$0xff] }
  0x17   : > { %1558 = vmatpush.msra.mxu2 %v7361_v16  ;;  %1444 = vmatpush.msra.mxu1 %v7366_v17  ;;  %209 = vst [vmem:[#allocation2 + $0x58] sm:$0x3] %v7246_v4  ;;  %v7480_v37 = vld [vmem:[%s11817_s1 + $0x118] sm:$0xff]  ;;  %v7485_v38 = vld [vmem:[%s11817_s1 + $0xa0] sm:$0xff]  ;;  %v1185_v39 = vld [vmem:[%s11817_s1 + $0x10] sm:$0xff] }
  0x18   : > { %1333 = vmatpush.msra.mxu0 %v1192_v18  ;;  %7174 = vmatpush.msra.mxu3 %v1192_v18  ;;  %210 = vst [vmem:[#allocation2 + $0x60] sm:$0xff] %v7246_v4  ;;  %v7497_v40 = vld [vmem:[%s11817_s1 + $0x110] sm:$0xff]  ;;  %v1184_v41 = vld [vmem:[%s11817_s1 + $0x8] sm:$0xff]  ;;  %v1183_v42 = vld [vmem:[%s11817_s1] sm:$0xff] }
  0x19   : > { %1559 = vmatpush.msra.mxu2 %v7378_v19  ;;  %1445 = vmatpush.msra.mxu1 %v7383_v20  ;;  %211 = vst [vmem:[#allocation2 + $0x68] sm:$0xff] %v7246_v4  ;;  %v7518_v43 = vld [vmem:[%s11817_s1 + $0x98] sm:$0xff]  ;;  %v7523_v44 = vld [vmem:[%s11817_s1 + $0x108] sm:$0xff]  ;;  %v7531_v45 = vld [vmem:[%s11817_s1 + $0x90] sm:$0xff] }
  0x1a   : > { %1334 = vmatpush.msra.mxu0 %v1191_v21  ;;  %7175 = vmatpush.msra.mxu3 %v1191_v21  ;;  %212 = vst [vmem:[#allocation2 + $0x70] sm:$0x3] %v7246_v4  ;;  %v7536_v46 = vld [vmem:[%s11817_s1 + $0x100] sm:$0xff]  ;;  %v7546_v48 = vld [vmem:[%s11817_s1 + $0x88] sm:$0xff]  ;;  %v1262_v51 = vld [vmem:[%s11817_s1 + $0x278] sm:$0xff] }
  0x1b   : > { %1560 = vmatpush.msra.mxu2 %v7398_v23  ;;  %1446 = vmatpush.msra.mxu1 %v7403_v24  ;;  %213 = vst [vmem:[#allocation2 + $0x78] sm:$0xff] %v7246_v4  ;;  %v446_v47 = vld [vmem:[#allocation2 + $0x2] sm:$0xff]  ;;  %v447_v52 = vld [vmem:[#allocation2 + $0xa] sm:$0xff]  ;;  %v275_v56 = vld [vmem:[%s7603_s25 + $0xb8] sm:$0xff] }
  0x1c   : > { %1335 = vmatpush.msra.mxu0 %v1190_v22  ;;  %7176 = vmatpush.msra.mxu3 %v1190_v22  ;;  %214 = vst [vmem:[#allocation2 + $0x80] sm:$0xff] %v7246_v4  ;;  %v7555_v49 = vld [vmem:[%s11817_s1 + $0x80] sm:$0xff]  ;;  %v383_v53 = vld [vmem:[#allocation2 + $0x9] sm:$0xff]  ;;  %v255_v63 = vld [vmem:[%s7603_s25 + $0x18] sm:$0xff] }
  0x1d   : > { %1561 = vmatpush.msra.mxu2 %v7408_v25  ;;  %1447 = vmatpush.msra.mxu1 %v7416_v26  ;;  %215 = vst [vmem:[#allocation2 + $0x88] sm:$0x3] %v7246_v4  ;;  %v382_v50 = vld [vmem:[#allocation2 + $0x1] sm:$0xff]  ;;  %v1261_v54 = vld [vmem:[%s11817_s1 + $0x270] sm:$0xff]  ;;  %v279_v1 = vld [vmem:[%s7603_s25 + $0xd8] sm:$0xff] }
  0x1e   : > { %1336 = vmatpush.msra.mxu0 %v1189_v27  ;;  %7177 = vmatpush.msra.mxu3 %v1189_v27  ;;  %216 = vst [vmem:[#allocation2 + $0x90] sm:$0xff] %v7246_v4  ;;  %v274_v55 = vld [vmem:[%s7603_s25 + $0xb0] sm:$0xff]  ;;  %v252_v57 = vld [vmem:[%s7603_s25] sm:$0xff]  ;;  %v253_v59 = vld [vmem:[%s7603_s25 + $0x8] sm:$0xff] }
  0x1f   : > { %1562 = vmatpush.msra.mxu2 %v7429_v28  ;;  %1448 = vmatpush.msra.mxu1 %v7434_v29  ;;  %217 = vst [vmem:[#allocation2 + $0x98] sm:$0xff] %v7246_v4  ;;  %v276_v58 = vld [vmem:[%s7603_s25 + $0xc0] sm:$0xff]  ;;  %v277_v60 = vld [vmem:[%s7603_s25 + $0xc8] sm:$0xff]  ;;  %v254_v61 = vld [vmem:[%s7603_s25 + $0x10] sm:$0xff] }
  0x20   : > { %1337 = vmatpush.msra.mxu0 %v1188_v30  ;;  %7178 = vmatpush.msra.mxu3 %v1188_v30  ;;  %218 = vst [vmem:[#allocation2 + $0xa0] sm:$0x3] %v7246_v4  ;;  %v278_v62 = vld [vmem:[%s7603_s25 + $0xd0] sm:$0xff] }
  0x21   : > { %1563 = vmatpush.msra.mxu2 %v7446_v31  ;;  %1449 = vmatpush.msra.mxu1 %v7451_v32  ;;  %219 = vst [vmem:[#allocation2 + $0xa8] sm:$0xff] %v7246_v4  ;;  %v258_v22 = vld [vmem:[%s7603_s25 + $0x30] sm:$0xff] }
  0x22   : > { %1338 = vmatpush.msra.mxu0 %v1187_v33  ;;  %7179 = vmatpush.msra.mxu3 %v1187_v33  ;;  %220 = vst [vmem:[#allocation2 + $0xb0] sm:$0xff] %v7246_v4 }
  0x23   : > { %1564 = vmatpush.msra.mxu2 %v7463_v34  ;;  %1450 = vmatpush.msra.mxu1 %v7468_v35  ;;  %221 = vst [vmem:[#allocation2 + $0xb8] sm:$0x3] %v7246_v4 }
  0x24   : > { %1339 = vmatpush.msra.mxu0 %v1186_v36  ;;  %7180 = vmatpush.msra.mxu3 %v1186_v36  ;;  %222 = vst [vmem:[#allocation2 + $0xc0] sm:$0xff] %v7246_v4  ;;  %v261_v36 = vld [vmem:[%s7603_s25 + $0x48] sm:$0xff] }
  0x25   : > { %1565 = vmatpush.msra.mxu2 %v7480_v37  ;;  %1451 = vmatpush.msra.mxu1 %v7485_v38  ;;  %223 = vst [vmem:[#allocation2 + $0xc8] sm:$0xff] %v7246_v4 }
  0x26   : > { %1340 = vmatpush.msra.mxu0 %v1185_v39  ;;  %7181 = vmatpush.msra.mxu3 %v1185_v39  ;;  %224 = vst [vmem:[#allocation2 + $0xd0] sm:$0x3] %v7246_v4 }
  0x27   : > { %1566 = vmatpush.msra.mxu2 %v7497_v40  ;;  %225 = vst [vmem:[#allocation2 + $0xd8] sm:$0xff] %v7246_v4  ;;  %1452 = vmatpush.msra.mxu1 %v7518_v43 }
  0x28   : > { %1341 = vmatpush.msra.mxu0 %v1184_v41  ;;  %7182 = vmatpush.msra.mxu3 %v1184_v41  ;;  %226 = vst [vmem:[#allocation2 + $0xe0] sm:$0xff] %v7246_v4 }
  0x29   : > { %227 = vst [vmem:[#allocation2 + $0xe8] sm:$0x3] %v7246_v4  ;;  %1567 = vmatpush.msra.mxu2 %v7523_v44  ;;  %1453 = vmatpush.msra.mxu1 %v7531_v45 }
  0x2a   : > { %1342 = vmatpush.msra.mxu0 %v1183_v42  ;;  %7183 = vmatpush.msra.mxu3 %v1183_v42  ;;  %228 = vst [vmem:[#allocation2 + $0xf0] sm:$0xff] %v7246_v4 }
  0x2b   : > { %1343 = vmatmul.f32.vlgmr.msra.gmra.mxu0 %v7246_v4  ;;  %229 = vst [vmem:[#allocation2 + $0xf8] sm:$0xff] %v7246_v4  ;;  %1568 = vmatpush.msra.mxu2 %v7536_v46 }
  0x2c   : > { %7184 = vmatpush.msrb.mxu3 %v7304_v6  ;;  %230 = vst [vmem:[#allocation2 + $0x100] sm:$0x3] %v7246_v4  ;;  %1569 = vmatmul.f32.vlgmr.msra.gmra.mxu2 %v446_v47 }
  0x2d   : > { %231 = vst [vmem:[#allocation2 + $0x108] sm:$0xff] %v7246_v4  ;;  %1454 = vmatpush.msra.mxu1 %v7546_v48  ;;  %1779 = vmatpush.msrb.mxu0 %v1262_v51 }
  0x2e   : > { %7185 = vmatpush.msrb.mxu3 %v7315_v8  ;;  %232 = vst [vmem:[#allocation2 + $0x110] sm:$0xff] %v7246_v4 }
  0x2f   : > { %233 = vst [vmem:[#allocation2 + $0x118] sm:$0x3] %v7246_v4  ;;  %1455 = vmatpush.msra.mxu1 %v7555_v49  ;;  %1780 = vmatpush.msrb.mxu0 %v1261_v54 }
  0x30   : > { %7186 = vmatpush.msrb.mxu3 %v7332_v11  ;;  %234 = vst [vmem:[#allocation2 + $0x120] sm:$0xff] %v7246_v4  ;;  %1456 = vmatmul.f32.vlgmr.msra.gmra.mxu1 %v382_v50 }
  0x31   : > { %235 = vst [vmem:[#allocation2 + $0x128] sm:$0xff] %v7246_v4 }
  0x32   : > { %7187 = vmatpush.msrb.mxu3 %v7349_v14  ;;  %236 = vst [vmem:[#allocation2 + $0x130] sm:$0x3] %v7246_v4  ;;  %v1259_v14 = vld [vmem:[%s11817_s1 + $0x260] sm:$0xff] }
  0x33   : > { %237 = vst [vmem:[#allocation2 + $0x138] sm:$0xff] %v7246_v4  ;;  %1346 = vmatmul.f32.gmra.mxu0 %v7246_v4 }
  0x34   : > { %238 = vst [vmem:[#allocation2 + $0x140] sm:$0xff] %v7246_v4  ;;  %7188 = vmatpush.msrb.mxu3 %v7366_v17  ;;  %1572 = vmatmul.f32.gmra.mxu2 %v447_v52  ;;  %v280_v17 = vld [vmem:[%s7603_s25 + $0xe0] sm:$0xff] }
  0x35   : > { %239 = vst [vmem:[#allocation2 + $0x148] sm:$0x3] %v7246_v4 }
  0x36   : > { %240 = vst [vmem:[#allocation2 + $0x150] sm:$0xff] %v7246_v4  ;;  %7189 = vmatpush.msrb.mxu3 %v7383_v20  ;;  %v281_v20 = vld [vmem:[%s7603_s25 + $0xe8] sm:$0xff] }
  0x37   : > { %241 = vst [vmem:[#allocation2 + $0x158] sm:$0xff] %v7246_v4 }
  0x38   : > { %242 = vst [vmem:[#allocation2 + $0x160] sm:$0x3] %v7246_v4  ;;  %7190 = vmatpush.msrb.mxu3 %v7403_v24  ;;  %1459 = vmatmul.f32.gmra.mxu1 %v383_v53 }
  0x39   : > { %243 = vst [vmem:[#allocation2 + $0x168] sm:$0xff] %v7246_v4 }
  0x3a   : > { %244 = vst [vmem:[#allocation2 + $0x170] sm:$0xff] %v7246_v4  ;;  %7191 = vmatpush.msrb.mxu3 %v7416_v26 }
  0x3b   : > { %245 = vst [vmem:[#allocation2 + $0x178] sm:$0x3] %v7246_v4 }
  0x3c   : > { %246 = vst [vmem:[#allocation2 + $0x180] sm:$0xff] %v7246_v4  ;;  %7192 = vmatpush.msrb.mxu3 %v7434_v29  ;;  %v1257_v29 = vld [vmem:[%s11817_s1 + $0x250] sm:$0xff] }
  0x3d   : > { %247 = vst [vmem:[#allocation2 + $0x188] sm:$0xff] %v7246_v4 }
  0x3e   : > { %248 = vst [vmem:[#allocation2 + $0x190] sm:$0x3] %v7246_v4  ;;  %7193 = vmatpush.msrb.mxu3 %v7451_v32 }
  0x3f   : > { %249 = vst [vmem:[#allocation2 + $0x198] sm:$0xff] %v7246_v4 }
  0x40   : > { %250 = vst [vmem:[#allocation2 + $0x1a0] sm:$0xff] %v7246_v4  ;;  %7194 = vmatpush.msrb.mxu3 %v7468_v35 }
  0x41   : > { %251 = vst [vmem:[#allocation2 + $0x1a8] sm:$0x3] %v7246_v4  ;;  %v1260_v4 = vld [vmem:[%s11817_s1 + $0x268] sm:$0xff] }
  0x42   : > { %308 = vst.msk [vmem:[#allocation2 + $0x121] sm:$0xff] %vm285_vm0, %v274_v55  ;;  %7195 = vmatpush.msrb.mxu3 %v7485_v38  ;;  %1781 = vmatpush.msrb.mxu0 %v1260_v4 }
  0x43   : > { %309 = vst.msk [vmem:[#allocation2 + $0x129] sm:$0xff] %vm285_vm0, %v275_v56  ;;  %v264_v56 = vld [vmem:[%s7603_s25 + $0x60] sm:$0xff] }
  0x44   : > { %286 = vst.msk [vmem:[#allocation2 + $0x19] sm:$0xff] %vm285_vm0, %v252_v57  ;;  %7196 = vmatpush.msrb.mxu3 %v7518_v43  ;;  %1782 = vmatpush.msrb.mxu0 %v1259_v14  ;;  %v1254_v57 = vld [vmem:[%s11817_s1 + $0x238] sm:$0xff]  ;;  %v266_v14 = vld [vmem:[%s7603_s25 + $0x70] sm:$0xff] }
  0x45   : > { %310 = vst.msk [vmem:[#allocation2 + $0x139] sm:$0xff] %vm285_vm0, %v276_v58 }
  0x46   : > { %287 = vst.msk [vmem:[#allocation2 + $0x21] sm:$0xff] %vm285_vm0, %v253_v59  ;;  %7197 = vmatpush.msrb.mxu3 %v7531_v45  ;;  %v262_v45 = vld [vmem:[%s7603_s25 + $0x50] sm:$0xff]  ;;  %v265_v59 = vld [vmem:[%s7603_s25 + $0x68] sm:$0xff] }
  0x47   : > { %311 = vst.msk [vmem:[#allocation2 + $0x141] sm:$0xff] %vm285_vm0, %v277_v60 }
  0x48   : > { %288 = vst.msk [vmem:[#allocation2 + $0x31] sm:$0xff] %vm285_vm0, %v254_v61  ;;  %7198 = vmatpush.msrb.mxu3 %v7546_v48  ;;  %v263_v48 = vld [vmem:[%s7603_s25 + $0x58] sm:$0xff] }
  0x49   : > { %v342_v0 = vld [vmem:[#allocation2 + $0x120] sm:$0xff]  ;;  %312 = vst.msk [vmem:[#allocation2 + $0x151] sm:$0xff] %vm285_vm0, %v278_v62 }
  0x4a   : > { %1415 = vmatmul.f32.vlgmr.msra.gmra.mxu3 %v342_v0  ;;  %289 = vst.msk [vmem:[#allocation2 + $0x39] sm:$0xff] %vm285_vm0, %v255_v63  ;;  %v343_v9 = vld [vmem:[#allocation2 + $0x128] sm:$0xff]  ;;  %v1253_v63 = vld [vmem:[%s11817_s1 + $0x230] sm:$0xff] }
  0x4b   : > { %v7639_v5 = vld [vmem:[#allocation2 + $0x18] sm:$0xff]  ;;  %313 = vst.msk [vmem:[#allocation2 + $0x159] sm:$0xff] %vm285_vm0, %v279_v1  ;;  %7199 = vmatpush.msrb.mxu3 %v7555_v49  ;;  %v406_v49 = vld [vmem:[#allocation2 + $0x121] sm:$0xff]  ;;  %v407_v53 = vld [vmem:[#allocation2 + $0x129] sm:$0xff] }
  0x4c   : > { %v7641_v6 = vld [vmem:[#allocation2 + $0x19] sm:$0xff]  ;;  %1349 = vmatmul.f32.gmra.mxu0 %v7639_v5  ;;  %314 = vst.msk [vmem:[#allocation2 + $0x169] sm:$0xff] %vm285_vm0, %v280_v17 }
  0x4d   : > { %1462 = vmatmul.f32.gmra.mxu1 %v7641_v6  ;;  %v7647_v8 = vld [vmem:[#allocation2 + $0x1a] sm:$0xff]  ;;  %7200 = vmatpush.msra.mxu3 %v7289_v2  ;;  %v7660_v15 = vld [vmem:[#allocation2 + $0x22] sm:$0xff]  ;;  %315 = vst.msk [vmem:[#allocation2 + $0x171] sm:$0xff] %vm285_vm0, %v281_v20 }
  0x4e   : > { %1575 = vmatmul.f32.gmra.mxu2 %v7647_v8  ;;  %v7652_v11 = vld [vmem:[#allocation2 + $0x20] sm:$0xff]  ;;  %292 = vst.msk [vmem:[#allocation2 + $0x61] sm:$0xff] %vm285_vm0, %v258_v22  ;;  %v267_v17 = vld [vmem:[%s7603_s25 + $0x78] sm:$0xff]  ;;  %v1252_v22 = vld [vmem:[%s11817_s1 + $0x228] sm:$0xff] }
  0x4f   : > { %7201 = vmatpush.msra.mxu3 %v7294_v3  ;;  %v7654_v12 = vld [vmem:[#allocation2 + $0x21] sm:$0xff]  ;;  %v7674_v18 = vld [vmem:[#allocation2 + $0x30] sm:$0xff]  ;;  %295 = vst.msk [vmem:[#allocation2 + $0x81] sm:$0xff] %vm285_vm0, %v261_v36  ;;  %v408_v60 = vld [vmem:[#allocation2 + $0x139] sm:$0xff] }
  0x50   : > { %v256_v2 = vld [vmem:[%s7603_s25 + $0x20] sm:$0xff]  ;;  %v257_v3 = vld [vmem:[%s7603_s25 + $0x28] sm:$0xff]  ;;  %v346_v26 = vld [vmem:[#allocation2 + $0x150] sm:$0xff]  ;;  %296 = vst.msk [vmem:[#allocation2 + $0x91] sm:$0xff] %vm285_vm0, %v262_v45 }
  0x51   : > { %7202 = vmatpush.msra.mxu3 %v7310_v7  ;;  %290 = vst.msk [vmem:[#allocation2 + $0x49] sm:$0xff] %vm285_vm0, %v256_v2  ;;  %v344_v7 = vld [vmem:[#allocation2 + $0x138] sm:$0xff]  ;;  %v409_v1 = vld [vmem:[#allocation2 + $0x141] sm:$0xff] }
  0x52   : > { %1418 = vmatmul.f32.gmra.mxu3 %v343_v9  ;;  %291 = vst.msk [vmem:[#allocation2 + $0x51] sm:$0xff] %vm285_vm0, %v257_v3  ;;  %v7681_v21 = vld [vmem:[#allocation2 + $0x32] sm:$0xff]  ;;  %v7699_v24 = vld [vmem:[#allocation2 + $0x3a] sm:$0xff] }
  0x53   : > { %7203 = vmatpush.msra.mxu3 %v7327_v10  ;;  %v7676_v10 = vld [vmem:[#allocation2 + $0x31] sm:$0xff]  ;;  %297 = vst.msk [vmem:[#allocation2 + $0x99] sm:$0xff] %vm285_vm0, %v263_v48  ;;  %v268_v36 = vld [vmem:[%s7603_s25 + $0x80] sm:$0xff] }
  0x54   : > { %1352 = vmatmul.f32.gmra.mxu0 %v7652_v11  ;;  %v349_v42 = vld [vmem:[#allocation2 + $0x170] sm:$0xff]  ;;  %298 = vst.msk [vmem:[#allocation2 + $0xa9] sm:$0xff] %vm285_vm0, %v264_v56  ;;  %v1251_v48 = vld [vmem:[%s11817_s1 + $0x220] sm:$0xff] }
  0x55   : > { %1465 = vmatmul.f32.gmra.mxu1 %v7654_v12  ;;  %7204 = vmatpush.msra.mxu3 %v7344_v13  ;;  %v345_v13 = vld [vmem:[#allocation2 + $0x140] sm:$0xff]  ;;  %299 = vst.msk [vmem:[#allocation2 + $0xb1] sm:$0xff] %vm285_vm0, %v265_v59  ;;  %v410_v3 = vld [vmem:[#allocation2 + $0x151] sm:$0xff] }
  0x56   : > { %1578 = vmatmul.f32.gmra.mxu2 %v7660_v15  ;;  %v7736_v38 = vld [vmem:[#allocation2 + $0x60] sm:$0xff]  ;;  %300 = vst.msk [vmem:[#allocation2 + $0xc1] sm:$0xff] %vm285_vm0, %v266_v14  ;;  %v1242_v59 = vld [vmem:[%s11817_s1 + $0x1d8] sm:$0xff]  ;;  %v1241_v14 = vld [vmem:[%s11817_s1 + $0x1d0] sm:$0xff] }
  0x57   : > { %7205 = vmatpush.msra.mxu3 %v7361_v16  ;;  %v7689_v16 = vld [vmem:[#allocation2 + $0x38] sm:$0xff]  ;;  %v7738_v39 = vld [vmem:[#allocation2 + $0x61] sm:$0xff]  ;;  %v7789_v61 = vld [vmem:[#allocation2 + $0x90] sm:$0xff]  ;;  %301 = vst.msk [vmem:[#allocation2 + $0xc9] sm:$0xff] %vm285_vm0, %v267_v17 }
  0x58   : > { %v7709_v27 = vld [vmem:[#allocation2 + $0x48] sm:$0xff]  ;;  %v7791_v62 = vld [vmem:[#allocation2 + $0x91] sm:$0xff]  ;;  %302 = vst.msk [vmem:[#allocation2 + $0xd9] sm:$0xff] %vm285_vm0, %v268_v36 }
  0x59   : > { %7206 = vmatpush.msra.mxu3 %v7378_v19  ;;  %v7691_v19 = vld [vmem:[#allocation2 + $0x39] sm:$0xff]  ;;  %v7717_v30 = vld [vmem:[#allocation2 + $0x4a] sm:$0xff]  ;;  %v7775_v55 = vld [vmem:[#allocation2 + $0x81] sm:$0xff] }
  0x5a   : > { %1421 = vmatmul.f32.gmra.mxu3 %v344_v7  ;;  %v7723_v32 = vld [vmem:[#allocation2 + $0x50] sm:$0xff]  ;;  %v7782_v58 = vld [vmem:[#allocation2 + $0x82] sm:$0xff]  ;;  %v7801_v4 = vld [vmem:[#allocation2 + $0x98] sm:$0xff] }
  0x5b   : > { %7207 = vmatpush.msra.mxu3 %v7398_v23  ;;  %v1258_v23 = vld [vmem:[%s11817_s1 + $0x258] sm:$0xff]  ;;  %v7814_v7 = vld [vmem:[#allocation2 + $0xa8] sm:$0xff] }
  0x5c   : > { %1355 = vmatmul.f32.gmra.mxu0 %v7674_v18  ;;  %v7725_v33 = vld [vmem:[#allocation2 + $0x51] sm:$0xff]  ;;  %v7803_v9 = vld [vmem:[#allocation2 + $0x99] sm:$0xff]  ;;  %v7816_v20 = vld [vmem:[#allocation2 + $0xa9] sm:$0xff] }
  0x5d   : > { %1468 = vmatmul.f32.gmra.mxu1 %v7676_v10  ;;  %7208 = vmatpush.msra.mxu3 %v7408_v25  ;;  %v259_v25 = vld [vmem:[%s7603_s25 + $0x38] sm:$0xff]  ;;  %v7861_v56 = vld [vmem:[#allocation2 + $0xc0] sm:$0xff] }
  0x5e   : > { %1581 = vmatmul.f32.gmra.mxu2 %v7681_v21  ;;  %1783 = vmatpush.msrb.mxu0 %v1258_v23  ;;  %293 = vst.msk [vmem:[#allocation2 + $0x69] sm:$0xff] %vm285_vm0, %v259_v25  ;;  %v7729_v35 = vld [vmem:[#allocation2 + $0x52] sm:$0xff]  ;;  %v7807_v2 = vld [vmem:[#allocation2 + $0x9a] sm:$0xff]  ;;  %v7824_v23 = vld [vmem:[#allocation2 + $0xaa] sm:$0xff] }
  0x5f   : > { %7209 = vmatpush.msra.mxu3 %v7429_v28  ;;  %v7711_v28 = vld [vmem:[#allocation2 + $0x49] sm:$0xff]  ;;  %v7796_v0 = vld [vmem:[#allocation2 + $0x92] sm:$0xff] }
  0x60   : > { %1784 = vmatpush.msrb.mxu0 %v1257_v29  ;;  %v1245_v25 = vld [vmem:[%s11817_s1 + $0x1f0] sm:$0xff]  ;;  %v411_v29 = vld [vmem:[#allocation2 + $0x159] sm:$0xff] }
  0x61   : > { %7210 = vmatpush.msra.mxu3 %v7446_v31  ;;  %v347_v31 = vld [vmem:[#allocation2 + $0x158] sm:$0xff] }
  0x62   : > { %1424 = vmatmul.f32.gmra.mxu3 %v345_v13  ;;  %v1246_v13 = vld [vmem:[%s11817_s1 + $0x1f8] sm:$0xff] }
  0x63   : > { %7211 = vmatpush.msra.mxu3 %v7463_v34  ;;  %v260_v34 = vld [vmem:[%s7603_s25 + $0x40] sm:$0xff]  ;;  %v413_v17 = vld [vmem:[#allocation2 + $0x171] sm:$0xff] }
  0x64   : > { %1358 = vmatmul.f32.gmra.mxu0 %v7689_v16  ;;  %294 = vst.msk [vmem:[#allocation2 + $0x79] sm:$0xff] %vm285_vm0, %v260_v34  ;;  %v7837_v34 = vld [vmem:[#allocation2 + $0xb1] sm:$0xff] }
  0x65   : > { %1471 = vmatmul.f32.gmra.mxu1 %v7691_v19  ;;  %7212 = vmatpush.msra.mxu3 %v7480_v37  ;;  %v348_v37 = vld [vmem:[#allocation2 + $0x168] sm:$0xff]  ;;  %v1250_v36 = vld [vmem:[%s11817_s1 + $0x218] sm:$0xff] }
  0x66   : > { %1584 = vmatmul.f32.gmra.mxu2 %v7699_v24  ;;  %v7743_v41 = vld [vmem:[#allocation2 + $0x62] sm:$0xff]  ;;  %v7757_v47 = vld [vmem:[#allocation2 + $0x6a] sm:$0xff] }
  0x67   : > { %7213 = vmatpush.msra.mxu3 %v7497_v40  ;;  %v1256_v40 = vld [vmem:[%s11817_s1 + $0x248] sm:$0xff] }
  0x68   : > { %1785 = vmatpush.msrb.mxu0 %v1256_v40  ;;  %v7748_v43 = vld [vmem:[#allocation2 + $0x68] sm:$0xff]  ;;  %v7844_v40 = vld [vmem:[#allocation2 + $0xb2] sm:$0xff] }
  0x69   : > { %7214 = vmatpush.msra.mxu3 %v7523_v44  ;;  %v7750_v44 = vld [vmem:[#allocation2 + $0x69] sm:$0xff] }
  0x6a   : > { %1427 = vmatmul.f32.gmra.mxu3 %v346_v26  ;;  %v1278_v26 = vld [vmem:[%s11817_s1 + $0x2f8] sm:$0xff] }
  0x6b   : > { %7215 = vmatpush.msra.mxu3 %v7536_v46  ;;  %v1255_v46 = vld [vmem:[%s11817_s1 + $0x240] sm:$0xff]  ;;  %v7764_v50 = vld [vmem:[#allocation2 + $0x78] sm:$0xff]  ;;  %1892 = vmatpush.msrb.mxu1 %v1278_v26  ;;  %v270_v26 = vld [vmem:[%s7603_s25 + $0x90] sm:$0xff] }
  0x6c   : > { %1361 = vmatmul.f32.gmra.mxu0 %v7709_v27  ;;  %v7766_v51 = vld [vmem:[#allocation2 + $0x79] sm:$0xff]  ;;  %304 = vst.msk [vmem:[#allocation2 + $0xf1] sm:$0xff] %vm285_vm0, %v270_v26 }
  0x6d   : > { %1474 = vmatmul.f32.gmra.mxu1 %v7711_v28  ;;  %1786 = vmatpush.msrb.mxu0 %v1255_v46  ;;  %v7768_v52 = vld [vmem:[#allocation2 + $0x7a] sm:$0xff] }
  0x6e   : > { %1587 = vmatmul.f32.gmra.mxu2 %v7717_v30  ;;  %v7773_v54 = vld [vmem:[#allocation2 + $0x80] sm:$0xff] }
  0x6f   : > { %1787 = vmatpush.msrb.mxu0 %v1254_v57  ;;  %v1243_v46 = vld [vmem:[%s11817_s1 + $0x1e0] sm:$0xff] }
  0x70   : > { %v7863_v57 = vld [vmem:[#allocation2 + $0xc1] sm:$0xff]  ;;  %v7918_v26 = vld [vmem:[#allocation2 + $0xd9] sm:$0xff] }
  0x71   : > { %1788 = vmatpush.msrb.mxu0 %v1253_v63  ;;  %v7871_v63 = vld [vmem:[#allocation2 + $0xc2] sm:$0xff]  ;;  %11869 = vst [vmem:[#allocation14_spill] sm:$0xff] %v7918_v26 }
  0x72   : > { %1430 = vmatmul.f32.gmra.mxu3 %v347_v31  ;;  %v7835_v31 = vld [vmem:[#allocation2 + $0xb0] sm:$0xff] }
  0x73   : > { %1789 = vmatpush.msrb.mxu0 %v1252_v22  ;;  %v7885_v22 = vld [vmem:[#allocation2 + $0xc8] sm:$0xff] }
  0x74   : > { %1364 = vmatmul.f32.gmra.mxu0 %v7723_v32 }
  0x75   : > { %1477 = vmatmul.f32.gmra.mxu1 %v7725_v33  ;;  %1790 = vmatpush.msrb.mxu0 %v1251_v48  ;;  %v1276_v48 = vld [vmem:[%s11817_s1 + $0x2e8] sm:$0xff] }
  0x76   : > { %1590 = vmatmul.f32.gmra.mxu2 %v7729_v35 }
  0x77   : > { %1791 = vmatpush.msrb.mxu0 %v1250_v36 }
  0x7a   : > { %1433 = vmatmul.f32.gmra.mxu3 %v348_v37  ;;  %v1244_v37 = vld [vmem:[%s11817_s1 + $0x1e8] sm:$0xff] }
  0x7c   : > { %1367 = vmatmul.f32.gmra.mxu0 %v7736_v38 }
  0x7d   : > { %1480 = vmatmul.f32.gmra.mxu1 %v7738_v39 }
  0x7e   : > { %1593 = vmatmul.f32.gmra.mxu2 %v7743_v41 }
  0x82   : > { %1436 = vmatmul.f32.gmra.mxu3 %v349_v42 }
  0x84   : > { %1370 = vmatmul.f32.gmra.mxu0 %v7748_v43 }
  0x85   : > { %1483 = vmatmul.f32.gmra.mxu1 %v7750_v44 }
  0x86   : > { %1596 = vmatmul.f32.gmra.mxu2 %v7757_v47 }
  0x8a   : > { %1528 = vmatmul.f32.vlgmr.msrb.gmra.mxu3 %v406_v49  ;;  %v269_v49 = vld [vmem:[%s7603_s25 + $0x88] sm:$0xff] }
  0x8b   : > { %1666 = vmatpush.msrb.mxu3 %v1246_v13  ;;  %303 = vst.msk [vmem:[#allocation2 + $0xe1] sm:$0xff] %vm285_vm0, %v269_v49  ;;  %v271_v49 = vld [vmem:[%s7603_s25 + $0x98] sm:$0xff] }
  0x8c   : > { %1373 = vmatmul.f32.gmra.mxu0 %v7764_v50  ;;  %305 = vst.msk [vmem:[#allocation2 + $0xf9] sm:$0xff] %vm285_vm0, %v271_v49  ;;  %v1249_v49 = vld [vmem:[%s11817_s1 + $0x210] sm:$0xff] }
  0x8d   : > { %1486 = vmatmul.f32.gmra.mxu1 %v7766_v51  ;;  %1667 = vmatpush.msrb.mxu3 %v1245_v25  ;;  %v7887_v25 = vld [vmem:[#allocation2 + $0xc9] sm:$0xff] }
  0x8e   : > { %1599 = vmatmul.f32.gmra.mxu2 %v7768_v52  ;;  %11864 = vst [vmem:[#allocation9_spill] sm:$0xff] %v7887_v25  ;;  %1792 = vmatpush.msrb.mxu0 %v1249_v49  ;;  %v1275_v49 = vld [vmem:[%s11817_s1 + $0x2e0] sm:$0xff] }
  0x8f   : > { %1668 = vmatpush.msrb.mxu3 %v1244_v37  ;;  %v7897_v37 = vld [vmem:[#allocation2 + $0xca] sm:$0xff] }
  0x90   : > { %11865 = vst [vmem:[#allocation10_spill] sm:$0xff] %v7897_v37 }
  0x91   : > { %1669 = vmatpush.msrb.mxu3 %v1243_v46  ;;  %v1239_v46 = vld [vmem:[%s11817_s1 + $0x1c0] sm:$0xff] }
  0x92   : > { %1531 = vmatmul.f32.gmra.mxu3 %v407_v53  ;;  %v412_v53 = vld [vmem:[#allocation2 + $0x169] sm:$0xff]  ;;  %v7923_v36 = vld [vmem:[#allocation2 + $0xda] sm:$0xff] }
  0x93   : > { %1670 = vmatpush.msrb.mxu3 %v1242_v59  ;;  %11870 = vst [vmem:[#allocation15_spill] sm:$0xff] %v7923_v36 }
  0x94   : > { %1376 = vmatmul.f32.gmra.mxu0 %v7773_v54 }
  0x95   : > { %1489 = vmatmul.f32.gmra.mxu1 %v7775_v55  ;;  %1671 = vmatpush.msrb.mxu3 %v1241_v14  ;;  %v7914_v14 = vld [vmem:[#allocation2 + $0xd8] sm:$0xff] }
  0x96   : > { %1602 = vmatmul.f32.gmra.mxu2 %v7782_v58 }
  0x9a   : > { %1534 = vmatmul.f32.gmra.mxu3 %v408_v60  ;;  %v1277_v60 = vld [vmem:[%s11817_s1 + $0x2f0] sm:$0xff] }
  0x9b   : > { %1893 = vmatpush.msrb.mxu1 %v1277_v60 }
  0x9c   : > { %1379 = vmatmul.f32.gmra.mxu0 %v7789_v61 }
  0x9d   : > { %1492 = vmatmul.f32.gmra.mxu1 %v7791_v62 }
  0x9e   : > { %1605 = vmatmul.f32.gmra.mxu2 %v7796_v0  ;;  %1894 = vmatpush.msrb.mxu1 %v1276_v48  ;;  %v1237_v48 = vld [vmem:[%s11817_s1 + $0x1b0] sm:$0xff] }
  0xa0   : > { %1895 = vmatpush.msrb.mxu1 %v1275_v49 }
  0xa2   : > { %1537 = vmatmul.f32.gmra.mxu3 %v409_v1 }
  0xa4   : > { %1382 = vmatmul.f32.gmra.mxu0 %v7801_v4 }
  0xa5   : > { %1495 = vmatmul.f32.gmra.mxu1 %v7803_v9 }
  0xa6   : > { %1608 = vmatmul.f32.gmra.mxu2 %v7807_v2 }
  0xa8   : > { %v7848_v42 = vpop.f32.mrf.mxu0 }
  0xa9   : > { %11859 = vst [vmem:[#allocation4_spill] sm:$0xff] %v7848_v42  ;;  %v7985_v42 = vld [vmem:[#allocation2 + $0xf0] sm:$0xff] }
  0xaa   : > { %1540 = vmatmul.f32.gmra.mxu3 %v410_v3  ;;  %11879 = vst [vmem:[#allocation24_spill] sm:$0xff] %v7985_v42 }
  0xac   : > { %1385 = vmatmul.f32.gmra.mxu0 %v7814_v7 }
  0xad   : > { %1498 = vmatmul.f32.gmra.mxu1 %v7816_v20  ;;  %v7850_v45 = vpop.f32.mrf.mxu1 }
  0xae   : > { %1611 = vmatmul.f32.gmra.mxu2 %v7824_v23  ;;  %11860 = vst [vmem:[#allocation5_spill] sm:$0xff] %v7850_v45  ;;  %v1236_v45 = vld [vmem:[%s11817_s1 + $0x1a8] sm:$0xff] }
  0xaf   : > { %v7875_v1 = vpop.f32.mrf.mxu2 }
  0xb0   : > { %11861 = vst [vmem:[#allocation6_spill] sm:$0xff] %v7875_v1  ;;  %v7881_v3 = vpop.f32.mrf.mxu0 }
  0xb1   : > { %11862 = vst [vmem:[#allocation7_spill] sm:$0xff] %v7881_v3  ;;  %v272_v3 = vld [vmem:[%s7603_s25 + $0xa0] sm:$0xff] }
  0xb2   : > { %1543 = vmatmul.f32.gmra.mxu3 %v411_v29  ;;  %v1240_v29 = vld [vmem:[%s11817_s1 + $0x1c8] sm:$0xff]  ;;  %306 = vst.msk [vmem:[#allocation2 + $0x109] sm:$0xff] %vm285_vm0, %v272_v3  ;;  %v1235_v3 = vld [vmem:[%s11817_s1 + $0x1a0] sm:$0xff] }
  0xb3   : > { %1672 = vmatpush.msrb.mxu3 %v1240_v29  ;;  %v1238_v29 = vld [vmem:[%s11817_s1 + $0x1b8] sm:$0xff] }
  0xb4   : > { %1388 = vmatmul.f32.gmra.mxu0 %v7835_v31 }
  0xb5   : > { %1501 = vmatmul.f32.gmra.mxu1 %v7837_v34  ;;  %v7883_v13 = vpop.f32.mrf.mxu1  ;;  %1673 = vmatpush.msrb.mxu3 %v1239_v46 }
  0xb6   : > { %1614 = vmatmul.f32.gmra.mxu2 %v7844_v40  ;;  %11863 = vst [vmem:[#allocation8_spill] sm:$0xff] %v7883_v13  ;;  %v7945_v13 = vld [vmem:[#allocation2 + $0xe1] sm:$0xff] }
  0xb7   : > { %v7909_v59 = vpop.f32.mrf.mxu2  ;;  %1674 = vmatpush.msrb.mxu3 %v1238_v29  ;;  %v471_v29 = vld [vmem:[#allocation2 + $0x12a] sm:$0xff]  ;;  %11874 = vst [vmem:[#allocation19_spill] sm:$0xff] %v7945_v13 }
  0xb8   : > { %11866 = vst [vmem:[#allocation11_spill] sm:$0xff] %v7909_v59  ;;  %v7943_v59 = vld [vmem:[#allocation2 + $0xe0] sm:$0xff] }
  0xb9   : > { %1675 = vmatpush.msrb.mxu3 %v1237_v48  ;;  %11873 = vst [vmem:[#allocation18_spill] sm:$0xff] %v7943_v59  ;;  %v1293_v48 = vld [vmem:[%s11817_s1 + $0x370] sm:$0xff] }
  0xba   : > { %1546 = vmatmul.f32.gmra.mxu3 %v412_v53  ;;  %v470_v53 = vld [vmem:[#allocation2 + $0x122] sm:$0xff] }
  0xbb   : > { %1676 = vmatpush.msrb.mxu3 %v1236_v45  ;;  %v1291_v45 = vld [vmem:[%s11817_s1 + $0x360] sm:$0xff] }
  0xbc   : > { %1391 = vmatmul.f32.gmra.mxu0 %v7861_v56 }
  0xbd   : > { %1504 = vmatmul.f32.gmra.mxu1 %v7863_v57  ;;  %1677 = vmatpush.msrb.mxu3 %v1235_v3 }
  0xbe   : > { %1617 = vmatmul.f32.gmra.mxu2 %v7871_v63 }
  0xc2   : > { %1549 = vmatmul.f32.gmra.mxu3 %v413_v17 }
  0xc4   : > { %1394 = vmatmul.f32.gmra.mxu0 %v7885_v22 }
  0xc5   : > { %1507 = vmatmul.f32.gmra.mxu1 %v7887_v25  ;;  %v1263_v25 = vld [vmem:[%s11817_s1 + $0x280] sm:$0xff] }
  0xc6   : > { %1620 = vmatmul.f32.gmra.mxu2 %v7897_v37  ;;  %v8084_v37 = vld [vmem:[#allocation2 + $0x109] sm:$0xff] }
  0xc7   : > { %11892 = vst [vmem:[#allocation37_spill] sm:$0xff] %v8084_v37 }
  0xc9   : > { %v7912_v60 = vpop.f32.mrf.mxu0 }
  0xca   : > { %11867 = vst [vmem:[#allocation12_spill] sm:$0xff] %v7912_v60  ;;  %v7916_v17 = vpop.f32.mrf.mxu1  ;;  %1641 = vmatmul.f32.vlgmr.msra.gmra.mxu3 %v470_v53  ;;  %v1294_v53 = vld [vmem:[%s11817_s1 + $0x378] sm:$0xff] }
  0xcb   : > { %11868 = vst [vmem:[#allocation13_spill] sm:$0xff] %v7916_v17  ;;  %2005 = vmatpush.msrb.mxu2 %v1294_v53  ;;  %v7960_v53 = vld [vmem:[#allocation2 + $0xe2] sm:$0xff] }
  0xcc   : > { %1397 = vmatmul.f32.gmra.mxu0 %v7914_v14  ;;  %11876 = vst [vmem:[#allocation21_spill] sm:$0xff] %v7960_v53 }
  0xcd   : > { %1510 = vmatmul.f32.gmra.mxu1 %v7918_v26  ;;  %v7927_v46 = vpop.f32.mrf.mxu3  ;;  %2006 = vmatpush.msrb.mxu2 %v1293_v48  ;;  %v1290_v48 = vld [vmem:[%s11817_s1 + $0x358] sm:$0xff] }
  0xce   : > { %1623 = vmatmul.f32.gmra.mxu2 %v7923_v36 }
  0xd1   : > { %v7939_v17 = vpop.f32.mrf.mxu0  ;;  %v7941_v60 = vpop.f32.mrf.mxu2 }
  0xd2   : > { %11871 = vst [vmem:[#allocation16_spill] sm:$0xff] %v7939_v17  ;;  %1644 = vmatmul.f32.gmra.mxu3 %v471_v29  ;;  %v7948_v1 = vpop.f32.mrf.mxu1  ;;  %v1292_v29 = vld [vmem:[%s11817_s1 + $0x368] sm:$0xff]  ;;  %v472_v17 = vld [vmem:[#allocation2 + $0x13a] sm:$0xff] }
  0xd3   : > { %11872 = vst [vmem:[#allocation17_spill] sm:$0xff] %v7941_v60  ;;  %2007 = vmatpush.msrb.mxu2 %v1292_v29  ;;  %v273_v60 = vld [vmem:[%s7603_s25 + $0xa8] sm:$0xff] }
  0xd4   : > { %11875 = vst [vmem:[#allocation20_spill] sm:$0xff] %v7948_v1  ;;  %1400 = vmatmul.f32.gmra.mxu0 %v7943_v59  ;;  %v8082_v59 = vld [vmem:[#allocation2 + $0x108] sm:$0xff] }
  0xd5   : > { %1513 = vmatmul.f32.gmra.mxu1 %v7945_v13  ;;  %v7967_v1 = vpop.f32.mrf.mxu3  ;;  %2008 = vmatpush.msrb.mxu2 %v1291_v45  ;;  %307 = vst.msk [vmem:[#allocation2 + $0x111] sm:$0xff] %vm285_vm0, %v273_v60  ;;  %v7987_v13 = vld [vmem:[#allocation2 + $0xf1] sm:$0xff]  ;;  %v1248_v60 = vld [vmem:[%s11817_s1 + $0x208] sm:$0xff] }
  0xd6   : > { %1626 = vmatmul.f32.gmra.mxu2 %v7960_v53  ;;  %11880 = vst [vmem:[#allocation25_spill] sm:$0xff] %v7987_v13  ;;  %v1234_v53 = vld [vmem:[%s11817_s1 + $0x198] sm:$0xff]  ;;  %v1289_v45 = vld [vmem:[%s11817_s1 + $0x350] sm:$0xff]  ;;  %1793 = vmatpush.msrb.mxu0 %v1248_v60 }
  0xd7   : > { %2009 = vmatpush.msrb.mxu2 %v1290_v48  ;;  %1678 = vmatpush.msrb.mxu3 %v1234_v53  ;;  %v1288_v48 = vld [vmem:[%s11817_s1 + $0x348] sm:$0xff]  ;;  %v1233_v53 = vld [vmem:[%s11817_s1 + $0x190] sm:$0xff]  ;;  %11891 = vst [vmem:[#allocation36_spill] sm:$0xff] %v8082_v59 }
  0xd8   : > { %v1273_v60 = vld [vmem:[%s11817_s1 + $0x2d0] sm:$0xff] }
  0xd9   : > { %v7981_v49 = vpop.f32.mrf.mxu0  ;;  %v7983_v29 = vpop.f32.mrf.mxu2  ;;  %2010 = vmatpush.msrb.mxu2 %v1289_v45  ;;  %1679 = vmatpush.msrb.mxu3 %v1233_v53  ;;  %v1272_v45 = vld [vmem:[%s11817_s1 + $0x2c8] sm:$0xff]  ;;  %v8032_v53 = vld [vmem:[#allocation2 + $0xf8] sm:$0xff] }
  0xda   : > { %11877 = vst [vmem:[#allocation22_spill] sm:$0xff] %v7981_v49  ;;  %1647 = vmatmul.f32.gmra.mxu3 %v472_v17  ;;  %v7989_v3 = vpop.f32.mrf.mxu1  ;;  %v8000_v49 = vld [vmem:[#allocation2 + $0xf2] sm:$0xff] }
  0xdb   : > { %11878 = vst [vmem:[#allocation23_spill] sm:$0xff] %v7983_v29  ;;  %v1274_v17 = vld [vmem:[%s11817_s1 + $0x2d8] sm:$0xff]  ;;  %v1287_v29 = vld [vmem:[%s11817_s1 + $0x340] sm:$0xff]  ;;  %2011 = vmatpush.msrb.mxu2 %v1288_v48  ;;  %v1232_v48 = vld [vmem:[%s11817_s1 + $0x188] sm:$0xff] }
  0xdc   : > { %11881 = vst [vmem:[#allocation26_spill] sm:$0xff] %v7989_v3  ;;  %1403 = vmatmul.f32.gmra.mxu0 %v7985_v42  ;;  %1896 = vmatpush.msrb.mxu1 %v1274_v17  ;;  %v473_v17 = vld [vmem:[#allocation2 + $0x142] sm:$0xff] }
  0xdd   : > { %11882 = vst [vmem:[#allocation27_spill] sm:$0xff] %v8000_v49  ;;  %1516 = vmatmul.f32.gmra.mxu1 %v7987_v13  ;;  %v8010_v3 = vpop.f32.mrf.mxu3  ;;  %v1286_v13 = vld [vmem:[%s11817_s1 + $0x338] sm:$0xff]  ;;  %2012 = vmatpush.msrb.mxu2 %v1287_v29 }
  0xde   : > { %1629 = vmatmul.f32.gmra.mxu2 %v8000_v49  ;;  %1897 = vmatpush.msrb.mxu1 %v1273_v60  ;;  %11885 = vst [vmem:[#allocation30_spill] sm:$0xff] %v8032_v53  ;;  %v8034_v49 = vld [vmem:[#allocation2 + $0xf9] sm:$0xff] }
  0xdf   : > { %11886 = vst [vmem:[#allocation31_spill] sm:$0xff] %v8034_v49  ;;  %v1271_v60 = vld [vmem:[%s11817_s1 + $0x2c0] sm:$0xff]  ;;  %2013 = vmatpush.msrb.mxu2 %v1286_v13  ;;  %1680 = vmatpush.msrb.mxu3 %v1232_v48  ;;  %v1270_v29 = vld [vmem:[%s11817_s1 + $0x2b8] sm:$0xff] }
  0xe0   : > { %1898 = vmatpush.msrb.mxu1 %v1272_v45  ;;  %v1284_v45 = vld [vmem:[%s11817_s1 + $0x328] sm:$0xff]  ;;  %v1231_v13 = vld [vmem:[%s11817_s1 + $0x180] sm:$0xff] }
  0xe1   : > { %v8028_v42 = vpop.f32.mrf.mxu0  ;;  %v8030_v36 = vpop.f32.mrf.mxu2  ;;  %v1247_v48 = vld [vmem:[%s11817_s1 + $0x200] sm:$0xff]  ;;  %1681 = vmatpush.msrb.mxu3 %v1231_v13  ;;  %v1282_v13 = vld [vmem:[%s11817_s1 + $0x318] sm:$0xff] }
  0xe2   : > { %11883 = vst [vmem:[#allocation28_spill] sm:$0xff] %v8028_v42  ;;  %1650 = vmatmul.f32.gmra.mxu3 %v473_v17  ;;  %v8036_v26 = vpop.f32.mrf.mxu1  ;;  %v1285_v42 = vld [vmem:[%s11817_s1 + $0x330] sm:$0xff]  ;;  %1899 = vmatpush.msrb.mxu1 %v1271_v60  ;;  %v1283_v60 = vld [vmem:[%s11817_s1 + $0x320] sm:$0xff] }
  0xe3   : > { %11884 = vst [vmem:[#allocation29_spill] sm:$0xff] %v8030_v36  ;;  %v8047_v36 = vld [vmem:[#allocation2 + $0xfa] sm:$0xff]  ;;  %2014 = vmatpush.msrb.mxu2 %v1285_v42  ;;  %v474_v42 = vld [vmem:[#allocation2 + $0x152] sm:$0xff]  ;;  %1794 = vmatpush.msrb.mxu0 %v1247_v48 }
  0xe4   : > { %11887 = vst [vmem:[#allocation32_spill] sm:$0xff] %v8036_v26  ;;  %1406 = vmatmul.f32.gmra.mxu0 %v8032_v53  ;;  %v1269_v26 = vld [vmem:[%s11817_s1 + $0x2b0] sm:$0xff]  ;;  %1900 = vmatpush.msrb.mxu1 %v1270_v29  ;;  %v1267_v48 = vld [vmem:[%s11817_s1 + $0x2a0] sm:$0xff] }
  0xe5   : > { %11888 = vst [vmem:[#allocation33_spill] sm:$0xff] %v8047_v36  ;;  %1519 = vmatmul.f32.gmra.mxu1 %v8034_v49  ;;  %v8057_v17 = vpop.f32.mrf.mxu3  ;;  %2015 = vmatpush.msrb.mxu2 %v1284_v45  ;;  %v1268_v49 = vld [vmem:[%s11817_s1 + $0x2a8] sm:$0xff]  ;;  %v1310_v45 = vld [vmem:[%s11817_s1 + $0x3f8] sm:$0xff] }
  0xe6   : > { %1632 = vmatmul.f32.gmra.mxu2 %v8047_v36  ;;  %1901 = vmatpush.msrb.mxu1 %v1269_v26  ;;  %v1281_v26 = vld [vmem:[%s11817_s1 + $0x310] sm:$0xff] }
  0xe7   : > { %2016 = vmatpush.msrb.mxu2 %v1283_v60  ;;  %v1266_v60 = vld [vmem:[%s11817_s1 + $0x298] sm:$0xff]  ;;  %2118 = vmatpush.msra.mxu3 %v1310_v45  ;;  %v1264_v45 = vld [vmem:[%s11817_s1 + $0x288] sm:$0xff] }
  0xe8   : > { %1902 = vmatpush.msrb.mxu1 %v1268_v49  ;;  %v1280_v49 = vld [vmem:[%s11817_s1 + $0x308] sm:$0xff] }
  0xe9   : > { %v8078_v36 = vpop.f32.mrf.mxu0  ;;  %v8080_v53 = vpop.f32.mrf.mxu2  ;;  %2017 = vmatpush.msrb.mxu2 %v1282_v13  ;;  %v1265_v13 = vld [vmem:[%s11817_s1 + $0x290] sm:$0xff] }
  0xea   : > { %11889 = vst [vmem:[#allocation34_spill] sm:$0xff] %v8078_v36  ;;  %1653 = vmatmul.f32.gmra.mxu3 %v474_v42  ;;  %v8086_v29 = vpop.f32.mrf.mxu1  ;;  %v8094_v36 = vld [vmem:[#allocation2 + $0x10a] sm:$0xff]  ;;  %1903 = vmatpush.msrb.mxu1 %v1267_v48 }
  0xeb   : > { %11890 = vst [vmem:[#allocation35_spill] sm:$0xff] %v8080_v53  ;;  %2018 = vmatpush.msrb.mxu2 %v1281_v26  ;;  %v1279_v53 = vld [vmem:[%s11817_s1 + $0x300] sm:$0xff] }
  0xec   : > { %11893 = vst [vmem:[#allocation38_spill] sm:$0xff] %v8086_v29  ;;  %1409 = vmatmul.f32.gmra.mxu0 %v8082_v59  ;;  %v475_v29 = vld [vmem:[#allocation2 + $0x15a] sm:$0xff]  ;;  %1904 = vmatpush.msrb.mxu1 %v1266_v60  ;;  %v8125_v59 = vld [vmem:[#allocation2 + $0x111] sm:$0xff] }
  0xed   : > { %11894 = vst [vmem:[#allocation39_spill] sm:$0xff] %v8094_v36  ;;  %1522 = vmatmul.f32.gmra.mxu1 %v8084_v37  ;;  %v8104_v42 = vpop.f32.mrf.mxu3  ;;  %v8123_v37 = vld [vmem:[#allocation2 + $0x110] sm:$0xff]  ;;  %2019 = vmatpush.msrb.mxu2 %v1280_v49  ;;  %v1326_v60 = vld [vmem:[%s11817_s1 + $0x478] sm:$0xff] }
  0xee   : > { %1635 = vmatmul.f32.gmra.mxu2 %v8094_v36  ;;  %1905 = vmatpush.msrb.mxu1 %v1265_v13 }
  0xef   : > { %2020 = vmatpush.msrb.mxu2 %v1279_v53  ;;  %2231 = vmatpush.msra.mxu0 %v1326_v60  ;;  %v1309_v53 = vld [vmem:[%s11817_s1 + $0x3f0] sm:$0xff] }
  0xf0   : > { %1906 = vmatpush.msrb.mxu1 %v1264_v45  ;;  %2119 = vmatpush.msra.mxu3 %v1309_v53  ;;  %v477_v45 = vld [vmem:[#allocation2 + $0x172] sm:$0xff] }
  0xf1   : > { %v8119_v48 = vpop.f32.mrf.mxu0  ;;  %v8121_v36 = vpop.f32.mrf.mxu2  ;;  %v1325_v53 = vld [vmem:[%s11817_s1 + $0x470] sm:$0xff] }
  0xf2   : > { %11895 = vst [vmem:[#allocation40_spill] sm:$0xff] %v8119_v48  ;;  %1656 = vmatmul.f32.gmra.mxu3 %v475_v29  ;;  %v8127_v26 = vpop.f32.mrf.mxu1  ;;  %v8135_v48 = vld [vmem:[#allocation2 + $0x112] sm:$0xff]  ;;  %1907 = vmatpush.msrb.mxu1 %v1263_v25  ;;  %v476_v29 = vld [vmem:[#allocation2 + $0x16a] sm:$0xff] }
  0xf3   : > { %11896 = vst [vmem:[#allocation41_spill] sm:$0xff] %v8121_v36  ;;  %2232 = vmatpush.msra.mxu0 %v1325_v53  ;;  %v1308_v53 = vld [vmem:[%s11817_s1 + $0x3e8] sm:$0xff] }
  0xf4   : > { %11897 = vst [vmem:[#allocation42_spill] sm:$0xff] %v8127_v26  ;;  %1412 = vmatmul.f32.gmra.mxu0 %v8123_v37  ;;  %2120 = vmatpush.msra.mxu3 %v1308_v53 }
  0xf5   : > { %1525 = vmatmul.f32.gmra.mxu1 %v8125_v59  ;;  %v8139_v49 = vpop.f32.mrf.mxu3 }
  0xf6   : > { %1638 = vmatmul.f32.gmra.mxu2 %v8135_v48 }
  0xf9   : > { %v8142_v13 = vpop.f32.mrf.mxu0  ;;  %v8144_v26 = vpop.f32.mrf.mxu2 }
  0xfa   : > { %11898 = vst [vmem:[#allocation43_spill] sm:$0xff] %v8142_v13  ;;  %1659 = vmatmul.f32.gmra.mxu3 %v476_v29  ;;  %v8146_v36 = vpop.f32.mrf.mxu1 }
  0xfc   : > { %1795 = vmatmul.f32.vlgmr.msrb.gmra.mxu0 %v7641_v6 }
  0xfd   : > { %1908 = vmatmul.f32.vlgmr.msrb.gmra.mxu1 %v7647_v8  ;;  %v8153_v25 = vpop.f32.mrf.mxu3 }
  0xfe   : > { %2021 = vmatmul.f32.vlgmr.msrb.gmra.mxu2 %v7674_v18 }
 0x101   : > { %v8156_v60 = vpop.f32.mrf.mxu0  ;;  %v8158_v13 = vpop.f32.mrf.mxu2 }
 0x102   : > { %11899 = vst [vmem:[#allocation44_spill] sm:$0xff] %v8156_v60  ;;  %1662 = vmatmul.f32.gmra.mxu3 %v477_v45  ;;  %v8160_v29 = vpop.f32.mrf.mxu1 }
 0x104   : > { %1798 = vmatmul.f32.gmra.mxu0 %v7654_v12 }
 0x105   : > { %1911 = vmatmul.f32.gmra.mxu1 %v7660_v15  ;;  %v8167_v6 = vpop.f32.mrf.mxu3 }
 0x106   : > { %2024 = vmatmul.f32.gmra.mxu2 %v7689_v16 }
 0x109   : > { %v8170_v8 = vpop.f32.mrf.mxu0  ;;  %v8172_v60 = vpop.f32.mrf.mxu2 }
 0x10a   : > { %11900 = vst [vmem:[#allocation45_spill] sm:$0xff] %v8170_v8  ;;  %1682 = vmatmul.f32.vlgmr.msrb.gmra.mxu3 %v7639_v5  ;;  %v8175_v45 = vpop.f32.mrf.mxu1 }
 0x10b   : > { %11901 = vst [vmem:[#allocation46_spill] sm:$0xff] %v8175_v45 }
 0x10c   : > { %1801 = vmatmul.f32.gmra.mxu0 %v7676_v10  ;;  %v1324_v10 = vld [vmem:[%s11817_s1 + $0x468] sm:$0xff] }
 0x10d   : > { %1914 = vmatmul.f32.gmra.mxu1 %v7681_v21  ;;  %v1529_v12 = vpop.f32.mrf.mxu3  ;;  %2233 = vmatpush.msra.mxu0 %v1324_v10 }
 0x10e   : > { %v8183_v15 = vadd.f32 %v1529_v12, %v7927_v46  ;;  %2027 = vmatmul.f32.gmra.mxu2 %v7709_v27 }
 0x111   : > { %v8186_v8 = vpop.f32.mrf.mxu0  ;;  %v8188_v5 = vpop.f32.mrf.mxu2 }
 0x112   : > { %1685 = vmatmul.f32.gmra.mxu3 %v7652_v11  ;;  %v8191_v45 = vpop.f32.mrf.mxu1 }
 0x114   : > { %1804 = vmatmul.f32.gmra.mxu0 %v7691_v19  ;;  %v1307_v19 = vld [vmem:[%s11817_s1 + $0x3e0] sm:$0xff] }
 0x115   : > { %1917 = vmatmul.f32.gmra.mxu1 %v7699_v24  ;;  %v1532_v21 = vpop.f32.mrf.mxu3  ;;  %2121 = vmatpush.msra.mxu3 %v1307_v19 }
 0x116   : > { %v8199_v46 = vadd.f32 %v1532_v21, %v7967_v1  ;;  %2030 = vmatmul.f32.gmra.mxu2 %v7723_v32 }
 0x119   : > { %v8202_v53 = vpop.f32.mrf.mxu0  ;;  %v8204_v11 = vpop.f32.mrf.mxu2 }
 0x11a   : > { %1688 = vmatmul.f32.gmra.mxu3 %v7674_v18  ;;  %v8207_v12 = vpop.f32.mrf.mxu1 }
 0x11c   : > { %1807 = vmatmul.f32.gmra.mxu0 %v7711_v28  ;;  %v1323_v28 = vld [vmem:[%s11817_s1 + $0x460] sm:$0xff] }
 0x11d   : > { %1920 = vmatmul.f32.gmra.mxu1 %v7717_v30  ;;  %v1535_v24 = vpop.f32.mrf.mxu3  ;;  %2234 = vmatpush.msra.mxu0 %v1323_v28 }
 0x11e   : > { %v8215_v1 = vadd.f32 %v1535_v24, %v8010_v3  ;;  %2033 = vmatmul.f32.gmra.mxu2 %v7736_v38 }
 0x121   : > { %v8218_v10 = vpop.f32.mrf.mxu0  ;;  %v8220_v18 = vpop.f32.mrf.mxu2 }
 0x122   : > { %1691 = vmatmul.f32.gmra.mxu3 %v7689_v16  ;;  %v8223_v21 = vpop.f32.mrf.mxu1 }
 0x124   : > { %1810 = vmatmul.f32.gmra.mxu0 %v7725_v33  ;;  %v1306_v33 = vld [vmem:[%s11817_s1 + $0x3d8] sm:$0xff] }
 0x125   : > { %1923 = vmatmul.f32.gmra.mxu1 %v7729_v35  ;;  %v1538_v30 = vpop.f32.mrf.mxu3  ;;  %2122 = vmatpush.msra.mxu3 %v1306_v33 }
 0x126   : > { %v8231_v3 = vadd.f32 %v1538_v30, %v8057_v17  ;;  %2036 = vmatmul.f32.gmra.mxu2 %v7748_v43 }
 0x129   : > { %v8234_v19 = vpop.f32.mrf.mxu0  ;;  %v8236_v16 = vpop.f32.mrf.mxu2 }
 0x12a   : > { %1694 = vmatmul.f32.gmra.mxu3 %v7709_v27  ;;  %v8239_v24 = vpop.f32.mrf.mxu1 }
 0x12c   : > { %1813 = vmatmul.f32.gmra.mxu0 %v7738_v39  ;;  %v1322_v39 = vld [vmem:[%s11817_s1 + $0x458] sm:$0xff] }
 0x12d   : > { %1926 = vmatmul.f32.gmra.mxu1 %v7743_v41  ;;  %v1541_v35 = vpop.f32.mrf.mxu3  ;;  %2235 = vmatpush.msra.mxu0 %v1322_v39 }
 0x12e   : > { %v8247_v17 = vadd.f32 %v1541_v35, %v8104_v42  ;;  %2039 = vmatmul.f32.gmra.mxu2 %v7764_v50 }
 0x131   : > { %v8250_v28 = vpop.f32.mrf.mxu0  ;;  %v8252_v27 = vpop.f32.mrf.mxu2 }
 0x132   : > { %1697 = vmatmul.f32.gmra.mxu3 %v7723_v32  ;;  %v8255_v30 = vpop.f32.mrf.mxu1 }
 0x134   : > { %1816 = vmatmul.f32.gmra.mxu0 %v7750_v44  ;;  %v1305_v44 = vld [vmem:[%s11817_s1 + $0x3d0] sm:$0xff] }
 0x135   : > { %1929 = vmatmul.f32.gmra.mxu1 %v7757_v47  ;;  %v1544_v41 = vpop.f32.mrf.mxu3  ;;  %2123 = vmatpush.msra.mxu3 %v1305_v44 }
 0x136   : > { %v8263_v42 = vadd.f32 %v1544_v41, %v8139_v49  ;;  %2042 = vmatmul.f32.gmra.mxu2 %v7773_v54 }
 0x139   : > { %v8266_v33 = vpop.f32.mrf.mxu0  ;;  %v8268_v32 = vpop.f32.mrf.mxu2 }
 0x13a   : > { %1700 = vmatmul.f32.gmra.mxu3 %v7736_v38  ;;  %v8271_v35 = vpop.f32.mrf.mxu1 }
 0x13c   : > { %1819 = vmatmul.f32.gmra.mxu0 %v7766_v51  ;;  %v1321_v51 = vld [vmem:[%s11817_s1 + $0x450] sm:$0xff] }
 0x13d   : > { %1932 = vmatmul.f32.gmra.mxu1 %v7768_v52  ;;  %v1547_v47 = vpop.f32.mrf.mxu3  ;;  %2236 = vmatpush.msra.mxu0 %v1321_v51 }
 0x13e   : > { %v8279_v49 = vadd.f32 %v1547_v47, %v8153_v25  ;;  %2045 = vmatmul.f32.gmra.mxu2 %v7789_v61 }
 0x141   : > { %v8282_v39 = vpop.f32.mrf.mxu0  ;;  %v8284_v38 = vpop.f32.mrf.mxu2 }
 0x142   : > { %1703 = vmatmul.f32.gmra.mxu3 %v7748_v43  ;;  %v8287_v41 = vpop.f32.mrf.mxu1 }
 0x144   : > { %1822 = vmatmul.f32.gmra.mxu0 %v7775_v55  ;;  %v1304_v55 = vld [vmem:[%s11817_s1 + $0x3c8] sm:$0xff] }
 0x145   : > { %1935 = vmatmul.f32.gmra.mxu1 %v7782_v58  ;;  %v1550_v52 = vpop.f32.mrf.mxu3  ;;  %2124 = vmatpush.msra.mxu3 %v1304_v55 }
 0x146   : > { %v8295_v25 = vadd.f32 %v1550_v52, %v8167_v6  ;;  %2048 = vmatmul.f32.gmra.mxu2 %v7801_v4 }
 0x149   : > { %v8298_v44 = vpop.f32.mrf.mxu0  ;;  %v8300_v43 = vpop.f32.mrf.mxu2 }
 0x14a   : > { %1706 = vmatmul.f32.gmra.mxu3 %v7764_v50  ;;  %v8303_v47 = vpop.f32.mrf.mxu1 }
 0x14c   : > { %1825 = vmatmul.f32.gmra.mxu0 %v7791_v62  ;;  %v1320_v62 = vld [vmem:[%s11817_s1 + $0x448] sm:$0xff] }
 0x14d   : > { %1938 = vmatmul.f32.gmra.mxu1 %v7796_v0  ;;  %v1642_v58 = vpop.f32.mrf.mxu3  ;;  %2237 = vmatpush.msra.mxu0 %v1320_v62 }
 0x14e   : > { %v8311_v6 = vadd.f32 %v1642_v58, %v8183_v15  ;;  %2051 = vmatmul.f32.gmra.mxu2 %v7814_v7  ;;  %v1303_v58 = vld [vmem:[%s11817_s1 + $0x3c0] sm:$0xff] }
 0x14f   : > { %2125 = vmatpush.msra.mxu3 %v1303_v58 }
 0x150   : > { %11902 = vst [vmem:[#allocation47_spill] sm:$0xff] %v8311_v6  ;;  %v11928_v6 = vld [vmem:[#allocation30_spill] sm:$0xff] }
 0x151   : > { %v8314_v51 = vpop.f32.mrf.mxu0  ;;  %v8316_v50 = vpop.f32.mrf.mxu2 }
 0x152   : > { %1709 = vmatmul.f32.gmra.mxu3 %v7773_v54  ;;  %v8319_v52 = vpop.f32.mrf.mxu1 }
 0x154   : > { %1828 = vmatmul.f32.gmra.mxu0 %v7803_v9 }
 0x155   : > { %1941 = vmatmul.f32.gmra.mxu1 %v7807_v2  ;;  %v1645_v0 = vpop.f32.mrf.mxu3 }
 0x156   : > { %v8327_v15 = vadd.f32 %v1645_v0, %v8199_v46  ;;  %2054 = vmatmul.f32.gmra.mxu2 %v7835_v31  ;;  %v1319_v0 = vld [vmem:[%s11817_s1 + $0x440] sm:$0xff] }
 0x157   : > { %2238 = vmatpush.msra.mxu0 %v1319_v0 }
 0x158   : > { %11903 = vst [vmem:[#allocation48_spill] sm:$0xff] %v8327_v15 }
 0x159   : > { %v8330_v55 = vpop.f32.mrf.mxu0  ;;  %v8332_v54 = vpop.f32.mrf.mxu2 }
 0x15a   : > { %1712 = vmatmul.f32.gmra.mxu3 %v7789_v61  ;;  %v8338_v62 = vpop.f32.mrf.mxu1 }
 0x15c   : > { %1831 = vmatmul.f32.gmra.mxu0 %v7816_v20 }
 0x15d   : > { %1944 = vmatmul.f32.gmra.mxu1 %v7824_v23  ;;  %v1648_v9 = vpop.f32.mrf.mxu3 }
 0x15e   : > { %v8343_v2 = vadd.f32 %v1648_v9, %v8215_v1  ;;  %2057 = vmatmul.f32.gmra.mxu2 %v7861_v56  ;;  %v6887_v9 = vld [vmem:[%s11817_s1 + $0x4f8] sm:$0xff] }
 0x15f   : > { %3489 = vmatpush.msra.mxu1 %v6887_v9  ;;  %v11918_v9 = vld [vmem:[#allocation18_spill] sm:$0xff] }
 0x160   : > { %11904 = vst [vmem:[#allocation49_spill] sm:$0xff] %v8343_v2 }
 0x161   : > { %v8346_v46 = vpop.f32.mrf.mxu0  ;;  %v8348_v61 = vpop.f32.mrf.mxu2 }
 0x162   : > { %11905 = vst [vmem:[#allocation50_spill] sm:$0xff] %v8346_v46  ;;  %1715 = vmatmul.f32.gmra.mxu3 %v7801_v4  ;;  %v8356_v23 = vpop.f32.mrf.mxu1 }
 0x163   : > { %11906 = vst [vmem:[#allocation51_spill] sm:$0xff] %v8348_v61 }
 0x164   : > { %1834 = vmatmul.f32.gmra.mxu0 %v7837_v34  ;;  %11907 = vst [vmem:[#allocation52_spill] sm:$0xff] %v8356_v23  ;;  %v1302_v34 = vld [vmem:[%s11817_s1 + $0x3b8] sm:$0xff] }
 0x165   : > { %1947 = vmatmul.f32.gmra.mxu1 %v7844_v40  ;;  %v1651_v20 = vpop.f32.mrf.mxu3  ;;  %2126 = vmatpush.msra.mxu3 %v1302_v34 }
 0x166   : > { %v8359_v1 = vadd.f32 %v1651_v20, %v8231_v3  ;;  %2060 = vmatmul.f32.gmra.mxu2 %v7885_v22 }
 0x168   : > { %11908 = vst [vmem:[#allocation53_spill] sm:$0xff] %v8359_v1 }
 0x169   : > { %v8362_v58 = vpop.f32.mrf.mxu0  ;;  %v8364_v4 = vpop.f32.mrf.mxu2 }
 0x16a   : > { %11909 = vst [vmem:[#allocation54_spill] sm:$0xff] %v8362_v58  ;;  %1718 = vmatmul.f32.gmra.mxu3 %v7814_v7  ;;  %v8379_v7 = vpop.f32.mrf.mxu1  ;;  %v11934_v58 = vld [vmem:[#allocation36_spill] sm:$0xff] }
 0x16b   : > { %11910 = vst [vmem:[#allocation55_spill] sm:$0xff] %v8364_v4 }
 0x16c   : > { %1837 = vmatmul.f32.gmra.mxu0 %v7863_v57  ;;  %11912 = vst [vmem:[#allocation57_spill] sm:$0xff] %v8379_v7  ;;  %v1318_v57 = vld [vmem:[%s11817_s1 + $0x438] sm:$0xff] }
 0x16d   : > { %1950 = vmatmul.f32.gmra.mxu1 %v7871_v63  ;;  %v1654_v40 = vpop.f32.mrf.mxu3  ;;  %2239 = vmatpush.msra.mxu0 %v1318_v57  ;;  %v11915_v63 = vld [vmem:[#allocation9_spill] sm:$0xff] }
 0x16e   : > { %v8373_v3 = vadd.f32 %v1654_v40, %v8247_v17  ;;  %2063 = vmatmul.f32.gmra.mxu2 %v7914_v14  ;;  %v11916_v17 = vld [vmem:[#allocation10_spill] sm:$0xff] }
 0x170   : > { %11911 = vst [vmem:[#allocation56_spill] sm:$0xff] %v8373_v3 }
 0x171   : > { %v8381_v0 = vpop.f32.mrf.mxu0  ;;  %v8383_v20 = vpop.f32.mrf.mxu2 }
 0x172   : > { %11913 = vst [vmem:[#allocation58_spill] sm:$0xff] %v8381_v0  ;;  %1721 = vmatmul.f32.gmra.mxu3 %v7835_v31  ;;  %v8395_v3 = vpop.f32.mrf.mxu1  ;;  %v1301_v31 = vld [vmem:[%s11817_s1 + $0x3b0] sm:$0xff] }
 0x173   : > { %11914 = vst [vmem:[#allocation59_spill] sm:$0xff] %v8383_v20  ;;  %2127 = vmatpush.msra.mxu3 %v1301_v31  ;;  %v1317_v31 = vld [vmem:[%s11817_s1 + $0x430] sm:$0xff]  ;;  %v11932_v20 = vld [vmem:[#allocation25_spill] sm:$0xff] }
 0x174   : > { %1840 = vmatmul.f32.gmra.mxu0 %v11915_v63  ;;  %11919 = vst [vmem:[#allocation10_spill] sm:$0xff] %v8395_v3  ;;  %v11921_v63 = vld [vmem:[#allocation14_spill] sm:$0xff] }
 0x175   : > { %1953 = vmatmul.f32.gmra.mxu1 %v11916_v17  ;;  %v1657_v34 = vpop.f32.mrf.mxu3  ;;  %v11922_v17 = vld [vmem:[#allocation15_spill] sm:$0xff]  ;;  %2240 = vmatpush.msra.mxu0 %v1317_v31 }
 0x176   : > { %v8392_v40 = vadd.f32 %v1657_v34, %v8263_v42  ;;  %2066 = vmatmul.f32.gmra.mxu2 %v11918_v9  ;;  %v1300_v31 = vld [vmem:[%s11817_s1 + $0x3a8] sm:$0xff] }
 0x177   : > { %2128 = vmatpush.msra.mxu3 %v1300_v31 }
 0x178   : > { %11917 = vst [vmem:[#allocation9_spill] sm:$0xff] %v8392_v40  ;;  %v11924_v40 = vld [vmem:[#allocation24_spill] sm:$0xff] }
 0x179   : > { %v1796_v1 = vpop.f32.mrf.mxu0  ;;  %v8401_v57 = vpop.f32.mrf.mxu2 }
 0x17a   : > { %1724 = vmatmul.f32.gmra.mxu3 %v7861_v56  ;;  %11920 = vst [vmem:[#allocation18_spill] sm:$0xff] %v8401_v57  ;;  %v6886_v56 = vld [vmem:[%s11817_s1 + $0x4f0] sm:$0xff]  ;;  %v1909_v15 = vpop.f32.mrf.mxu1  ;;  %v11930_v57 = vld [vmem:[#allocation5_spill] sm:$0xff] }
 0x17b   : > { %3490 = vmatpush.msra.mxu1 %v6886_v56  ;;  %v11929_v56 = vld [vmem:[#allocation4_spill] sm:$0xff] }
 0x17c   : > { %1843 = vmatmul.f32.gmra.mxu0 %v11921_v63  ;;  %v1458_v3 = vadd.f32 %v11930_v57, %v11929_v56  ;;  %v11935_v57 = vld [vmem:[#allocation7_spill] sm:$0xff]  ;;  %v11936_v56 = vld [vmem:[#allocation8_spill] sm:$0xff] }
 0x17d   : > { %1956 = vmatmul.f32.gmra.mxu1 %v11922_v17  ;;  %v1660_v42 = vpop.f32.mrf.mxu3  ;;  %v11925_v17 = vld [vmem:[#allocation19_spill] sm:$0xff]  ;;  %v1461_v4 = vadd.f32 %v11936_v56, %v11935_v57 }
 0x17e   : > { %v8406_v34 = vadd.f32 %v1660_v42, %v8279_v49  ;;  %2069 = vmatmul.f32.gmra.mxu2 %v11924_v40  ;;  %v11926_v49 = vld [vmem:[#allocation21_spill] sm:$0xff] }
 0x180   : > { %11923 = vst [vmem:[#allocation14_spill] sm:$0xff] %v8406_v34 }
 0x181   : > { %v1799_v2 = vpop.f32.mrf.mxu0  ;;  %v2022_v63 = vpop.f32.mrf.mxu2 }
 0x182   : > { %1727 = vmatmul.f32.gmra.mxu3 %v7885_v22  ;;  %v1912_v0 = vpop.f32.mrf.mxu1 }
 0x184   : > { %1846 = vmatmul.f32.gmra.mxu0 %v11925_v17  ;;  %v11931_v17 = vld [vmem:[#allocation6_spill] sm:$0xff] }
 0x185   : > { %1959 = vmatmul.f32.gmra.mxu1 %v11926_v49  ;;  %v1663_v42 = vpop.f32.mrf.mxu3  ;;  %v1571_v49 = vadd.f32 %v11931_v17, %v1458_v3  ;;  %v11937_v17 = vld [vmem:[#allocation11_spill] sm:$0xff] }
 0x186   : > { %v8419_v34 = vadd.f32 %v1663_v42, %v8295_v25  ;;  %2072 = vmatmul.f32.gmra.mxu2 %v11928_v6  ;;  %v11933_v25 = vld [vmem:[#allocation27_spill] sm:$0xff] }
 0x188   : > { %11927 = vst [vmem:[#allocation15_spill] sm:$0xff] %v8419_v34 }
 0x189   : > { %v1802_v22 = vpop.f32.mrf.mxu0  ;;  %v2025_v34 = vpop.f32.mrf.mxu2 }
 0x18a   : > { %1730 = vmatmul.f32.gmra.mxu3 %v7914_v14  ;;  %v6885_v14 = vld [vmem:[%s11817_s1 + $0x4e8] sm:$0xff]  ;;  %v1915_v57 = vpop.f32.mrf.mxu1 }
 0x18b   : > { %3491 = vmatpush.msra.mxu1 %v6885_v14  ;;  %v11939_v14 = vld [vmem:[#allocation33_spill] sm:$0xff] }
 0x18c   : > { %1849 = vmatmul.f32.gmra.mxu0 %v11932_v20  ;;  %v1316_v20 = vld [vmem:[%s11817_s1 + $0x428] sm:$0xff] }
 0x18d   : > { %1962 = vmatmul.f32.gmra.mxu1 %v11933_v25  ;;  %v1683_v42 = vpop.f32.mrf.mxu3  ;;  %2241 = vmatpush.msra.mxu0 %v1316_v20 }
 0x18e   : > { %v1684_v7 = vadd.f32 %v1683_v42, %v1571_v49  ;;  %2075 = vmatmul.f32.gmra.mxu2 %v11934_v58  ;;  %v1574_v49 = vadd.f32 %v11937_v17, %v1461_v4  ;;  %v11938_v42 = vld [vmem:[#allocation31_spill] sm:$0xff]  ;;  %v1299_v4 = vld [vmem:[%s11817_s1 + $0x3a0] sm:$0xff] }
 0x18f   : > { %2129 = vmatpush.msra.mxu3 %v1299_v4  ;;  %v1315_v4 = vld [vmem:[%s11817_s1 + $0x420] sm:$0xff] }
 0x190   : > { %v1797_v31 = vadd.f32 %v1796_v1, %v1684_v7  ;;  %v11940_v7 = vld [vmem:[#allocation12_spill] sm:$0xff]  ;;  %2242 = vmatpush.msra.mxu0 %v1315_v4  ;;  %v8480_v4 = vld [vmem:[#allocation2 + $0x122] sm:$0xff] }
 0x191   : > { %v1805_v23 = vpop.f32.mrf.mxu0  ;;  %11951 = vst [vmem:[#allocation19_spill] sm:$0xff] %v8480_v4 }
 0x192   : > { %v1910_v3 = vadd.f32 %v1909_v15, %v1797_v31  ;;  %1733 = vmatmul.f32.gmra.mxu3 %v11918_v9  ;;  %v2028_v15 = vpop.f32.mrf.mxu2  ;;  %v11941_v9 = vld [vmem:[#allocation13_spill] sm:$0xff] }
 0x193   : > { %v1464_v56 = vadd.f32 %v11941_v9, %v11940_v7  ;;  %v11946_v7 = vld [vmem:[#allocation20_spill] sm:$0xff] }
 0x194   : > { %v8442_v25 = vadd.f32 %v2022_v63, %v1910_v3  ;;  %1852 = vmatmul.f32.gmra.mxu0 %v11938_v42  ;;  %v8453_v63 = vld [vmem:[#allocation2 + $0x120] sm:$0xff]  ;;  %v11942_v3 = vld [vmem:[#allocation17_spill] sm:$0xff]  ;;  %v11944_v42 = vld [vmem:[#allocation39_spill] sm:$0xff] }
 0x195   : > { %1965 = vmatmul.f32.gmra.mxu1 %v11939_v14  ;;  %v1686_v46 = vpop.f32.mrf.mxu3 }
 0x196   : > { %v1687_v1 = vadd.f32 %v1686_v46, %v1574_v49  ;;  %2078 = vmatmul.f32.gmra.mxu2 %v8123_v37  ;;  %v1577_v46 = vadd.f32 %v11942_v3, %v1464_v56  ;;  %v11943_v49 = vld [vmem:[#allocation37_spill] sm:$0xff]  ;;  %v8470_v3 = vld [vmem:[#allocation2 + $0x128] sm:$0xff] }
 0x198   : > { %v1800_v31 = vadd.f32 %v1799_v2, %v1687_v1  ;;  %v11945_v1 = vld [vmem:[#allocation16_spill] sm:$0xff] }
 0x199   : > { %v1808_v61 = vpop.f32.mrf.mxu0  ;;  %v1467_v9 = vadd.f32 %v11946_v7, %v11945_v1 }
 0x19a   : > { %v1913_v20 = vadd.f32 %v1912_v0, %v1800_v31  ;;  %1736 = vmatmul.f32.gmra.mxu3 %v11924_v40  ;;  %v6884_v0 = vld [vmem:[%s11817_s1 + $0x4e0] sm:$0xff]  ;;  %v1918_v40 = vpop.f32.mrf.mxu1 }
 0x19b   : > { %3492 = vmatpush.msra.mxu1 %v6884_v0 }
 0x19c   : > { %v8456_v17 = vadd.f32 %v2025_v34, %v1913_v20  ;;  %1855 = vmatmul.f32.gmra.mxu0 %v11943_v49  ;;  %v2031_v34 = vpop.f32.mrf.mxu2 }
 0x19d   : > { %1968 = vmatmul.f32.gmra.mxu1 %v11944_v42  ;;  %v1689_v2 = vpop.f32.mrf.mxu3 }
 0x19e   : > { %v1690_v14 = vadd.f32 %v1689_v2, %v1577_v46  ;;  %2081 = vmatmul.f32.gmra.mxu2 %v8453_v63  ;;  %v11947_v46 = vld [vmem:[#allocation23_spill] sm:$0xff] }
 0x19f   : > { %v1580_v49 = vadd.f32 %v11947_v46, %v1467_v9 }
 0x1a0   : > { %v1803_v56 = vadd.f32 %v1802_v22, %v1690_v14 }
 0x1a1   : > { %v1811_v31 = vpop.f32.mrf.mxu0 }
 0x1a2   : > { %v1916_v20 = vadd.f32 %v1915_v57, %v1803_v56  ;;  %1739 = vmatmul.f32.gmra.mxu3 %v11928_v6  ;;  %v11949_v6 = vld [vmem:[#allocation22_spill] sm:$0xff]  ;;  %v1921_v1 = vpop.f32.mrf.mxu1 }
 0x1a3   : > { %v11950_v57 = vld [vmem:[#allocation26_spill] sm:$0xff] }
 0x1a4   : > { %v8473_v42 = vadd.f32 %v2028_v15, %v1916_v20  ;;  %1858 = vmatmul.f32.gmra.mxu0 %v8125_v59  ;;  %v1470_v14 = vadd.f32 %v11950_v57, %v11949_v6  ;;  %v596_v56 = vld [vmem:[#allocation2 + $0x121] sm:$0xff]  ;;  %v1298_v59 = vld [vmem:[%s11817_s1 + $0x398] sm:$0xff] }
 0x1a5   : > { %1971 = vmatmul.f32.gmra.mxu1 %v8135_v48  ;;  %v1692_v22 = vpop.f32.mrf.mxu3  ;;  %v2034_v48 = vpop.f32.mrf.mxu2  ;;  %v8486_v15 = vld [vmem:[#allocation2 + $0x138] sm:$0xff]  ;;  %2130 = vmatpush.msra.mxu3 %v1298_v59 }
 0x1a6   : > { %11948 = vst [vmem:[#allocation24_spill] sm:$0xff] %v8473_v42  ;;  %v1693_v2 = vadd.f32 %v1692_v22, %v1580_v49  ;;  %2084 = vmatmul.f32.gmra.mxu2 %v8470_v3  ;;  %v11952_v20 = vld [vmem:[#allocation29_spill] sm:$0xff] }
 0x1a7   : > { %v1583_v46 = vadd.f32 %v11952_v20, %v1470_v14  ;;  %v597_v14 = vld [vmem:[#allocation2 + $0x129] sm:$0xff]  ;;  %v8504_v20 = vld [vmem:[#allocation2 + $0x140] sm:$0xff] }
 0x1a8   : > { %v1806_v0 = vadd.f32 %v1805_v23, %v1693_v2  ;;  %v11955_v2 = vld [vmem:[#allocation32_spill] sm:$0xff]  ;;  %v598_v42 = vld [vmem:[#allocation2 + $0x139] sm:$0xff] }
 0x1a9   : > { %v1814_v7 = vpop.f32.mrf.mxu0 }
 0x1aa   : > { %v1919_v9 = vadd.f32 %v1918_v40, %v1806_v0  ;;  %1742 = vmatmul.f32.gmra.mxu3 %v11934_v58  ;;  %v6883_v58 = vld [vmem:[%s11817_s1 + $0x4d8] sm:$0xff]  ;;  %v11954_v40 = vld [vmem:[#allocation28_spill] sm:$0xff]  ;;  %v1924_v59 = vpop.f32.mrf.mxu1 }
 0x1ab   : > { %3493 = vmatpush.msra.mxu1 %v6883_v58  ;;  %v1473_v6 = vadd.f32 %v11955_v2, %v11954_v40  ;;  %v11958_v40 = vld [vmem:[#allocation38_spill] sm:$0xff] }
 0x1ac   : > { %v8489_v49 = vadd.f32 %v2031_v34, %v1919_v9  ;;  %1861 = vmatmul.f32.gmra.mxu0 %v596_v56  ;;  %v8498_v34 = vld [vmem:[#allocation2 + $0x12a] sm:$0xff]  ;;  %v1314_v9 = vld [vmem:[%s11817_s1 + $0x418] sm:$0xff] }
 0x1ad   : > { %1974 = vmatmul.f32.gmra.mxu1 %v8480_v4  ;;  %v1695_v23 = vpop.f32.mrf.mxu3  ;;  %2243 = vmatpush.msra.mxu0 %v1314_v9  ;;  %v8513_v4 = vld [vmem:[#allocation2 + $0x13a] sm:$0xff] }
 0x1ae   : > { %11953 = vst [vmem:[#allocation21_spill] sm:$0xff] %v8489_v49  ;;  %v1696_v22 = vadd.f32 %v1695_v23, %v1583_v46  ;;  %2087 = vmatmul.f32.gmra.mxu2 %v8486_v15  ;;  %v11956_v46 = vld [vmem:[#allocation35_spill] sm:$0xff] }
 0x1af   : > { %v1586_v23 = vadd.f32 %v11956_v46, %v1473_v6  ;;  %v8519_v6 = vld [vmem:[#allocation2 + $0x150] sm:$0xff] }
 0x1b0   : > { %v1809_v57 = vadd.f32 %v1808_v61, %v1696_v22  ;;  %v2037_v22 = vpop.f32.mrf.mxu2 }
 0x1b1   : > { %v1817_v0 = vpop.f32.mrf.mxu0 }
 0x1b2   : > { %v1922_v56 = vadd.f32 %v1921_v1, %v1809_v57  ;;  %1745 = vmatmul.f32.gmra.mxu3 %v8123_v37  ;;  %v11957_v37 = vld [vmem:[#allocation34_spill] sm:$0xff] }
 0x1b3   : > { %v1476_v2 = vadd.f32 %v11958_v40, %v11957_v37  ;;  %v11961_v37 = vld [vmem:[#allocation42_spill] sm:$0xff] }
 0x1b4   : > { %v8507_v58 = vadd.f32 %v2034_v48, %v1922_v56  ;;  %1864 = vmatmul.f32.gmra.mxu0 %v597_v14  ;;  %v1297_v48 = vld [vmem:[%s11817_s1 + $0x390] sm:$0xff]  ;;  %v11959_v14 = vld [vmem:[#allocation41_spill] sm:$0xff] }
 0x1b5   : > { %1977 = vmatmul.f32.gmra.mxu1 %v8498_v34  ;;  %v1698_v61 = vpop.f32.mrf.mxu3  ;;  %2131 = vmatpush.msra.mxu3 %v1297_v48  ;;  %v1589_v56 = vadd.f32 %v11959_v14, %v1476_v2  ;;  %v1313_v48 = vld [vmem:[%s11817_s1 + $0x410] sm:$0xff]  ;;  %v8537_v14 = vld [vmem:[#allocation2 + $0x158] sm:$0xff] }
 0x1b6   : > { %v1699_v1 = vadd.f32 %v1698_v61, %v1586_v23  ;;  %2090 = vmatmul.f32.gmra.mxu2 %v8504_v20  ;;  %v1927_v23 = vpop.f32.mrf.mxu1  ;;  %2244 = vmatpush.msra.mxu0 %v1313_v48 }
 0x1b8   : > { %v1812_v57 = vadd.f32 %v1811_v31, %v1699_v1  ;;  %v11960_v1 = vld [vmem:[#allocation40_spill] sm:$0xff] }
 0x1b9   : > { %v1820_v49 = vpop.f32.mrf.mxu0  ;;  %v1479_v40 = vadd.f32 %v11961_v37, %v11960_v1 }
 0x1ba   : > { %v1925_v9 = vadd.f32 %v1924_v59, %v1812_v57  ;;  %1748 = vmatmul.f32.gmra.mxu3 %v8453_v63  ;;  %v6882_v63 = vld [vmem:[%s11817_s1 + $0x4d0] sm:$0xff]  ;;  %v2040_v59 = vpop.f32.mrf.mxu2  ;;  %v8531_v57 = vld [vmem:[#allocation2 + $0x142] sm:$0xff] }
 0x1bb   : > { %3494 = vmatpush.msra.mxu1 %v6882_v63  ;;  %v11962_v63 = vld [vmem:[#allocation43_spill] sm:$0xff] }
 0x1bc   : > { %v8522_v46 = vadd.f32 %v2037_v22, %v1925_v9  ;;  %1867 = vmatmul.f32.gmra.mxu0 %v598_v42  ;;  %v599_v42 = vld [vmem:[#allocation2 + $0x141] sm:$0xff]  ;;  %v1482_v1 = vadd.f32 %v8146_v36, %v11962_v63 }
 0x1bd   : > { %1980 = vmatmul.f32.gmra.mxu1 %v8513_v4  ;;  %v1701_v31 = vpop.f32.mrf.mxu3 }
 0x1be   : > { %v1702_v61 = vadd.f32 %v1701_v31, %v1589_v56  ;;  %2093 = vmatmul.f32.gmra.mxu2 %v8519_v6  ;;  %v1592_v56 = vadd.f32 %v8144_v26, %v1479_v40  ;;  %v600_v26 = vld [vmem:[#allocation2 + $0x151] sm:$0xff]  ;;  %v1595_v36 = vadd.f32 %v8158_v13, %v1482_v1  ;;  %v601_v1 = vld [vmem:[#allocation2 + $0x159] sm:$0xff] }
 0x1c0   : > { %v1815_v2 = vadd.f32 %v1814_v7, %v1702_v61 }
 0x1c1   : > { %v1823_v22 = vpop.f32.mrf.mxu0 }
 0x1c2   : > { %v1928_v9 = vadd.f32 %v1927_v23, %v1815_v2  ;;  %1751 = vmatmul.f32.gmra.mxu3 %v8470_v3  ;;  %v1930_v23 = vpop.f32.mrf.mxu1  ;;  %v282_v3 = vld [vmem:[%s7603_s25 + $0xf0] sm:$0xff]  ;;  %v2043_v2 = vpop.f32.mrf.mxu2 }
 0x1c3   : > { %316 = vst.msk [vmem:[#allocation2 + $0x181] sm:$0xff] %vm285_vm0, %v282_v3 }
 0x1c4   : > { %v8540_v31 = vadd.f32 %v2040_v59, %v1928_v9  ;;  %1870 = vmatmul.f32.gmra.mxu0 %v599_v42  ;;  %v8548_v59 = vld [vmem:[#allocation2 + $0x152] sm:$0xff]  ;;  %v1296_v42 = vld [vmem:[%s11817_s1 + $0x388] sm:$0xff] }
 0x1c5   : > { %1983 = vmatmul.f32.gmra.mxu1 %v8531_v57  ;;  %v1704_v7 = vpop.f32.mrf.mxu3  ;;  %v8554_v9 = vld [vmem:[#allocation2 + $0x168] sm:$0xff]  ;;  %2132 = vmatpush.msra.mxu3 %v1296_v42  ;;  %v11964_v42 = vld [vmem:[#allocation45_spill] sm:$0xff] }
 0x1c6   : > { %v1705_v61 = vadd.f32 %v1704_v7, %v1592_v56  ;;  %2096 = vmatmul.f32.gmra.mxu2 %v8537_v14 }
 0x1c8   : > { %v1818_v37 = vadd.f32 %v1817_v0, %v1705_v61  ;;  %v283_v61 = vld [vmem:[%s7603_s25 + $0xf8] sm:$0xff] }
 0x1c9   : > { %v1826_v48 = vpop.f32.mrf.mxu0  ;;  %317 = vst.msk [vmem:[#allocation2 + $0x189] sm:$0xff] %vm285_vm0, %v283_v61  ;;  %v8582_v61 = vld [vmem:[#allocation2 + $0x16a] sm:$0xff] }
 0x1ca   : > { %v1931_v40 = vadd.f32 %v1930_v23, %v1818_v37  ;;  %1754 = vmatmul.f32.gmra.mxu3 %v8486_v15  ;;  %v6881_v15 = vld [vmem:[%s11817_s1 + $0x4c8] sm:$0xff]  ;;  %v11963_v23 = vld [vmem:[#allocation44_spill] sm:$0xff]  ;;  %v8570_v37 = vld [vmem:[#allocation2 + $0x15a] sm:$0xff] }
 0x1cb   : > { %3495 = vmatpush.msra.mxu1 %v6881_v15  ;;  %v1485_v3 = vadd.f32 %v8160_v29, %v11963_v23  ;;  %v602_v15 = vld [vmem:[#allocation2 + $0x169] sm:$0xff]  ;;  %v731_v23 = vld [vmem:[#allocation2 + $0x180] sm:$0xff] }
 0x1cc   : > { %v8557_v0 = vadd.f32 %v2043_v2, %v1931_v40  ;;  %1873 = vmatmul.f32.gmra.mxu0 %v600_v26  ;;  %v1312_v2 = vld [vmem:[%s11817_s1 + $0x408] sm:$0xff]  ;;  %v730_v26 = vld [vmem:[#allocation2 + $0x170] sm:$0xff] }
 0x1cd   : > { %1986 = vmatmul.f32.gmra.mxu1 %v8548_v59  ;;  %v1707_v56 = vpop.f32.mrf.mxu3  ;;  %2245 = vmatpush.msra.mxu0 %v1312_v2  ;;  %v1598_v40 = vadd.f32 %v8172_v60, %v1485_v3  ;;  %v1295_v60 = vld [vmem:[%s11817_s1 + $0x380] sm:$0xff] }
 0x1ce   : > { %v1708_v7 = vadd.f32 %v1707_v56, %v1595_v36  ;;  %2099 = vmatmul.f32.gmra.mxu2 %v8554_v9  ;;  %v11965_v36 = vld [vmem:[#allocation46_spill] sm:$0xff]  ;;  %2133 = vmatpush.msra.mxu3 %v1295_v60 }
 0x1cf   : > { %v1488_v56 = vadd.f32 %v11965_v36, %v11964_v42  ;;  %v6880_v2 = vld [vmem:[%s11817_s1 + $0x4c0] sm:$0xff]  ;;  %v8597_v42 = vld [vmem:[#allocation2 + $0x172] sm:$0xff] }
 0x1d0   : > { %v8567_v63 = vadd.f32 %v1820_v49, %v1708_v7  ;;  %3496 = vmatpush.msra.mxu1 %v6880_v2  ;;  %v732_v36 = vld [vmem:[#allocation2 + $0x188] sm:$0xff]  ;;  %v8614_v2 = vld [vmem:[#allocation2] sm:$0xff] }
 0x1d1   : > { %v1829_v13 = vpop.f32.mrf.mxu0  ;;  %v1601_v3 = vadd.f32 %v8188_v5, %v1488_v56  ;;  %v1311_v5 = vld [vmem:[%s11817_s1 + $0x400] sm:$0xff] }
 0x1d2   : > { %1757 = vmatmul.f32.gmra.mxu3 %v8504_v20  ;;  %2246 = vmatpush.msra.mxu0 %v1311_v5  ;;  %v604_v60 = vld [vmem:[#allocation2 + $0x181] sm:$0xff] }
 0x1d4   : > { %1876 = vmatmul.f32.gmra.mxu0 %v601_v1 }
 0x1d5   : > { %1989 = vmatmul.f32.gmra.mxu1 %v8570_v37  ;;  %v1710_v29 = vpop.f32.mrf.mxu3 }
 0x1d6   : > { %v1711_v49 = vadd.f32 %v1710_v29, %v1598_v40  ;;  %2102 = vmatmul.f32.gmra.mxu2 %v730_v26 }
 0x1d8   : > { %v8580_v7 = vadd.f32 %v1823_v22, %v1711_v49  ;;  %v603_v49 = vld [vmem:[#allocation2 + $0x171] sm:$0xff] }
 0x1d9   : > { %v1832_v20 = vpop.f32.mrf.mxu0 }
 0x1da   : > { %1760 = vmatmul.f32.gmra.mxu3 %v8519_v6  ;;  %v1491_v6 = vadd.f32 %v8191_v45, %v8186_v8 }
 0x1dc   : > { %1879 = vmatmul.f32.gmra.mxu0 %v602_v15  ;;  %v1604_v56 = vadd.f32 %v8204_v11, %v1491_v6  ;;  %v605_v6 = vld [vmem:[#allocation2 + $0x189] sm:$0xff] }
 0x1dd   : > { %1992 = vmatmul.f32.gmra.mxu1 %v8582_v61  ;;  %v1713_v1 = vpop.f32.mrf.mxu3 }
 0x1de   : > { %v1714_v22 = vadd.f32 %v1713_v1, %v1601_v3  ;;  %2105 = vmatmul.f32.gmra.mxu2 %v731_v23  ;;  %v8609_v3 = vld [vmem:[#allocation2 + $0x182] sm:$0xff] }
 0x1e0   : > { %v8595_v40 = vadd.f32 %v1826_v48, %v1714_v22  ;;  %v1494_v48 = vadd.f32 %v8207_v12, %v8202_v53  ;;  %v6903_v53 = vld [vmem:[%s11817_s1 + $0x578] sm:$0xff] }
 0x1e1   : > { %v1835_v29 = vpop.f32.mrf.mxu0  ;;  %v6879_v12 = vld [vmem:[%s11817_s1 + $0x4b8] sm:$0xff]  ;;  %3602 = vmatpush.msra.mxu2 %v6903_v53 }
 0x1e2   : > { %1763 = vmatmul.f32.gmra.mxu3 %v8537_v14  ;;  %v1607_v1 = vadd.f32 %v8220_v18, %v1494_v48  ;;  %3497 = vmatpush.msra.mxu1 %v6879_v12  ;;  %v1497_v18 = vadd.f32 %v8223_v21, %v8218_v10  ;;  %v767_v53 = vld [vmem:[#allocation2 + $0x31] sm:$0xff]  ;;  %v1506_v12 = vadd.f32 %v8271_v35, %v8266_v33 }
 0x1e3   : > { %v1509_v33 = vadd.f32 %v8287_v41, %v8282_v39  ;;  %v835_v39 = vld [vmem:[#allocation2 + $0x62] sm:$0xff]  ;;  %v8670_v41 = vpop.f32.mrf.mxu1 }
 0x1e4   : > { %1882 = vmatmul.f32.gmra.mxu0 %v603_v49  ;;  %v8627_v49 = vld [vmem:[#allocation2 + $0x18a] sm:$0xff]  ;;  %v1610_v5 = vadd.f32 %v8236_v16, %v1497_v18 }
 0x1e5   : > { %1995 = vmatmul.f32.gmra.mxu1 %v8597_v42  ;;  %v1716_v8 = vpop.f32.mrf.mxu3 }
 0x1e6   : > { %v1717_v45 = vadd.f32 %v1716_v8, %v1604_v56  ;;  %2108 = vmatmul.f32.gmra.mxu2 %v732_v36 }
 0x1e8   : > { %v8607_v15 = vadd.f32 %v1829_v13, %v1717_v45  ;;  %v1500_v45 = vadd.f32 %v8239_v24, %v8234_v19  ;;  %v1503_v19 = vadd.f32 %v8255_v30, %v8250_v28  ;;  %v1619_v28 = vadd.f32 %v8284_v38, %v1506_v12 }
 0x1e9   : > { %v1838_v14 = vpop.f32.mrf.mxu0 }
 0x1ea   : > { %1766 = vmatmul.f32.gmra.mxu3 %v8554_v9  ;;  %v1613_v48 = vadd.f32 %v8252_v27, %v1500_v45  ;;  %v832_v27 = vld [vmem:[#allocation2 + $0x3a] sm:$0xff] }
 0x1eb   : > { %v8686_v12 = vpop.f32.mrf.mxu1 }
 0x1ec   : > { %1885 = vmatmul.f32.gmra.mxu0 %v604_v60  ;;  %v6902_v60 = vld [vmem:[%s11817_s1 + $0x570] sm:$0xff] }
 0x1ed   : > { %1998 = vmatmul.f32.gmra.mxu1 %v8609_v3  ;;  %v1719_v11 = vpop.f32.mrf.mxu3  ;;  %3603 = vmatpush.msra.mxu2 %v6902_v60  ;;  %v8668_v60 = vpop.f32.mrf.mxu2 }
 0x1ee   : > { %v1720_v22 = vadd.f32 %v1719_v11, %v1607_v1  ;;  %2111 = vmatmul.f32.gmra.mxu2 %v8614_v2  ;;  %v6878_v1 = vld [vmem:[%s11817_s1 + $0x4b0] sm:$0xff] }
 0x1ef   : > { %3498 = vmatpush.msra.mxu1 %v6878_v1 }
 0x1f0   : > { %v8625_v9 = vadd.f32 %v1832_v20, %v1720_v22  ;;  %v831_v20 = vld [vmem:[#allocation2 + $0x32] sm:$0xff] }
 0x1f1   : > { %v1841_v13 = vpop.f32.mrf.mxu0 }
 0x1f2   : > { %1769 = vmatmul.f32.gmra.mxu3 %v730_v26 }
 0x1f4   : > { %1888 = vmatmul.f32.gmra.mxu0 %v605_v6 }
 0x1f5   : > { %2001 = vmatmul.f32.gmra.mxu1 %v8627_v49  ;;  %v1722_v56 = vpop.f32.mrf.mxu3 }
 0x1f6   : > { %v1723_v8 = vadd.f32 %v1722_v56, %v1610_v5  ;;  %2114 = vmatmul.f32.gmra.mxu2 %v8614_v2  ;;  %v833_v5 = vld [vmem:[#allocation2 + $0x4a] sm:$0xff]  ;;  %v768_v56 = vld [vmem:[#allocation2 + $0x39] sm:$0xff] }
 0x1f8   : > { %v8634_v10 = vadd.f32 %v1835_v29, %v1723_v8  ;;  %v1616_v29 = vadd.f32 %v8268_v32, %v1503_v19  ;;  %v6901_v32 = vld [vmem:[%s11817_s1 + $0x568] sm:$0xff]  ;;  %v1622_v8 = vadd.f32 %v8300_v43, %v1509_v33 }
 0x1f9   : > { %v1844_v21 = vpop.f32.mrf.mxu0  ;;  %3604 = vmatpush.msra.mxu2 %v6901_v32 }
 0x1fa   : > { %1772 = vmatmul.f32.gmra.mxu3 %v731_v23 }
 0x1fc   : > { %2247 = vmatmul.f32.vlgmr.msra.gmra.mxu0 %v831_v20 }
 0x1fd   : > { %v1725_v26 = vpop.f32.mrf.mxu3 }
 0x1fe   : > { %v1726_v16 = vadd.f32 %v1725_v26, %v1613_v48  ;;  %v769_v48 = vld [vmem:[#allocation2 + $0x49] sm:$0xff]  ;;  %v1512_v26 = vadd.f32 %v8303_v47, %v8298_v44  ;;  %v6876_v44 = vld [vmem:[%s11817_s1 + $0x4a0] sm:$0xff]  ;;  %v770_v47 = vld [vmem:[#allocation2 + $0x51] sm:$0xff] }
 0x200   : > { %v8645_v24 = vadd.f32 %v1838_v14, %v1726_v16 }
 0x201   : > { %v1847_v23 = vpop.f32.mrf.mxu0 }
 0x202   : > { %1775 = vmatmul.f32.gmra.mxu3 %v732_v36  ;;  %v6877_v36 = vld [vmem:[%s11817_s1 + $0x4a8] sm:$0xff] }
 0x203   : > { %3499 = vmatpush.msra.mxu1 %v6877_v36 }
 0x204   : > { %2250 = vmatmul.f32.gmra.mxu0 %v832_v27  ;;  %v6900_v27 = vld [vmem:[%s11817_s1 + $0x560] sm:$0xff] }
 0x205   : > { %v1728_v11 = vpop.f32.mrf.mxu3  ;;  %3605 = vmatpush.msra.mxu2 %v6900_v27  ;;  %3500 = vmatpush.msra.mxu1 %v6876_v44 }
 0x206   : > { %v1729_v22 = vadd.f32 %v1728_v11, %v1616_v29  ;;  %v836_v11 = vld [vmem:[#allocation2 + $0x6a] sm:$0xff] }
 0x208   : > { %v8650_v18 = vadd.f32 %v1841_v13, %v1729_v22  ;;  %v834_v13 = vld [vmem:[#allocation2 + $0x52] sm:$0xff]  ;;  %v8683_v22 = vpop.f32.mrf.mxu2 }
 0x209   : > { %v1850_v6 = vpop.f32.mrf.mxu0 }
 0x20a   : > { %2134 = vmatmul.f32.vlgmr.msra.gmra.mxu3 %v767_v53 }
 0x20c   : > { %2253 = vmatmul.f32.gmra.mxu0 %v833_v5 }
 0x20d   : > { %v1731_v30 = vpop.f32.mrf.mxu3 }
 0x20e   : > { %v1732_v14 = vadd.f32 %v1731_v30, %v1619_v28  ;;  %v771_v30 = vld [vmem:[#allocation2 + $0x61] sm:$0xff] }
 0x210   : > { %v8661_v35 = vadd.f32 %v1844_v21, %v1732_v14  ;;  %v1625_v21 = vadd.f32 %v8316_v50, %v1512_v26  ;;  %v1518_v14 = vadd.f32 %v8338_v62, %v8330_v55  ;;  %v6875_v55 = vld [vmem:[%s11817_s1 + $0x498] sm:$0xff]  ;;  %v8701_v62 = vpop.f32.mrf.mxu1 }
 0x211   : > { %v1853_v38 = vpop.f32.mrf.mxu0  ;;  %3501 = vmatpush.msra.mxu1 %v6875_v55  ;;  %v11977_v55 = vld [vmem:[#allocation10_spill] sm:$0xff] }
 0x212   : > { %2137 = vmatmul.f32.gmra.mxu3 %v768_v56  ;;  %v8693_v56 = vpop.f32.mrf.mxu2 }
 0x214   : > { %2256 = vmatmul.f32.gmra.mxu0 %v834_v13  ;;  %v6899_v13 = vld [vmem:[%s11817_s1 + $0x558] sm:$0xff] }
 0x215   : > { %v1734_v45 = vpop.f32.mrf.mxu3  ;;  %3606 = vmatpush.msra.mxu2 %v6899_v13  ;;  %v11976_v13 = vld [vmem:[#allocation58_spill] sm:$0xff] }
 0x216   : > { %v1735_v20 = vadd.f32 %v1734_v45, %v1622_v8  ;;  %v11968_v8 = vld [vmem:[#allocation50_spill] sm:$0xff]  ;;  %v11969_v45 = vld [vmem:[#allocation52_spill] sm:$0xff] }
 0x218   : > { %v8666_v16 = vadd.f32 %v1847_v23, %v1735_v20  ;;  %v1515_v23 = vadd.f32 %v8319_v52, %v8314_v51  ;;  %v837_v52 = vld [vmem:[#allocation2 + $0x7a] sm:$0xff]  ;;  %v1521_v20 = vadd.f32 %v11969_v45, %v11968_v8 }
 0x219   : > { %v1856_v1 = vpop.f32.mrf.mxu0 }
 0x21a   : > { %2140 = vmatmul.f32.gmra.mxu3 %v769_v48  ;;  %v1628_v53 = vadd.f32 %v8332_v54, %v1515_v23  ;;  %v8708_v44 = vpop.f32.mrf.mxu2  ;;  %v11972_v23 = vld [vmem:[#allocation54_spill] sm:$0xff] }
 0x21c   : > { %2259 = vmatmul.f32.gmra.mxu0 %v835_v39  ;;  %v838_v39 = vld [vmem:[#allocation2 + $0x82] sm:$0xff] }
 0x21d   : > { %v1737_v43 = vpop.f32.mrf.mxu3 }
 0x21e   : > { %v1738_v19 = vadd.f32 %v1737_v43, %v1625_v21  ;;  %v11971_v21 = vld [vmem:[#allocation55_spill] sm:$0xff] }
 0x21f   : > { %v1634_v43 = vadd.f32 %v11971_v21, %v1521_v20 }
 0x220   : > { %v8681_v29 = vadd.f32 %v1850_v6, %v1738_v19  ;;  %v11967_v6 = vld [vmem:[#allocation51_spill] sm:$0xff] }
 0x221   : > { %v1859_v50 = vpop.f32.mrf.mxu0  ;;  %v1631_v36 = vadd.f32 %v11967_v6, %v1518_v14  ;;  %v11975_v14 = vld [vmem:[#allocation59_spill] sm:$0xff] }
 0x222   : > { %2143 = vmatmul.f32.gmra.mxu3 %v770_v47  ;;  %v773_v47 = vld [vmem:[#allocation2 + $0x79] sm:$0xff]  ;;  %v8727_v45 = vpop.f32.mrf.mxu2 }
 0x224   : > { %2262 = vmatmul.f32.gmra.mxu0 %v836_v11  ;;  %v11973_v11 = vld [vmem:[#allocation57_spill] sm:$0xff] }
 0x225   : > { %v1740_v5 = vpop.f32.mrf.mxu3 }
 0x226   : > { %v1741_v28 = vadd.f32 %v1740_v5, %v1628_v53  ;;  %v1524_v53 = vadd.f32 %v11973_v11, %v11972_v23  ;;  %v775_v23 = vld [vmem:[#allocation2 + $0x91] sm:$0xff] }
 0x228   : > { %v8690_v32 = vadd.f32 %v1853_v38, %v1741_v28  ;;  %v772_v38 = vld [vmem:[#allocation2 + $0x69] sm:$0xff]  ;;  %v8714_v28 = vpop.f32.mrf.mxu1 }
 0x229   : > { %v1862_v51 = vpop.f32.mrf.mxu0 }
 0x22a   : > { %11966 = vst [vmem:[#allocation30_spill] sm:$0xff] %v8690_v32  ;;  %2146 = vmatmul.f32.gmra.mxu3 %v771_v30  ;;  %v839_v30 = vld [vmem:[#allocation2 + $0x92] sm:$0xff]  ;;  %v785_v32 = vld [vmem:[#allocation2 + $0x109] sm:$0xff] }
 0x22c   : > { %2265 = vmatmul.f32.gmra.mxu0 %v837_v52  ;;  %v1637_v52 = vadd.f32 %v11975_v14, %v1524_v53 }
 0x22d   : > { %v1743_v54 = vpop.f32.mrf.mxu3 }
 0x22e   : > { %v1744_v33 = vadd.f32 %v1743_v54, %v1631_v36  ;;  %v6898_v54 = vld [vmem:[%s11817_s1 + $0x550] sm:$0xff] }
 0x22f   : > { %3607 = vmatpush.msra.mxu2 %v6898_v54  ;;  %v6897_v54 = vld [vmem:[%s11817_s1 + $0x548] sm:$0xff] }
 0x230   : > { %v8705_v48 = vadd.f32 %v1856_v1, %v1744_v33  ;;  %v6874_v33 = vld [vmem:[%s11817_s1 + $0x490] sm:$0xff]  ;;  %v8729_v21 = vpop.f32.mrf.mxu1 }
 0x231   : > { %v1865_v26 = vpop.f32.mrf.mxu0  ;;  %3502 = vmatpush.msra.mxu1 %v6874_v33  ;;  %v776_v33 = vld [vmem:[#allocation2 + $0x99] sm:$0xff]  ;;  %3608 = vmatpush.msra.mxu2 %v6897_v54  ;;  %v6893_v54 = vld [vmem:[%s11817_s1 + $0x528] sm:$0xff] }
 0x232   : > { %11970 = vst [vmem:[#allocation4_spill] sm:$0xff] %v8705_v48  ;;  %2149 = vmatmul.f32.gmra.mxu3 %v772_v38  ;;  %v1527_v38 = vadd.f32 %v11977_v55, %v11976_v13  ;;  %v842_v55 = vld [vmem:[#allocation2 + $0xb2] sm:$0xff]  ;;  %v848_v48 = vld [vmem:[#allocation2 + $0xfa] sm:$0xff] }
 0x234   : > { %2268 = vmatmul.f32.gmra.mxu0 %v838_v39  ;;  %v840_v39 = vld [vmem:[#allocation2 + $0x9a] sm:$0xff] }
 0x235   : > { %v1746_v19 = vpop.f32.mrf.mxu3 }
 0x236   : > { %v1747_v27 = vadd.f32 %v1746_v19, %v1634_v43  ;;  %v11979_v43 = vld [vmem:[#allocation18_spill] sm:$0xff] }
 0x237   : > { %v1640_v19 = vadd.f32 %v11979_v43, %v1527_v38  ;;  %v11983_v43 = vld [vmem:[#allocation48_spill] sm:$0xff] }
 0x238   : > { %v8712_v5 = vadd.f32 %v1859_v50, %v1747_v27  ;;  %v774_v50 = vld [vmem:[#allocation2 + $0x81] sm:$0xff]  ;;  %v8736_v14 = vpop.f32.mrf.mxu1 }
 0x239   : > { %v1868_v1 = vpop.f32.mrf.mxu0 }
 0x23a   : > { %11974 = vst [vmem:[#allocation5_spill] sm:$0xff] %v8712_v5  ;;  %2152 = vmatmul.f32.gmra.mxu3 %v773_v47 }
 0x23c   : > { %2271 = vmatmul.f32.gmra.mxu0 %v839_v30  ;;  %v841_v30 = vld [vmem:[#allocation2 + $0xaa] sm:$0xff] }
 0x23d   : > { %v1749_v6 = vpop.f32.mrf.mxu3 }
 0x23e   : > { %v1750_v36 = vadd.f32 %v1749_v6, %v1637_v52  ;;  %v11981_v6 = vld [vmem:[#allocation47_spill] sm:$0xff] }
 0x240   : > { %v8725_v8 = vadd.f32 %v1862_v51, %v1750_v36  ;;  %v8734_v51 = vpop.f32.mrf.mxu2 }
 0x241   : > { %v1871_v20 = vpop.f32.mrf.mxu0 }
 0x242   : > { %11978 = vst [vmem:[#allocation6_spill] sm:$0xff] %v8725_v8  ;;  %2155 = vmatmul.f32.gmra.mxu3 %v774_v50 }
 0x244   : > { %2274 = vmatmul.f32.gmra.mxu0 %v840_v39 }
 0x245   : > { %v1752_v27 = vpop.f32.mrf.mxu3 }
 0x246   : > { %v1753_v47 = vadd.f32 %v1752_v27, %v1640_v19  ;;  %v6896_v27 = vld [vmem:[%s11817_s1 + $0x540] sm:$0xff] }
 0x247   : > { %3609 = vmatpush.msra.mxu2 %v6896_v27 }
 0x248   : > { %v8732_v11 = vadd.f32 %v1865_v26, %v1753_v47  ;;  %v6873_v26 = vld [vmem:[%s11817_s1 + $0x488] sm:$0xff]  ;;  %v8747_v38 = vpop.f32.mrf.mxu2  ;;  %v8753_v47 = vpop.f32.mrf.mxu1 }
 0x249   : > { %v1874_v53 = vpop.f32.mrf.mxu0  ;;  %3503 = vmatpush.msra.mxu1 %v6873_v26  ;;  %v11985_v26 = vld [vmem:[#allocation49_spill] sm:$0xff] }
 0x24a   : > { %11980 = vst [vmem:[#allocation25_spill] sm:$0xff] %v8732_v11  ;;  %2158 = vmatmul.f32.gmra.mxu3 %v775_v23  ;;  %v777_v23 = vld [vmem:[#allocation2 + $0xa9] sm:$0xff] }
 0x24b   : > { %v780_v11 = vld [vmem:[#allocation2 + $0xc9] sm:$0xff] }
 0x24c   : > { %2277 = vmatmul.f32.gmra.mxu0 %v841_v30 }
 0x24d   : > { %v1755_v52 = vpop.f32.mrf.mxu3 }
 0x24e   : > { %v1756_v36 = vadd.f32 %v1755_v52, %v11981_v6  ;;  %v843_v6 = vld [vmem:[#allocation2 + $0xc2] sm:$0xff] }
 0x250   : > { %v8745_v50 = vadd.f32 %v1868_v1, %v1756_v36  ;;  %v6895_v1 = vld [vmem:[%s11817_s1 + $0x538] sm:$0xff]  ;;  %v6894_v36 = vld [vmem:[%s11817_s1 + $0x530] sm:$0xff] }
 0x251   : > { %v1877_v13 = vpop.f32.mrf.mxu0  ;;  %3610 = vmatpush.msra.mxu2 %v6895_v1  ;;  %v8781_v1 = vpop.f32.mrf.mxu1 }
 0x252   : > { %11982 = vst [vmem:[#allocation27_spill] sm:$0xff] %v8745_v50  ;;  %2161 = vmatmul.f32.gmra.mxu3 %v776_v33 }
 0x253   : > { %3611 = vmatpush.msra.mxu2 %v6894_v36  ;;  %v844_v36 = vld [vmem:[#allocation2 + $0xca] sm:$0xff] }
 0x254   : > { %2280 = vmatmul.f32.gmra.mxu0 %v842_v55  ;;  %v6872_v55 = vld [vmem:[%s11817_s1 + $0x480] sm:$0xff] }
 0x255   : > { %v1758_v39 = vpop.f32.mrf.mxu3  ;;  %3612 = vmatpush.msra.mxu2 %v6893_v54  ;;  %3504 = vmatpush.msra.mxu1 %v6872_v55  ;;  %v6890_v54 = vld [vmem:[%s11817_s1 + $0x510] sm:$0xff]  ;;  %v6919_v55 = vld [vmem:[%s11817_s1 + $0x5f8] sm:$0xff] }
 0x256   : > { %v1759_v19 = vadd.f32 %v1758_v39, %v11983_v43  ;;  %v6892_v39 = vld [vmem:[%s11817_s1 + $0x520] sm:$0xff]  ;;  %v8773_v43 = vpop.f32.mrf.mxu2  ;;  %3505 = vmatmul.f32.vlgmr.msra.gmra.mxu1 %v8614_v2  ;;  %3715 = vmatpush.msrb.mxu3 %v6919_v55  ;;  %v2545_v55 = vld [vmem:[#allocation2 + $0x9] sm:$0xff] }
 0x257   : > { %3613 = vmatpush.msra.mxu2 %v6892_v39  ;;  %v6888_v39 = vld [vmem:[%s11817_s1 + $0x500] sm:$0xff] }
 0x258   : > { %v8755_v30 = vadd.f32 %v1871_v20, %v1759_v19  ;;  %v778_v19 = vld [vmem:[#allocation2 + $0xb1] sm:$0xff] }
 0x259   : > { %v1880_v52 = vpop.f32.mrf.mxu0 }
 0x25a   : > { %11984 = vst [vmem:[#allocation36_spill] sm:$0xff] %v8755_v30  ;;  %2164 = vmatmul.f32.gmra.mxu3 %v777_v23  ;;  %v6891_v23 = vld [vmem:[%s11817_s1 + $0x518] sm:$0xff]  ;;  %v11989_v30 = vld [vmem:[#allocation56_spill] sm:$0xff] }
 0x25b   : > { %3614 = vmatpush.msra.mxu2 %v6891_v23  ;;  %v2544_v23 = vld [vmem:[#allocation2 + $0x1] sm:$0xff] }
 0x25c   : > { %2283 = vmatmul.f32.gmra.mxu0 %v843_v6 }
 0x25d   : > { %v1761_v20 = vpop.f32.mrf.mxu3  ;;  %3615 = vmatpush.msra.mxu2 %v6890_v54 }
 0x25e   : > { %v1762_v33 = vadd.f32 %v1761_v20, %v11985_v26  ;;  %v11987_v26 = vld [vmem:[#allocation53_spill] sm:$0xff]  ;;  %3508 = vmatmul.f32.gmra.mxu1 %v8614_v2  ;;  %v8799_v54 = vpop.f32.mrf.mxu2 }
 0x260   : > { %v8775_v27 = vadd.f32 %v1874_v53, %v1762_v33  ;;  %v6889_v53 = vld [vmem:[%s11817_s1 + $0x508] sm:$0xff] }
 0x261   : > { %v1883_v6 = vpop.f32.mrf.mxu0  ;;  %3616 = vmatpush.msra.mxu2 %v6889_v53 }
 0x262   : > { %11986 = vst [vmem:[#allocation7_spill] sm:$0xff] %v8775_v27  ;;  %2167 = vmatmul.f32.gmra.mxu3 %v778_v19  ;;  %v779_v19 = vld [vmem:[#allocation2 + $0xc1] sm:$0xff] }
 0x263   : > { %3617 = vmatpush.msra.mxu2 %v6888_v39 }
 0x264   : > { %2286 = vmatmul.f32.gmra.mxu0 %v844_v36  ;;  %3618 = vmatmul.f32.vlgmr.msra.gmra.mxu2 %v2544_v23 }
 0x265   : > { %v1764_v20 = vpop.f32.mrf.mxu3 }
 0x266   : > { %v1765_v33 = vadd.f32 %v1764_v20, %v11987_v26  ;;  %v845_v20 = vld [vmem:[#allocation2 + $0xda] sm:$0xff]  ;;  %v8801_v26 = vpop.f32.mrf.mxu1  ;;  %v8806_v2 = vpop.f32.mrf.mxu2 }
 0x268   : > { %v8796_v36 = vadd.f32 %v1877_v13, %v1765_v33  ;;  %v846_v33 = vld [vmem:[#allocation2 + $0xe2] sm:$0xff] }
 0x269   : > { %v1886_v53 = vpop.f32.mrf.mxu0 }
 0x26a   : > { %11988 = vst [vmem:[#allocation8_spill] sm:$0xff] %v8796_v36  ;;  %2170 = vmatmul.f32.gmra.mxu3 %v779_v19  ;;  %v11991_v36 = vld [vmem:[#allocation9_spill] sm:$0xff] }
 0x26c   : > { %2289 = vmatmul.f32.gmra.mxu0 %v845_v20  ;;  %3621 = vmatmul.f32.gmra.mxu2 %v2545_v55  ;;  %v781_v20 = vld [vmem:[#allocation2 + $0xd9] sm:$0xff] }
 0x26d   : > { %v1767_v27 = vpop.f32.mrf.mxu3  ;;  %v11994_v55 = vld [vmem:[#allocation14_spill] sm:$0xff] }
 0x26e   : > { %v1768_v50 = vadd.f32 %v1767_v27, %v11989_v30  ;;  %v8808_v23 = vpop.f32.mrf.mxu1  ;;  %v6951_v30 = vld [vmem:[%s11817_s1 + $0x6f8] sm:$0xff]  ;;  %v8819_v27 = vpop.f32.mrf.mxu2 }
 0x26f   : > { %3941 = vmatpush.msrb.mxu1 %v6951_v30  ;;  %11993 = vst [vmem:[#allocation33_spill] sm:$0xff] %v8819_v27 }
 0x270   : > { %v8804_v39 = vadd.f32 %v1880_v52, %v1768_v50  ;;  %v6935_v50 = vld [vmem:[%s11817_s1 + $0x678] sm:$0xff] }
 0x271   : > { %v1889_v13 = vpop.f32.mrf.mxu0  ;;  %v847_v52 = vld [vmem:[#allocation2 + $0xf2] sm:$0xff]  ;;  %3828 = vmatpush.msrb.mxu0 %v6935_v50  ;;  %v11997_v50 = vld [vmem:[#allocation15_spill] sm:$0xff] }
 0x272   : > { %11990 = vst [vmem:[#allocation11_spill] sm:$0xff] %v8804_v39  ;;  %2173 = vmatmul.f32.gmra.mxu3 %v780_v11 }
 0x274   : > { %2292 = vmatmul.f32.gmra.mxu0 %v846_v33  ;;  %v782_v33 = vld [vmem:[#allocation2 + $0xe1] sm:$0xff] }
 0x275   : > { %v1770_v19 = vpop.f32.mrf.mxu3 }
 0x276   : > { %v1771_v8 = vadd.f32 %v1770_v19, %v11991_v36 }
 0x278   : > { %v8811_v5 = vadd.f32 %v1883_v6, %v1771_v8  ;;  %v8822_v6 = vpop.f32.mrf.mxu1 }
 0x279   : > { %v2248_v11 = vpop.f32.mrf.mxu0  ;;  %11995 = vst [vmem:[#allocation12_spill] sm:$0xff] %v8822_v6  ;;  %v786_v6 = vld [vmem:[#allocation2 + $0x111] sm:$0xff] }
 0x27a   : > { %11992 = vst [vmem:[#allocation31_spill] sm:$0xff] %v8811_v5  ;;  %2176 = vmatmul.f32.gmra.mxu3 %v781_v20  ;;  %v6918_v5 = vld [vmem:[%s11817_s1 + $0x5f0] sm:$0xff] }
 0x27b   : > { %3716 = vmatpush.msrb.mxu3 %v6918_v5 }
 0x27c   : > { %2295 = vmatmul.f32.gmra.mxu0 %v847_v52  ;;  %v8830_v52 = vpop.f32.mrf.mxu2 }
 0x27d   : > { %v1773_v36 = vpop.f32.mrf.mxu3  ;;  %11998 = vst [vmem:[#allocation17_spill] sm:$0xff] %v8830_v52 }
 0x27e   : > { %v1774_v8 = vadd.f32 %v1773_v36, %v11994_v55  ;;  %v783_v36 = vld [vmem:[#allocation2 + $0xf1] sm:$0xff] }
 0x280   : > { %v8824_v19 = vadd.f32 %v1886_v53, %v1774_v8  ;;  %v6934_v53 = vld [vmem:[%s11817_s1 + $0x670] sm:$0xff] }
 0x281   : > { %v2251_v39 = vpop.f32.mrf.mxu0  ;;  %v6950_v8 = vld [vmem:[%s11817_s1 + $0x6f0] sm:$0xff]  ;;  %3829 = vmatpush.msrb.mxu0 %v6934_v53 }
 0x282   : > { %11996 = vst [vmem:[#allocation13_spill] sm:$0xff] %v8824_v19  ;;  %2179 = vmatmul.f32.gmra.mxu3 %v782_v33  ;;  %v8840_v19 = vpop.f32.mrf.mxu1  ;;  %3942 = vmatpush.msrb.mxu1 %v6950_v8 }
 0x283   : > { %12000 = vst [vmem:[#allocation39_spill] sm:$0xff] %v8840_v19 }
 0x284   : > { %2298 = vmatmul.f32.gmra.mxu0 %v848_v48  ;;  %v849_v48 = vld [vmem:[#allocation2 + $0x10a] sm:$0xff]  ;;  %v8856_v53 = vpop.f32.mrf.mxu2 }
 0x285   : > { %v1776_v20 = vpop.f32.mrf.mxu3  ;;  %12001 = vst [vmem:[#allocation16_spill] sm:$0xff] %v8856_v53 }
 0x286   : > { %v1777_v30 = vadd.f32 %v1776_v20, %v11997_v50  ;;  %v8846_v20 = vld [vmem:[%s11818_s2] ss:$0 sm:$0xff] }
 0x287   : > { %v784_v50 = vld [vmem:[#allocation2 + $0xf9] sm:$0xff] }
 0x288   : > { %v8832_v55 = vadd.f32 %v1889_v13, %v1777_v30 }
 0x289   : > { %v2254_v5 = vpop.f32.mrf.mxu0 }
 0x28a   : > { %11999 = vst [vmem:[#allocation37_spill] sm:$0xff] %v8832_v55  ;;  %2182 = vmatmul.f32.gmra.mxu3 %v783_v36  ;;  %v8851_v55 = vld [vmem:[%s11819_s3] ss:$0 sm:$0xff]  ;;  %v6917_v36 = vld [vmem:[%s11817_s1 + $0x5e8] sm:$0xff] }
 0x28b   : > { %3717 = vmatpush.msrb.mxu3 %v6917_v36  ;;  %v6933_v36 = vld [vmem:[%s11817_s1 + $0x668] sm:$0xff] }
 0x28c   : > { %2301 = vmatmul.f32.gmra.mxu0 %v849_v48 }
 0x28d   : > { %v2135_v33 = vpop.f32.mrf.mxu3  ;;  %3830 = vmatpush.msrb.mxu0 %v6933_v36 }
 0x28e   : > { %v2136_v13 = vadd.f32 %v2135_v33, %v8442_v25  ;;  %v850_v25 = vld [vmem:[#allocation2 + $0x112] sm:$0xff]  ;;  %v8859_v33 = vpop.f32.mrf.mxu1 }
 0x28f   : > { %12002 = vst [vmem:[#allocation20_spill] sm:$0xff] %v8859_v33 }
 0x290   : > { %v2249_v30 = vadd.f32 %v2248_v11, %v2136_v13 }
 0x291   : > { %v2257_v8 = vpop.f32.mrf.mxu0 }
 0x292   : > { %v2348_v48 = vmul.f32 %v8846_v20, %v2249_v30  ;;  %2185 = vmatmul.f32.gmra.mxu3 %v784_v50  ;;  %v6949_v50 = vld [vmem:[%s11817_s1 + $0x6e8] sm:$0xff] }
 0x293   : > { %3943 = vmatpush.msrb.mxu1 %v6949_v50 }
 0x294   : > { %v2384_v11 = vadd.f32 %v8851_v55, %v2348_v48  ;;  %2304 = vmatmul.f32.gmra.mxu0 %v850_v25  ;;  %v8870_v48 = vpop.f32.mrf.mxu2 }
 0x295   : > { %v2138_v13 = vpop.f32.mrf.mxu3  ;;  %12003 = vst [vmem:[#allocation23_spill] sm:$0xff] %v8870_v48  ;;  %v787_v48 = vld [vmem:[#allocation2 + $0x121] sm:$0xff] }
 0x296   : > { %v2416_v52 = vmax.f32 %v2384_v11, 0.0  ;;  %v2139_v19 = vadd.f32 %v2138_v13, %v8456_v17  ;;  %v12005_v13 = vld [vmem:[#allocation24_spill] sm:$0xff] }
 0x298   : > { %2448 = vst [vmem:[#allocation2 + $0x19] sm:$0xff] %v2416_v52  ;;  %v2252_v27 = vadd.f32 %v2251_v39, %v2139_v19  ;;  %3624 = vmatmul.f32.gmra.mxu2 %v2416_v52  ;;  %v12004_v39 = vld [vmem:[#allocation19_spill] sm:$0xff]  ;;  %v8874_v19 = vpop.f32.mrf.mxu1 }
 0x299   : > { %v2260_v30 = vpop.f32.mrf.mxu0 }
 0x29a   : > { %v2349_v25 = vmul.f32 %v8846_v20, %v2252_v27  ;;  %2188 = vmatmul.f32.gmra.mxu3 %v785_v32  ;;  %v6916_v32 = vld [vmem:[%s11817_s1 + $0x5e0] sm:$0xff] }
 0x29b   : > { %3718 = vmatpush.msrb.mxu3 %v6916_v32 }
 0x29c   : > { %v2385_v17 = vadd.f32 %v8851_v55, %v2349_v25  ;;  %2307 = vmatmul.f32.gmra.mxu0 %v12004_v39 }
 0x29d   : > { %v2141_v52 = vpop.f32.mrf.mxu3 }
 0x29e   : > { %v2417_v11 = vmax.f32 %v2385_v17, 0.0  ;;  %v2142_v53 = vadd.f32 %v2141_v52, %v12005_v13  ;;  %v8886_v17 = vpop.f32.mrf.mxu2 }
 0x29f   : > { %v8877_v33 = vld [vmem:[#allocation2 + $0x18] sm:$0xff]  ;;  %12006 = vst [vmem:[#allocation22_spill] sm:$0xff] %v8886_v17  ;;  %v788_v17 = vld [vmem:[#allocation2 + $0x129] sm:$0xff] }
 0x2a0   : > { %2449 = vst [vmem:[#allocation2 + $0x21] sm:$0xff] %v2417_v11  ;;  %v2255_v36 = vadd.f32 %v2254_v5, %v2142_v53  ;;  %3511 = vmatmul.f32.gmra.mxu1 %v8877_v33  ;;  %3627 = vmatmul.f32.gmra.mxu2 %v2417_v11  ;;  %v12007_v53 = vld [vmem:[#allocation21_spill] sm:$0xff]  ;;  %v8889_v11 = vpop.f32.mrf.mxu1 }
 0x2a1   : > { %v2263_v27 = vpop.f32.mrf.mxu0  ;;  %12008 = vst [vmem:[#allocation26_spill] sm:$0xff] %v8889_v11 }
 0x2a2   : > { %v2350_v50 = vmul.f32 %v8846_v20, %v2255_v36  ;;  %2191 = vmatmul.f32.gmra.mxu3 %v786_v6  ;;  %v6948_v6 = vld [vmem:[%s11817_s1 + $0x6e0] sm:$0xff] }
 0x2a3   : > { %3944 = vmatpush.msrb.mxu1 %v6948_v6 }
 0x2a4   : > { %v2386_v25 = vadd.f32 %v8851_v55, %v2350_v50  ;;  %2310 = vmatmul.f32.gmra.mxu0 %v8498_v34  ;;  %v6932_v34 = vld [vmem:[%s11817_s1 + $0x660] sm:$0xff] }
 0x2a5   : > { %v2144_v39 = vpop.f32.mrf.mxu3  ;;  %3831 = vmatpush.msrb.mxu0 %v6932_v34 }
 0x2a6   : > { %v2418_v5 = vmax.f32 %v2386_v25, 0.0  ;;  %v2145_v52 = vadd.f32 %v2144_v39, %v12007_v53  ;;  %v8904_v53 = vpop.f32.mrf.mxu2 }
 0x2a7   : > { %v8891_v13 = vld [vmem:[#allocation2 + $0x20] sm:$0xff] }
 0x2a8   : > { %2450 = vst [vmem:[#allocation2 + $0x31] sm:$0xff] %v2418_v5  ;;  %v2258_v32 = vadd.f32 %v2257_v8, %v2145_v52  ;;  %3514 = vmatmul.f32.gmra.mxu1 %v8891_v13  ;;  %3630 = vmatmul.f32.gmra.mxu2 %v2418_v5 }
 0x2a9   : > { %v2266_v36 = vpop.f32.mrf.mxu0 }
 0x2aa   : > { %v2351_v50 = vmul.f32 %v8846_v20, %v2258_v32  ;;  %2194 = vmatmul.f32.gmra.mxu3 %v787_v48  ;;  %v6915_v48 = vld [vmem:[%s11817_s1 + $0x5d8] sm:$0xff]  ;;  %v8912_v32 = vpop.f32.mrf.mxu1 }
 0x2ab   : > { %3719 = vmatpush.msrb.mxu3 %v6915_v48 }
 0x2ac   : > { %v2387_v25 = vadd.f32 %v8851_v55, %v2351_v50  ;;  %2313 = vmatmul.f32.gmra.mxu0 %v8513_v4 }
 0x2ad   : > { %v2147_v8 = vpop.f32.mrf.mxu3 }
 0x2ae   : > { %v2419_v39 = vmax.f32 %v2387_v25, 0.0  ;;  %v2148_v5 = vadd.f32 %v2147_v8, %v8507_v58  ;;  %v789_v8 = vld [vmem:[#allocation2 + $0x139] sm:$0xff] }
 0x2af   : > { %v8906_v52 = vld [vmem:[#allocation2 + $0x30] sm:$0xff] }
 0x2b0   : > { %2451 = vst [vmem:[#allocation2 + $0x39] sm:$0xff] %v2419_v39  ;;  %v2261_v11 = vadd.f32 %v2260_v30, %v2148_v5  ;;  %3517 = vmatmul.f32.gmra.mxu1 %v8906_v52  ;;  %3633 = vmatmul.f32.gmra.mxu2 %v2419_v39 }
 0x2b1   : > { %v2269_v4 = vpop.f32.mrf.mxu0 }
 0x2b2   : > { %v2352_v58 = vmul.f32 %v8846_v20, %v2261_v11  ;;  %2197 = vmatmul.f32.gmra.mxu3 %v788_v17  ;;  %v6931_v17 = vld [vmem:[%s11817_s1 + $0x658] sm:$0xff]  ;;  %v8927_v11 = vpop.f32.mrf.mxu2 }
 0x2b3   : > { %12009 = vst [vmem:[#allocation29_spill] sm:$0xff] %v8927_v11  ;;  %3832 = vmatpush.msrb.mxu0 %v6931_v17 }
 0x2b4   : > { %v2388_v34 = vadd.f32 %v8851_v55, %v2352_v58  ;;  %2316 = vmatmul.f32.gmra.mxu0 %v8531_v57  ;;  %v6947_v57 = vld [vmem:[%s11817_s1 + $0x6d8] sm:$0xff] }
 0x2b5   : > { %v2150_v6 = vpop.f32.mrf.mxu3  ;;  %3945 = vmatpush.msrb.mxu1 %v6947_v57 }
 0x2b6   : > { %v2420_v30 = vmax.f32 %v2388_v34, 0.0  ;;  %v2151_v50 = vadd.f32 %v2150_v6, %v8522_v46 }
 0x2b7   : > { %v8918_v25 = vld [vmem:[#allocation2 + $0x38] sm:$0xff] }
 0x2b8   : > { %2452 = vst [vmem:[#allocation2 + $0x49] sm:$0xff] %v2420_v30  ;;  %v2264_v39 = vadd.f32 %v2263_v27, %v2151_v50  ;;  %3520 = vmatmul.f32.gmra.mxu1 %v8918_v25  ;;  %3636 = vmatmul.f32.gmra.mxu2 %v2420_v30  ;;  %v8930_v27 = vpop.f32.mrf.mxu1  ;;  %v790_v50 = vld [vmem:[#allocation2 + $0x141] sm:$0xff] }
 0x2b9   : > { %v2272_v5 = vpop.f32.mrf.mxu0 }
 0x2ba   : > { %v2353_v46 = vmul.f32 %v8846_v20, %v2264_v39  ;;  %2200 = vmatmul.f32.gmra.mxu3 %v789_v8  ;;  %v6914_v8 = vld [vmem:[%s11817_s1 + $0x5d0] sm:$0xff]  ;;  %v8942_v17 = vpop.f32.mrf.mxu2 }
 0x2bb   : > { %3720 = vmatpush.msrb.mxu3 %v6914_v8 }
 0x2bc   : > { %v2389_v48 = vadd.f32 %v8851_v55, %v2353_v46  ;;  %2319 = vmatmul.f32.gmra.mxu0 %v8548_v59 }
 0x2bd   : > { %v2153_v58 = vpop.f32.mrf.mxu3 }
 0x2be   : > { %v2421_v34 = vmax.f32 %v2389_v48, 0.0  ;;  %v2154_v6 = vadd.f32 %v2153_v58, %v8540_v31 }
 0x2bf   : > { %v8935_v30 = vld [vmem:[#allocation2 + $0x48] sm:$0xff] }
 0x2c0   : > { %2453 = vst [vmem:[#allocation2 + $0x51] sm:$0xff] %v2421_v34  ;;  %v2267_v11 = vadd.f32 %v2266_v36, %v2154_v6  ;;  %3523 = vmatmul.f32.gmra.mxu1 %v8935_v30  ;;  %3639 = vmatmul.f32.gmra.mxu2 %v2421_v34  ;;  %v8946_v57 = vpop.f32.mrf.mxu1  ;;  %v791_v34 = vld [vmem:[#allocation2 + $0x151] sm:$0xff]  ;;  %v1934_v6 = vadd.f32 %v8670_v41, %v8567_v63 }
 0x2c1   : > { %v2275_v39 = vpop.f32.mrf.mxu0 }
 0x2c2   : > { %v2354_v59 = vmul.f32 %v8846_v20, %v2267_v11  ;;  %2203 = vmatmul.f32.gmra.mxu3 %v790_v50  ;;  %v6946_v50 = vld [vmem:[%s11817_s1 + $0x6d0] sm:$0xff]  ;;  %v2047_v63 = vadd.f32 %v8668_v60, %v1934_v6 }
 0x2c3   : > { %3946 = vmatpush.msrb.mxu1 %v6946_v50 }
 0x2c4   : > { %v2390_v31 = vadd.f32 %v8851_v55, %v2354_v59  ;;  %2322 = vmatmul.f32.gmra.mxu0 %v8570_v37  ;;  %v6930_v37 = vld [vmem:[%s11817_s1 + $0x650] sm:$0xff] }
 0x2c5   : > { %v2156_v36 = vpop.f32.mrf.mxu3  ;;  %3833 = vmatpush.msrb.mxu0 %v6930_v37  ;;  %v792_v37 = vld [vmem:[#allocation2 + $0x159] sm:$0xff] }
 0x2c6   : > { %v2422_v46 = vmax.f32 %v2390_v31, 0.0  ;;  %v2157_v48 = vadd.f32 %v2156_v36, %v8557_v0 }
 0x2c7   : > { %v8949_v58 = vld [vmem:[#allocation2 + $0x50] sm:$0xff] }
 0x2c8   : > { %2454 = vst [vmem:[#allocation2 + $0x61] sm:$0xff] %v2422_v46  ;;  %v2270_v11 = vadd.f32 %v2269_v4, %v2157_v48  ;;  %3526 = vmatmul.f32.gmra.mxu1 %v8949_v58  ;;  %3642 = vmatmul.f32.gmra.mxu2 %v2422_v46  ;;  %v8966_v4 = vpop.f32.mrf.mxu2  ;;  %v8968_v46 = vpop.f32.mrf.mxu1 }
 0x2c9   : > { %v8960_v0 = vpop.f32.mrf.mxu0 }
 0x2ca   : > { %v2355_v8 = vmul.f32 %v8846_v20, %v2270_v11  ;;  %2206 = vmatmul.f32.gmra.mxu3 %v791_v34  ;;  %v1937_v11 = vadd.f32 %v8686_v12, %v8580_v7 }
 0x2cc   : > { %v2391_v41 = vadd.f32 %v8851_v55, %v2355_v8  ;;  %2325 = vmatmul.f32.gmra.mxu0 %v8582_v61  ;;  %v6913_v61 = vld [vmem:[%s11817_s1 + $0x5c8] sm:$0xff]  ;;  %v2050_v50 = vadd.f32 %v8683_v22, %v1937_v11  ;;  %v1940_v22 = vadd.f32 %v8701_v62, %v8595_v40  ;;  %v6928_v11 = vld [vmem:[%s11817_s1 + $0x640] sm:$0xff] }
 0x2cd   : > { %v2159_v59 = vpop.f32.mrf.mxu3  ;;  %3721 = vmatpush.msrb.mxu3 %v6913_v61  ;;  %v6927_v61 = vld [vmem:[%s11817_s1 + $0x638] sm:$0xff] }
 0x2ce   : > { %v2423_v31 = vmax.f32 %v2391_v41, 0.0  ;;  %v2160_v36 = vadd.f32 %v2159_v59, %v2047_v63  ;;  %v6929_v63 = vld [vmem:[%s11817_s1 + $0x648] sm:$0xff] }
 0x2cf   : > { %v8970_v48 = vld [vmem:[#allocation2 + $0x60] sm:$0xff]  ;;  %3834 = vmatpush.msrb.mxu0 %v6929_v63 }
 0x2d0   : > { %2455 = vst [vmem:[#allocation2 + $0x69] sm:$0xff] %v2423_v31  ;;  %v2273_v34 = vadd.f32 %v2272_v5, %v2160_v36  ;;  %3529 = vmatmul.f32.gmra.mxu1 %v8970_v48  ;;  %3645 = vmatmul.f32.gmra.mxu2 %v2423_v31  ;;  %v8987_v41 = vpop.f32.mrf.mxu2  ;;  %v793_v31 = vld [vmem:[#allocation2 + $0x169] sm:$0xff] }
 0x2d1   : > { %v8978_v60 = vpop.f32.mrf.mxu0  ;;  %3835 = vmatpush.msrb.mxu0 %v6928_v11  ;;  %v6924_v11 = vld [vmem:[%s11817_s1 + $0x620] sm:$0xff] }
 0x2d2   : > { %v2356_v6 = vmul.f32 %v8846_v20, %v2273_v34  ;;  %2209 = vmatmul.f32.gmra.mxu3 %v792_v37  ;;  %v6912_v37 = vld [vmem:[%s11817_s1 + $0x5c0] sm:$0xff]  ;;  %v9003_v34 = vpop.f32.mrf.mxu1 }
 0x2d3   : > { %3722 = vmatpush.msrb.mxu3 %v6912_v37  ;;  %3836 = vmatpush.msrb.mxu0 %v6927_v61  ;;  %v6908_v37 = vld [vmem:[%s11817_s1 + $0x5a0] sm:$0xff] }
 0x2d4   : > { %v2392_v8 = vadd.f32 %v8851_v55, %v2356_v6  ;;  %2328 = vmatmul.f32.gmra.mxu0 %v8597_v42  ;;  %v6945_v42 = vld [vmem:[%s11817_s1 + $0x6c8] sm:$0xff]  ;;  %v2053_v6 = vadd.f32 %v8693_v56, %v1940_v22  ;;  %v794_v22 = vld [vmem:[#allocation2 + $0x171] sm:$0xff] }
 0x2d5   : > { %v2162_v7 = vpop.f32.mrf.mxu3  ;;  %3947 = vmatpush.msrb.mxu1 %v6945_v42  ;;  %v6909_v56 = vld [vmem:[%s11817_s1 + $0x5a8] sm:$0xff] }
 0x2d6   : > { %v2424_v12 = vmax.f32 %v2392_v8, 0.0  ;;  %v2163_v5 = vadd.f32 %v2162_v7, %v2050_v50  ;;  %v6910_v8 = vld [vmem:[%s11817_s1 + $0x5b0] sm:$0xff] }
 0x2d7   : > { %v8989_v59 = vld [vmem:[#allocation2 + $0x68] sm:$0xff]  ;;  %v6926_v7 = vld [vmem:[%s11817_s1 + $0x630] sm:$0xff] }
 0x2d8   : > { %2456 = vst [vmem:[#allocation2 + $0x79] sm:$0xff] %v2424_v12  ;;  %v2276_v36 = vadd.f32 %v2275_v39, %v2163_v5  ;;  %3532 = vmatmul.f32.gmra.mxu1 %v8989_v59  ;;  %3648 = vmatmul.f32.gmra.mxu2 %v2424_v12  ;;  %v6911_v39 = vld [vmem:[%s11817_s1 + $0x5b8] sm:$0xff] }
 0x2d9   : > { %v9005_v40 = vpop.f32.mrf.mxu0  ;;  %3723 = vmatpush.msrb.mxu3 %v6911_v39  ;;  %3837 = vmatpush.msrb.mxu0 %v6926_v7  ;;  %v6922_v7 = vld [vmem:[%s11817_s1 + $0x610] sm:$0xff] }
 0x2da   : > { %v2357_v62 = vmul.f32 %v8846_v20, %v2276_v36  ;;  %2212 = vmatmul.f32.gmra.mxu3 %v793_v31  ;;  %v1943_v36 = vadd.f32 %v8714_v28, %v8607_v15  ;;  %v6907_v28 = vld [vmem:[%s11817_s1 + $0x598] sm:$0xff]  ;;  %v9052_v61 = vpop.f32.mrf.mxu1 }
 0x2db   : > { %3724 = vmatpush.msrb.mxu3 %v6910_v8  ;;  %v6906_v8 = vld [vmem:[%s11817_s1 + $0x590] sm:$0xff] }
 0x2dc   : > { %v2393_v50 = vadd.f32 %v8851_v55, %v2357_v62  ;;  %2331 = vmatmul.f32.gmra.mxu0 %v8609_v3  ;;  %v6925_v3 = vld [vmem:[%s11817_s1 + $0x628] sm:$0xff]  ;;  %v9041_v62 = vpop.f32.mrf.mxu2 }
 0x2dd   : > { %v2165_v12 = vpop.f32.mrf.mxu3  ;;  %3725 = vmatpush.msrb.mxu3 %v6909_v56  ;;  %3838 = vmatpush.msrb.mxu0 %v6925_v3  ;;  %v795_v3 = vld [vmem:[#allocation2 + $0x181] sm:$0xff] }
 0x2de   : > { %v2425_v5 = vmax.f32 %v2393_v50, 0.0  ;;  %v2166_v63 = vadd.f32 %v2165_v12, %v2053_v6  ;;  %v2056_v6 = vadd.f32 %v8708_v44, %v1943_v36  ;;  %v6905_v44 = vld [vmem:[%s11817_s1 + $0x588] sm:$0xff] }
 0x2df   : > { %v9029_v31 = vld [vmem:[#allocation2 + $0x78] sm:$0xff]  ;;  %3726 = vmatpush.msrb.mxu3 %v6908_v37  ;;  %3839 = vmatpush.msrb.mxu0 %v6924_v11  ;;  %v6904_v37 = vld [vmem:[%s11817_s1 + $0x580] sm:$0xff] }
 0x2e0   : > { %2457 = vst [vmem:[#allocation2 + $0x81] sm:$0xff] %v2425_v5  ;;  %v2279_v42 = vadd.f32 %v8960_v0, %v2166_v63  ;;  %3535 = vmatmul.f32.gmra.mxu1 %v9029_v31  ;;  %3651 = vmatmul.f32.gmra.mxu2 %v2425_v5  ;;  %v6923_v0 = vld [vmem:[%s11817_s1 + $0x618] sm:$0xff]  ;;  %v6920_v11 = vld [vmem:[%s11817_s1 + $0x600] sm:$0xff] }
 0x2e1   : > { %v9043_v39 = vpop.f32.mrf.mxu0  ;;  %3727 = vmatpush.msrb.mxu3 %v6907_v28  ;;  %3840 = vmatpush.msrb.mxu0 %v6923_v0 }
 0x2e2   : > { %v2358_v15 = vmul.f32 %v8846_v20, %v2279_v42  ;;  %2215 = vmatmul.f32.gmra.mxu3 %v794_v22  ;;  %v1946_v22 = vadd.f32 %v8729_v21, %v8625_v9  ;;  %v6944_v42 = vld [vmem:[%s11817_s1 + $0x6c0] sm:$0xff] }
 0x2e3   : > { %3728 = vmatpush.msrb.mxu3 %v6906_v8  ;;  %3841 = vmatpush.msrb.mxu0 %v6922_v7  ;;  %v861_v9 = vld [vmem:[#allocation2 + $0x19a] sm:$0xff] }
 0x2e4   : > { %v2394_v50 = vadd.f32 %v8851_v55, %v2358_v15  ;;  %2334 = vmatmul.f32.gmra.mxu0 %v8627_v49  ;;  %v6921_v49 = vld [vmem:[%s11817_s1 + $0x608] sm:$0xff]  ;;  %3948 = vmatpush.msrb.mxu1 %v6944_v42  ;;  %v2059_v28 = vadd.f32 %v8727_v45, %v1946_v22 }
 0x2e5   : > { %v2168_v12 = vpop.f32.mrf.mxu3  ;;  %3729 = vmatpush.msrb.mxu3 %v6905_v44  ;;  %3842 = vmatpush.msrb.mxu0 %v6921_v49  ;;  %v862_v49 = vld [vmem:[#allocation2 + $0x1a2] sm:$0xff] }
 0x2e6   : > { %v2426_v5 = vmax.f32 %v2394_v50, 0.0  ;;  %v2169_v63 = vadd.f32 %v2168_v12, %v2056_v6  ;;  %v9089_v6 = vpop.f32.mrf.mxu1 }
 0x2e7   : > { %v9069_v56 = vld [vmem:[#allocation2 + $0x80] sm:$0xff]  ;;  %3730 = vmatpush.msrb.mxu3 %v6904_v37  ;;  %3843 = vmatpush.msrb.mxu0 %v6920_v11 }
 0x2e8   : > { %2458 = vst [vmem:[#allocation2 + $0x91] sm:$0xff] %v2426_v5  ;;  %v2282_v36 = vadd.f32 %v8978_v60, %v2169_v63  ;;  %3538 = vmatmul.f32.gmra.mxu1 %v9069_v56  ;;  %3654 = vmatmul.f32.gmra.mxu2 %v2426_v5  ;;  %v9085_v60 = vpop.f32.mrf.mxu2  ;;  %v796_v5 = vld [vmem:[#allocation2 + $0x189] sm:$0xff]  ;;  %v1949_v63 = vadd.f32 %v8736_v14, %v8634_v10 }
 0x2e9   : > { %v2290_v15 = vpop.f32.mrf.mxu0 }
 0x2ea   : > { %v2359_v21 = vmul.f32 %v8846_v20, %v2282_v36  ;;  %2218 = vmatmul.f32.gmra.mxu3 %v795_v3  ;;  %v2062_v22 = vadd.f32 %v8734_v51, %v1949_v63  ;;  %v6967_v51 = vld [vmem:[%s11817_s1 + $0x778] sm:$0xff] }
 0x2eb   : > { %4054 = vmatpush.msrb.mxu2 %v6967_v51 }
 0x2ec   : > { %v2395_v0 = vadd.f32 %v8851_v55, %v2359_v21  ;;  %2337 = vmatmul.f32.gmra.mxu0 %v861_v9  ;;  %v797_v9 = vld [vmem:[#allocation2 + $0x199] sm:$0xff]  ;;  %v1952_v21 = vadd.f32 %v8753_v47, %v8645_v24 }
 0x2ed   : > { %v2171_v50 = vpop.f32.mrf.mxu3 }
 0x2ee   : > { %v2427_v8 = vmax.f32 %v2395_v0, 0.0  ;;  %v2172_v7 = vadd.f32 %v2171_v50, %v2059_v28  ;;  %v9102_v11 = vpop.f32.mrf.mxu1  ;;  %v6943_v0 = vld [vmem:[%s11817_s1 + $0x6b8] sm:$0xff]  ;;  %v2065_v24 = vadd.f32 %v8747_v38, %v1952_v21 }
 0x2ef   : > { %v9091_v12 = vld [vmem:[#allocation2 + $0x90] sm:$0xff]  ;;  %3949 = vmatpush.msrb.mxu1 %v6943_v0 }
 0x2f0   : > { %2459 = vst [vmem:[#allocation2 + $0x99] sm:$0xff] %v2427_v8  ;;  %v2285_v44 = vadd.f32 %v9005_v40, %v2172_v7  ;;  %3541 = vmatmul.f32.gmra.mxu1 %v9091_v12  ;;  %3657 = vmatmul.f32.gmra.mxu2 %v2427_v8  ;;  %v9100_v42 = vpop.f32.mrf.mxu2 }
 0x2f1   : > { %v2293_v45 = vpop.f32.mrf.mxu0 }
 0x2f2   : > { %v2360_v3 = vmul.f32 %v8846_v20, %v2285_v44  ;;  %2221 = vmatmul.f32.gmra.mxu3 %v796_v5 }
 0x2f4   : > { %v2396_v36 = vadd.f32 %v8851_v55, %v2360_v3  ;;  %2340 = vmatmul.f32.gmra.mxu0 %v862_v49  ;;  %v798_v49 = vld [vmem:[#allocation2 + $0x1a1] sm:$0xff]  ;;  %v1955_v3 = vadd.f32 %v8781_v1, %v8650_v18 }
 0x2f5   : > { %v2174_v37 = vpop.f32.mrf.mxu3 }
 0x2f6   : > { %v2428_v10 = vmax.f32 %v2396_v36, 0.0  ;;  %v2175_v14 = vadd.f32 %v2174_v37, %v2062_v22  ;;  %v9127_v38 = vpop.f32.mrf.mxu1  ;;  %v2068_v37 = vadd.f32 %v8773_v43, %v1955_v3  ;;  %v6966_v43 = vld [vmem:[%s11817_s1 + $0x770] sm:$0xff] }
 0x2f7   : > { %v9104_v40 = vld [vmem:[#allocation2 + $0x98] sm:$0xff]  ;;  %4055 = vmatpush.msrb.mxu2 %v6966_v43 }
 0x2f8   : > { %2460 = vst [vmem:[#allocation2 + $0xa9] sm:$0xff] %v2428_v10  ;;  %v2288_v28 = vadd.f32 %v9043_v39, %v2175_v14  ;;  %3544 = vmatmul.f32.gmra.mxu1 %v9104_v40  ;;  %3660 = vmatmul.f32.gmra.mxu2 %v2428_v10  ;;  %v9120_v63 = vpop.f32.mrf.mxu2  ;;  %v12011_v43 = vld [vmem:[#allocation33_spill] sm:$0xff] }
 0x2f9   : > { %v2296_v50 = vpop.f32.mrf.mxu0 }
 0x2fa   : > { %v2361_v8 = vmul.f32 %v8846_v20, %v2288_v28  ;;  %2224 = vmatmul.f32.gmra.mxu3 %v797_v9  ;;  %v1958_v28 = vadd.f32 %v8801_v26, %v8661_v35 }
 0x2fc   : > { %v2397_v47 = vadd.f32 %v8851_v55, %v2361_v8  ;;  %3844 = vmatmul.f32.vlgmr.msrb.gmra.mxu0 %v8877_v33  ;;  %v2071_v26 = vadd.f32 %v8799_v54, %v1958_v28  ;;  %v9176_v28 = vld [vmem:[#allocation2 + $0x1a] sm:$0xff] }
 0x2fd   : > { %v2177_v39 = vpop.f32.mrf.mxu3 }
 0x2fe   : > { %v2429_v7 = vmax.f32 %v2397_v47, 0.0  ;;  %v2178_v5 = vadd.f32 %v2177_v39, %v2065_v24  ;;  %v9146_v0 = vpop.f32.mrf.mxu1 }
 0x2ff   : > { %v9122_v44 = vld [vmem:[#allocation2 + $0xa8] sm:$0xff] }
 0x300   : > { %2461 = vst [vmem:[#allocation2 + $0xb1] sm:$0xff] %v2429_v7  ;;  %v2291_v22 = vadd.f32 %v2290_v15, %v2178_v5  ;;  %3547 = vmatmul.f32.gmra.mxu1 %v9122_v44  ;;  %3663 = vmatmul.f32.gmra.mxu2 %v2429_v7  ;;  %v2608_v15 = vld [vmem:[#allocation2 + $0x2] sm:$0xff]  ;;  %v9135_v21 = vpop.f32.mrf.mxu2  ;;  %v2609_v5 = vld [vmem:[#allocation2 + $0xa] sm:$0xff] }
 0x301   : > { %v2299_v36 = vpop.f32.mrf.mxu0 }
 0x302   : > { %v2362_v33 = vmul.f32 %v8846_v20, %v2291_v22  ;;  %2227 = vmatmul.f32.gmra.mxu3 %v798_v49  ;;  %v1961_v49 = vadd.f32 %v8808_v23, %v8666_v16 }
 0x304   : > { %v2398_v10 = vadd.f32 %v8851_v55, %v2362_v33  ;;  %3847 = vmatmul.f32.gmra.mxu0 %v8891_v13  ;;  %v6942_v13 = vld [vmem:[%s11817_s1 + $0x6b0] sm:$0xff] }
 0x305   : > { %v2180_v14 = vpop.f32.mrf.mxu3  ;;  %3950 = vmatpush.msrb.mxu1 %v6942_v13 }
 0x306   : > { %v2430_v9 = vmax.f32 %v2398_v10, 0.0  ;;  %v2181_v18 = vadd.f32 %v2180_v14, %v2068_v37  ;;  %v2074_v37 = vadd.f32 %v8806_v2, %v1961_v49  ;;  %v6965_v2 = vld [vmem:[%s11817_s1 + $0x768] sm:$0xff] }
 0x307   : > { %v9133_v1 = vld [vmem:[#allocation2 + $0xb0] sm:$0xff]  ;;  %4056 = vmatpush.msrb.mxu2 %v6965_v2  ;;  %v12013_v49 = vld [vmem:[#allocation39_spill] sm:$0xff] }
 0x308   : > { %2462 = vst [vmem:[#allocation2 + $0xc1] sm:$0xff] %v2430_v9  ;;  %v2294_v51 = vadd.f32 %v2293_v45, %v2181_v18  ;;  %3550 = vmatmul.f32.gmra.mxu1 %v9133_v1  ;;  %3666 = vmatmul.f32.gmra.mxu2 %v2430_v9  ;;  %v9157_v22 = vpop.f32.mrf.mxu2  ;;  %v12010_v9 = vld [vmem:[#allocation12_spill] sm:$0xff] }
 0x309   : > { %v2302_v8 = vpop.f32.mrf.mxu0  ;;  %v1964_v18 = vadd.f32 %v12010_v9, %v8681_v29 }
 0x30a   : > { %v2363_v35 = vmul.f32 %v8846_v20, %v2294_v51  ;;  %3731 = vmatmul.f32.vlgmr.msrb.gmra.mxu3 %v2608_v15 }
 0x30b   : > { %v2077_v13 = vadd.f32 %v12011_v43, %v1964_v18  ;;  %v12016_v43 = vld [vmem:[#allocation20_spill] sm:$0xff] }
 0x30c   : > { %v2399_v45 = vadd.f32 %v8851_v55, %v2363_v35  ;;  %3850 = vmatmul.f32.gmra.mxu0 %v8906_v52  ;;  %v9160_v52 = vpop.f32.mrf.mxu1 }
 0x30d   : > { %v2183_v24 = vpop.f32.mrf.mxu3 }
 0x30e   : > { %v2431_v47 = vmax.f32 %v2399_v45, 0.0  ;;  %v2184_v39 = vadd.f32 %v2183_v24, %v2071_v26 }
 0x30f   : > { %v9152_v7 = vld [vmem:[#allocation2 + $0xc0] sm:$0xff] }
 0x310   : > { %2463 = vst [vmem:[#allocation2 + $0xc9] sm:$0xff] %v2431_v47  ;;  %v2297_v3 = vadd.f32 %v2296_v50, %v2184_v39  ;;  %3553 = vmatmul.f32.gmra.mxu1 %v9152_v7  ;;  %3669 = vmatmul.f32.gmra.mxu2 %v2431_v47 }
 0x311   : > { %v2305_v54 = vpop.f32.mrf.mxu0 }
 0x312   : > { %v2364_v33 = vmul.f32 %v8846_v20, %v2297_v3  ;;  %3734 = vmatmul.f32.gmra.mxu3 %v2609_v5  ;;  %v12012_v5 = vld [vmem:[#allocation30_spill] sm:$0xff] }
 0x313   : > { %v1967_v3 = vadd.f32 %v12013_v49, %v12012_v5  ;;  %v12017_v49 = vld [vmem:[#allocation16_spill] sm:$0xff] }
 0x314   : > { %v2400_v10 = vadd.f32 %v8851_v55, %v2364_v33  ;;  %3853 = vmatmul.f32.gmra.mxu0 %v8918_v25  ;;  %v6941_v25 = vld [vmem:[%s11817_s1 + $0x6a8] sm:$0xff] }
 0x315   : > { %v2186_v16 = vpop.f32.mrf.mxu3  ;;  %3951 = vmatpush.msrb.mxu1 %v6941_v25 }
 0x316   : > { %v2432_v23 = vmax.f32 %v2400_v10, 0.0  ;;  %v2187_v50 = vadd.f32 %v2186_v16, %v2074_v37  ;;  %v9192_v37 = vld [vmem:[#allocation2 + $0x22] sm:$0xff] }
 0x317   : > { %v9165_v14 = vld [vmem:[#allocation2 + $0xc8] sm:$0xff] }
 0x318   : > { %2464 = vst [vmem:[#allocation2 + $0xd9] sm:$0xff] %v2432_v23  ;;  %v2300_v15 = vadd.f32 %v2299_v36, %v2187_v50  ;;  %3556 = vmatmul.f32.gmra.mxu1 %v9165_v14  ;;  %3672 = vmatmul.f32.gmra.mxu2 %v2432_v23  ;;  %v12014_v23 = vld [vmem:[#allocation17_spill] sm:$0xff] }
 0x319   : > { %v2308_v51 = vpop.f32.mrf.mxu0  ;;  %v2080_v50 = vadd.f32 %v12014_v23, %v1967_v3 }
 0x31a   : > { %v2365_v29 = vmul.f32 %v8846_v20, %v2300_v15  ;;  %3737 = vmatmul.f32.gmra.mxu3 %v9176_v28 }
 0x31b   : > { %v9180_v36 = vpop.f32.mrf.mxu2 }
 0x31c   : > { %v2401_v35 = vadd.f32 %v8851_v55, %v2365_v29  ;;  %3856 = vmatmul.f32.gmra.mxu0 %v8935_v30  ;;  %v12015_v29 = vld [vmem:[#allocation4_spill] sm:$0xff] }
 0x31d   : > { %v2189_v26 = vpop.f32.mrf.mxu3  ;;  %v9185_v45 = vpop.f32.mrf.mxu1 }
 0x31e   : > { %v2433_v24 = vmax.f32 %v2401_v35, 0.0  ;;  %v2190_v47 = vadd.f32 %v2189_v26, %v2077_v13  ;;  %v1970_v13 = vadd.f32 %v12016_v43, %v12015_v29  ;;  %v6964_v26 = vld [vmem:[%s11817_s1 + $0x760] sm:$0xff] }
 0x31f   : > { %v9187_v39 = vld [vmem:[#allocation2 + $0xd8] sm:$0xff]  ;;  %4057 = vmatpush.msrb.mxu2 %v6964_v26  ;;  %v12020_v26 = vld [vmem:[#allocation23_spill] sm:$0xff] }
 0x320   : > { %2465 = vst [vmem:[#allocation2 + $0xe1] sm:$0xff] %v2433_v24  ;;  %v2303_v33 = vadd.f32 %v2302_v8, %v2190_v47  ;;  %3559 = vmatmul.f32.gmra.mxu1 %v9187_v39  ;;  %3675 = vmatmul.f32.gmra.mxu2 %v2433_v24  ;;  %v9214_v24 = vld [vmem:[#allocation2 + $0x32] sm:$0xff]  ;;  %v2083_v3 = vadd.f32 %v12017_v49, %v1970_v13  ;;  %v9230_v43 = vld [vmem:[#allocation2 + $0x3a] sm:$0xff] }
 0x321   : > { %v2311_v10 = vpop.f32.mrf.mxu0 }
 0x322   : > { %v2366_v30 = vmul.f32 %v8846_v20, %v2303_v33  ;;  %3740 = vmatmul.f32.gmra.mxu3 %v9192_v37 }
 0x323   : > { %v9196_v16 = vpop.f32.mrf.mxu2 }
 0x324   : > { %v2402_v9 = vadd.f32 %v8851_v55, %v2366_v30  ;;  %3859 = vmatmul.f32.gmra.mxu0 %v8949_v58  ;;  %v6940_v58 = vld [vmem:[%s11817_s1 + $0x6a0] sm:$0xff] }
 0x325   : > { %v2192_v18 = vpop.f32.mrf.mxu3  ;;  %v9201_v8 = vpop.f32.mrf.mxu1  ;;  %3952 = vmatpush.msrb.mxu1 %v6940_v58 }
 0x326   : > { %v2434_v15 = vmax.f32 %v2402_v9, 0.0  ;;  %v2193_v2 = vadd.f32 %v2192_v18, %v2080_v50 }
 0x327   : > { %v9203_v25 = vld [vmem:[#allocation2 + $0xe0] sm:$0xff] }
 0x328   : > { %2466 = vst [vmem:[#allocation2 + $0xf1] sm:$0xff] %v2434_v15  ;;  %v2306_v35 = vadd.f32 %v2305_v54, %v2193_v2  ;;  %3562 = vmatmul.f32.gmra.mxu1 %v9203_v25  ;;  %3678 = vmatmul.f32.gmra.mxu2 %v2434_v15  ;;  %v12018_v15 = vld [vmem:[#allocation5_spill] sm:$0xff] }
 0x329   : > { %v2314_v47 = vpop.f32.mrf.mxu0  ;;  %v1973_v2 = vadd.f32 %v8874_v19, %v12018_v15 }
 0x32a   : > { %v2367_v5 = vmul.f32 %v8846_v20, %v2306_v35  ;;  %3743 = vmatmul.f32.gmra.mxu3 %v9214_v24 }
 0x32b   : > { %v9218_v54 = vpop.f32.mrf.mxu2  ;;  %v2086_v58 = vadd.f32 %v12020_v26, %v1973_v2  ;;  %v6963_v2 = vld [vmem:[%s11817_s1 + $0x758] sm:$0xff] }
 0x32c   : > { %v2403_v33 = vadd.f32 %v8851_v55, %v2367_v5  ;;  %3862 = vmatmul.f32.gmra.mxu0 %v8970_v48  ;;  %4058 = vmatpush.msrb.mxu2 %v6963_v2  ;;  %v12025_v2 = vld [vmem:[#allocation25_spill] sm:$0xff] }
 0x32d   : > { %v2195_v30 = vpop.f32.mrf.mxu3  ;;  %v9223_v23 = vpop.f32.mrf.mxu1 }
 0x32e   : > { %v2435_v50 = vmax.f32 %v2403_v33, 0.0  ;;  %v2196_v9 = vadd.f32 %v2195_v30, %v2083_v3  ;;  %v12021_v30 = vld [vmem:[#allocation6_spill] sm:$0xff] }
 0x32f   : > { %v9225_v18 = vld [vmem:[#allocation2 + $0xf0] sm:$0xff] }
 0x330   : > { %2467 = vst [vmem:[#allocation2 + $0xf9] sm:$0xff] %v2435_v50  ;;  %v2309_v29 = vadd.f32 %v2308_v51, %v2196_v9  ;;  %3565 = vmatmul.f32.gmra.mxu1 %v9225_v18  ;;  %3681 = vmatmul.f32.gmra.mxu2 %v2435_v50  ;;  %v12022_v50 = vld [vmem:[#allocation26_spill] sm:$0xff] }
 0x331   : > { %v2317_v13 = vpop.f32.mrf.mxu0  ;;  %v1976_v9 = vadd.f32 %v12022_v50, %v12021_v30 }
 0x332   : > { %v2368_v48 = vmul.f32 %v8846_v20, %v2309_v29  ;;  %3746 = vmatmul.f32.gmra.mxu3 %v9230_v43  ;;  %v9252_v29 = vld [vmem:[#allocation2 + $0x4a] sm:$0xff] }
 0x333   : > { %v9234_v35 = vpop.f32.mrf.mxu2 }
 0x334   : > { %12019 = vst [vmem:[#allocation28_spill] sm:$0xff] %v9234_v35  ;;  %v2404_v5 = vadd.f32 %v8851_v55, %v2368_v48  ;;  %3865 = vmatmul.f32.gmra.mxu0 %v8989_v59  ;;  %v6939_v59 = vld [vmem:[%s11817_s1 + $0x698] sm:$0xff] }
 0x335   : > { %v2198_v19 = vpop.f32.mrf.mxu3  ;;  %v9239_v51 = vpop.f32.mrf.mxu1  ;;  %3953 = vmatpush.msrb.mxu1 %v6939_v59 }
 0x336   : > { %v2436_v49 = vmax.f32 %v2404_v5, 0.0  ;;  %v2199_v3 = vadd.f32 %v2198_v19, %v2086_v58  ;;  %v12024_v58 = vld [vmem:[#allocation22_spill] sm:$0xff] }
 0x337   : > { %v9241_v33 = vld [vmem:[#allocation2 + $0xf8] sm:$0xff]  ;;  %v2089_v5 = vadd.f32 %v12024_v58, %v1976_v9 }
 0x338   : > { %2468 = vst [vmem:[#allocation2 + $0x109] sm:$0xff] %v2436_v49  ;;  %v2312_v15 = vadd.f32 %v2311_v10, %v2199_v3  ;;  %3568 = vmatmul.f32.gmra.mxu1 %v9241_v33  ;;  %3684 = vmatmul.f32.gmra.mxu2 %v2436_v49  ;;  %v9268_v9 = vld [vmem:[#allocation2 + $0x52] sm:$0xff] }
 0x339   : > { %v2320_v48 = vpop.f32.mrf.mxu0 }
 0x33a   : > { %v2369_v26 = vmul.f32 %v8846_v20, %v2312_v15  ;;  %3749 = vmatmul.f32.gmra.mxu3 %v9252_v29  ;;  %v1979_v15 = vadd.f32 %v8912_v32, %v12025_v2  ;;  %v12028_v2 = vld [vmem:[#allocation27_spill] sm:$0xff] }
 0x33b   : > { %v9256_v10 = vpop.f32.mrf.mxu2 }
 0x33c   : > { %12023 = vst [vmem:[#allocation32_spill] sm:$0xff] %v9256_v10  ;;  %v2405_v19 = vadd.f32 %v8851_v55, %v2369_v26  ;;  %3868 = vmatmul.f32.gmra.mxu0 %v9029_v31 }
 0x33d   : > { %v2201_v49 = vpop.f32.mrf.mxu3  ;;  %v9261_v3 = vpop.f32.mrf.mxu1 }
 0x33e   : > { %v2437_v30 = vmax.f32 %v2405_v19, 0.0  ;;  %v2202_v50 = vadd.f32 %v2201_v49, %v2089_v5  ;;  %v2092_v5 = vadd.f32 %v8904_v53, %v1979_v15  ;;  %v6962_v53 = vld [vmem:[%s11817_s1 + $0x750] sm:$0xff]  ;;  %v9290_v15 = vld [vmem:[#allocation2 + $0x62] sm:$0xff] }
 0x33f   : > { %v9263_v35 = vld [vmem:[#allocation2 + $0x108] sm:$0xff]  ;;  %4059 = vmatpush.msrb.mxu2 %v6962_v53  ;;  %v12030_v53 = vld [vmem:[#allocation36_spill] sm:$0xff] }
 0x340   : > { %2469 = vst [vmem:[#allocation2 + $0x111] sm:$0xff] %v2437_v30  ;;  %v2315_v59 = vadd.f32 %v2314_v47, %v2202_v50  ;;  %3571 = vmatmul.f32.gmra.mxu1 %v9263_v35  ;;  %3687 = vmatmul.f32.gmra.mxu2 %v2437_v30 }
 0x341   : > { %v2323_v26 = vpop.f32.mrf.mxu0 }
 0x342   : > { %v2370_v31 = vmul.f32 %v8846_v20, %v2315_v59  ;;  %3752 = vmatmul.f32.gmra.mxu3 %v9268_v9  ;;  %v1982_v59 = vadd.f32 %v8930_v27, %v12028_v2 }
 0x343   : > { %v9272_v58 = vpop.f32.mrf.mxu2 }
 0x344   : > { %12026 = vst [vmem:[#allocation35_spill] sm:$0xff] %v9272_v58  ;;  %v2406_v19 = vadd.f32 %v8851_v55, %v2370_v31  ;;  %3871 = vmatmul.f32.gmra.mxu0 %v9069_v56  ;;  %v6938_v56 = vld [vmem:[%s11817_s1 + $0x690] sm:$0xff] }
 0x345   : > { %v2204_v32 = vpop.f32.mrf.mxu3  ;;  %v9277_v47 = vpop.f32.mrf.mxu1  ;;  %3954 = vmatpush.msrb.mxu1 %v6938_v56 }
 0x346   : > { %12027 = vst [vmem:[#allocation34_spill] sm:$0xff] %v9277_v47  ;;  %v2438_v49 = vmax.f32 %v2406_v19, 0.0  ;;  %v2205_v30 = vadd.f32 %v2204_v32, %v2092_v5  ;;  %v12029_v5 = vld [vmem:[#allocation29_spill] sm:$0xff] }
 0x347   : > { %v9279_v50 = vld [vmem:[#allocation2 + $0x110] sm:$0xff]  ;;  %v2095_v19 = vadd.f32 %v12029_v5, %v1982_v59 }
 0x348   : > { %2470 = vst [vmem:[#allocation2 + $0x121] sm:$0xff] %v2438_v49  ;;  %v2318_v10 = vadd.f32 %v2317_v13, %v2205_v30  ;;  %3574 = vmatmul.f32.gmra.mxu1 %v9279_v50  ;;  %3690 = vmatmul.f32.gmra.mxu2 %v2438_v49  ;;  %v9308_v59 = vld [vmem:[#allocation2 + $0x6a] sm:$0xff] }
 0x349   : > { %v9292_v31 = vpop.f32.mrf.mxu0 }
 0x34a   : > { %v2371_v27 = vmul.f32 %v8846_v20, %v2318_v10  ;;  %3755 = vmatmul.f32.gmra.mxu3 %v9290_v15  ;;  %v1985_v10 = vadd.f32 %v8946_v57, %v12030_v53  ;;  %v9320_v57 = vld [vmem:[%s11819_s3] ss:$0 sm:$0xff]  ;;  %v12031_v53 = vld [vmem:[#allocation7_spill] sm:$0xff] }
 0x34b   : > { %v9296_v13 = vpop.f32.mrf.mxu2 }
 0x34c   : > { %v2407_v32 = vadd.f32 %v8851_v55, %v2371_v27  ;;  %3874 = vmatmul.f32.gmra.mxu0 %v9091_v12  ;;  %v2098_v5 = vadd.f32 %v8942_v17, %v1985_v10  ;;  %v6960_v17 = vld [vmem:[%s11817_s1 + $0x740] sm:$0xff] }
 0x34d   : > { %v2207_v49 = vpop.f32.mrf.mxu3  ;;  %v9301_v30 = vpop.f32.mrf.mxu1 }
 0x34e   : > { %v2439_v2 = vmax.f32 %v2407_v32, 0.0  ;;  %v2208_v58 = vadd.f32 %v2207_v49, %v2095_v19 }
 0x34f   : > { %v9303_v47 = vld [vmem:[#allocation2 + $0x120] sm:$0xff] }
 0x350   : > { %2471 = vst [vmem:[#allocation2 + $0x129] sm:$0xff] %v2439_v2  ;;  %v2321_v56 = vadd.f32 %v2320_v48, %v2208_v58  ;;  %3577 = vmatmul.f32.gmra.mxu1 %v9303_v47  ;;  %3693 = vmatmul.f32.gmra.mxu2 %v2439_v2  ;;  %v6961_v58 = vld [vmem:[%s11817_s1 + $0x748] sm:$0xff] }
 0x351   : > { %v9310_v55 = vpop.f32.mrf.mxu0  ;;  %4060 = vmatpush.msrb.mxu2 %v6961_v58  ;;  %v6958_v58 = vld [vmem:[%s11817_s1 + $0x730] sm:$0xff] }
 0x352   : > { %v2372_v12 = vmul.f32 %v8846_v20, %v2321_v56  ;;  %3758 = vmatmul.f32.gmra.mxu3 %v9308_v59  ;;  %v6937_v56 = vld [vmem:[%s11817_s1 + $0x688] sm:$0xff] }
 0x353   : > { %v9314_v27 = vpop.f32.mrf.mxu2  ;;  %4061 = vmatpush.msrb.mxu2 %v6960_v17  ;;  %3955 = vmatpush.msrb.mxu1 %v6937_v56  ;;  %v6957_v17 = vld [vmem:[%s11817_s1 + $0x728] sm:$0xff] }
 0x354   : > { %v2408_v48 = vadd.f32 %v9320_v57, %v2372_v12  ;;  %3877 = vmatmul.f32.gmra.mxu0 %v9104_v40  ;;  %v1988_v40 = vadd.f32 %v8968_v46, %v12031_v53  ;;  %v6959_v12 = vld [vmem:[%s11817_s1 + $0x738] sm:$0xff]  ;;  %v9350_v46 = vld [vmem:[%s11818_s2] ss:$0 sm:$0xff] }
 0x355   : > { %v2210_v20 = vpop.f32.mrf.mxu3  ;;  %v9327_v19 = vpop.f32.mrf.mxu1  ;;  %4062 = vmatpush.msrb.mxu2 %v6959_v12 }
 0x356   : > { %v2440_v32 = vmax.f32 %v2408_v48, 0.0  ;;  %v2211_v49 = vadd.f32 %v2210_v20, %v2098_v5  ;;  %v9343_v5 = vld [vmem:[#allocation2 + $0x7a] sm:$0xff] }
 0x357   : > { %v9332_v2 = vld [vmem:[#allocation2 + $0x128] sm:$0xff]  ;;  %4063 = vmatpush.msrb.mxu2 %v6958_v58  ;;  %v6956_v58 = vld [vmem:[%s11817_s1 + $0x720] sm:$0xff] }
 0x358   : > { %2472 = vst [vmem:[#allocation2 + $0x139] sm:$0xff] %v2440_v32  ;;  %v2324_v10 = vadd.f32 %v2323_v26, %v2211_v49  ;;  %3580 = vmatmul.f32.gmra.mxu1 %v9332_v2  ;;  %3696 = vmatmul.f32.gmra.mxu2 %v2440_v32  ;;  %v2101_v32 = vadd.f32 %v8966_v4, %v1988_v40  ;;  %v12034_v4 = vld [vmem:[#allocation8_spill] sm:$0xff] }
 0x359   : > { %v9345_v48 = vpop.f32.mrf.mxu0  ;;  %4064 = vmatpush.msrb.mxu2 %v6957_v17 }
 0x35a   : > { %v2373_v26 = vmul.f32 %v9350_v46, %v2324_v10  ;;  %3761 = vmatmul.f32.gmra.mxu3 %v9343_v5 }
 0x35b   : > { %v9357_v20 = vpop.f32.mrf.mxu2  ;;  %4065 = vmatpush.msrb.mxu2 %v6956_v58 }
 0x35c   : > { %12032 = vst [vmem:[#allocation38_spill] sm:$0xff] %v9357_v20  ;;  %v2409_v49 = vadd.f32 %v9320_v57, %v2373_v26  ;;  %3880 = vmatmul.f32.gmra.mxu0 %v9122_v44  ;;  %v1991_v44 = vadd.f32 %v9003_v34, %v12034_v4  ;;  %v6955_v26 = vld [vmem:[%s11817_s1 + $0x718] sm:$0xff]  ;;  %v6954_v34 = vld [vmem:[%s11817_s1 + $0x710] sm:$0xff] }
 0x35d   : > { %v2213_v53 = vpop.f32.mrf.mxu3  ;;  %v9365_v10 = vpop.f32.mrf.mxu1  ;;  %4066 = vmatpush.msrb.mxu2 %v6955_v26 }
 0x35e   : > { %12033 = vst [vmem:[#allocation41_spill] sm:$0xff] %v9365_v10  ;;  %v2441_v56 = vmax.f32 %v2409_v49, 0.0  ;;  %v2214_v12 = vadd.f32 %v2213_v53, %v2101_v32  ;;  %v9379_v32 = vld [vmem:[#allocation2 + $0x82] sm:$0xff]  ;;  %v2104_v53 = vadd.f32 %v8987_v41, %v1991_v44 }
 0x35f   : > { %v9370_v20 = vld [vmem:[#allocation2 + $0x138] sm:$0xff]  ;;  %4067 = vmatpush.msrb.mxu2 %v6954_v34  ;;  %v6952_v34 = vld [vmem:[%s11817_s1 + $0x700] sm:$0xff]  ;;  %v12037_v41 = vld [vmem:[#allocation11_spill] sm:$0xff] }
 0x360   : > { %2473 = vst [vmem:[#allocation2 + $0x141] sm:$0xff] %v2441_v56  ;;  %v2327_v40 = vadd.f32 %v9292_v31, %v2214_v12  ;;  %3583 = vmatmul.f32.gmra.mxu1 %v9370_v20  ;;  %3699 = vmatmul.f32.gmra.mxu2 %v2441_v56  ;;  %v6953_v12 = vld [vmem:[%s11817_s1 + $0x708] sm:$0xff] }
 0x361   : > { %v9381_v49 = vpop.f32.mrf.mxu0  ;;  %4068 = vmatpush.msrb.mxu2 %v6953_v12 }
 0x362   : > { %v2374_v17 = vmul.f32 %v9350_v46, %v2327_v40  ;;  %3764 = vmatmul.f32.gmra.mxu3 %v9379_v32 }
 0x363   : > { %v9388_v31 = vpop.f32.mrf.mxu2  ;;  %4069 = vmatpush.msrb.mxu2 %v6952_v34 }
 0x364   : > { %12035 = vst [vmem:[#allocation40_spill] sm:$0xff] %v9388_v31  ;;  %v2410_v56 = vadd.f32 %v9320_v57, %v2374_v17  ;;  %3883 = vmatmul.f32.gmra.mxu0 %v9133_v1  ;;  %v1994_v1 = vadd.f32 %v9052_v61, %v12037_v41  ;;  %v6936_v17 = vld [vmem:[%s11817_s1 + $0x680] sm:$0xff] }
 0x365   : > { %v2216_v58 = vpop.f32.mrf.mxu3  ;;  %v9396_v4 = vpop.f32.mrf.mxu1  ;;  %3956 = vmatpush.msrb.mxu1 %v6936_v17  ;;  %v12039_v17 = vld [vmem:[#allocation31_spill] sm:$0xff] }
 0x366   : > { %12036 = vst [vmem:[#allocation42_spill] sm:$0xff] %v9396_v4  ;;  %v2442_v40 = vmax.f32 %v2410_v56, 0.0  ;;  %v2217_v26 = vadd.f32 %v2216_v58, %v2104_v53  ;;  %v9410_v53 = vld [vmem:[#allocation2 + $0x92] sm:$0xff]  ;;  %v2107_v61 = vadd.f32 %v9041_v62, %v1994_v1 }
 0x367   : > { %v9401_v31 = vld [vmem:[#allocation2 + $0x140] sm:$0xff]  ;;  %v6983_v62 = vld [vmem:[%s11817_s1 + $0x7f8] sm:$0xff] }
 0x368   : > { %2474 = vst [vmem:[#allocation2 + $0x151] sm:$0xff] %v2442_v40  ;;  %v2330_v44 = vadd.f32 %v9310_v55, %v2217_v26  ;;  %3586 = vmatmul.f32.gmra.mxu1 %v9401_v31  ;;  %3702 = vmatmul.f32.gmra.mxu2 %v2442_v40  ;;  %v7015_v1 = vld [vmem:[%s11817_s1 + $0x8f8] sm:$0xff] }
 0x369   : > { %v2338_v56 = vpop.f32.mrf.mxu0  ;;  %4167 = vmatpush.msra.mxu3 %v6983_v62  ;;  %4393 = vmatpush.msra.mxu1 %v7015_v1 }
 0x36a   : > { %v2375_v12 = vmul.f32 %v9350_v46, %v2330_v44  ;;  %3767 = vmatmul.f32.gmra.mxu3 %v9410_v53  ;;  %v1997_v44 = vadd.f32 %v9089_v6, %v12039_v17 }
 0x36b   : > { %v9414_v58 = vpop.f32.mrf.mxu2 }
 0x36c   : > { %12038 = vst [vmem:[#allocation43_spill] sm:$0xff] %v9414_v58  ;;  %v2411_v55 = vadd.f32 %v9320_v57, %v2375_v12  ;;  %3886 = vmatmul.f32.gmra.mxu0 %v9152_v7  ;;  %v6999_v7 = vld [vmem:[%s11817_s1 + $0x878] sm:$0xff] }
 0x36d   : > { %v2219_v40 = vpop.f32.mrf.mxu3  ;;  %v9419_v26 = vpop.f32.mrf.mxu1  ;;  %v9436_v12 = vld [vmem:[#allocation2 + $0x9a] sm:$0xff]  ;;  %4280 = vmatpush.msra.mxu0 %v6999_v7 }
 0x36e   : > { %v2443_v34 = vmax.f32 %v2411_v55, 0.0  ;;  %v2220_v41 = vadd.f32 %v2219_v40, %v2107_v61  ;;  %v2110_v55 = vadd.f32 %v9085_v60, %v1997_v44  ;;  %v12040_v7 = vld [vmem:[#allocation13_spill] sm:$0xff] }
 0x36f   : > { %v9421_v4 = vld [vmem:[#allocation2 + $0x150] sm:$0xff]  ;;  %v2000_v1 = vadd.f32 %v9102_v11, %v12040_v7 }
 0x370   : > { %2475 = vst [vmem:[#allocation2 + $0x159] sm:$0xff] %v2443_v34  ;;  %v2333_v10 = vadd.f32 %v9345_v48, %v2220_v41  ;;  %3589 = vmatmul.f32.gmra.mxu1 %v9421_v4  ;;  %3705 = vmatmul.f32.gmra.mxu2 %v2443_v34 }
 0x371   : > { %v2341_v6 = vpop.f32.mrf.mxu0 }
 0x372   : > { %v2376_v48 = vmul.f32 %v9350_v46, %v2333_v10  ;;  %3770 = vmatmul.f32.gmra.mxu3 %v9436_v12  ;;  %v6982_v10 = vld [vmem:[%s11817_s1 + $0x7f0] sm:$0xff] }
 0x373   : > { %v9440_v61 = vpop.f32.mrf.mxu2  ;;  %4168 = vmatpush.msra.mxu3 %v6982_v10  ;;  %v6998_v10 = vld [vmem:[%s11817_s1 + $0x870] sm:$0xff] }
 0x374   : > { %v2412_v40 = vadd.f32 %v9320_v57, %v2376_v48  ;;  %3889 = vmatmul.f32.gmra.mxu0 %v9165_v14  ;;  %v9456_v14 = vld [vmem:[#allocation2 + $0xaa] sm:$0xff] }
 0x375   : > { %v2222_v34 = vpop.f32.mrf.mxu3  ;;  %v9445_v41 = vpop.f32.mrf.mxu1  ;;  %4281 = vmatpush.msra.mxu0 %v6998_v10 }
 0x376   : > { %v2444_v17 = vmax.f32 %v2412_v40, 0.0  ;;  %v2223_v58 = vadd.f32 %v2222_v34, %v2110_v55  ;;  %v2113_v40 = vadd.f32 %v9100_v42, %v2000_v1  ;;  %v9478_v1 = vld [vmem:[#allocation2 + $0xb2] sm:$0xff] }
 0x377   : > { %v9450_v62 = vld [vmem:[#allocation2 + $0x158] sm:$0xff] }
 0x378   : > { %2476 = vst [vmem:[#allocation2 + $0x169] sm:$0xff] %v2444_v17  ;;  %v2336_v60 = vadd.f32 %v9381_v49, %v2223_v58  ;;  %3592 = vmatmul.f32.gmra.mxu1 %v9450_v62  ;;  %3708 = vmatmul.f32.gmra.mxu2 %v2444_v17 }
 0x379   : > { %v3845_v44 = vpop.f32.mrf.mxu0 }
 0x37a   : > { %v2377_v48 = vmul.f32 %v9350_v46, %v2336_v60  ;;  %3773 = vmatmul.f32.gmra.mxu3 %v9456_v14  ;;  %v12042_v60 = vld [vmem:[#allocation37_spill] sm:$0xff] }
 0x37b   : > { %v9460_v55 = vpop.f32.mrf.mxu2 }
 0x37c   : > { %12041 = vst [vmem:[#allocation44_spill] sm:$0xff] %v9460_v55  ;;  %v2413_v34 = vadd.f32 %v9320_v57, %v2377_v48  ;;  %3892 = vmatmul.f32.gmra.mxu0 %v9187_v39  ;;  %v2003_v55 = vadd.f32 %v9127_v38, %v12042_v60  ;;  %v7014_v39 = vld [vmem:[%s11817_s1 + $0x8f0] sm:$0xff]  ;;  %v6981_v60 = vld [vmem:[%s11817_s1 + $0x7e8] sm:$0xff] }
 0x37d   : > { %v2225_v11 = vpop.f32.mrf.mxu3  ;;  %v9465_v49 = vpop.f32.mrf.mxu1  ;;  %4394 = vmatpush.msra.mxu1 %v7014_v39  ;;  %4169 = vmatpush.msra.mxu3 %v6981_v60 }
 0x37e   : > { %v2445_v58 = vmax.f32 %v2413_v34, 0.0  ;;  %v2226_v17 = vadd.f32 %v2225_v11, %v2113_v40  ;;  %v2116_v38 = vadd.f32 %v9120_v63, %v2003_v55  ;;  %v9496_v63 = vld [vmem:[#allocation2 + $0xc2] sm:$0xff] }
 0x37f   : > { %v9470_v7 = vld [vmem:[#allocation2 + $0x168] sm:$0xff] }
 0x380   : > { %2477 = vst [vmem:[#allocation2 + $0x171] sm:$0xff] %v2445_v58  ;;  %v2339_v42 = vadd.f32 %v2338_v56, %v2226_v17  ;;  %3595 = vmatmul.f32.gmra.mxu1 %v9470_v7  ;;  %3711 = vmatmul.f32.gmra.mxu2 %v2445_v58 }
 0x381   : > { %v3848_v48 = vpop.f32.mrf.mxu0 }
 0x382   : > { %v2378_v40 = vmul.f32 %v9350_v46, %v2339_v42  ;;  %3776 = vmatmul.f32.gmra.mxu3 %v9478_v1 }
 0x383   : > { %v9482_v34 = vpop.f32.mrf.mxu2 }
 0x384   : > { %v2414_v56 = vadd.f32 %v9320_v57, %v2378_v40  ;;  %3895 = vmatmul.f32.gmra.mxu0 %v9203_v25 }
 0x385   : > { %v2228_v11 = vpop.f32.mrf.mxu3  ;;  %v9487_v58 = vpop.f32.mrf.mxu1 }
 0x386   : > { %v2446_v17 = vmax.f32 %v2414_v56, 0.0  ;;  %v2229_v10 = vadd.f32 %v2228_v11, %v2116_v38  ;;  %v3620_v38 = vadd.f32 %v9135_v21, %v9146_v0  ;;  %v7013_v21 = vld [vmem:[%s11817_s1 + $0x8e8] sm:$0xff] }
 0x387   : > { %v9492_v42 = vld [vmem:[#allocation2 + $0x170] sm:$0xff]  ;;  %4395 = vmatpush.msra.mxu1 %v7013_v21 }
 0x388   : > { %2478 = vst [vmem:[#allocation2 + $0x181] sm:$0xff] %v2446_v17  ;;  %v2342_v39 = vadd.f32 %v2341_v6, %v2229_v10  ;;  %3598 = vmatmul.f32.gmra.mxu1 %v9492_v42  ;;  %4070 = vmatmul.f32.vlgmr.msrb.gmra.mxu2 %v9176_v28  ;;  %v2736_v10 = vld [vmem:[#allocation2 + $0x19] sm:$0xff] }
 0x389   : > { %v3851_v25 = vpop.f32.mrf.mxu0 }
 0x38a   : > { %v2379_v55 = vmul.f32 %v9350_v46, %v2342_v39  ;;  %3779 = vmatmul.f32.gmra.mxu3 %v9496_v63  ;;  %v6997_v46 = vld [vmem:[%s11817_s1 + $0x868] sm:$0xff]  ;;  %v3623_v39 = vadd.f32 %v9157_v22, %v9160_v52 }
 0x38b   : > { %v9500_v40 = vpop.f32.mrf.mxu2  ;;  %4282 = vmatpush.msra.mxu0 %v6997_v46 }
 0x38c   : > { %v2415_v56 = vadd.f32 %v9320_v57, %v2379_v55  ;;  %3898 = vmatmul.f32.gmra.mxu0 %v9225_v18  ;;  %v9517_v18 = vld [vmem:[#allocation2 + $0xca] sm:$0xff] }
 0x38d   : > { %v9506_v6 = vpop.f32.mrf.mxu1  ;;  %v3732_v11 = vpop.f32.mrf.mxu3 }
 0x38e   : > { %v2447_v28 = vmax.f32 %v2415_v56, 0.0  ;;  %v3733_v17 = vadd.f32 %v3732_v11, %v3620_v38  ;;  %v2737_v56 = vld [vmem:[#allocation2 + $0x21] sm:$0xff] }
 0x390   : > { %2479 = vst [vmem:[#allocation2 + $0x189] sm:$0xff] %v2447_v28  ;;  %3957 = vmatmul.f32.vlgmr.msrb.gmra.mxu1 %v2736_v10  ;;  %4073 = vmatmul.f32.gmra.mxu2 %v9192_v37  ;;  %v9515_v0 = vadd.f32 %v3845_v44, %v3733_v17  ;;  %v6980_v44 = vld [vmem:[%s11817_s1 + $0x7e0] sm:$0xff] }
 0x391   : > { %v3854_v57 = vpop.f32.mrf.mxu0  ;;  %4170 = vmatpush.msra.mxu3 %v6980_v44  ;;  %v9533_v28 = vld [vmem:[#allocation2 + $0xda] sm:$0xff] }
 0x392   : > { %3782 = vmatmul.f32.gmra.mxu3 %v9517_v18 }
 0x393   : > { %v9520_v60 = vpop.f32.mrf.mxu2 }
 0x394   : > { %3901 = vmatmul.f32.gmra.mxu0 %v9241_v33  ;;  %v3626_v33 = vadd.f32 %v9180_v36, %v9185_v45  ;;  %v7012_v36 = vld [vmem:[%s11817_s1 + $0x8e0] sm:$0xff] }
 0x395   : > { %v9525_v37 = vpop.f32.mrf.mxu1  ;;  %v3735_v55 = vpop.f32.mrf.mxu3  ;;  %4396 = vmatpush.msra.mxu1 %v7012_v36 }
 0x396   : > { %v3736_v38 = vadd.f32 %v3735_v55, %v3623_v39  ;;  %v3629_v55 = vadd.f32 %v9196_v16, %v9201_v8  ;;  %v9574_v16 = vld [vmem:[#allocation2 + $0xf2] sm:$0xff] }
 0x398   : > { %3960 = vmatmul.f32.gmra.mxu1 %v2737_v56  ;;  %4076 = vmatmul.f32.gmra.mxu2 %v9214_v24  ;;  %v9531_v11 = vadd.f32 %v3848_v48, %v3736_v38  ;;  %v6996_v24 = vld [vmem:[%s11817_s1 + $0x860] sm:$0xff]  ;;  %v9546_v48 = vld [vmem:[#allocation2 + $0x31] sm:$0xff] }
 0x399   : > { %v3857_v22 = vpop.f32.mrf.mxu0  ;;  %4283 = vmatpush.msra.mxu0 %v6996_v24  ;;  %v9568_v56 = vld [vmem:[#allocation2 + $0x39] sm:$0xff] }
 0x39a   : > { %3785 = vmatmul.f32.gmra.mxu3 %v9533_v28 }
 0x39b   : > { %v9536_v52 = vpop.f32.mrf.mxu2 }
 0x39c   : > { %3904 = vmatmul.f32.gmra.mxu0 %v9263_v35  ;;  %v9555_v35 = vld [vmem:[#allocation2 + $0xe2] sm:$0xff] }
 0x39d   : > { %v9541_v17 = vpop.f32.mrf.mxu1  ;;  %v3738_v46 = vpop.f32.mrf.mxu3 }
 0x39e   : > { %v3739_v10 = vadd.f32 %v3738_v46, %v3626_v33  ;;  %v3632_v46 = vadd.f32 %v9218_v54, %v9223_v23  ;;  %v7011_v54 = vld [vmem:[%s11817_s1 + $0x8d8] sm:$0xff] }
 0x39f   : > { %4397 = vmatpush.msra.mxu1 %v7011_v54 }
 0x3a0   : > { %3963 = vmatmul.f32.gmra.mxu1 %v9546_v48  ;;  %4079 = vmatmul.f32.gmra.mxu2 %v9230_v43  ;;  %v9553_v45 = vadd.f32 %v3851_v25, %v3739_v10  ;;  %v6979_v25 = vld [vmem:[%s11817_s1 + $0x7d8] sm:$0xff] }
 0x3a1   : > { %v3860_v21 = vpop.f32.mrf.mxu0  ;;  %4171 = vmatpush.msra.mxu3 %v6979_v25 }
 0x3a2   : > { %3788 = vmatmul.f32.gmra.mxu3 %v9555_v35 }
 0x3a3   : > { %v9558_v39 = vpop.f32.mrf.mxu2 }
 0x3a4   : > { %3907 = vmatmul.f32.gmra.mxu0 %v9279_v50 }
 0x3a5   : > { %v9563_v43 = vpop.f32.mrf.mxu1  ;;  %v3741_v38 = vpop.f32.mrf.mxu3 }
 0x3a6   : > { %v3742_v44 = vadd.f32 %v3741_v38, %v3629_v55 }
 0x3a8   : > { %3966 = vmatmul.f32.gmra.mxu1 %v9568_v56  ;;  %4082 = vmatmul.f32.gmra.mxu2 %v9252_v29  ;;  %v9572_v33 = vadd.f32 %v3854_v57, %v3742_v44  ;;  %v6995_v29 = vld [vmem:[%s11817_s1 + $0x858] sm:$0xff]  ;;  %v9587_v57 = vld [vmem:[#allocation2 + $0x49] sm:$0xff] }
 0x3a9   : > { %v3863_v8 = vpop.f32.mrf.mxu0  ;;  %4284 = vmatpush.msra.mxu0 %v6995_v29  ;;  %v12044_v44 = vld [vmem:[#allocation28_spill] sm:$0xff] }
 0x3aa   : > { %3791 = vmatmul.f32.gmra.mxu3 %v9574_v16  ;;  %v3635_v25 = vadd.f32 %v12044_v44, %v9239_v51  ;;  %v9615_v51 = vld [vmem:[#allocation2 + $0x10a] sm:$0xff] }
 0x3ab   : > { %v9577_v50 = vpop.f32.mrf.mxu2  ;;  %v12047_v44 = vld [vmem:[#allocation32_spill] sm:$0xff] }
 0x3ac   : > { %3910 = vmatmul.f32.gmra.mxu0 %v9303_v47  ;;  %v9596_v47 = vld [vmem:[#allocation2 + $0xfa] sm:$0xff] }
 0x3ad   : > { %v9582_v10 = vpop.f32.mrf.mxu1  ;;  %v3744_v24 = vpop.f32.mrf.mxu3 }
 0x3ae   : > { %v3745_v36 = vadd.f32 %v3744_v24, %v3632_v46 }
 0x3b0   : > { %3969 = vmatmul.f32.gmra.mxu1 %v9587_v57  ;;  %4085 = vmatmul.f32.gmra.mxu2 %v9268_v9  ;;  %v9594_v23 = vadd.f32 %v3857_v22, %v3745_v36  ;;  %v6978_v22 = vld [vmem:[%s11817_s1 + $0x7d0] sm:$0xff] }
 0x3b1   : > { %v3866_v55 = vpop.f32.mrf.mxu0  ;;  %v9609_v36 = vld [vmem:[#allocation2 + $0x51] sm:$0xff]  ;;  %4172 = vmatpush.msra.mxu3 %v6978_v22 }
 0x3b2   : > { %3794 = vmatmul.f32.gmra.mxu3 %v9596_v47 }
 0x3b3   : > { %v9599_v38 = vpop.f32.mrf.mxu2 }
 0x3b4   : > { %12043 = vst [vmem:[#allocation45_spill] sm:$0xff] %v9599_v38  ;;  %3913 = vmatmul.f32.gmra.mxu0 %v9332_v2 }
 0x3b5   : > { %v9604_v9 = vpop.f32.mrf.mxu1  ;;  %v3747_v46 = vpop.f32.mrf.mxu3 }
 0x3b6   : > { %v3748_v24 = vadd.f32 %v3747_v46, %v3635_v25  ;;  %v3638_v25 = vadd.f32 %v12047_v44, %v9261_v3  ;;  %v7010_v3 = vld [vmem:[%s11817_s1 + $0x8d0] sm:$0xff] }
 0x3b7   : > { %4398 = vmatpush.msra.mxu1 %v7010_v3 }
 0x3b8   : > { %3972 = vmatmul.f32.gmra.mxu1 %v9609_v36  ;;  %4088 = vmatmul.f32.gmra.mxu2 %v9290_v15  ;;  %v9613_v29 = vadd.f32 %v3860_v21, %v3748_v24  ;;  %v6994_v15 = vld [vmem:[%s11817_s1 + $0x850] sm:$0xff]  ;;  %v9628_v21 = vld [vmem:[#allocation2 + $0x61] sm:$0xff] }
 0x3b9   : > { %v3869_v2 = vpop.f32.mrf.mxu0  ;;  %4285 = vmatpush.msra.mxu0 %v6994_v15  ;;  %v9637_v24 = vld [vmem:[#allocation2 + $0x112] sm:$0xff]  ;;  %v12051_v15 = vld [vmem:[#allocation35_spill] sm:$0xff] }
 0x3ba   : > { %12045 = vst [vmem:[#allocation46_spill] sm:$0xff] %v9613_v29  ;;  %3797 = vmatmul.f32.gmra.mxu3 %v9615_v51 }
 0x3bb   : > { %v9618_v54 = vpop.f32.mrf.mxu2 }
 0x3bc   : > { %12046 = vst [vmem:[#allocation51_spill] sm:$0xff] %v9618_v54  ;;  %3916 = vmatmul.f32.gmra.mxu0 %v9370_v20 }
 0x3bd   : > { %v9623_v46 = vpop.f32.mrf.mxu1  ;;  %v3750_v22 = vpop.f32.mrf.mxu3 }
 0x3be   : > { %12048 = vst [vmem:[#allocation50_spill] sm:$0xff] %v9623_v46  ;;  %v3751_v38 = vadd.f32 %v3750_v22, %v3638_v25  ;;  %v12050_v22 = vld [vmem:[#allocation34_spill] sm:$0xff] }
 0x3bf   : > { %v3641_v54 = vadd.f32 %v12051_v15, %v12050_v22  ;;  %v9656_v22 = vld [vmem:[#allocation2 + $0x122] sm:$0xff] }
 0x3c0   : > { %3975 = vmatmul.f32.gmra.mxu1 %v9628_v21  ;;  %4091 = vmatmul.f32.gmra.mxu2 %v9308_v59  ;;  %v9635_v20 = vadd.f32 %v3863_v8, %v3751_v38  ;;  %v6977_v8 = vld [vmem:[%s11817_s1 + $0x7c8] sm:$0xff] }
 0x3c1   : > { %v3872_v44 = vpop.f32.mrf.mxu0  ;;  %v9650_v38 = vld [vmem:[#allocation2 + $0x69] sm:$0xff]  ;;  %4173 = vmatpush.msra.mxu3 %v6977_v8 }
 0x3c2   : > { %3800 = vmatmul.f32.gmra.mxu3 %v9637_v24 }
 0x3c3   : > { %v9640_v25 = vpop.f32.mrf.mxu2 }
 0x3c4   : > { %12049 = vst [vmem:[#allocation52_spill] sm:$0xff] %v9640_v25  ;;  %3919 = vmatmul.f32.gmra.mxu0 %v9401_v31 }
 0x3c5   : > { %v9645_v59 = vpop.f32.mrf.mxu1  ;;  %v3753_v46 = vpop.f32.mrf.mxu3 }
 0x3c6   : > { %v3754_v29 = vadd.f32 %v3753_v46, %v3641_v54  ;;  %v3644_v54 = vadd.f32 %v9296_v13, %v9301_v30  ;;  %v7009_v13 = vld [vmem:[%s11817_s1 + $0x8c8] sm:$0xff] }
 0x3c7   : > { %4399 = vmatpush.msra.mxu1 %v7009_v13 }
 0x3c8   : > { %3978 = vmatmul.f32.gmra.mxu1 %v9650_v38  ;;  %4094 = vmatmul.f32.gmra.mxu2 %v9343_v5  ;;  %v9654_v3 = vadd.f32 %v3866_v55, %v3754_v29  ;;  %v6993_v5 = vld [vmem:[%s11817_s1 + $0x848] sm:$0xff]  ;;  %v9669_v55 = vld [vmem:[#allocation2 + $0x79] sm:$0xff] }
 0x3c9   : > { %v3875_v31 = vpop.f32.mrf.mxu0  ;;  %4286 = vmatpush.msra.mxu0 %v6993_v5 }
 0x3ca   : > { %3803 = vmatmul.f32.gmra.mxu3 %v9656_v22 }
 0x3cb   : > { %v9659_v15 = vpop.f32.mrf.mxu2 }
 0x3cc   : > { %12052 = vst [vmem:[#allocation55_spill] sm:$0xff] %v9659_v15  ;;  %3922 = vmatmul.f32.gmra.mxu0 %v9421_v4  ;;  %v9678_v4 = vld [vmem:[#allocation2 + $0x12a] sm:$0xff] }
 0x3cd   : > { %v9664_v46 = vpop.f32.mrf.mxu1  ;;  %v3756_v8 = vpop.f32.mrf.mxu3 }
 0x3ce   : > { %v3757_v25 = vadd.f32 %v3756_v8, %v3644_v54  ;;  %v3647_v8 = vadd.f32 %v9314_v27, %v9327_v19  ;;  %v6992_v27 = vld [vmem:[%s11817_s1 + $0x840] sm:$0xff] }
 0x3cf   : > { %4287 = vmatpush.msra.mxu0 %v6992_v27 }
 0x3d0   : > { %3981 = vmatmul.f32.gmra.mxu1 %v9669_v55  ;;  %4097 = vmatmul.f32.gmra.mxu2 %v9379_v32  ;;  %v9676_v30 = vadd.f32 %v3869_v2, %v3757_v25  ;;  %v6976_v2 = vld [vmem:[%s11817_s1 + $0x7c0] sm:$0xff] }
 0x3d1   : > { %v9680_v29 = vpop.f32.mrf.mxu0  ;;  %v9693_v25 = vld [vmem:[#allocation2 + $0x81] sm:$0xff]  ;;  %4174 = vmatpush.msra.mxu3 %v6976_v2 }
 0x3d2   : > { %12053 = vst [vmem:[#allocation54_spill] sm:$0xff] %v9676_v30  ;;  %3806 = vmatmul.f32.gmra.mxu3 %v9678_v4 }
 0x3d3   : > { %v9683_v54 = vpop.f32.mrf.mxu2 }
 0x3d4   : > { %12054 = vst [vmem:[#allocation57_spill] sm:$0xff] %v9683_v54  ;;  %3925 = vmatmul.f32.gmra.mxu0 %v9450_v62  ;;  %v9702_v62 = vld [vmem:[#allocation2 + $0x13a] sm:$0xff]  ;;  %v6974_v54 = vld [vmem:[%s11817_s1 + $0x7b0] sm:$0xff] }
 0x3d5   : > { %v9688_v32 = vpop.f32.mrf.mxu1  ;;  %v3759_v5 = vpop.f32.mrf.mxu3 }
 0x3d6   : > { %12055 = vst [vmem:[#allocation59_spill] sm:$0xff] %v9688_v32  ;;  %v3760_v15 = vadd.f32 %v3759_v5, %v3647_v8  ;;  %v6975_v8 = vld [vmem:[%s11817_s1 + $0x7b8] sm:$0xff]  ;;  %v6990_v32 = vld [vmem:[%s11817_s1 + $0x830] sm:$0xff] }
 0x3d7   : > { %4175 = vmatpush.msra.mxu3 %v6975_v8  ;;  %v6973_v8 = vld [vmem:[%s11817_s1 + $0x7a8] sm:$0xff] }
 0x3d8   : > { %3984 = vmatmul.f32.gmra.mxu1 %v9693_v25  ;;  %4100 = vmatmul.f32.gmra.mxu2 %v9410_v53  ;;  %v9700_v19 = vadd.f32 %v3872_v44, %v3760_v15  ;;  %v6991_v53 = vld [vmem:[%s11817_s1 + $0x838] sm:$0xff]  ;;  %v12059_v15 = vld [vmem:[#allocation38_spill] sm:$0xff] }
 0x3d9   : > { %v9704_v13 = vpop.f32.mrf.mxu0  ;;  %4288 = vmatpush.msra.mxu0 %v6991_v53  ;;  %v12058_v44 = vld [vmem:[#allocation41_spill] sm:$0xff]  ;;  %4176 = vmatpush.msra.mxu3 %v6974_v54  ;;  %v6988_v54 = vld [vmem:[%s11817_s1 + $0x820] sm:$0xff] }
 0x3da   : > { %12056 = vst [vmem:[#allocation58_spill] sm:$0xff] %v9700_v19  ;;  %3809 = vmatmul.f32.gmra.mxu3 %v9702_v62  ;;  %v3650_v2 = vadd.f32 %v12059_v15, %v12058_v44  ;;  %v9729_v53 = vld [vmem:[#allocation2 + $0x91] sm:$0xff]  ;;  %v6972_v44 = vld [vmem:[%s11817_s1 + $0x7a0] sm:$0xff] }
 0x3db   : > { %v9713_v5 = vpop.f32.mrf.mxu2  ;;  %4289 = vmatpush.msra.mxu0 %v6990_v32  ;;  %v9747_v15 = vld [vmem:[#allocation2 + $0x142] sm:$0xff]  ;;  %4177 = vmatpush.msra.mxu3 %v6973_v8 }
 0x3dc   : > { %12057 = vst [vmem:[#allocation10_spill] sm:$0xff] %v9713_v5  ;;  %3928 = vmatmul.f32.gmra.mxu0 %v9470_v7  ;;  %v6989_v7 = vld [vmem:[%s11817_s1 + $0x828] sm:$0xff]  ;;  %v6987_v5 = vld [vmem:[%s11817_s1 + $0x818] sm:$0xff] }
 0x3dd   : > { %v9718_v27 = vpop.f32.mrf.mxu1  ;;  %v3762_v19 = vpop.f32.mrf.mxu3  ;;  %12062 = vst [vmem:[#allocation48_spill] sm:$0xff] %v9747_v15  ;;  %4290 = vmatpush.msra.mxu0 %v6989_v7  ;;  %4178 = vmatpush.msra.mxu3 %v6972_v44  ;;  %v6986_v44 = vld [vmem:[%s11817_s1 + $0x810] sm:$0xff] }
 0x3de   : > { %12060 = vst [vmem:[#allocation18_spill] sm:$0xff] %v9718_v27  ;;  %v3763_v30 = vadd.f32 %v3762_v19, %v3650_v2  ;;  %v7008_v19 = vld [vmem:[%s11817_s1 + $0x8c0] sm:$0xff] }
 0x3df   : > { %4400 = vmatpush.msra.mxu1 %v7008_v19  ;;  %4291 = vmatpush.msra.mxu0 %v6988_v54  ;;  %v6969_v54 = vld [vmem:[%s11817_s1 + $0x788] sm:$0xff] }
 0x3e0   : > { %3987 = vmatmul.f32.gmra.mxu1 %v9729_v53  ;;  %4103 = vmatmul.f32.gmra.mxu2 %v9436_v12  ;;  %v9745_v32 = vadd.f32 %v3875_v31, %v3763_v30  ;;  %v6971_v12 = vld [vmem:[%s11817_s1 + $0x798] sm:$0xff]  ;;  %v12064_v31 = vld [vmem:[#allocation42_spill] sm:$0xff]  ;;  %v12065_v30 = vld [vmem:[#allocation40_spill] sm:$0xff] }
 0x3e1   : > { %v9749_v2 = vpop.f32.mrf.mxu0  ;;  %4179 = vmatpush.msra.mxu3 %v6971_v12  ;;  %4292 = vmatpush.msra.mxu0 %v6987_v5  ;;  %v6968_v5 = vld [vmem:[%s11817_s1 + $0x780] sm:$0xff] }
 0x3e2   : > { %12061 = vst [vmem:[#allocation47_spill] sm:$0xff] %v9745_v32  ;;  %3812 = vmatmul.f32.gmra.mxu3 %v9747_v15  ;;  %v3653_v32 = vadd.f32 %v12065_v30, %v12064_v31  ;;  %v6970_v15 = vld [vmem:[%s11817_s1 + $0x790] sm:$0xff]  ;;  %v9774_v31 = vld [vmem:[#allocation2 + $0x99] sm:$0xff] }
 0x3e3   : > { %v9758_v27 = vpop.f32.mrf.mxu2  ;;  %4180 = vmatpush.msra.mxu3 %v6970_v15  ;;  %4293 = vmatpush.msra.mxu0 %v6986_v44  ;;  %v9790_v15 = vld [vmem:[#allocation2 + $0x152] sm:$0xff]  ;;  %v12069_v44 = vld [vmem:[#allocation43_spill] sm:$0xff] }
 0x3e4   : > { %12063 = vst [vmem:[#allocation49_spill] sm:$0xff] %v9758_v27  ;;  %3931 = vmatmul.f32.gmra.mxu0 %v9492_v42  ;;  %v6985_v42 = vld [vmem:[%s11817_s1 + $0x808] sm:$0xff]  ;;  %v3656_v27 = vadd.f32 %v12069_v44, %v9419_v26  ;;  %v7007_v26 = vld [vmem:[%s11817_s1 + $0x8b8] sm:$0xff] }
 0x3e5   : > { %v9763_v8 = vpop.f32.mrf.mxu1  ;;  %v3765_v7 = vpop.f32.mrf.mxu3  ;;  %4181 = vmatpush.msra.mxu3 %v6969_v54  ;;  %4294 = vmatpush.msra.mxu0 %v6985_v42  ;;  %v7033_v54 = vld [vmem:[%s11817_s1 + $0x978] sm:$0xff]  ;;  %v9802_v42 = vld [vmem:[#allocation2 + $0xa9] sm:$0xff] }
 0x3e6   : > { %12066 = vst [vmem:[#allocation53_spill] sm:$0xff] %v9763_v8  ;;  %v3766_v19 = vadd.f32 %v3765_v7, %v3653_v32  ;;  %v6984_v32 = vld [vmem:[%s11817_s1 + $0x800] sm:$0xff]  ;;  %5653 = vmatpush.msra.mxu2 %v7033_v54  ;;  %4401 = vmatpush.msra.mxu1 %v7007_v26  ;;  %v2703_v44 = vld [vmem:[#allocation2 + $0x188] sm:$0xff] }
 0x3e7   : > { %4182 = vmatpush.msra.mxu3 %v6968_v5  ;;  %4295 = vmatpush.msra.mxu0 %v6984_v32  ;;  %v9812_v32 = vld [vmem:[#allocation2 + $0x15a] sm:$0xff] }
 0x3e8   : > { %3990 = vmatmul.f32.gmra.mxu1 %v9774_v31  ;;  %4106 = vmatmul.f32.gmra.mxu2 %v9456_v14  ;;  %v9788_v12 = vadd.f32 %v9680_v29, %v3766_v19  ;;  %v2702_v14 = vld [vmem:[#allocation2 + $0x180] sm:$0xff] }
 0x3e9   : > { %v3887_v30 = vpop.f32.mrf.mxu0 }
 0x3ea   : > { %12067 = vst [vmem:[#allocation56_spill] sm:$0xff] %v9788_v12  ;;  %3815 = vmatmul.f32.gmra.mxu3 %v9790_v15 }
 0x3eb   : > { %v9793_v7 = vpop.f32.mrf.mxu2 }
 0x3ec   : > { %12068 = vst [vmem:[#allocation9_spill] sm:$0xff] %v9793_v7  ;;  %3934 = vmatmul.f32.gmra.mxu0 %v2702_v14  ;;  %v9821_v7 = vld [vmem:[#allocation2 + $0xb1] sm:$0xff] }
 0x3ed   : > { %v9797_v8 = vpop.f32.mrf.mxu1  ;;  %v3768_v29 = vpop.f32.mrf.mxu3 }
 0x3ee   : > { %v3769_v19 = vadd.f32 %v3768_v29, %v3656_v27  ;;  %v3659_v29 = vadd.f32 %v9440_v61, %v9445_v41  ;;  %v12073_v41 = vld [vmem:[#allocation44_spill] sm:$0xff] }
 0x3f0   : > { %3993 = vmatmul.f32.gmra.mxu1 %v9802_v42  ;;  %4109 = vmatmul.f32.gmra.mxu2 %v9478_v1  ;;  %v9810_v5 = vadd.f32 %v9704_v13, %v3769_v19  ;;  %v9828_v19 = vld [vmem:[#allocation2 + $0x16a] sm:$0xff] }
 0x3f1   : > { %v3890_v27 = vpop.f32.mrf.mxu0 }
 0x3f2   : > { %12070 = vst [vmem:[#allocation14_spill] sm:$0xff] %v9810_v5  ;;  %3818 = vmatmul.f32.gmra.mxu3 %v9812_v32 }
 0x3f3   : > { %v9815_v14 = vpop.f32.mrf.mxu2 }
 0x3f4   : > { %3937 = vmatmul.f32.gmra.mxu0 %v2703_v44  ;;  %v3662_v44 = vadd.f32 %v12073_v41, %v9465_v49  ;;  %v7006_v49 = vld [vmem:[%s11817_s1 + $0x8b0] sm:$0xff] }
 0x3f5   : > { %v9819_v1 = vpop.f32.mrf.mxu1  ;;  %v3771_v54 = vpop.f32.mrf.mxu3  ;;  %4402 = vmatpush.msra.mxu1 %v7006_v49 }
 0x3f6   : > { %v3772_v12 = vadd.f32 %v3771_v54, %v3659_v29 }
 0x3f8   : > { %3996 = vmatmul.f32.gmra.mxu1 %v9821_v7  ;;  %4112 = vmatmul.f32.gmra.mxu2 %v9496_v63  ;;  %v9826_v13 = vadd.f32 %v9749_v2, %v3772_v12  ;;  %v7032_v63 = vld [vmem:[%s11817_s1 + $0x970] sm:$0xff]  ;;  %v9841_v2 = vld [vmem:[#allocation2 + $0xc1] sm:$0xff] }
 0x3f9   : > { %v3893_v26 = vpop.f32.mrf.mxu0  ;;  %5654 = vmatpush.msra.mxu2 %v7032_v63  ;;  %v9850_v12 = vld [vmem:[#allocation2 + $0x172] sm:$0xff] }
 0x3fa   : > { %12071 = vst [vmem:[#allocation15_spill] sm:$0xff] %v9826_v13  ;;  %3821 = vmatmul.f32.gmra.mxu3 %v9828_v19 }
 0x3fb   : > { %v9831_v61 = vpop.f32.mrf.mxu2 }
 0x3fc   : > { %12072 = vst [vmem:[#allocation19_spill] sm:$0xff] %v9831_v61  ;;  %4296 = vmatmul.f32.vlgmr.msra.gmra.mxu0 %v9546_v48  ;;  %v9860_v61 = vld [vmem:[#allocation2 + $0xc9] sm:$0xff] }
 0x3fd   : > { %v9836_v29 = vpop.f32.mrf.mxu1  ;;  %v3774_v54 = vpop.f32.mrf.mxu3 }
 0x3fe   : > { %v3775_v5 = vadd.f32 %v3774_v54, %v3662_v44  ;;  %v3665_v54 = vadd.f32 %v9482_v34, %v9487_v58  ;;  %v3668_v34 = vadd.f32 %v9500_v40, %v9506_v6  ;;  %v7005_v40 = vld [vmem:[%s11817_s1 + $0x8a8] sm:$0xff] }
 0x3ff   : > { %4403 = vmatpush.msra.mxu1 %v7005_v40 }
 0x400   : > { %3999 = vmatmul.f32.gmra.mxu1 %v9841_v2  ;;  %4115 = vmatmul.f32.gmra.mxu2 %v9517_v18  ;;  %v9848_v48 = vadd.f32 %v3887_v30, %v3775_v5  ;;  %v2864_v5 = vld [vmem:[#allocation2 + $0x30] sm:$0xff] }
 0x401   : > { %v3896_v41 = vpop.f32.mrf.mxu0 }
 0x402   : > { %12074 = vst [vmem:[#allocation24_spill] sm:$0xff] %v9848_v48  ;;  %3824 = vmatmul.f32.gmra.mxu3 %v9850_v12 }
 0x403   : > { %v9853_v44 = vpop.f32.mrf.mxu2 }
 0x404   : > { %4299 = vmatmul.f32.gmra.mxu0 %v9568_v56 }
 0x405   : > { %v9858_v18 = vpop.f32.mrf.mxu1  ;;  %v3777_v63 = vpop.f32.mrf.mxu3 }
 0x406   : > { %v3778_v13 = vadd.f32 %v3777_v63, %v3665_v54 }
 0x408   : > { %4002 = vmatmul.f32.gmra.mxu1 %v9860_v61  ;;  %4118 = vmatmul.f32.gmra.mxu2 %v9533_v28  ;;  %v9864_v30 = vadd.f32 %v3890_v27, %v3778_v13  ;;  %v7031_v28 = vld [vmem:[%s11817_s1 + $0x968] sm:$0xff]  ;;  %v9873_v27 = vld [vmem:[#allocation2 + $0xd9] sm:$0xff] }
 0x409   : > { %v3899_v49 = vpop.f32.mrf.mxu0  ;;  %5655 = vmatpush.msra.mxu2 %v7031_v28  ;;  %v2866_v28 = vld [vmem:[#allocation2 + $0x48] sm:$0xff] }
 0x40a   : > { %4183 = vmatmul.f32.vlgmr.msra.gmra.mxu3 %v2864_v5 }
 0x40b   : > { %v4071_v48 = vpop.f32.mrf.mxu2 }
 0x40c   : > { %4302 = vmatmul.f32.gmra.mxu0 %v9587_v57 }
 0x40d   : > { %v3780_v58 = vpop.f32.mrf.mxu3  ;;  %v3958_v56 = vpop.f32.mrf.mxu1 }
 0x40e   : > { %v3781_v54 = vadd.f32 %v3780_v58, %v3668_v34  ;;  %v3959_v63 = vadd.f32 %v3958_v56, %v9515_v0  ;;  %v2865_v0 = vld [vmem:[#allocation2 + $0x38] sm:$0xff]  ;;  %v3671_v34 = vadd.f32 %v9520_v60, %v9525_v37  ;;  %v3674_v37 = vadd.f32 %v9536_v52, %v9541_v17  ;;  %v7004_v52 = vld [vmem:[%s11817_s1 + $0x8a0] sm:$0xff] }
 0x40f   : > { %4404 = vmatpush.msra.mxu1 %v7004_v52 }
 0x410   : > { %4005 = vmatmul.f32.gmra.mxu1 %v9873_v27  ;;  %v9876_v13 = vadd.f32 %v4071_v48, %v3959_v63  ;;  %4121 = vmatmul.f32.gmra.mxu2 %v9555_v35  ;;  %v9882_v6 = vadd.f32 %v3893_v26, %v3781_v54  ;;  %v9888_v63 = vld [vmem:[#allocation2 + $0xe1] sm:$0xff] }
 0x411   : > { %v3902_v57 = vpop.f32.mrf.mxu0 }
 0x412   : > { %4186 = vmatmul.f32.gmra.mxu3 %v2865_v0 }
 0x413   : > { %v4074_v5 = vpop.f32.mrf.mxu2 }
 0x414   : > { %4305 = vmatmul.f32.gmra.mxu0 %v9609_v36 }
 0x415   : > { %v3783_v48 = vpop.f32.mrf.mxu3  ;;  %v3961_v58 = vpop.f32.mrf.mxu1 }
 0x416   : > { %v3784_v56 = vadd.f32 %v3783_v48, %v3671_v34  ;;  %v3962_v35 = vadd.f32 %v3961_v58, %v9531_v11  ;;  %v3677_v58 = vadd.f32 %v9558_v39, %v9563_v43  ;;  %v3680_v43 = vadd.f32 %v9577_v50, %v9582_v10  ;;  %v7003_v50 = vld [vmem:[%s11817_s1 + $0x898] sm:$0xff] }
 0x417   : > { %4405 = vmatpush.msra.mxu1 %v7003_v50 }
 0x418   : > { %4008 = vmatmul.f32.gmra.mxu1 %v9888_v63  ;;  %v9891_v26 = vadd.f32 %v4074_v5, %v3962_v35  ;;  %4124 = vmatmul.f32.gmra.mxu2 %v9574_v16  ;;  %v9894_v54 = vadd.f32 %v3896_v41, %v3784_v56  ;;  %v7030_v16 = vld [vmem:[%s11817_s1 + $0x960] sm:$0xff]  ;;  %v9903_v41 = vld [vmem:[#allocation2 + $0xf1] sm:$0xff] }
 0x419   : > { %v3905_v40 = vpop.f32.mrf.mxu0  ;;  %5656 = vmatpush.msra.mxu2 %v7030_v16 }
 0x41a   : > { %4189 = vmatmul.f32.gmra.mxu3 %v2866_v28 }
 0x41b   : > { %v4077_v60 = vpop.f32.mrf.mxu2 }
 0x41c   : > { %4308 = vmatmul.f32.gmra.mxu0 %v9628_v21 }
 0x41d   : > { %v3786_v11 = vpop.f32.mrf.mxu3  ;;  %v3964_v36 = vpop.f32.mrf.mxu1 }
 0x41e   : > { %v3787_v0 = vadd.f32 %v3786_v11, %v3674_v37  ;;  %v3965_v34 = vadd.f32 %v3964_v36, %v9553_v45  ;;  %v2867_v45 = vld [vmem:[#allocation2 + $0x50] sm:$0xff]  ;;  %v2868_v11 = vld [vmem:[#allocation2 + $0x60] sm:$0xff] }
 0x420   : > { %4011 = vmatmul.f32.gmra.mxu1 %v9903_v41  ;;  %v9906_v5 = vadd.f32 %v4077_v60, %v3965_v34  ;;  %4127 = vmatmul.f32.gmra.mxu2 %v9596_v47  ;;  %v9912_v17 = vadd.f32 %v3899_v49, %v3787_v0  ;;  %v9918_v60 = vld [vmem:[#allocation2 + $0xf9] sm:$0xff] }
 0x421   : > { %v3908_v21 = vpop.f32.mrf.mxu0 }
 0x422   : > { %4192 = vmatmul.f32.gmra.mxu3 %v2867_v45  ;;  %v12076_v45 = vld [vmem:[#allocation45_spill] sm:$0xff] }
 0x423   : > { %v4080_v48 = vpop.f32.mrf.mxu2 }
 0x424   : > { %4311 = vmatmul.f32.gmra.mxu0 %v9650_v38 }
 0x425   : > { %v3789_v56 = vpop.f32.mrf.mxu3  ;;  %v3967_v35 = vpop.f32.mrf.mxu1 }
 0x426   : > { %v3790_v28 = vadd.f32 %v3789_v56, %v3677_v58  ;;  %v3968_v47 = vadd.f32 %v3967_v35, %v9572_v33 }
 0x428   : > { %4014 = vmatmul.f32.gmra.mxu1 %v9918_v60  ;;  %v9921_v49 = vadd.f32 %v4080_v48, %v3968_v47  ;;  %4130 = vmatmul.f32.gmra.mxu2 %v9615_v51  ;;  %v9924_v37 = vadd.f32 %v3902_v57, %v3790_v28  ;;  %v7029_v51 = vld [vmem:[%s11817_s1 + $0x958] sm:$0xff]  ;;  %v9933_v57 = vld [vmem:[#allocation2 + $0x109] sm:$0xff]  ;;  %v3683_v48 = vadd.f32 %v12076_v45, %v9604_v9  ;;  %v12079_v9 = vld [vmem:[#allocation50_spill] sm:$0xff] }
 0x429   : > { %v3911_v36 = vpop.f32.mrf.mxu0  ;;  %5657 = vmatpush.msra.mxu2 %v7029_v51  ;;  %v9948_v47 = vld [vmem:[#allocation2 + $0x111] sm:$0xff] }
 0x42a   : > { %4195 = vmatmul.f32.gmra.mxu3 %v2868_v11 }
 0x42b   : > { %v4083_v39 = vpop.f32.mrf.mxu2 }
 0x42c   : > { %4314 = vmatmul.f32.gmra.mxu0 %v9669_v55 }
 0x42d   : > { %v3792_v33 = vpop.f32.mrf.mxu3  ;;  %v3970_v38 = vpop.f32.mrf.mxu1 }
 0x42e   : > { %v3793_v0 = vadd.f32 %v3792_v33, %v3680_v43  ;;  %v3971_v34 = vadd.f32 %v3970_v38, %v9594_v23  ;;  %v2869_v23 = vld [vmem:[#allocation2 + $0x68] sm:$0xff] }
 0x430   : > { %4017 = vmatmul.f32.gmra.mxu1 %v9933_v57  ;;  %v9936_v16 = vadd.f32 %v4083_v39, %v3971_v34  ;;  %4133 = vmatmul.f32.gmra.mxu2 %v9637_v24  ;;  %v9942_v10 = vadd.f32 %v3905_v40, %v3793_v0  ;;  %v12077_v24 = vld [vmem:[#allocation46_spill] sm:$0xff]  ;;  %v2870_v39 = vld [vmem:[#allocation2 + $0x78] sm:$0xff] }
 0x431   : > { %v3914_v55 = vpop.f32.mrf.mxu0 }
 0x432   : > { %12075 = vst [vmem:[#allocation21_spill] sm:$0xff] %v9942_v10  ;;  %4198 = vmatmul.f32.gmra.mxu3 %v2869_v23  ;;  %v7095_v10 = vld [vmem:[%s11817_s1 + $0xb68] sm:$0xff] }
 0x433   : > { %v4086_v52 = vpop.f32.mrf.mxu2 }
 0x434   : > { %4317 = vmatmul.f32.gmra.mxu0 %v9693_v25  ;;  %v12080_v25 = vld [vmem:[#allocation51_spill] sm:$0xff] }
 0x435   : > { %v3795_v58 = vpop.f32.mrf.mxu3  ;;  %v3973_v56 = vpop.f32.mrf.mxu1  ;;  %v3686_v33 = vadd.f32 %v12080_v25, %v12079_v9  ;;  %v2872_v25 = vld [vmem:[#allocation2 + $0x90] sm:$0xff] }
 0x436   : > { %v3796_v35 = vadd.f32 %v3795_v58, %v3683_v48  ;;  %v3974_v28 = vadd.f32 %v3973_v56, %v12077_v24  ;;  %v12082_v48 = vld [vmem:[#allocation52_spill] sm:$0xff] }
 0x437   : > { %v3689_v58 = vadd.f32 %v12082_v48, %v9645_v59 }
 0x438   : > { %4020 = vmatmul.f32.gmra.mxu1 %v9948_v47  ;;  %v9951_v40 = vadd.f32 %v4086_v52, %v3974_v28  ;;  %4136 = vmatmul.f32.gmra.mxu2 %v9656_v22  ;;  %v9954_v11 = vadd.f32 %v3908_v21, %v3796_v35  ;;  %v7028_v22 = vld [vmem:[%s11817_s1 + $0x950] sm:$0xff]  ;;  %v9963_v21 = vld [vmem:[#allocation2 + $0x121] sm:$0xff] }
 0x439   : > { %v3917_v43 = vpop.f32.mrf.mxu0  ;;  %5658 = vmatpush.msra.mxu2 %v7028_v22  ;;  %v9978_v28 = vld [vmem:[#allocation2 + $0x129] sm:$0xff] }
 0x43a   : > { %12078 = vst [vmem:[#allocation12_spill] sm:$0xff] %v9954_v11  ;;  %4201 = vmatmul.f32.gmra.mxu3 %v2870_v39  ;;  %v12087_v22 = vld [vmem:[#allocation59_spill] sm:$0xff] }
 0x43b   : > { %v4089_v38 = vpop.f32.mrf.mxu2 }
 0x43c   : > { %4320 = vmatmul.f32.gmra.mxu0 %v9729_v53  ;;  %v7002_v53 = vld [vmem:[%s11817_s1 + $0x890] sm:$0xff] }
 0x43d   : > { %v3798_v0 = vpop.f32.mrf.mxu3  ;;  %v3976_v34 = vpop.f32.mrf.mxu1  ;;  %4406 = vmatpush.msra.mxu1 %v7002_v53  ;;  %v12088_v53 = vld [vmem:[#allocation57_spill] sm:$0xff] }
 0x43e   : > { %v3799_v51 = vadd.f32 %v3798_v0, %v3686_v33  ;;  %v3977_v50 = vadd.f32 %v3976_v34, %v9635_v20  ;;  %v2871_v20 = vld [vmem:[#allocation2 + $0x80] sm:$0xff]  ;;  %v7027_v34 = vld [vmem:[%s11817_s1 + $0x948] sm:$0xff] }
 0x43f   : > { %5659 = vmatpush.msra.mxu2 %v7027_v34  ;;  %v10022_v34 = vld [vmem:[#allocation2 + $0x151] sm:$0xff] }
 0x440   : > { %4023 = vmatmul.f32.gmra.mxu1 %v9963_v21  ;;  %v9966_v23 = vadd.f32 %v4089_v38, %v3977_v50  ;;  %4139 = vmatmul.f32.gmra.mxu2 %v9678_v4  ;;  %v9972_v52 = vadd.f32 %v3911_v36, %v3799_v51  ;;  %v9994_v51 = vld [vmem:[#allocation2 + $0x139] sm:$0xff] }
 0x441   : > { %v3920_v45 = vpop.f32.mrf.mxu0 }
 0x442   : > { %12081 = vst [vmem:[#allocation33_spill] sm:$0xff] %v9972_v52  ;;  %4204 = vmatmul.f32.gmra.mxu3 %v2871_v20  ;;  %v3695_v20 = vadd.f32 %v12088_v53, %v12087_v22 }
 0x443   : > { %v4092_v39 = vpop.f32.mrf.mxu2 }
 0x444   : > { %4323 = vmatmul.f32.gmra.mxu0 %v9774_v31  ;;  %v12084_v31 = vld [vmem:[#allocation55_spill] sm:$0xff] }
 0x445   : > { %v3801_v56 = vpop.f32.mrf.mxu3  ;;  %v3979_v35 = vpop.f32.mrf.mxu1  ;;  %v3692_v33 = vadd.f32 %v12084_v31, %v9664_v46  ;;  %v7001_v46 = vld [vmem:[%s11817_s1 + $0x888] sm:$0xff] }
 0x446   : > { %v3802_v24 = vadd.f32 %v3801_v56, %v3689_v58  ;;  %v3980_v4 = vadd.f32 %v3979_v35, %v9654_v3  ;;  %4407 = vmatpush.msra.mxu1 %v7001_v46  ;;  %v10008_v35 = vld [vmem:[#allocation2 + $0x141] sm:$0xff]  ;;  %v12093_v46 = vld [vmem:[#allocation53_spill] sm:$0xff] }
 0x448   : > { %4026 = vmatmul.f32.gmra.mxu1 %v9978_v28  ;;  %v9981_v36 = vadd.f32 %v4092_v39, %v3980_v4  ;;  %4142 = vmatmul.f32.gmra.mxu2 %v9702_v62  ;;  %v9984_v9 = vadd.f32 %v3914_v55, %v3802_v24  ;;  %v12085_v62 = vld [vmem:[#allocation48_spill] sm:$0xff]  ;;  %v2873_v55 = vld [vmem:[#allocation2 + $0x98] sm:$0xff]  ;;  %v2874_v24 = vld [vmem:[#allocation2 + $0xa8] sm:$0xff] }
 0x449   : > { %v3923_v59 = vpop.f32.mrf.mxu0  ;;  %v12090_v39 = vld [vmem:[#allocation18_spill] sm:$0xff] }
 0x44a   : > { %12083 = vst [vmem:[#allocation30_spill] sm:$0xff] %v9984_v9  ;;  %4207 = vmatmul.f32.gmra.mxu3 %v2872_v25  ;;  %v12091_v25 = vld [vmem:[#allocation10_spill] sm:$0xff] }
 0x44b   : > { %v3698_v31 = vadd.f32 %v12091_v25, %v12090_v39  ;;  %v12096_v39 = vld [vmem:[#allocation9_spill] sm:$0xff] }
 0x44c   : > { %4326 = vmatmul.f32.gmra.mxu0 %v9802_v42  ;;  %v3704_v25 = vadd.f32 %v12096_v39, %v9797_v8  ;;  %v2877_v8 = vld [vmem:[#allocation2 + $0xc8] sm:$0xff]  ;;  %v7024_v39 = vld [vmem:[%s11817_s1 + $0x930] sm:$0xff] }
 0x44d   : > { %v3804_v3 = vpop.f32.mrf.mxu3  ;;  %v9989_v38 = vpop.f32.mrf.mxu1 }
 0x44e   : > { %v3805_v0 = vadd.f32 %v3804_v3, %v3692_v33 }
 0x450   : > { %4029 = vmatmul.f32.gmra.mxu1 %v9994_v51  ;;  %4145 = vmatmul.f32.gmra.mxu2 %v12085_v62  ;;  %v10001_v42 = vadd.f32 %v3917_v43, %v3805_v0  ;;  %v7026_v0 = vld [vmem:[%s11817_s1 + $0x940] sm:$0xff] }
 0x451   : > { %v3926_v50 = vpop.f32.mrf.mxu0  ;;  %5660 = vmatpush.msra.mxu2 %v7026_v0  ;;  %v10050_v0 = vld [vmem:[#allocation2 + $0x169] sm:$0xff] }
 0x452   : > { %12086 = vst [vmem:[#allocation39_spill] sm:$0xff] %v10001_v42  ;;  %4210 = vmatmul.f32.gmra.mxu3 %v2873_v55  ;;  %v12094_v55 = vld [vmem:[#allocation49_spill] sm:$0xff] }
 0x453   : > { %v3701_v22 = vadd.f32 %v12094_v55, %v12093_v46  ;;  %v10061_v55 = vld [vmem:[#allocation2 + $0x171] sm:$0xff] }
 0x454   : > { %4329 = vmatmul.f32.gmra.mxu0 %v9821_v7 }
 0x455   : > { %v3807_v48 = vpop.f32.mrf.mxu3  ;;  %v10006_v58 = vpop.f32.mrf.mxu1 }
 0x456   : > { %v3808_v56 = vadd.f32 %v3807_v48, %v3695_v20 }
 0x458   : > { %4032 = vmatmul.f32.gmra.mxu1 %v10008_v35  ;;  %4148 = vmatmul.f32.gmra.mxu2 %v9790_v15  ;;  %v10012_v43 = vadd.f32 %v3920_v45, %v3808_v56  ;;  %v7000_v15 = vld [vmem:[%s11817_s1 + $0x880] sm:$0xff]  ;;  %v2875_v45 = vld [vmem:[#allocation2 + $0xb0] sm:$0xff] }
 0x459   : > { %v3929_v4 = vpop.f32.mrf.mxu0  ;;  %4408 = vmatpush.msra.mxu1 %v7000_v15  ;;  %v2876_v56 = vld [vmem:[#allocation2 + $0xc0] sm:$0xff] }
 0x45a   : > { %12089 = vst [vmem:[#allocation17_spill] sm:$0xff] %v10012_v43  ;;  %4213 = vmatmul.f32.gmra.mxu3 %v2874_v24 }
 0x45c   : > { %4332 = vmatmul.f32.gmra.mxu0 %v9841_v2 }
 0x45d   : > { %v3810_v7 = vpop.f32.mrf.mxu3  ;;  %v10017_v33 = vpop.f32.mrf.mxu1 }
 0x45e   : > { %v3811_v3 = vadd.f32 %v3810_v7, %v3698_v31 }
 0x460   : > { %4035 = vmatmul.f32.gmra.mxu1 %v10022_v34  ;;  %4151 = vmatmul.f32.gmra.mxu2 %v9812_v32  ;;  %v10029_v2 = vadd.f32 %v3923_v59, %v3811_v3  ;;  %v10036_v32 = vld [vmem:[#allocation2 + $0x159] sm:$0xff] }
 0x461   : > { %v3932_v62 = vpop.f32.mrf.mxu0  ;;  %v7025_v3 = vld [vmem:[%s11817_s1 + $0x938] sm:$0xff] }
 0x462   : > { %12092 = vst [vmem:[#allocation4_spill] sm:$0xff] %v10029_v2  ;;  %4216 = vmatmul.f32.gmra.mxu3 %v2875_v45  ;;  %5661 = vmatpush.msra.mxu2 %v7025_v3 }
 0x464   : > { %4335 = vmatmul.f32.gmra.mxu0 %v9860_v61  ;;  %5662 = vmatpush.msra.mxu2 %v7024_v39 }
 0x465   : > { %v3813_v53 = vpop.f32.mrf.mxu3  ;;  %v10034_v20 = vpop.f32.mrf.mxu1 }
 0x466   : > { %v3814_v48 = vadd.f32 %v3813_v53, %v3701_v22  ;;  %v2830_v22 = vld [vmem:[#allocation2 + $0x182] sm:$0xff] }
 0x468   : > { %4038 = vmatmul.f32.gmra.mxu1 %v10036_v32  ;;  %4154 = vmatmul.f32.gmra.mxu2 %v9828_v19  ;;  %v10040_v59 = vadd.f32 %v3926_v50, %v3814_v48  ;;  %v12099_v48 = vld [vmem:[#allocation19_spill] sm:$0xff] }
 0x469   : > { %v3935_v24 = vpop.f32.mrf.mxu0 }
 0x46a   : > { %12095 = vst [vmem:[#allocation20_spill] sm:$0xff] %v10040_v59  ;;  %4219 = vmatmul.f32.gmra.mxu3 %v2876_v56  ;;  %v7054_v59 = vld [vmem:[%s11817_s1 + $0xa20] sm:$0xff] }
 0x46c   : > { %4338 = vmatmul.f32.gmra.mxu0 %v9873_v27  ;;  %v3707_v27 = vadd.f32 %v9815_v14, %v9819_v1  ;;  %v3710_v14 = vadd.f32 %v12099_v48, %v9836_v29  ;;  %v2879_v29 = vld [vmem:[#allocation2 + $0xe0] sm:$0xff]  ;;  %v2992_v48 = vld [vmem:[#allocation2 + $0x32] sm:$0xff] }
 0x46d   : > { %v3816_v61 = vpop.f32.mrf.mxu3  ;;  %v10045_v31 = vpop.f32.mrf.mxu1 }
 0x46e   : > { %v3817_v7 = vadd.f32 %v3816_v61, %v3704_v25  ;;  %v10074_v25 = vld [vmem:[#allocation2 + $0x181] sm:$0xff] }
 0x470   : > { %4041 = vmatmul.f32.gmra.mxu1 %v10050_v0  ;;  %4157 = vmatmul.f32.gmra.mxu2 %v9850_v12  ;;  %v10054_v19 = vadd.f32 %v3929_v4, %v3817_v7  ;;  %v2878_v4 = vld [vmem:[#allocation2 + $0xd8] sm:$0xff] }
 0x471   : > { %v3938_v50 = vpop.f32.mrf.mxu0 }
 0x472   : > { %12097 = vst [vmem:[#allocation16_spill] sm:$0xff] %v10054_v19  ;;  %4222 = vmatmul.f32.gmra.mxu3 %v2877_v8  ;;  %v2958_v19 = vld [vmem:[#allocation2 + $0x199] sm:$0xff] }
 0x474   : > { %4341 = vmatmul.f32.gmra.mxu0 %v9888_v63 }
 0x475   : > { %v3819_v15 = vpop.f32.mrf.mxu3  ;;  %v10059_v45 = vpop.f32.mrf.mxu1 }
 0x476   : > { %v3820_v46 = vadd.f32 %v3819_v15, %v3707_v27  ;;  %v10084_v15 = vld [vmem:[#allocation2 + $0x189] sm:$0xff] }
 0x478   : > { %4044 = vmatmul.f32.gmra.mxu1 %v10061_v55  ;;  %4160 = vmatmul.f32.gmra.mxu2 %v2830_v22  ;;  %v10064_v12 = vadd.f32 %v3932_v62, %v3820_v46  ;;  %v2831_v62 = vld [vmem:[#allocation2 + $0x18a] sm:$0xff] }
 0x479   : > { %v4297_v53 = vpop.f32.mrf.mxu0 }
 0x47a   : > { %12098 = vst [vmem:[#allocation5_spill] sm:$0xff] %v10064_v12  ;;  %4225 = vmatmul.f32.gmra.mxu3 %v2878_v4 }
 0x47c   : > { %4344 = vmatmul.f32.gmra.mxu0 %v9903_v41  ;;  %v3713_v41 = vadd.f32 %v9853_v44, %v9858_v18 }
 0x47d   : > { %v3822_v1 = vpop.f32.mrf.mxu3  ;;  %v10069_v63 = vpop.f32.mrf.mxu1 }
 0x47e   : > { %v3823_v56 = vadd.f32 %v3822_v1, %v3710_v14 }
 0x480   : > { %4047 = vmatmul.f32.gmra.mxu1 %v10074_v25  ;;  %4163 = vmatmul.f32.gmra.mxu2 %v2831_v62  ;;  %v10077_v61 = vadd.f32 %v3935_v24, %v3823_v56  ;;  %v2880_v24 = vld [vmem:[#allocation2 + $0xf0] sm:$0xff] }
 0x481   : > { %v4300_v7 = vpop.f32.mrf.mxu0 }
 0x482   : > { %12100 = vst [vmem:[#allocation23_spill] sm:$0xff] %v10077_v61  ;;  %4228 = vmatmul.f32.gmra.mxu3 %v2879_v29  ;;  %v2882_v29 = vld [vmem:[#allocation2 + $0x108] sm:$0xff]  ;;  %v2892_v61 = vld [vmem:[#allocation2 + $0x180] sm:$0xff] }
 0x484   : > { %4347 = vmatmul.f32.gmra.mxu0 %v9918_v60  ;;  %v7023_v60 = vld [vmem:[%s11817_s1 + $0x928] sm:$0xff] }
 0x485   : > { %v3825_v3 = vpop.f32.mrf.mxu3  ;;  %v10082_v8 = vpop.f32.mrf.mxu1  ;;  %5663 = vmatpush.msra.mxu2 %v7023_v60 }
 0x486   : > { %v3826_v27 = vadd.f32 %v3825_v3, %v3713_v41  ;;  %v10104_v3 = vpop.f32.mrf.mxu2 }
 0x488   : > { %4050 = vmatmul.f32.gmra.mxu1 %v10084_v15  ;;  %v10087_v46 = vadd.f32 %v3938_v50, %v3826_v27  ;;  %v2881_v50 = vld [vmem:[#allocation2 + $0xf8] sm:$0xff] }
 0x489   : > { %v4303_v22 = vpop.f32.mrf.mxu0 }
 0x48a   : > { %12101 = vst [vmem:[#allocation6_spill] sm:$0xff] %v10087_v46  ;;  %4231 = vmatmul.f32.gmra.mxu3 %v2880_v24  ;;  %v2994_v24 = vld [vmem:[#allocation2 + $0x4a] sm:$0xff] }
 0x48c   : > { %4350 = vmatmul.f32.gmra.mxu0 %v9933_v57 }
 0x48d   : > { %v10090_v4 = vpop.f32.mrf.mxu1  ;;  %v4184_v44 = vpop.f32.mrf.mxu3 }
 0x48e   : > { %v4185_v18 = vadd.f32 %v4184_v44, %v9876_v13  ;;  %v2993_v13 = vld [vmem:[#allocation2 + $0x3a] sm:$0xff]  ;;  %v2883_v44 = vld [vmem:[#allocation2 + $0x110] sm:$0xff]  ;;  %v10115_v60 = vpop.f32.mrf.mxu2 }
 0x490   : > { %4409 = vmatmul.f32.vlgmr.msra.gmra.mxu1 %v2992_v48  ;;  %v10096_v14 = vadd.f32 %v4297_v53, %v4185_v18 }
 0x491   : > { %v4306_v1 = vpop.f32.mrf.mxu0 }
 0x492   : > { %4234 = vmatmul.f32.gmra.mxu3 %v2881_v50  ;;  %v2995_v50 = vld [vmem:[#allocation2 + $0x52] sm:$0xff] }
 0x494   : > { %4353 = vmatmul.f32.gmra.mxu0 %v9948_v47 }
 0x495   : > { %v10099_v57 = vpop.f32.mrf.mxu1  ;;  %v4187_v56 = vpop.f32.mrf.mxu3 }
 0x496   : > { %v4188_v39 = vadd.f32 %v4187_v56, %v9891_v26  ;;  %v7022_v26 = vld [vmem:[%s11817_s1 + $0x920] sm:$0xff] }
 0x497   : > { %5664 = vmatpush.msra.mxu2 %v7022_v26  ;;  %v2885_v26 = vld [vmem:[#allocation2 + $0x128] sm:$0xff] }
 0x498   : > { %4412 = vmatmul.f32.gmra.mxu1 %v2993_v13  ;;  %v10102_v62 = vadd.f32 %v4300_v7, %v4188_v39  ;;  %v2884_v39 = vld [vmem:[#allocation2 + $0x120] sm:$0xff] }
 0x499   : > { %v4309_v41 = vpop.f32.mrf.mxu0 }
 0x49a   : > { %4237 = vmatmul.f32.gmra.mxu3 %v2882_v29 }
 0x49c   : > { %4356 = vmatmul.f32.gmra.mxu0 %v9963_v21 }
 0x49d   : > { %v10107_v53 = vpop.f32.mrf.mxu1  ;;  %v4190_v27 = vpop.f32.mrf.mxu3 }
 0x49e   : > { %v4191_v47 = vadd.f32 %v4190_v27, %v9906_v5  ;;  %v10126_v27 = vpop.f32.mrf.mxu2 }
 0x4a0   : > { %4415 = vmatmul.f32.gmra.mxu1 %v2994_v24  ;;  %v10113_v7 = vadd.f32 %v4303_v22, %v4191_v47  ;;  %v2996_v47 = vld [vmem:[#allocation2 + $0x62] sm:$0xff] }
 0x4a1   : > { %v4312_v18 = vpop.f32.mrf.mxu0 }
 0x4a2   : > { %4240 = vmatmul.f32.gmra.mxu3 %v2883_v44 }
 0x4a4   : > { %4359 = vmatmul.f32.gmra.mxu0 %v9978_v28 }
 0x4a5   : > { %v10118_v21 = vpop.f32.mrf.mxu1  ;;  %v4193_v48 = vpop.f32.mrf.mxu3 }
 0x4a6   : > { %12102 = vst [vmem:[#allocation26_spill] sm:$0xff] %v10118_v21  ;;  %v4194_v5 = vadd.f32 %v4193_v48, %v9921_v49  ;;  %v7021_v49 = vld [vmem:[%s11817_s1 + $0x918] sm:$0xff] }
 0x4a7   : > { %5665 = vmatpush.msra.mxu2 %v7021_v49  ;;  %v2998_v49 = vld [vmem:[#allocation2 + $0x7a] sm:$0xff] }
 0x4a8   : > { %4418 = vmatmul.f32.gmra.mxu1 %v2995_v50  ;;  %v10121_v56 = vadd.f32 %v4306_v1, %v4194_v5  ;;  %v10138_v5 = vpop.f32.mrf.mxu2 }
 0x4a9   : > { %v4315_v13 = vpop.f32.mrf.mxu0 }
 0x4aa   : > { %4243 = vmatmul.f32.gmra.mxu3 %v2884_v39  ;;  %v2886_v39 = vld [vmem:[#allocation2 + $0x138] sm:$0xff] }
 0x4ac   : > { %4362 = vmatmul.f32.gmra.mxu0 %v9994_v51 }
 0x4ad   : > { %v10124_v22 = vpop.f32.mrf.mxu1  ;;  %v4196_v29 = vpop.f32.mrf.mxu3 }
 0x4ae   : > { %12103 = vst [vmem:[#allocation22_spill] sm:$0xff] %v10124_v22  ;;  %v4197_v28 = vadd.f32 %v4196_v29, %v9936_v16  ;;  %v2997_v16 = vld [vmem:[#allocation2 + $0x6a] sm:$0xff] }
 0x4b0   : > { %4421 = vmatmul.f32.gmra.mxu1 %v2996_v47  ;;  %v10132_v1 = vadd.f32 %v4309_v41, %v4197_v28 }
 0x4b1   : > { %v4318_v24 = vpop.f32.mrf.mxu0 }
 0x4b2   : > { %4246 = vmatmul.f32.gmra.mxu3 %v2885_v26 }
 0x4b4   : > { %4365 = vmatmul.f32.gmra.mxu0 %v10008_v35 }
 0x4b5   : > { %v10135_v51 = vpop.f32.mrf.mxu1  ;;  %v4199_v44 = vpop.f32.mrf.mxu3 }
 0x4b6   : > { %12104 = vst [vmem:[#allocation25_spill] sm:$0xff] %v10135_v51  ;;  %v4200_v48 = vadd.f32 %v4199_v44, %v9951_v40  ;;  %v7020_v40 = vld [vmem:[%s11817_s1 + $0x910] sm:$0xff]  ;;  %v10151_v44 = vpop.f32.mrf.mxu2 }
 0x4b7   : > { %5666 = vmatpush.msra.mxu2 %v7020_v40 }
 0x4b8   : > { %4424 = vmatmul.f32.gmra.mxu1 %v2997_v16  ;;  %v10140_v50 = vadd.f32 %v4312_v18, %v4200_v48  ;;  %v2887_v18 = vld [vmem:[#allocation2 + $0x140] sm:$0xff] }
 0x4b9   : > { %v4321_v29 = vpop.f32.mrf.mxu0  ;;  %v2999_v16 = vld [vmem:[#allocation2 + $0x82] sm:$0xff] }
 0x4ba   : > { %4249 = vmatmul.f32.gmra.mxu3 %v2886_v39  ;;  %v12107_v39 = vld [vmem:[#allocation54_spill] sm:$0xff] }
 0x4bc   : > { %4368 = vmatmul.f32.gmra.mxu0 %v10022_v34 }
 0x4bd   : > { %v10143_v41 = vpop.f32.mrf.mxu1  ;;  %v4202_v28 = vpop.f32.mrf.mxu3 }
 0x4be   : > { %12105 = vst [vmem:[#allocation27_spill] sm:$0xff] %v10143_v41  ;;  %v4203_v35 = vadd.f32 %v4202_v28, %v9966_v23  ;;  %v3983_v28 = vadd.f32 %v9989_v38, %v12107_v39  ;;  %v7019_v38 = vld [vmem:[%s11817_s1 + $0x908] sm:$0xff] }
 0x4bf   : > { %5667 = vmatpush.msra.mxu2 %v7019_v38 }
 0x4c0   : > { %4427 = vmatmul.f32.gmra.mxu1 %v2998_v49  ;;  %v10149_v47 = vadd.f32 %v4315_v13, %v4203_v35  ;;  %v2888_v13 = vld [vmem:[#allocation2 + $0x150] sm:$0xff]  ;;  %v4096_v49 = vadd.f32 %v10104_v3, %v3983_v28  ;;  %v12109_v3 = vld [vmem:[#allocation58_spill] sm:$0xff]  ;;  %v2889_v28 = vld [vmem:[#allocation2 + $0x158] sm:$0xff] }
 0x4c1   : > { %v4324_v26 = vpop.f32.mrf.mxu0 }
 0x4c2   : > { %4252 = vmatmul.f32.gmra.mxu3 %v2887_v18  ;;  %v10164_v18 = vpop.f32.mrf.mxu2 }
 0x4c4   : > { %4371 = vmatmul.f32.gmra.mxu0 %v10036_v32 }
 0x4c5   : > { %v10154_v34 = vpop.f32.mrf.mxu1  ;;  %v4205_v48 = vpop.f32.mrf.mxu3 }
 0x4c6   : > { %12106 = vst [vmem:[#allocation29_spill] sm:$0xff] %v10154_v34  ;;  %v4206_v23 = vadd.f32 %v4205_v48, %v9981_v36 }
 0x4c8   : > { %4430 = vmatmul.f32.gmra.mxu1 %v2999_v16  ;;  %v10159_v40 = vadd.f32 %v4318_v24, %v4206_v23  ;;  %v7049_v24 = vld [vmem:[%s11817_s1 + $0x9f8] sm:$0xff]  ;;  %v3986_v16 = vadd.f32 %v10006_v58, %v12109_v3  ;;  %v7046_v58 = vld [vmem:[%s11817_s1 + $0x9e0] sm:$0xff]  ;;  %v7044_v3 = vld [vmem:[%s11817_s1 + $0x9d0] sm:$0xff] }
 0x4c9   : > { %v10161_v35 = vpop.f32.mrf.mxu0  ;;  %v3000_v23 = vld [vmem:[#allocation2 + $0x92] sm:$0xff]  ;;  %5766 = vmatpush.msrb.mxu3 %v7049_v24 }
 0x4ca   : > { %4255 = vmatmul.f32.gmra.mxu3 %v2888_v13  ;;  %v10194_v38 = vpop.f32.mrf.mxu2 }
 0x4cc   : > { %4374 = vmatmul.f32.gmra.mxu0 %v10050_v0  ;;  %v7048_v0 = vld [vmem:[%s11817_s1 + $0x9f0] sm:$0xff] }
 0x4cd   : > { %v10167_v32 = vpop.f32.mrf.mxu1  ;;  %v4208_v36 = vpop.f32.mrf.mxu3  ;;  %5767 = vmatpush.msrb.mxu3 %v7048_v0 }
 0x4ce   : > { %12108 = vst [vmem:[#allocation36_spill] sm:$0xff] %v10167_v32  ;;  %v4209_v48 = vadd.f32 %v4208_v36, %v4096_v49  ;;  %v7047_v49 = vld [vmem:[%s11817_s1 + $0x9e8] sm:$0xff]  ;;  %v4099_v36 = vadd.f32 %v10115_v60, %v3986_v16  ;;  %v7065_v60 = vld [vmem:[%s11817_s1 + $0xa78] sm:$0xff]  ;;  %v7064_v16 = vld [vmem:[%s11817_s1 + $0xa70] sm:$0xff] }
 0x4cf   : > { %5768 = vmatpush.msrb.mxu3 %v7047_v49  ;;  %5879 = vmatpush.msrb.mxu0 %v7065_v60  ;;  %v7018_v60 = vld [vmem:[%s11817_s1 + $0x900] sm:$0xff] }
 0x4d0   : > { %4433 = vmatmul.f32.gmra.mxu1 %v3000_v23  ;;  %v10180_v39 = vadd.f32 %v4321_v29, %v4209_v48  ;;  %v7045_v23 = vld [vmem:[%s11817_s1 + $0x9d8] sm:$0xff]  ;;  %5668 = vmatpush.msra.mxu2 %v7018_v60  ;;  %v7039_v60 = vld [vmem:[%s11817_s1 + $0x9a8] sm:$0xff] }
 0x4d1   : > { %v10182_v13 = vpop.f32.mrf.mxu0  ;;  %5769 = vmatpush.msrb.mxu3 %v7046_v58  ;;  %5880 = vmatpush.msrb.mxu0 %v7064_v16  ;;  %v7063_v58 = vld [vmem:[%s11817_s1 + $0xa68] sm:$0xff] }
 0x4d2   : > { %4258 = vmatmul.f32.gmra.mxu3 %v2889_v28  ;;  %v2890_v28 = vld [vmem:[#allocation2 + $0x168] sm:$0xff]  ;;  %v10238_v16 = vpop.f32.mrf.mxu2 }
 0x4d3   : > { %5770 = vmatpush.msrb.mxu3 %v7045_v23  ;;  %5881 = vmatpush.msrb.mxu0 %v7063_v58  ;;  %v7062_v23 = vld [vmem:[%s11817_s1 + $0xa60] sm:$0xff]  ;;  %v2891_v58 = vld [vmem:[#allocation2 + $0x170] sm:$0xff] }
 0x4d4   : > { %4377 = vmatmul.f32.gmra.mxu0 %v10061_v55  ;;  %v3001_v55 = vld [vmem:[#allocation2 + $0x9a] sm:$0xff] }
 0x4d5   : > { %v10192_v29 = vpop.f32.mrf.mxu1  ;;  %v4211_v48 = vpop.f32.mrf.mxu3  ;;  %5771 = vmatpush.msrb.mxu3 %v7044_v3  ;;  %5882 = vmatpush.msrb.mxu0 %v7062_v23  ;;  %v7061_v3 = vld [vmem:[%s11817_s1 + $0xa58] sm:$0xff]  ;;  %v10248_v23 = vld [vmem:[#allocation2] sm:$0xff] }
 0x4d6   : > { %12110 = vst [vmem:[#allocation7_spill] sm:$0xff] %v10192_v29  ;;  %v4212_v24 = vadd.f32 %v4211_v48, %v4099_v36  ;;  %v7043_v36 = vld [vmem:[%s11817_s1 + $0x9c8] sm:$0xff]  ;;  %5669 = vmatmul.f32.vlgmr.msra.gmra.mxu2 %v10248_v23 }
 0x4d7   : > { %5772 = vmatpush.msrb.mxu3 %v7043_v36  ;;  %v7060_v36 = vld [vmem:[%s11817_s1 + $0xa50] sm:$0xff]  ;;  %5883 = vmatpush.msrb.mxu0 %v7061_v3 }
 0x4d8   : > { %4436 = vmatmul.f32.gmra.mxu1 %v3001_v55  ;;  %v10208_v0 = vadd.f32 %v4324_v26, %v4212_v24  ;;  %v7042_v26 = vld [vmem:[%s11817_s1 + $0x9c0] sm:$0xff]  ;;  %v3002_v55 = vld [vmem:[#allocation2 + $0xaa] sm:$0xff] }
 0x4d9   : > { %v10210_v49 = vpop.f32.mrf.mxu0  ;;  %5773 = vmatpush.msrb.mxu3 %v7042_v26  ;;  %5884 = vmatpush.msrb.mxu0 %v7060_v36  ;;  %v3003_v36 = vld [vmem:[#allocation2 + $0xb2] sm:$0xff] }
 0x4da   : > { %4261 = vmatmul.f32.gmra.mxu3 %v2890_v28  ;;  %v7040_v28 = vld [vmem:[%s11817_s1 + $0x9b0] sm:$0xff] }
 0x4dc   : > { %4380 = vmatmul.f32.gmra.mxu0 %v10074_v25  ;;  %v7041_v25 = vld [vmem:[%s11817_s1 + $0x9b8] sm:$0xff] }
 0x4dd   : > { %v10222_v48 = vpop.f32.mrf.mxu1  ;;  %v10224_v24 = vpop.f32.mrf.mxu3  ;;  %5774 = vmatpush.msrb.mxu3 %v7041_v25  ;;  %v7059_v25 = vld [vmem:[%s11817_s1 + $0xa48] sm:$0xff] }
 0x4de   : > { %12111 = vst [vmem:[#allocation8_spill] sm:$0xff] %v10222_v48  ;;  %5885 = vmatpush.msrb.mxu0 %v7059_v25  ;;  %v7056_v25 = vld [vmem:[%s11817_s1 + $0xa30] sm:$0xff]  ;;  %5672 = vmatmul.f32.gmra.mxu2 %v10248_v23  ;;  %v4772_v48 = vld [vmem:[#allocation2 + $0x2] sm:$0xff] }
 0x4df   : > { %5775 = vmatpush.msrb.mxu3 %v7040_v28  ;;  %v7037_v28 = vld [vmem:[%s11817_s1 + $0x998] sm:$0xff] }
 0x4e0   : > { %4439 = vmatmul.f32.gmra.mxu1 %v3002_v55  ;;  %v7038_v55 = vld [vmem:[%s11817_s1 + $0x9a0] sm:$0xff] }
 0x4e1   : > { %v10246_v26 = vpop.f32.mrf.mxu0  ;;  %5776 = vmatpush.msrb.mxu3 %v7039_v60  ;;  %v7036_v60 = vld [vmem:[%s11817_s1 + $0x990] sm:$0xff] }
 0x4e2   : > { %4264 = vmatmul.f32.gmra.mxu3 %v2891_v58  ;;  %v7058_v58 = vld [vmem:[%s11817_s1 + $0xa40] sm:$0xff] }
 0x4e3   : > { %5777 = vmatpush.msrb.mxu3 %v7038_v55  ;;  %5886 = vmatpush.msrb.mxu0 %v7058_v58  ;;  %v7035_v55 = vld [vmem:[%s11817_s1 + $0x988] sm:$0xff] }
 0x4e4   : > { %4383 = vmatmul.f32.gmra.mxu0 %v10084_v15  ;;  %v7057_v15 = vld [vmem:[%s11817_s1 + $0xa38] sm:$0xff]  ;;  %v7055_v58 = vld [vmem:[%s11817_s1 + $0xa28] sm:$0xff] }
 0x4e5   : > { %v10261_v3 = vpop.f32.mrf.mxu1  ;;  %v10263_v46 = vpop.f32.mrf.mxu3  ;;  %5778 = vmatpush.msrb.mxu3 %v7037_v28  ;;  %5887 = vmatpush.msrb.mxu0 %v7057_v15  ;;  %v7034_v28 = vld [vmem:[%s11817_s1 + $0x980] sm:$0xff] }
 0x4e6   : > { %12112 = vst [vmem:[#allocation11_spill] sm:$0xff] %v10261_v3  ;;  %v10282_v3 = vpop.f32.mrf.mxu2 }
 0x4e7   : > { %5779 = vmatpush.msrb.mxu3 %v7036_v60  ;;  %5888 = vmatpush.msrb.mxu0 %v7056_v25  ;;  %v2893_v60 = vld [vmem:[#allocation2 + $0x188] sm:$0xff] }
 0x4e8   : > { %4442 = vmatmul.f32.gmra.mxu1 %v3003_v36  ;;  %v3004_v36 = vld [vmem:[#allocation2 + $0xc2] sm:$0xff] }
 0x4e9   : > { %v10280_v12 = vpop.f32.mrf.mxu0  ;;  %5780 = vmatpush.msrb.mxu3 %v7035_v55  ;;  %5889 = vmatpush.msrb.mxu0 %v7055_v58  ;;  %v7052_v58 = vld [vmem:[%s11817_s1 + $0xa10] sm:$0xff] }
 0x4ea   : > { %4267 = vmatmul.f32.gmra.mxu3 %v2892_v61 }
 0x4eb   : > { %5781 = vmatpush.msrb.mxu3 %v7034_v28  ;;  %5890 = vmatpush.msrb.mxu0 %v7054_v59  ;;  %v7097_v59 = vld [vmem:[%s11817_s1 + $0xb78] sm:$0xff] }
 0x4ec   : > { %4386 = vmatmul.f32.gmra.mxu0 %v2958_v19  ;;  %v2959_v19 = vld [vmem:[#allocation2 + $0x1a1] sm:$0xff]  ;;  %6105 = vmatpush.msrb.mxu2 %v7097_v59 }
 0x4ed   : > { %v10294_v15 = vpop.f32.mrf.mxu1  ;;  %v10296_v61 = vpop.f32.mrf.mxu3  ;;  %v3006_v59 = vld [vmem:[#allocation2 + $0xda] sm:$0xff] }
 0x4ee   : > { %12113 = vst [vmem:[#allocation31_spill] sm:$0xff] %v10294_v15  ;;  %v7053_v15 = vld [vmem:[%s11817_s1 + $0xa18] sm:$0xff]  ;;  %v10306_v55 = vpop.f32.mrf.mxu2 }
 0x4ef   : > { %5891 = vmatpush.msrb.mxu0 %v7053_v15  ;;  %v7081_v15 = vld [vmem:[%s11817_s1 + $0xaf8] sm:$0xff] }
 0x4f0   : > { %4445 = vmatmul.f32.gmra.mxu1 %v3004_v36 }
 0x4f1   : > { %v10301_v25 = vpop.f32.mrf.mxu0  ;;  %5892 = vmatpush.msrb.mxu0 %v7052_v58  ;;  %5992 = vmatpush.msrb.mxu1 %v7081_v15  ;;  %v7050_v58 = vld [vmem:[%s11817_s1 + $0xa00] sm:$0xff] }
 0x4f2   : > { %4270 = vmatmul.f32.gmra.mxu3 %v2893_v60  ;;  %v7051_v60 = vld [vmem:[%s11817_s1 + $0xa08] sm:$0xff] }
 0x4f3   : > { %5893 = vmatpush.msrb.mxu0 %v7051_v60  ;;  %v4773_v60 = vld [vmem:[#allocation2 + $0xa] sm:$0xff] }
 0x4f4   : > { %4389 = vmatmul.f32.gmra.mxu0 %v2959_v19  ;;  %v3005_v19 = vld [vmem:[#allocation2 + $0xca] sm:$0xff] }
 0x4f5   : > { %v10311_v28 = vpop.f32.mrf.mxu1  ;;  %v10313_v36 = vpop.f32.mrf.mxu3  ;;  %5894 = vmatpush.msrb.mxu0 %v7050_v58  ;;  %v7080_v58 = vld [vmem:[%s11817_s1 + $0xaf0] sm:$0xff] }
 0x4f6   : > { %12114 = vst [vmem:[#allocation13_spill] sm:$0xff] %v10311_v28  ;;  %v10334_v43 = vpop.f32.mrf.mxu2  ;;  %5993 = vmatpush.msrb.mxu1 %v7080_v58  ;;  %v3008_v58 = vld [vmem:[#allocation2 + $0xf2] sm:$0xff] }
 0x4f8   : > { %4448 = vmatmul.f32.gmra.mxu1 %v3005_v19 }
 0x4f9   : > { %v10327_v28 = vpop.f32.mrf.mxu0 }
 0x4fa   : > { %4273 = vmatmul.f32.gmra.mxu3 %v10248_v23 }
 0x4fc   : > { %5895 = vmatmul.f32.vlgmr.msrb.gmra.mxu0 %v4772_v48  ;;  %v7096_v48 = vld [vmem:[%s11817_s1 + $0xb70] sm:$0xff] }
 0x4fd   : > { %v10330_v2 = vpop.f32.mrf.mxu1  ;;  %v10332_v29 = vpop.f32.mrf.mxu3  ;;  %6106 = vmatpush.msrb.mxu2 %v7096_v48  ;;  %v10364_v48 = vld [vmem:[%s11819_s3 + $0x1] ss:$0 sm:$0xff] }
 0x4fe   : > { %12115 = vst [vmem:[#allocation37_spill] sm:$0xff] %v10330_v2  ;;  %v3007_v2 = vld [vmem:[#allocation2 + $0xe2] sm:$0xff]  ;;  %v10349_v42 = vpop.f32.mrf.mxu2 }
 0x4ff   : > { %12117 = vst [vmem:[#allocation32_spill] sm:$0xff] %v10349_v42  ;;  %6107 = vmatpush.msrb.mxu2 %v7095_v10 }
 0x500   : > { %4451 = vmatmul.f32.gmra.mxu1 %v3006_v59  ;;  %v4708_v59 = vld [vmem:[#allocation2 + $0x1] sm:$0xff] }
 0x501   : > { %v10336_v15 = vpop.f32.mrf.mxu0 }
 0x502   : > { %4276 = vmatmul.f32.gmra.mxu3 %v10248_v23 }
 0x504   : > { %5898 = vmatmul.f32.gmra.mxu0 %v4773_v60  ;;  %v10356_v60 = vld [vmem:[%s11818_s2 + $0x1] ss:$0 sm:$0xff] }
 0x505   : > { %v10339_v19 = vpop.f32.mrf.mxu1  ;;  %v10341_v32 = vpop.f32.mrf.mxu3 }
 0x506   : > { %12116 = vst [vmem:[#allocation28_spill] sm:$0xff] %v10339_v19  ;;  %v10369_v52 = vpop.f32.mrf.mxu2 }
 0x507   : > { %12120 = vst [vmem:[#allocation41_spill] sm:$0xff] %v10369_v52 }
 0x508   : > { %4454 = vmatmul.f32.gmra.mxu1 %v3007_v2  ;;  %v4709_v2 = vld [vmem:[#allocation2 + $0x9] sm:$0xff] }
 0x509   : > { %v10351_v23 = vpop.f32.mrf.mxu0 }
 0x50a   : > { %12118 = vst [vmem:[#allocation34_spill] sm:$0xff] %v10351_v23  ;;  %5782 = vmatmul.f32.vlgmr.msrb.gmra.mxu3 %v4708_v59 }
 0x50d   : > { %v10358_v19 = vpop.f32.mrf.mxu3  ;;  %v4410_v34 = vpop.f32.mrf.mxu1 }
 0x50e   : > { %v4411_v9 = vadd.f32 %v4410_v34, %v10096_v14 }
 0x510   : > { %v4511_v41 = vmul.f32 %v10356_v60, %v4411_v9  ;;  %4457 = vmatmul.f32.gmra.mxu1 %v3008_v58  ;;  %v7079_v9 = vld [vmem:[%s11817_s1 + $0xae8] sm:$0xff]  ;;  %v3009_v58 = vld [vmem:[#allocation2 + $0xfa] sm:$0xff] }
 0x511   : > { %v10367_v59 = vpop.f32.mrf.mxu0  ;;  %5994 = vmatpush.msrb.mxu1 %v7079_v9 }
 0x512   : > { %12119 = vst [vmem:[#allocation35_spill] sm:$0xff] %v10367_v59  ;;  %v4548_v51 = vadd.f32 %v10364_v48, %v4511_v41  ;;  %5785 = vmatmul.f32.gmra.mxu3 %v4709_v2 }
 0x514   : > { %v4580_v11 = vmax.f32 %v4548_v51, 0.0 }
 0x515   : > { %v10372_v22 = vpop.f32.mrf.mxu3  ;;  %v4413_v14 = vpop.f32.mrf.mxu1 }
 0x516   : > { %4612 = vst [vmem:[#allocation2 + $0x19] sm:$0xff] %v4580_v11  ;;  %v4414_v34 = vadd.f32 %v4413_v14, %v10102_v62  ;;  %v10385_v62 = vpop.f32.mrf.mxu2 }
 0x517   : > { %12122 = vst [vmem:[#allocation42_spill] sm:$0xff] %v10385_v62 }
 0x518   : > { %v4512_v41 = vmul.f32 %v10356_v60, %v4414_v34  ;;  %4460 = vmatmul.f32.gmra.mxu1 %v3009_v58  ;;  %v3010_v34 = vld [vmem:[#allocation2 + $0x10a] sm:$0xff] }
 0x519   : > { %v10383_v2 = vpop.f32.mrf.mxu0 }
 0x51a   : > { %v4549_v51 = vadd.f32 %v10364_v48, %v4512_v41  ;;  %5788 = vmatmul.f32.gmra.mxu3 %v4580_v11  ;;  %12121 = vst [vmem:[#allocation38_spill] sm:$0xff] %v10383_v2 }
 0x51c   : > { %v4581_v14 = vmax.f32 %v4549_v51, 0.0 }
 0x51d   : > { %v10387_v52 = vpop.f32.mrf.mxu3  ;;  %v4416_v59 = vpop.f32.mrf.mxu1  ;;  %v10389_v42 = vld [vmem:[#allocation2 + $0x18] sm:$0xff] }
 0x51e   : > { %4613 = vst [vmem:[#allocation2 + $0x21] sm:$0xff] %v4581_v14  ;;  %v4417_v10 = vadd.f32 %v4416_v59, %v10113_v7  ;;  %5675 = vmatmul.f32.gmra.mxu2 %v10389_v42  ;;  %v10401_v21 = vpop.f32.mrf.mxu2  ;;  %v7094_v59 = vld [vmem:[%s11817_s1 + $0xb60] sm:$0xff] }
 0x51f   : > { %12125 = vst [vmem:[#allocation44_spill] sm:$0xff] %v10401_v21  ;;  %6108 = vmatpush.msrb.mxu2 %v7094_v59 }
 0x520   : > { %v4513_v9 = vmul.f32 %v10356_v60, %v4417_v10  ;;  %4463 = vmatmul.f32.gmra.mxu1 %v3010_v34  ;;  %v3011_v10 = vld [vmem:[#allocation2 + $0x112] sm:$0xff] }
 0x521   : > { %v10395_v41 = vpop.f32.mrf.mxu0 }
 0x522   : > { %v4550_v11 = vadd.f32 %v10364_v48, %v4513_v9  ;;  %5791 = vmatmul.f32.gmra.mxu3 %v4581_v14  ;;  %12123 = vst [vmem:[#allocation40_spill] sm:$0xff] %v10395_v41  ;;  %v7078_v14 = vld [vmem:[%s11817_s1 + $0xae0] sm:$0xff] }
 0x523   : > { %5995 = vmatpush.msrb.mxu1 %v7078_v14 }
 0x524   : > { %v4582_v58 = vmax.f32 %v4550_v11, 0.0 }
 0x525   : > { %v10397_v51 = vpop.f32.mrf.mxu3  ;;  %v4419_v62 = vpop.f32.mrf.mxu1  ;;  %v10399_v2 = vld [vmem:[#allocation2 + $0x20] sm:$0xff] }
 0x526   : > { %12124 = vst [vmem:[#allocation43_spill] sm:$0xff] %v10397_v51  ;;  %v4774_v23 = vld [vmem:[#allocation2 + $0x1a] sm:$0xff]  ;;  %v4420_v7 = vadd.f32 %v4419_v62, %v10121_v56  ;;  %5678 = vmatmul.f32.gmra.mxu2 %v10399_v2  ;;  %v4775_v21 = vld [vmem:[#allocation2 + $0x22] sm:$0xff]  ;;  %v10421_v14 = vpop.f32.mrf.mxu2 }
 0x527   : > { %4614 = vst [vmem:[#allocation2 + $0x31] sm:$0xff] %v4582_v58  ;;  %5901 = vmatmul.f32.gmra.mxu0 %v4774_v23 }
 0x528   : > { %v4514_v34 = vmul.f32 %v10356_v60, %v4420_v7  ;;  %4466 = vmatmul.f32.gmra.mxu1 %v3011_v10  ;;  %v3012_v7 = vld [vmem:[#allocation2 + $0x122] sm:$0xff]  ;;  %12128 = vst [vmem:[#allocation50_spill] sm:$0xff] %v10421_v14 }
 0x529   : > { %v10419_v59 = vpop.f32.mrf.mxu0 }
 0x52a   : > { %v4551_v9 = vadd.f32 %v10364_v48, %v4514_v34  ;;  %5794 = vmatmul.f32.gmra.mxu3 %v4582_v58  ;;  %12127 = vst [vmem:[#allocation46_spill] sm:$0xff] %v10419_v59 }
 0x52c   : > { %v4583_v56 = vmax.f32 %v4551_v9, 0.0 }
 0x52d   : > { %v10413_v62 = vpop.f32.mrf.mxu3  ;;  %v4422_v23 = vpop.f32.mrf.mxu1 }
 0x52e   : > { %12126 = vst [vmem:[#allocation45_spill] sm:$0xff] %v10413_v62  ;;  %v10415_v11 = vld [vmem:[#allocation2 + $0x30] sm:$0xff]  ;;  %v4423_v41 = vadd.f32 %v4422_v23, %v10132_v1 }
 0x52f   : > { %4615 = vst [vmem:[#allocation2 + $0x39] sm:$0xff] %v4583_v56  ;;  %5681 = vmatmul.f32.gmra.mxu2 %v10415_v11  ;;  %5904 = vmatmul.f32.gmra.mxu0 %v4775_v21  ;;  %v3013_v23 = vld [vmem:[#allocation2 + $0x12a] sm:$0xff] }
 0x530   : > { %v4515_v58 = vmul.f32 %v10356_v60, %v4423_v41  ;;  %4469 = vmatmul.f32.gmra.mxu1 %v3012_v7  ;;  %v7093_v41 = vld [vmem:[%s11817_s1 + $0xb58] sm:$0xff] }
 0x531   : > { %6109 = vmatpush.msrb.mxu2 %v7093_v41 }
 0x532   : > { %v4552_v10 = vadd.f32 %v10364_v48, %v4515_v58  ;;  %5797 = vmatmul.f32.gmra.mxu3 %v4583_v56  ;;  %v7077_v56 = vld [vmem:[%s11817_s1 + $0xad8] sm:$0xff]  ;;  %v10438_v58 = vpop.f32.mrf.mxu0 }
 0x533   : > { %5996 = vmatpush.msrb.mxu1 %v7077_v56  ;;  %12130 = vst [vmem:[#allocation52_spill] sm:$0xff] %v10438_v58 }
 0x534   : > { %v4584_v34 = vmax.f32 %v4552_v10, 0.0 }
 0x535   : > { %v10425_v9 = vpop.f32.mrf.mxu3  ;;  %v4425_v62 = vpop.f32.mrf.mxu1 }
 0x536   : > { %12129 = vst [vmem:[#allocation51_spill] sm:$0xff] %v10425_v9  ;;  %v10427_v51 = vld [vmem:[#allocation2 + $0x38] sm:$0xff]  ;;  %v4426_v21 = vadd.f32 %v4425_v62, %v10140_v50  ;;  %v10440_v50 = vpop.f32.mrf.mxu2 }
 0x537   : > { %v4776_v1 = vld [vmem:[#allocation2 + $0x32] sm:$0xff]  ;;  %4616 = vst [vmem:[#allocation2 + $0x49] sm:$0xff] %v4584_v34  ;;  %5684 = vmatmul.f32.gmra.mxu2 %v10427_v51  ;;  %v4777_v9 = vld [vmem:[#allocation2 + $0x3a] sm:$0xff] }
 0x538   : > { %5907 = vmatmul.f32.gmra.mxu0 %v4776_v1  ;;  %v4516_v7 = vmul.f32 %v10356_v60, %v4426_v21  ;;  %4472 = vmatmul.f32.gmra.mxu1 %v3013_v23  ;;  %12131 = vst [vmem:[#allocation55_spill] sm:$0xff] %v10440_v50  ;;  %v3014_v21 = vld [vmem:[#allocation2 + $0x13a] sm:$0xff] }
 0x53a   : > { %v4553_v62 = vadd.f32 %v10364_v48, %v4516_v7  ;;  %5800 = vmatmul.f32.gmra.mxu3 %v4584_v34  ;;  %v10451_v34 = vpop.f32.mrf.mxu0 }
 0x53b   : > { %12133 = vst [vmem:[#allocation59_spill] sm:$0xff] %v10451_v34 }
 0x53c   : > { %v4585_v10 = vmax.f32 %v4553_v62, 0.0 }
 0x53d   : > { %v10443_v1 = vpop.f32.mrf.mxu3  ;;  %v4428_v14 = vpop.f32.mrf.mxu1 }
 0x53e   : > { %12132 = vst [vmem:[#allocation48_spill] sm:$0xff] %v10443_v1  ;;  %v10445_v59 = vld [vmem:[#allocation2 + $0x48] sm:$0xff]  ;;  %v4429_v41 = vadd.f32 %v4428_v14, %v10149_v47  ;;  %v10453_v7 = vpop.f32.mrf.mxu2 }
 0x53f   : > { %4617 = vst [vmem:[#allocation2 + $0x51] sm:$0xff] %v4585_v10  ;;  %5687 = vmatmul.f32.gmra.mxu2 %v10445_v59 }
 0x540   : > { %5910 = vmatmul.f32.gmra.mxu0 %v4777_v9  ;;  %v4517_v56 = vmul.f32 %v10356_v60, %v4429_v41  ;;  %4475 = vmatmul.f32.gmra.mxu1 %v3014_v21  ;;  %12134 = vst [vmem:[#allocation57_spill] sm:$0xff] %v10453_v7  ;;  %v7092_v9 = vld [vmem:[%s11817_s1 + $0xb50] sm:$0xff]  ;;  %v3015_v41 = vld [vmem:[#allocation2 + $0x142] sm:$0xff] }
 0x541   : > { %6110 = vmatpush.msrb.mxu2 %v7092_v9 }
 0x542   : > { %v4554_v23 = vadd.f32 %v10364_v48, %v4517_v56  ;;  %5803 = vmatmul.f32.gmra.mxu3 %v4585_v10  ;;  %v7076_v10 = vld [vmem:[%s11817_s1 + $0xad0] sm:$0xff] }
 0x543   : > { %5997 = vmatpush.msrb.mxu1 %v7076_v10  ;;  %v12139_v10 = vld [vmem:[#allocation47_spill] sm:$0xff] }
 0x544   : > { %v4586_v62 = vmax.f32 %v4554_v23, 0.0 }
 0x545   : > { %v10455_v50 = vpop.f32.mrf.mxu3  ;;  %v4431_v58 = vpop.f32.mrf.mxu1 }
 0x546   : > { %12135 = vst [vmem:[#allocation18_spill] sm:$0xff] %v10455_v50  ;;  %v10457_v1 = vld [vmem:[#allocation2 + $0x50] sm:$0xff]  ;;  %v4432_v14 = vadd.f32 %v4431_v58, %v10159_v40  ;;  %v10469_v58 = vpop.f32.mrf.mxu0  ;;  %v10475_v50 = vpop.f32.mrf.mxu2 }
 0x547   : > { %v4778_v47 = vld [vmem:[#allocation2 + $0x4a] sm:$0xff]  ;;  %4618 = vst [vmem:[#allocation2 + $0x61] sm:$0xff] %v4586_v62  ;;  %5690 = vmatmul.f32.gmra.mxu2 %v10457_v1  ;;  %v4779_v34 = vld [vmem:[#allocation2 + $0x52] sm:$0xff] }
 0x548   : > { %5913 = vmatmul.f32.gmra.mxu0 %v4778_v47  ;;  %v4518_v21 = vmul.f32 %v10356_v60, %v4432_v14  ;;  %4478 = vmatmul.f32.gmra.mxu1 %v3015_v41  ;;  %12136 = vst [vmem:[#allocation10_spill] sm:$0xff] %v10469_v58  ;;  %v3016_v14 = vld [vmem:[#allocation2 + $0x152] sm:$0xff]  ;;  %v3989_v41 = vadd.f32 %v10017_v33, %v12139_v10  ;;  %v7091_v33 = vld [vmem:[%s11817_s1 + $0xb48] sm:$0xff] }
 0x549   : > { %12138 = vst [vmem:[#allocation49_spill] sm:$0xff] %v10475_v50  ;;  %6111 = vmatpush.msrb.mxu2 %v7091_v33 }
 0x54a   : > { %v4555_v56 = vadd.f32 %v10364_v48, %v4518_v21  ;;  %5806 = vmatmul.f32.gmra.mxu3 %v4586_v62 }
 0x54c   : > { %v4587_v40 = vmax.f32 %v4555_v56, 0.0 }
 0x54d   : > { %v10471_v23 = vpop.f32.mrf.mxu3  ;;  %v4434_v47 = vpop.f32.mrf.mxu1 }
 0x54e   : > { %12137 = vst [vmem:[#allocation53_spill] sm:$0xff] %v10471_v23  ;;  %v10473_v7 = vld [vmem:[#allocation2 + $0x60] sm:$0xff]  ;;  %v4435_v9 = vadd.f32 %v4434_v47, %v10180_v39  ;;  %v4102_v47 = vadd.f32 %v10126_v27, %v3989_v41 }
 0x54f   : > { %4619 = vst [vmem:[#allocation2 + $0x69] sm:$0xff] %v4587_v40  ;;  %5693 = vmatmul.f32.gmra.mxu2 %v10473_v7 }
 0x550   : > { %5916 = vmatmul.f32.gmra.mxu0 %v4779_v34  ;;  %v4519_v62 = vmul.f32 %v10356_v60, %v4435_v9  ;;  %4481 = vmatmul.f32.gmra.mxu1 %v3016_v14  ;;  %v10490_v9 = vpop.f32.mrf.mxu0  ;;  %v3017_v14 = vld [vmem:[#allocation2 + $0x15a] sm:$0xff]  ;;  %v4215_v27 = vadd.f32 %v10224_v24, %v4102_v47 }
 0x551   : > { %12140 = vst [vmem:[#allocation9_spill] sm:$0xff] %v10490_v9 }
 0x552   : > { %v4556_v21 = vadd.f32 %v10364_v48, %v4519_v62  ;;  %5809 = vmatmul.f32.gmra.mxu3 %v4587_v40  ;;  %v7075_v40 = vld [vmem:[%s11817_s1 + $0xac8] sm:$0xff]  ;;  %v10499_v62 = vpop.f32.mrf.mxu2 }
 0x553   : > { %5998 = vmatpush.msrb.mxu1 %v7075_v40 }
 0x554   : > { %v4588_v56 = vmax.f32 %v4556_v21, 0.0 }
 0x555   : > { %v10483_v58 = vpop.f32.mrf.mxu3  ;;  %v4437_v50 = vpop.f32.mrf.mxu1 }
 0x556   : > { %v10485_v23 = vld [vmem:[#allocation2 + $0x68] sm:$0xff]  ;;  %4620 = vst [vmem:[#allocation2 + $0x79] sm:$0xff] %v4588_v56  ;;  %v4438_v34 = vadd.f32 %v4437_v50, %v10208_v0  ;;  %v12141_v50 = vld [vmem:[#allocation56_spill] sm:$0xff] }
 0x557   : > { %v4780_v39 = vld [vmem:[#allocation2 + $0x62] sm:$0xff]  ;;  %5696 = vmatmul.f32.gmra.mxu2 %v10485_v23  ;;  %v3992_v10 = vadd.f32 %v10034_v20, %v12141_v50  ;;  %v4781_v24 = vld [vmem:[#allocation2 + $0x6a] sm:$0xff] }
 0x558   : > { %5919 = vmatmul.f32.gmra.mxu0 %v4780_v39  ;;  %v4520_v0 = vmul.f32 %v10356_v60, %v4438_v34  ;;  %4484 = vmatmul.f32.gmra.mxu1 %v3017_v14  ;;  %v4328_v39 = vadd.f32 %v10161_v35, %v4215_v27  ;;  %v3018_v20 = vld [vmem:[#allocation2 + $0x16a] sm:$0xff]  ;;  %v12142_v35 = vld [vmem:[#allocation14_spill] sm:$0xff] }
 0x559   : > { %v4105_v47 = vadd.f32 %v10138_v5, %v3992_v10  ;;  %v3995_v27 = vadd.f32 %v10045_v31, %v12142_v35  ;;  %v7074_v10 = vld [vmem:[%s11817_s1 + $0xac0] sm:$0xff]  ;;  %v7071_v35 = vld [vmem:[%s11817_s1 + $0xaa8] sm:$0xff] }
 0x55a   : > { %v4557_v41 = vadd.f32 %v10364_v48, %v4520_v0  ;;  %5812 = vmatmul.f32.gmra.mxu3 %v4588_v56  ;;  %v10514_v0 = vpop.f32.mrf.mxu0  ;;  %v10518_v50 = vpop.f32.mrf.mxu2  ;;  %5999 = vmatpush.msrb.mxu1 %v7074_v10 }
 0x55b   : > { %v4218_v14 = vadd.f32 %v10263_v46, %v4105_v47 }
 0x55c   : > { %v4589_v21 = vmax.f32 %v4557_v41, 0.0 }
 0x55d   : > { %v10506_v9 = vpop.f32.mrf.mxu3  ;;  %v4440_v33 = vpop.f32.mrf.mxu1  ;;  %v10508_v40 = vld [vmem:[#allocation2 + $0x78] sm:$0xff]  ;;  %v4331_v46 = vadd.f32 %v10182_v13, %v4218_v14  ;;  %v7090_v13 = vld [vmem:[%s11817_s1 + $0xb40] sm:$0xff] }
 0x55e   : > { %4621 = vst [vmem:[#allocation2 + $0x81] sm:$0xff] %v4589_v21  ;;  %v4441_v34 = vadd.f32 %v4440_v33, %v4328_v39  ;;  %v7073_v39 = vld [vmem:[%s11817_s1 + $0xab8] sm:$0xff]  ;;  %6112 = vmatpush.msrb.mxu2 %v7090_v13 }
 0x55f   : > { %5699 = vmatmul.f32.gmra.mxu2 %v10508_v40  ;;  %6000 = vmatpush.msrb.mxu1 %v7073_v39  ;;  %v3019_v14 = vld [vmem:[#allocation2 + $0x172] sm:$0xff] }
 0x560   : > { %5922 = vmatmul.f32.gmra.mxu0 %v4781_v24  ;;  %v4521_v56 = vmul.f32 %v10356_v60, %v4441_v34  ;;  %4487 = vmatmul.f32.gmra.mxu1 %v3018_v20  ;;  %v7072_v20 = vld [vmem:[%s11817_s1 + $0xab0] sm:$0xff] }
 0x561   : > { %6001 = vmatpush.msrb.mxu1 %v7072_v20 }
 0x562   : > { %v4558_v5 = vadd.f32 %v10364_v48, %v4521_v56  ;;  %5815 = vmatmul.f32.gmra.mxu3 %v4589_v21  ;;  %v4108_v21 = vadd.f32 %v10151_v44, %v3995_v27  ;;  %v12143_v27 = vld [vmem:[#allocation15_spill] sm:$0xff]  ;;  %v10553_v39 = vpop.f32.mrf.mxu2 }
 0x563   : > { %6002 = vmatpush.msrb.mxu1 %v7071_v35 }
 0x564   : > { %v4590_v41 = vmax.f32 %v4558_v5, 0.0  ;;  %v4221_v56 = vadd.f32 %v10296_v61, %v4108_v21  ;;  %v3998_v5 = vadd.f32 %v10059_v45, %v12143_v27  ;;  %v7070_v61 = vld [vmem:[%s11817_s1 + $0xaa0] sm:$0xff]  ;;  %v7069_v21 = vld [vmem:[%s11817_s1 + $0xa98] sm:$0xff]  ;;  %v12144_v27 = vld [vmem:[#allocation24_spill] sm:$0xff] }
 0x565   : > { %v10528_v33 = vpop.f32.mrf.mxu3  ;;  %v4443_v31 = vpop.f32.mrf.mxu1  ;;  %v10530_v24 = vld [vmem:[#allocation2 + $0x80] sm:$0xff]  ;;  %6003 = vmatpush.msrb.mxu1 %v7070_v61 }
 0x566   : > { %v4782_v47 = vld [vmem:[#allocation2 + $0x7a] sm:$0xff]  ;;  %4622 = vst [vmem:[#allocation2 + $0x91] sm:$0xff] %v4590_v41  ;;  %v4444_v34 = vadd.f32 %v4443_v31, %v4331_v46  ;;  %v10548_v46 = vpop.f32.mrf.mxu0  ;;  %v4111_v20 = vadd.f32 %v10164_v18, %v3998_v5  ;;  %v7067_v18 = vld [vmem:[%s11817_s1 + $0xa88] sm:$0xff]  ;;  %v4001_v5 = vadd.f32 %v10069_v63, %v12144_v27 }
 0x567   : > { %5702 = vmatmul.f32.gmra.mxu2 %v10530_v24  ;;  %6004 = vmatpush.msrb.mxu1 %v7069_v21  ;;  %v7066_v61 = vld [vmem:[%s11817_s1 + $0xa80] sm:$0xff] }
 0x568   : > { %5925 = vmatmul.f32.gmra.mxu0 %v4782_v47  ;;  %v4522_v44 = vmul.f32 %v10356_v60, %v4444_v34  ;;  %4490 = vmatmul.f32.gmra.mxu1 %v3019_v14  ;;  %v4334_v47 = vadd.f32 %v10210_v49, %v4221_v56  ;;  %v7068_v49 = vld [vmem:[%s11817_s1 + $0xa90] sm:$0xff]  ;;  %v3020_v56 = vld [vmem:[#allocation2 + $0x182] sm:$0xff]  ;;  %v4114_v63 = vadd.f32 %v10194_v38, %v4001_v5 }
 0x569   : > { %6005 = vmatpush.msrb.mxu1 %v7068_v49  ;;  %v7089_v49 = vld [vmem:[%s11817_s1 + $0xb38] sm:$0xff]  ;;  %v4004_v38 = vadd.f32 %v10082_v8, %v9864_v30 }
 0x56a   : > { %v4559_v10 = vadd.f32 %v10364_v48, %v4522_v44  ;;  %5818 = vmatmul.f32.gmra.mxu3 %v4590_v41  ;;  %v4783_v41 = vld [vmem:[#allocation2 + $0x82] sm:$0xff]  ;;  %v4224_v44 = vadd.f32 %v10313_v36, %v4111_v20  ;;  %6113 = vmatpush.msrb.mxu2 %v7089_v49 }
 0x56b   : > { %6006 = vmatpush.msrb.mxu1 %v7067_v18 }
 0x56c   : > { %v4591_v31 = vmax.f32 %v4559_v10, 0.0  ;;  %v4337_v21 = vadd.f32 %v10246_v26, %v4224_v44  ;;  %v3021_v26 = vld [vmem:[#allocation2 + $0x18a] sm:$0xff]  ;;  %v4227_v44 = vadd.f32 %v10332_v29, %v4114_v63  ;;  %v4117_v63 = vadd.f32 %v10238_v16, %v4004_v38 }
 0x56d   : > { %v10559_v45 = vpop.f32.mrf.mxu3  ;;  %v4446_v34 = vpop.f32.mrf.mxu1  ;;  %v10561_v13 = vld [vmem:[#allocation2 + $0x90] sm:$0xff]  ;;  %6007 = vmatpush.msrb.mxu1 %v7066_v61 }
 0x56e   : > { %4623 = vst [vmem:[#allocation2 + $0x99] sm:$0xff] %v4591_v31  ;;  %v4447_v14 = vadd.f32 %v4446_v34, %v4334_v47  ;;  %v10579_v47 = vpop.f32.mrf.mxu0  ;;  %v4340_v5 = vadd.f32 %v10280_v12, %v4227_v44  ;;  %v4230_v30 = vadd.f32 %v10341_v32, %v4117_v63 }
 0x56f   : > { %5705 = vmatmul.f32.gmra.mxu2 %v10561_v13 }
 0x570   : > { %5928 = vmatmul.f32.gmra.mxu0 %v4783_v41  ;;  %v4523_v35 = vmul.f32 %v10356_v60, %v4447_v14  ;;  %4493 = vmatmul.f32.gmra.mxu1 %v3020_v56  ;;  %v10591_v56 = vpop.f32.mrf.mxu2  ;;  %v4343_v16 = vadd.f32 %v10301_v25, %v4230_v30 }
 0x572   : > { %v4560_v10 = vadd.f32 %v10364_v48, %v4523_v35  ;;  %5821 = vmatmul.f32.gmra.mxu3 %v4591_v31 }
 0x574   : > { %v4592_v36 = vmax.f32 %v4560_v10, 0.0 }
 0x575   : > { %v10582_v34 = vpop.f32.mrf.mxu3  ;;  %v4449_v41 = vpop.f32.mrf.mxu1  ;;  %v10584_v20 = vld [vmem:[#allocation2 + $0x98] sm:$0xff] }
 0x576   : > { %v4784_v14 = vld [vmem:[#allocation2 + $0x92] sm:$0xff]  ;;  %4624 = vst [vmem:[#allocation2 + $0xa9] sm:$0xff] %v4592_v36  ;;  %v4450_v31 = vadd.f32 %v4449_v41, %v4337_v21  ;;  %v10599_v10 = vpop.f32.mrf.mxu0  ;;  %v4785_v29 = vld [vmem:[#allocation2 + $0x9a] sm:$0xff] }
 0x577   : > { %5708 = vmatmul.f32.gmra.mxu2 %v10584_v20 }
 0x578   : > { %5931 = vmatmul.f32.gmra.mxu0 %v4784_v14  ;;  %v4524_v35 = vmul.f32 %v10356_v60, %v4450_v31  ;;  %4496 = vmatmul.f32.gmra.mxu1 %v3021_v26  ;;  %v3022_v14 = vld [vmem:[#allocation2 + $0x19a] sm:$0xff]  ;;  %v10609_v8 = vpop.f32.mrf.mxu2 }
 0x57a   : > { %v4561_v18 = vadd.f32 %v10364_v48, %v4524_v35  ;;  %5824 = vmatmul.f32.gmra.mxu3 %v4592_v36  ;;  %v4007_v36 = vadd.f32 %v10090_v4, %v9882_v6  ;;  %v7088_v6 = vld [vmem:[%s11817_s1 + $0xb30] sm:$0xff] }
 0x57b   : > { %6114 = vmatpush.msrb.mxu2 %v7088_v6 }
 0x57c   : > { %v4593_v27 = vmax.f32 %v4561_v18, 0.0  ;;  %v3023_v18 = vld [vmem:[#allocation2 + $0x1a2] sm:$0xff] }
 0x57d   : > { %v10601_v61 = vpop.f32.mrf.mxu3  ;;  %v4452_v21 = vpop.f32.mrf.mxu1  ;;  %v10603_v41 = vld [vmem:[#allocation2 + $0xa8] sm:$0xff] }
 0x57e   : > { %4625 = vst [vmem:[#allocation2 + $0xb1] sm:$0xff] %v4593_v27  ;;  %v4453_v31 = vadd.f32 %v4452_v21, %v4340_v5  ;;  %v4120_v5 = vadd.f32 %v10282_v3, %v4007_v36  ;;  %v10624_v4 = vpop.f32.mrf.mxu0  ;;  %v4010_v3 = vadd.f32 %v10099_v57, %v9894_v54 }
 0x57f   : > { %5711 = vmatmul.f32.gmra.mxu2 %v10603_v41 }
 0x580   : > { %5934 = vmatmul.f32.gmra.mxu0 %v4785_v29  ;;  %v4525_v12 = vmul.f32 %v10356_v60, %v4453_v31  ;;  %4499 = vmatmul.f32.gmra.mxu1 %v3022_v14  ;;  %v4233_v25 = vadd.f32 %v10358_v19, %v4120_v5  ;;  %v10628_v29 = vpop.f32.mrf.mxu2  ;;  %v4123_v19 = vadd.f32 %v10306_v55, %v4010_v3 }
 0x582   : > { %v4562_v49 = vadd.f32 %v10364_v48, %v4525_v12  ;;  %5827 = vmatmul.f32.gmra.mxu3 %v4593_v27  ;;  %v4346_v31 = vadd.f32 %v10327_v28, %v4233_v25  ;;  %v4236_v57 = vadd.f32 %v10372_v22, %v4123_v19  ;;  %v4013_v28 = vadd.f32 %v10107_v53, %v9912_v17 }
 0x584   : > { %v4594_v26 = vmax.f32 %v4562_v49, 0.0  ;;  %v4126_v22 = vadd.f32 %v10334_v43, %v4013_v28  ;;  %v12145_v43 = vld [vmem:[#allocation26_spill] sm:$0xff] }
 0x585   : > { %v10615_v44 = vpop.f32.mrf.mxu3  ;;  %v4455_v35 = vpop.f32.mrf.mxu1  ;;  %v10617_v38 = vld [vmem:[#allocation2 + $0xb0] sm:$0xff] }
 0x586   : > { %v4786_v32 = vld [vmem:[#allocation2 + $0xaa] sm:$0xff]  ;;  %4626 = vst [vmem:[#allocation2 + $0xc1] sm:$0xff] %v4594_v26  ;;  %v4456_v21 = vadd.f32 %v4455_v35, %v4343_v16  ;;  %v4787_v36 = vld [vmem:[#allocation2 + $0xb2] sm:$0xff]  ;;  %v10640_v54 = vpop.f32.mrf.mxu0  ;;  %v4239_v53 = vadd.f32 %v10387_v52, %v4126_v22 }
 0x587   : > { %5714 = vmatmul.f32.gmra.mxu2 %v10617_v38 }
 0x588   : > { %5937 = vmatmul.f32.gmra.mxu0 %v4786_v32  ;;  %v4526_v27 = vmul.f32 %v10356_v60, %v4456_v21  ;;  %4502 = vmatmul.f32.gmra.mxu1 %v3023_v18  ;;  %v5673_v55 = vpop.f32.mrf.mxu2  ;;  %v4349_v18 = vadd.f32 %v10336_v15, %v4236_v57 }
 0x58a   : > { %v4563_v14 = vadd.f32 %v10364_v48, %v4526_v27  ;;  %5830 = vmatmul.f32.gmra.mxu3 %v4594_v26 }
 0x58c   : > { %v4595_v63 = vmax.f32 %v4563_v14, 0.0  ;;  %v4016_v14 = vadd.f32 %v12145_v43, %v9924_v37 }
 0x58d   : > { %v4458_v30 = vpop.f32.mrf.mxu1  ;;  %v10634_v12 = vld [vmem:[#allocation2 + $0xc0] sm:$0xff]  ;;  %v10636_v49 = vpop.f32.mrf.mxu3 }
 0x58e   : > { %4627 = vst [vmem:[#allocation2 + $0xc9] sm:$0xff] %v4595_v63  ;;  %v4459_v16 = vadd.f32 %v4458_v30, %v4346_v31  ;;  %v10661_v3 = vpop.f32.mrf.mxu0  ;;  %v12146_v30 = vld [vmem:[#allocation34_spill] sm:$0xff] }
 0x58f   : > { %5717 = vmatmul.f32.gmra.mxu2 %v10634_v12 }
 0x590   : > { %5940 = vmatmul.f32.gmra.mxu0 %v4787_v36  ;;  %v4527_v26 = vmul.f32 %v10356_v60, %v4459_v16  ;;  %6008 = vmatmul.f32.vlgmr.msrb.gmra.mxu1 %v10389_v42  ;;  %v7087_v42 = vld [vmem:[%s11817_s1 + $0xb28] sm:$0xff]  ;;  %v4352_v36 = vadd.f32 %v12146_v30, %v4239_v53 }
 0x591   : > { %6115 = vmatpush.msrb.mxu2 %v7087_v42  ;;  %v12151_v53 = vld [vmem:[#allocation35_spill] sm:$0xff] }
 0x592   : > { %v4564_v35 = vadd.f32 %v10364_v48, %v4527_v26  ;;  %5833 = vmatmul.f32.gmra.mxu3 %v4595_v63  ;;  %v12147_v26 = vld [vmem:[#allocation32_spill] sm:$0xff] }
 0x593   : > { %v4129_v28 = vadd.f32 %v12147_v26, %v4016_v14 }
 0x594   : > { %v4596_v32 = vmax.f32 %v4564_v35, 0.0  ;;  %v12148_v35 = vld [vmem:[#allocation43_spill] sm:$0xff] }
 0x595   : > { %v4461_v5 = vpop.f32.mrf.mxu1  ;;  %v10649_v21 = vld [vmem:[#allocation2 + $0xc8] sm:$0xff]  ;;  %v5786_v25 = vpop.f32.mrf.mxu3  ;;  %v4242_v37 = vadd.f32 %v12148_v35, %v4129_v28  ;;  %v12155_v35 = vld [vmem:[#allocation25_spill] sm:$0xff] }
 0x596   : > { %v4788_v6 = vld [vmem:[#allocation2 + $0xc2] sm:$0xff]  ;;  %4628 = vst [vmem:[#allocation2 + $0xd9] sm:$0xff] %v4596_v32  ;;  %v4462_v27 = vadd.f32 %v4461_v5, %v4349_v18  ;;  %v10653_v17 = vadd.f32 %v5786_v25, %v5673_v55  ;;  %v4789_v57 = vld [vmem:[#allocation2 + $0xca] sm:$0xff]  ;;  %v12149_v18 = vld [vmem:[#allocation21_spill] sm:$0xff] }
 0x597   : > { %5720 = vmatmul.f32.gmra.mxu2 %v10649_v21  ;;  %v12150_v5 = vld [vmem:[#allocation22_spill] sm:$0xff] }
 0x598   : > { %5943 = vmatmul.f32.gmra.mxu0 %v4788_v6  ;;  %v4528_v15 = vmul.f32 %v10356_v60, %v4462_v27  ;;  %6011 = vmatmul.f32.gmra.mxu1 %v10399_v2  ;;  %v4019_v6 = vadd.f32 %v12150_v5, %v12149_v18 }
 0x59a   : > { %v4565_v63 = vadd.f32 %v10364_v48, %v4528_v15  ;;  %5836 = vmatmul.f32.gmra.mxu3 %v4596_v32  ;;  %v4355_v15 = vadd.f32 %v12151_v53, %v4242_v37 }
 0x59c   : > { %v4597_v31 = vmax.f32 %v4565_v63, 0.0 }
 0x59d   : > { %v4464_v19 = vpop.f32.mrf.mxu1  ;;  %v10667_v16 = vld [vmem:[#allocation2 + $0xd8] sm:$0xff]  ;;  %v5789_v52 = vpop.f32.mrf.mxu3 }
 0x59e   : > { %4629 = vst [vmem:[#allocation2 + $0xe1] sm:$0xff] %v4597_v31  ;;  %v4465_v2 = vadd.f32 %v4464_v19, %v4352_v36 }
 0x59f   : > { %5723 = vmatmul.f32.gmra.mxu2 %v10667_v16 }
 0x5a0   : > { %5946 = vmatmul.f32.gmra.mxu0 %v4789_v57  ;;  %v4529_v55 = vmul.f32 %v10356_v60, %v4465_v2  ;;  %6014 = vmatmul.f32.gmra.mxu1 %v10415_v11  ;;  %v12152_v11 = vld [vmem:[#allocation41_spill] sm:$0xff]  ;;  %v12154_v2 = vld [vmem:[#allocation12_spill] sm:$0xff] }
 0x5a1   : > { %v5676_v32 = vpop.f32.mrf.mxu2  ;;  %v4132_v36 = vadd.f32 %v12152_v11, %v4019_v6  ;;  %v12153_v57 = vld [vmem:[#allocation45_spill] sm:$0xff]  ;;  %v4022_v37 = vadd.f32 %v12155_v35, %v12154_v2  ;;  %v12156_v6 = vld [vmem:[#allocation38_spill] sm:$0xff] }
 0x5a2   : > { %v4566_v25 = vadd.f32 %v10364_v48, %v4529_v55  ;;  %v10677_v22 = vadd.f32 %v5789_v52, %v5676_v32  ;;  %5839 = vmatmul.f32.gmra.mxu3 %v4597_v31  ;;  %v7086_v31 = vld [vmem:[%s11817_s1 + $0xb20] sm:$0xff] }
 0x5a3   : > { %6116 = vmatpush.msrb.mxu2 %v7086_v31  ;;  %v4245_v52 = vadd.f32 %v12153_v57, %v4132_v36  ;;  %v12159_v57 = vld [vmem:[#allocation33_spill] sm:$0xff] }
 0x5a4   : > { %v10679_v27 = vpop.f32.mrf.mxu0  ;;  %v4598_v42 = vmax.f32 %v4566_v25, 0.0 }
 0x5a5   : > { %v4467_v43 = vpop.f32.mrf.mxu1  ;;  %v10682_v14 = vld [vmem:[#allocation2 + $0xe0] sm:$0xff]  ;;  %v5792_v30 = vpop.f32.mrf.mxu3  ;;  %v4358_v25 = vadd.f32 %v12156_v6, %v4245_v52  ;;  %v12160_v52 = vld [vmem:[#allocation27_spill] sm:$0xff] }
 0x5a6   : > { %v4790_v63 = vld [vmem:[#allocation2 + $0xda] sm:$0xff]  ;;  %4630 = vst [vmem:[#allocation2 + $0xf1] sm:$0xff] %v4598_v42  ;;  %v4468_v19 = vadd.f32 %v4467_v43, %v4355_v15  ;;  %v4791_v43 = vld [vmem:[#allocation2 + $0xe2] sm:$0xff] }
 0x5a7   : > { %5726 = vmatmul.f32.gmra.mxu2 %v10682_v14 }
 0x5a8   : > { %5949 = vmatmul.f32.gmra.mxu0 %v4790_v63  ;;  %v4530_v26 = vmul.f32 %v10356_v60, %v4468_v19  ;;  %6017 = vmatmul.f32.gmra.mxu1 %v10427_v51  ;;  %v12157_v51 = vld [vmem:[#allocation42_spill] sm:$0xff] }
 0x5a9   : > { %v5679_v28 = vpop.f32.mrf.mxu2  ;;  %v4135_v11 = vadd.f32 %v12157_v51, %v4022_v37 }
 0x5aa   : > { %v4567_v55 = vadd.f32 %v10364_v48, %v4530_v26  ;;  %v10695_v32 = vadd.f32 %v5792_v30, %v5679_v28  ;;  %5842 = vmatmul.f32.gmra.mxu3 %v4598_v42  ;;  %v12158_v30 = vld [vmem:[#allocation51_spill] sm:$0xff]  ;;  %v4025_v26 = vadd.f32 %v12160_v52, %v12159_v57  ;;  %v12166_v57 = vld [vmem:[#allocation29_spill] sm:$0xff] }
 0x5ab   : > { %v4248_v19 = vadd.f32 %v12158_v30, %v4135_v11 }
 0x5ac   : > { %v10697_v18 = vpop.f32.mrf.mxu0  ;;  %v4599_v5 = vmax.f32 %v4567_v55, 0.0  ;;  %v12162_v55 = vld [vmem:[#allocation40_spill] sm:$0xff] }
 0x5ad   : > { %v4470_v53 = vpop.f32.mrf.mxu1  ;;  %v10700_v15 = vld [vmem:[#allocation2 + $0xf0] sm:$0xff]  ;;  %v5795_v63 = vpop.f32.mrf.mxu3  ;;  %v4361_v6 = vadd.f32 %v12162_v55, %v4248_v19 }
 0x5ae   : > { %4631 = vst [vmem:[#allocation2 + $0xf9] sm:$0xff] %v4599_v5  ;;  %v4471_v36 = vadd.f32 %v4470_v53, %v4358_v25 }
 0x5af   : > { %5729 = vmatmul.f32.gmra.mxu2 %v10700_v15 }
 0x5b0   : > { %5952 = vmatmul.f32.gmra.mxu0 %v4791_v43  ;;  %v4531_v42 = vmul.f32 %v10356_v60, %v4471_v36  ;;  %6020 = vmatmul.f32.gmra.mxu1 %v10445_v59  ;;  %v12163_v59 = vld [vmem:[#allocation44_spill] sm:$0xff] }
 0x5b1   : > { %v4138_v11 = vadd.f32 %v12163_v59, %v4025_v26 }
 0x5b2   : > { %v5682_v31 = vpop.f32.mrf.mxu2  ;;  %v4568_v28 = vadd.f32 %v10364_v48, %v4531_v42  ;;  %5845 = vmatmul.f32.gmra.mxu3 %v4599_v5  ;;  %v7085_v5 = vld [vmem:[%s11817_s1 + $0xb18] sm:$0xff] }
 0x5b3   : > { %v10710_v2 = vadd.f32 %v5795_v63, %v5682_v31  ;;  %6117 = vmatpush.msrb.mxu2 %v7085_v5  ;;  %v12164_v63 = vld [vmem:[#allocation48_spill] sm:$0xff]  ;;  %v12165_v31 = vld [vmem:[#allocation30_spill] sm:$0xff] }
 0x5b4   : > { %v4600_v37 = vmax.f32 %v4568_v28, 0.0  ;;  %v4251_v30 = vadd.f32 %v12164_v63, %v4138_v11  ;;  %v4028_v52 = vadd.f32 %v12166_v57, %v12165_v31  ;;  %v12173_v31 = vld [vmem:[#allocation36_spill] sm:$0xff] }
 0x5b5   : > { %v10712_v35 = vpop.f32.mrf.mxu0  ;;  %v4473_v25 = vpop.f32.mrf.mxu1  ;;  %v10715_v53 = vld [vmem:[#allocation2 + $0xf8] sm:$0xff] }
 0x5b6   : > { %12161 = vst [vmem:[#allocation19_spill] sm:$0xff] %v10712_v35  ;;  %v4792_v43 = vld [vmem:[#allocation2 + $0xf2] sm:$0xff]  ;;  %v5798_v51 = vpop.f32.mrf.mxu3  ;;  %v4474_v36 = vadd.f32 %v4473_v25, %v4361_v6  ;;  %v12169_v25 = vld [vmem:[#allocation46_spill] sm:$0xff] }
 0x5b7   : > { %4632 = vst [vmem:[#allocation2 + $0x109] sm:$0xff] %v4600_v37  ;;  %5732 = vmatmul.f32.gmra.mxu2 %v10715_v53 }
 0x5b8   : > { %5955 = vmatmul.f32.gmra.mxu0 %v4792_v43  ;;  %v4532_v19 = vmul.f32 %v10356_v60, %v4474_v36  ;;  %6023 = vmatmul.f32.gmra.mxu1 %v10457_v1  ;;  %v4364_v43 = vadd.f32 %v12169_v25, %v4251_v30  ;;  %v4793_v36 = vld [vmem:[#allocation2 + $0xfa] sm:$0xff]  ;;  %v12172_v30 = vld [vmem:[#allocation39_spill] sm:$0xff] }
 0x5b9   : > { %v12170_v1 = vld [vmem:[#allocation50_spill] sm:$0xff]  ;;  %v4031_v57 = vadd.f32 %v12173_v31, %v12172_v30  ;;  %v12179_v30 = vld [vmem:[#allocation17_spill] sm:$0xff]  ;;  %v12180_v31 = vld [vmem:[#allocation7_spill] sm:$0xff] }
 0x5ba   : > { %v5685_v42 = vpop.f32.mrf.mxu2  ;;  %v4569_v26 = vadd.f32 %v10364_v48, %v4532_v19  ;;  %5848 = vmatmul.f32.gmra.mxu3 %v4600_v37  ;;  %v4141_v63 = vadd.f32 %v12170_v1, %v4028_v52 }
 0x5bb   : > { %v10728_v28 = vadd.f32 %v5798_v51, %v5685_v42  ;;  %v12171_v51 = vld [vmem:[#allocation18_spill] sm:$0xff] }
 0x5bc   : > { %v4601_v6 = vmax.f32 %v4569_v26, 0.0  ;;  %v4254_v19 = vadd.f32 %v12171_v51, %v4141_v63 }
 0x5bd   : > { %12167 = vst [vmem:[#allocation54_spill] sm:$0xff] %v10728_v28  ;;  %v10730_v55 = vpop.f32.mrf.mxu0  ;;  %v4476_v59 = vpop.f32.mrf.mxu1 }
 0x5be   : > { %12168 = vst [vmem:[#allocation58_spill] sm:$0xff] %v10730_v55  ;;  %v10733_v11 = vld [vmem:[#allocation2 + $0x108] sm:$0xff]  ;;  %v5801_v5 = vpop.f32.mrf.mxu3  ;;  %v4477_v35 = vadd.f32 %v4476_v59, %v4364_v43  ;;  %v12176_v59 = vld [vmem:[#allocation52_spill] sm:$0xff] }
 0x5bf   : > { %4633 = vst [vmem:[#allocation2 + $0x111] sm:$0xff] %v4601_v6  ;;  %5735 = vmatmul.f32.gmra.mxu2 %v10733_v11 }
 0x5c0   : > { %5958 = vmatmul.f32.gmra.mxu0 %v4793_v36  ;;  %v4533_v37 = vmul.f32 %v10356_v60, %v4477_v35  ;;  %6026 = vmatmul.f32.gmra.mxu1 %v10473_v7  ;;  %v4367_v36 = vadd.f32 %v12176_v59, %v4254_v19  ;;  %v12177_v7 = vld [vmem:[#allocation55_spill] sm:$0xff] }
 0x5c1   : > { %v4144_v55 = vadd.f32 %v12177_v7, %v4031_v57  ;;  %v4034_v57 = vadd.f32 %v12180_v31, %v12179_v30  ;;  %v12183_v30 = vld [vmem:[#allocation4_spill] sm:$0xff] }
 0x5c2   : > { %v5688_v42 = vpop.f32.mrf.mxu2  ;;  %v4570_v26 = vadd.f32 %v10364_v48, %v4533_v37  ;;  %5851 = vmatmul.f32.gmra.mxu3 %v4601_v6  ;;  %v7084_v6 = vld [vmem:[%s11817_s1 + $0xb10] sm:$0xff] }
 0x5c3   : > { %v10743_v25 = vadd.f32 %v5801_v5, %v5688_v42  ;;  %6118 = vmatpush.msrb.mxu2 %v7084_v6  ;;  %v12178_v5 = vld [vmem:[#allocation53_spill] sm:$0xff]  ;;  %v12184_v31 = vld [vmem:[#allocation8_spill] sm:$0xff] }
 0x5c4   : > { %v4602_v43 = vmax.f32 %v4570_v26, 0.0  ;;  %v4257_v37 = vadd.f32 %v12178_v5, %v4144_v55 }
 0x5c5   : > { %12174 = vst [vmem:[#allocation47_spill] sm:$0xff] %v10743_v25  ;;  %v10745_v52 = vpop.f32.mrf.mxu0  ;;  %v4479_v1 = vpop.f32.mrf.mxu1 }
 0x5c6   : > { %12175 = vst [vmem:[#allocation56_spill] sm:$0xff] %v10745_v52  ;;  %v10748_v63 = vld [vmem:[#allocation2 + $0x110] sm:$0xff]  ;;  %v5804_v51 = vpop.f32.mrf.mxu3  ;;  %v4480_v28 = vadd.f32 %v4479_v1, %v4367_v36 }
 0x5c7   : > { %v4794_v35 = vld [vmem:[#allocation2 + $0x10a] sm:$0xff]  ;;  %4634 = vst [vmem:[#allocation2 + $0x121] sm:$0xff] %v4602_v43  ;;  %5738 = vmatmul.f32.gmra.mxu2 %v10748_v63 }
 0x5c8   : > { %5961 = vmatmul.f32.gmra.mxu0 %v4794_v35  ;;  %v4534_v19 = vmul.f32 %v10356_v60, %v4480_v28  ;;  %6029 = vmatmul.f32.gmra.mxu1 %v10485_v23  ;;  %v12181_v35 = vld [vmem:[#allocation59_spill] sm:$0xff]  ;;  %v4795_v28 = vld [vmem:[#allocation2 + $0x112] sm:$0xff] }
 0x5c9   : > { %v4370_v7 = vadd.f32 %v12181_v35, %v4257_v37  ;;  %v12182_v23 = vld [vmem:[#allocation57_spill] sm:$0xff] }
 0x5ca   : > { %v5691_v42 = vpop.f32.mrf.mxu2  ;;  %v4571_v26 = vadd.f32 %v10364_v48, %v4534_v19  ;;  %5854 = vmatmul.f32.gmra.mxu3 %v4602_v43  ;;  %v4147_v52 = vadd.f32 %v12182_v23, %v4034_v57  ;;  %v7113_v43 = vld [vmem:[%s11817_s1 + $0xbf8] sm:$0xff]  ;;  %v7112_v19 = vld [vmem:[%s11817_s1 + $0xbf0] sm:$0xff]  ;;  %v4037_v57 = vadd.f32 %v12184_v31, %v12183_v30 }
 0x5cb   : > { %v10761_v59 = vadd.f32 %v5804_v51, %v5691_v42  ;;  %6218 = vmatpush.msra.mxu3 %v7113_v43  ;;  %v7108_v31 = vld [vmem:[%s11817_s1 + $0xbd0] sm:$0xff] }
 0x5cc   : > { %v4603_v1 = vmax.f32 %v4571_v26, 0.0  ;;  %v4260_v51 = vadd.f32 %v10483_v58, %v4147_v52 }
 0x5cd   : > { %v10763_v36 = vpop.f32.mrf.mxu0  ;;  %v4482_v6 = vpop.f32.mrf.mxu1  ;;  %6219 = vmatpush.msra.mxu3 %v7112_v19 }
 0x5ce   : > { %v10766_v55 = vld [vmem:[#allocation2 + $0x120] sm:$0xff]  ;;  %v5807_v5 = vpop.f32.mrf.mxu3  ;;  %4635 = vst [vmem:[#allocation2 + $0x129] sm:$0xff] %v4603_v1  ;;  %v4483_v25 = vadd.f32 %v4482_v6, %v4370_v7 }
 0x5cf   : > { %5741 = vmatmul.f32.gmra.mxu2 %v10766_v55  ;;  %v7110_v7 = vld [vmem:[%s11817_s1 + $0xbe0] sm:$0xff] }
 0x5d0   : > { %5964 = vmatmul.f32.gmra.mxu0 %v4795_v28  ;;  %v4535_v37 = vmul.f32 %v10356_v60, %v4483_v25  ;;  %6032 = vmatmul.f32.gmra.mxu1 %v10508_v40  ;;  %v7111_v60 = vld [vmem:[%s11817_s1 + $0xbe8] sm:$0xff]  ;;  %v12185_v25 = vld [vmem:[#allocation10_spill] sm:$0xff] }
 0x5d1   : > { %6220 = vmatpush.msra.mxu3 %v7111_v60  ;;  %v4373_v52 = vadd.f32 %v12185_v25, %v4260_v51  ;;  %v7083_v51 = vld [vmem:[%s11817_s1 + $0xb08] sm:$0xff] }
 0x5d2   : > { %v5694_v42 = vpop.f32.mrf.mxu2  ;;  %v4572_v26 = vadd.f32 %v10364_v48, %v4535_v37  ;;  %5857 = vmatmul.f32.gmra.mxu3 %v4603_v1  ;;  %v12186_v1 = vld [vmem:[#allocation49_spill] sm:$0xff]  ;;  %6119 = vmatpush.msrb.mxu2 %v7083_v51  ;;  %v12188_v60 = vld [vmem:[#allocation11_spill] sm:$0xff] }
 0x5d3   : > { %v10782_v35 = vadd.f32 %v5807_v5, %v5694_v42  ;;  %6221 = vmatpush.msra.mxu3 %v7110_v7  ;;  %v4150_v23 = vadd.f32 %v12186_v1, %v4037_v57  ;;  %v7109_v37 = vld [vmem:[%s11817_s1 + $0xbd8] sm:$0xff]  ;;  %v10807_v42 = vld [vmem:[%s11818_s2 + $0x1] ss:$0 sm:$0xff] }
 0x5d4   : > { %v4604_v40 = vmax.f32 %v4572_v26, 0.0  ;;  %v12187_v26 = vld [vmem:[#allocation20_spill] sm:$0xff] }
 0x5d5   : > { %v10787_v58 = vpop.f32.mrf.mxu0  ;;  %v4485_v6 = vpop.f32.mrf.mxu1  ;;  %v10793_v28 = vld [vmem:[#allocation2 + $0x128] sm:$0xff]  ;;  %6222 = vmatpush.msra.mxu3 %v7109_v37  ;;  %v4263_v19 = vadd.f32 %v10506_v9, %v4150_v23  ;;  %v4040_v25 = vadd.f32 %v12188_v60, %v12187_v26  ;;  %v10819_v9 = vld [vmem:[%s11819_s3 + $0x1] ss:$0 sm:$0xff]  ;;  %v12189_v23 = vld [vmem:[#allocation9_spill] sm:$0xff] }
 0x5d6   : > { %v4796_v48 = vld [vmem:[#allocation2 + $0x122] sm:$0xff]  ;;  %v5810_v5 = vpop.f32.mrf.mxu3  ;;  %4636 = vst [vmem:[#allocation2 + $0x139] sm:$0xff] %v4604_v40  ;;  %v4486_v43 = vadd.f32 %v4485_v6, %v4373_v52  ;;  %v7105_v60 = vld [vmem:[%s11817_s1 + $0xbb8] sm:$0xff] }
 0x5d7   : > { %5744 = vmatmul.f32.gmra.mxu2 %v10793_v28  ;;  %6223 = vmatpush.msra.mxu3 %v7108_v31  ;;  %v7107_v6 = vld [vmem:[%s11817_s1 + $0xbc8] sm:$0xff] }
 0x5d8   : > { %5967 = vmatmul.f32.gmra.mxu0 %v4796_v48  ;;  %v4536_v30 = vmul.f32 %v10807_v42, %v4486_v43  ;;  %6035 = vmatmul.f32.gmra.mxu1 %v10530_v24  ;;  %v7129_v24 = vld [vmem:[%s11817_s1 + $0xc78] sm:$0xff]  ;;  %v4376_v43 = vadd.f32 %v12189_v23, %v4263_v19  ;;  %v7127_v19 = vld [vmem:[%s11817_s1 + $0xc68] sm:$0xff]  ;;  %v12190_v23 = vld [vmem:[#allocation16_spill] sm:$0xff] }
 0x5d9   : > { %6331 = vmatpush.msra.mxu0 %v7129_v24  ;;  %6224 = vmatpush.msra.mxu3 %v7107_v6 }
 0x5da   : > { %v5697_v57 = vpop.f32.mrf.mxu2  ;;  %v4573_v52 = vadd.f32 %v10819_v9, %v4536_v30  ;;  %5860 = vmatmul.f32.gmra.mxu3 %v4604_v40  ;;  %v7106_v40 = vld [vmem:[%s11817_s1 + $0xbc0] sm:$0xff]  ;;  %v4797_v30 = vld [vmem:[#allocation2 + $0x12a] sm:$0xff] }
 0x5db   : > { %v10822_v7 = vadd.f32 %v5810_v5, %v5697_v57  ;;  %v7128_v5 = vld [vmem:[%s11817_s1 + $0xc70] sm:$0xff]  ;;  %6225 = vmatpush.msra.mxu3 %v7106_v40  ;;  %v4153_v57 = vadd.f32 %v10499_v62, %v4040_v25  ;;  %v7126_v62 = vld [vmem:[%s11817_s1 + $0xc60] sm:$0xff] }
 0x5dc   : > { %v4605_v1 = vmax.f32 %v4573_v52, 0.0  ;;  %6332 = vmatpush.msra.mxu0 %v7128_v5  ;;  %v7104_v25 = vld [vmem:[%s11817_s1 + $0xbb0] sm:$0xff] }
 0x5dd   : > { %v10830_v48 = vpop.f32.mrf.mxu0  ;;  %v4488_v51 = vpop.f32.mrf.mxu1  ;;  %v10839_v37 = vld [vmem:[#allocation2 + $0x138] sm:$0xff]  ;;  %6226 = vmatpush.msra.mxu3 %v7105_v60  ;;  %v4266_v52 = vadd.f32 %v10528_v33, %v4153_v57 }
 0x5de   : > { %v5813_v31 = vpop.f32.mrf.mxu3  ;;  %4637 = vst [vmem:[#allocation2 + $0x141] sm:$0xff] %v4605_v1  ;;  %v4489_v26 = vadd.f32 %v4488_v51, %v4376_v43  ;;  %6333 = vmatpush.msra.mxu0 %v7127_v19  ;;  %v12191_v43 = vld [vmem:[#allocation31_spill] sm:$0xff] }
 0x5df   : > { %5747 = vmatmul.f32.gmra.mxu2 %v10839_v37  ;;  %6227 = vmatpush.msra.mxu3 %v7104_v25  ;;  %v4043_v5 = vadd.f32 %v12191_v43, %v12190_v23  ;;  %v7103_v51 = vld [vmem:[%s11817_s1 + $0xba8] sm:$0xff]  ;;  %v7101_v23 = vld [vmem:[%s11817_s1 + $0xb98] sm:$0xff] }
 0x5e0   : > { %5970 = vmatmul.f32.gmra.mxu0 %v4797_v30  ;;  %v4537_v24 = vmul.f32 %v10807_v42, %v4489_v26  ;;  %6038 = vmatmul.f32.gmra.mxu1 %v10561_v13  ;;  %v7125_v13 = vld [vmem:[%s11817_s1 + $0xc58] sm:$0xff]  ;;  %v4379_v26 = vadd.f32 %v10514_v0, %v4266_v52  ;;  %v7082_v0 = vld [vmem:[%s11817_s1 + $0xb00] sm:$0xff]  ;;  %v7123_v52 = vld [vmem:[%s11817_s1 + $0xc48] sm:$0xff] }
 0x5e1   : > { %6334 = vmatpush.msra.mxu0 %v7126_v62  ;;  %6228 = vmatpush.msra.mxu3 %v7103_v51  ;;  %v4156_v25 = vadd.f32 %v10518_v50, %v4043_v5  ;;  %v7122_v5 = vld [vmem:[%s11817_s1 + $0xc40] sm:$0xff]  ;;  %v12192_v51 = vld [vmem:[#allocation5_spill] sm:$0xff] }
 0x5e2   : > { %v5700_v6 = vpop.f32.mrf.mxu2  ;;  %v4574_v33 = vadd.f32 %v10819_v9, %v4537_v24  ;;  %5863 = vmatmul.f32.gmra.mxu3 %v4605_v1  ;;  %v7102_v1 = vld [vmem:[%s11817_s1 + $0xba0] sm:$0xff]  ;;  %6120 = vmatpush.msrb.mxu2 %v7082_v0 }
 0x5e3   : > { %v10861_v40 = vadd.f32 %v5813_v31, %v5700_v6  ;;  %6335 = vmatpush.msra.mxu0 %v7125_v13  ;;  %v7124_v31 = vld [vmem:[%s11817_s1 + $0xc50] sm:$0xff]  ;;  %6229 = vmatpush.msra.mxu3 %v7102_v1  ;;  %v4269_v50 = vadd.f32 %v10559_v45, %v4156_v25 }
 0x5e4   : > { %v4606_v57 = vmax.f32 %v4574_v33, 0.0  ;;  %v7100_v33 = vld [vmem:[%s11817_s1 + $0xb90] sm:$0xff] }
 0x5e5   : > { %v10869_v30 = vpop.f32.mrf.mxu0  ;;  %v4491_v19 = vpop.f32.mrf.mxu1  ;;  %v10878_v60 = vld [vmem:[#allocation2 + $0x140] sm:$0xff]  ;;  %6336 = vmatpush.msra.mxu0 %v7124_v31  ;;  %6230 = vmatpush.msra.mxu3 %v7101_v23 }
 0x5e6   : > { %v4798_v24 = vld [vmem:[#allocation2 + $0x13a] sm:$0xff]  ;;  %v5816_v62 = vpop.f32.mrf.mxu3  ;;  %4638 = vst [vmem:[#allocation2 + $0x151] sm:$0xff] %v4606_v57  ;;  %v4492_v6 = vadd.f32 %v4491_v19, %v4379_v26  ;;  %v7099_v19 = vld [vmem:[%s11817_s1 + $0xb88] sm:$0xff] }
 0x5e7   : > { %5750 = vmatmul.f32.gmra.mxu2 %v10878_v60  ;;  %6337 = vmatpush.msra.mxu0 %v7123_v52  ;;  %v12193_v26 = vld [vmem:[#allocation13_spill] sm:$0xff]  ;;  %v4799_v23 = vld [vmem:[#allocation2 + $0x142] sm:$0xff] }
 0x5e8   : > { %5973 = vmatmul.f32.gmra.mxu0 %v4798_v24  ;;  %v4538_v43 = vmul.f32 %v10807_v42, %v4492_v6  ;;  %6041 = vmatmul.f32.gmra.mxu1 %v10584_v20  ;;  %v4046_v31 = vadd.f32 %v12193_v26, %v12192_v51  ;;  %v7121_v20 = vld [vmem:[%s11817_s1 + $0xc38] sm:$0xff]  ;;  %v4382_v6 = vadd.f32 %v10548_v46, %v4269_v50  ;;  %v7119_v46 = vld [vmem:[%s11817_s1 + $0xc28] sm:$0xff]  ;;  %v7118_v50 = vld [vmem:[%s11817_s1 + $0xc20] sm:$0xff] }
 0x5e9   : > { %6338 = vmatpush.msra.mxu0 %v7122_v5  ;;  %6231 = vmatpush.msra.mxu3 %v7100_v33  ;;  %v7117_v26 = vld [vmem:[%s11817_s1 + $0xc18] sm:$0xff] }
 0x5ea   : > { %v5703_v13 = vpop.f32.mrf.mxu2  ;;  %v4575_v45 = vadd.f32 %v10819_v9, %v4538_v43  ;;  %5866 = vmatmul.f32.gmra.mxu3 %v4606_v57  ;;  %v7098_v57 = vld [vmem:[%s11817_s1 + $0xb80] sm:$0xff]  ;;  %v4159_v5 = vadd.f32 %v10553_v39, %v4046_v31 }
 0x5eb   : > { %v10903_v1 = vadd.f32 %v5816_v62, %v5703_v13  ;;  %6339 = vmatpush.msra.mxu0 %v7121_v20  ;;  %v7120_v62 = vld [vmem:[%s11817_s1 + $0xc30] sm:$0xff]  ;;  %6232 = vmatpush.msra.mxu3 %v7099_v19  ;;  %v7161_v13 = vld [vmem:[%s11817_s1 + $0xd78] sm:$0xff] }
 0x5ec   : > { %v4607_v25 = vmax.f32 %v4575_v45, 0.0  ;;  %v4272_v39 = vadd.f32 %v10582_v34, %v4159_v5  ;;  %6557 = vmatpush.msra.mxu2 %v7161_v13  ;;  %v12194_v45 = vld [vmem:[#allocation23_spill] sm:$0xff]  ;;  %v12195_v20 = vld [vmem:[#allocation37_spill] sm:$0xff]  ;;  %v7116_v34 = vld [vmem:[%s11817_s1 + $0xc10] sm:$0xff] }
 0x5ed   : > { %v10911_v24 = vpop.f32.mrf.mxu0  ;;  %v4494_v0 = vpop.f32.mrf.mxu1  ;;  %v10920_v52 = vld [vmem:[#allocation2 + $0x150] sm:$0xff]  ;;  %6340 = vmatpush.msra.mxu0 %v7120_v62  ;;  %6233 = vmatpush.msra.mxu3 %v7098_v57  ;;  %v4049_v19 = vadd.f32 %v12195_v20, %v12194_v45 }
 0x5ee   : > { %v5819_v43 = vpop.f32.mrf.mxu3  ;;  %4639 = vst [vmem:[#allocation2 + $0x159] sm:$0xff] %v4607_v25  ;;  %v4495_v33 = vadd.f32 %v4494_v0, %v4382_v6 }
 0x5ef   : > { %5753 = vmatmul.f32.gmra.mxu2 %v10920_v52  ;;  %6341 = vmatpush.msra.mxu0 %v7119_v46 }
 0x5f0   : > { %5976 = vmatmul.f32.gmra.mxu0 %v4799_v23  ;;  %v4539_v51 = vmul.f32 %v10807_v42, %v4495_v33  ;;  %6044 = vmatmul.f32.gmra.mxu1 %v10603_v41  ;;  %v7145_v41 = vld [vmem:[%s11817_s1 + $0xcf8] sm:$0xff]  ;;  %v4385_v23 = vadd.f32 %v10579_v47, %v4272_v39  ;;  %v7114_v47 = vld [vmem:[%s11817_s1 + $0xc00] sm:$0xff] }
 0x5f1   : > { %6342 = vmatpush.msra.mxu0 %v7118_v50  ;;  %6444 = vmatpush.msra.mxu1 %v7145_v41  ;;  %v4162_v50 = vadd.f32 %v10591_v56, %v4049_v19  ;;  %v12197_v56 = vld [vmem:[#allocation28_spill] sm:$0xff] }
 0x5f2   : > { %v5706_v31 = vpop.f32.mrf.mxu2  ;;  %v4576_v6 = vadd.f32 %v10819_v9, %v4539_v51  ;;  %5869 = vmatmul.f32.gmra.mxu3 %v4607_v25 }
 0x5f3   : > { %v10942_v62 = vadd.f32 %v5819_v43, %v5706_v31  ;;  %6343 = vmatpush.msra.mxu0 %v7117_v26  ;;  %v7115_v43 = vld [vmem:[%s11817_s1 + $0xc08] sm:$0xff]  ;;  %v4275_v39 = vadd.f32 %v10601_v61, %v4162_v50  ;;  %v12196_v31 = vld [vmem:[#allocation6_spill] sm:$0xff] }
 0x5f4   : > { %v4608_v0 = vmax.f32 %v4576_v6, 0.0  ;;  %v4052_v45 = vadd.f32 %v12197_v56, %v12196_v31 }
 0x5f5   : > { %v10950_v57 = vpop.f32.mrf.mxu0  ;;  %v4497_v25 = vpop.f32.mrf.mxu1  ;;  %v10956_v5 = vld [vmem:[#allocation2 + $0x158] sm:$0xff]  ;;  %6344 = vmatpush.msra.mxu0 %v7116_v34  ;;  %v4388_v34 = vadd.f32 %v10599_v10, %v4275_v39 }
 0x5f6   : > { %v4800_v33 = vld [vmem:[#allocation2 + $0x152] sm:$0xff]  ;;  %v5822_v46 = vpop.f32.mrf.mxu3  ;;  %4640 = vst [vmem:[#allocation2 + $0x169] sm:$0xff] %v4608_v0  ;;  %v4498_v13 = vadd.f32 %v4497_v25, %v4385_v23  ;;  %v4165_v25 = vadd.f32 %v10609_v8, %v4052_v45 }
 0x5f7   : > { %5756 = vmatmul.f32.gmra.mxu2 %v10956_v5  ;;  %6345 = vmatpush.msra.mxu0 %v7115_v43  ;;  %v4801_v43 = vld [vmem:[#allocation2 + $0x15a] sm:$0xff] }
 0x5f8   : > { %5979 = vmatmul.f32.gmra.mxu0 %v4800_v33  ;;  %v4540_v51 = vmul.f32 %v10807_v42, %v4498_v13  ;;  %6047 = vmatmul.f32.gmra.mxu1 %v10617_v38  ;;  %v4278_v10 = vadd.f32 %v10615_v44, %v4165_v25 }
 0x5f9   : > { %6346 = vmatpush.msra.mxu0 %v7114_v47  ;;  %v7144_v47 = vld [vmem:[%s11817_s1 + $0xcf0] sm:$0xff] }
 0x5fa   : > { %v5709_v26 = vpop.f32.mrf.mxu2  ;;  %v4577_v20 = vadd.f32 %v10819_v9, %v4540_v51  ;;  %5872 = vmatmul.f32.gmra.mxu3 %v4608_v0  ;;  %v7160_v0 = vld [vmem:[%s11817_s1 + $0xd70] sm:$0xff]  ;;  %6445 = vmatpush.msra.mxu1 %v7144_v47  ;;  %v4391_v51 = vadd.f32 %v10624_v4, %v4278_v10 }
 0x5fb   : > { %v10969_v19 = vadd.f32 %v5822_v46, %v5709_v26  ;;  %6558 = vmatpush.msra.mxu2 %v7160_v0  ;;  %v4900_v0 = vld [vmem:[#allocation2 + $0x19] sm:$0xff] }
 0x5fc   : > { %v4609_v41 = vmax.f32 %v4577_v20, 0.0 }
 0x5fd   : > { %v10971_v6 = vpop.f32.mrf.mxu0  ;;  %v4500_v61 = vpop.f32.mrf.mxu1  ;;  %v10974_v23 = vld [vmem:[#allocation2 + $0x168] sm:$0xff] }
 0x5fe   : > { %v5825_v38 = vpop.f32.mrf.mxu3  ;;  %4641 = vst [vmem:[#allocation2 + $0x171] sm:$0xff] %v4609_v41  ;;  %v4501_v33 = vadd.f32 %v4500_v61, %v4388_v34 }
 0x5ff   : > { %5759 = vmatmul.f32.gmra.mxu2 %v10974_v23 }
 0x600   : > { %5982 = vmatmul.f32.gmra.mxu0 %v4801_v43  ;;  %v4541_v46 = vmul.f32 %v10807_v42, %v4501_v33  ;;  %6050 = vmatmul.f32.gmra.mxu1 %v10634_v12 }
 0x602   : > { %v5712_v50 = vpop.f32.mrf.mxu2  ;;  %v4578_v13 = vadd.f32 %v10819_v9, %v4541_v46  ;;  %5875 = vmatmul.f32.gmra.mxu3 %v4609_v41  ;;  %v4964_v41 = vld [vmem:[#allocation2 + $0x1a] sm:$0xff] }
 0x603   : > { %v10985_v8 = vadd.f32 %v5825_v38, %v5712_v50  ;;  %v7143_v50 = vld [vmem:[%s11817_s1 + $0xce8] sm:$0xff] }
 0x604   : > { %v4610_v44 = vmax.f32 %v4578_v13, 0.0  ;;  %6446 = vmatpush.msra.mxu1 %v7143_v50  ;;  %v5030_v50 = vld [vmem:[#allocation2 + $0x48] sm:$0xff] }
 0x605   : > { %12198 = vst [vmem:[#allocation14_spill] sm:$0xff] %v10985_v8  ;;  %v10990_v39 = vpop.f32.mrf.mxu0  ;;  %v4503_v26 = vpop.f32.mrf.mxu1  ;;  %v10993_v31 = vld [vmem:[#allocation2 + $0x170] sm:$0xff] }
 0x606   : > { %12199 = vst [vmem:[#allocation15_spill] sm:$0xff] %v10990_v39  ;;  %v4802_v12 = vld [vmem:[#allocation2 + $0x16a] sm:$0xff]  ;;  %v5828_v56 = vpop.f32.mrf.mxu3  ;;  %v4504_v45 = vadd.f32 %v4503_v26, %v4391_v51  ;;  %v4803_v33 = vld [vmem:[#allocation2 + $0x172] sm:$0xff]  ;;  %v4901_v51 = vld [vmem:[#allocation2 + $0x21] sm:$0xff] }
 0x607   : > { %4642 = vst [vmem:[#allocation2 + $0x181] sm:$0xff] %v4610_v44  ;;  %5762 = vmatmul.f32.gmra.mxu2 %v10993_v31  ;;  %v5028_v44 = vld [vmem:[#allocation2 + $0x30] sm:$0xff]  ;;  %v5043_v39 = vld [vmem:[#allocation2 + $0xe0] sm:$0xff] }
 0x608   : > { %5985 = vmatmul.f32.gmra.mxu0 %v4802_v12  ;;  %v4542_v20 = vmul.f32 %v10807_v42, %v4504_v45  ;;  %6053 = vmatmul.f32.gmra.mxu1 %v10649_v21  ;;  %v7159_v21 = vld [vmem:[%s11817_s1 + $0xd68] sm:$0xff]  ;;  %v4966_v12 = vld [vmem:[#allocation2 + $0x32] sm:$0xff] }
 0x609   : > { %6559 = vmatpush.msra.mxu2 %v7159_v21 }
 0x60a   : > { %v5715_v34 = vpop.f32.mrf.mxu2  ;;  %v4579_v61 = vadd.f32 %v10819_v9, %v4542_v20  ;;  %6234 = vmatmul.f32.vlgmr.msra.gmra.mxu3 %v4964_v41  ;;  %v4965_v9 = vld [vmem:[#allocation2 + $0x22] sm:$0xff]  ;;  %v5029_v41 = vld [vmem:[#allocation2 + $0x38] sm:$0xff] }
 0x60b   : > { %v10999_v4 = vadd.f32 %v5828_v56, %v5715_v34  ;;  %v11025_v34 = vld [vmem:[#allocation2 + $0x31] sm:$0xff] }
 0x60c   : > { %v4611_v38 = vmax.f32 %v4579_v61, 0.0 }
 0x60d   : > { %12200 = vst [vmem:[#allocation24_spill] sm:$0xff] %v10999_v4  ;;  %v11001_v43 = vpop.f32.mrf.mxu0  ;;  %v11003_v25 = vpop.f32.mrf.mxu1 }
 0x60e   : > { %12201 = vst [vmem:[#allocation26_spill] sm:$0xff] %v11001_v43  ;;  %v5831_v10 = vpop.f32.mrf.mxu3 }
 0x60f   : > { %4643 = vst [vmem:[#allocation2 + $0x189] sm:$0xff] %v4611_v38  ;;  %6121 = vmatmul.f32.vlgmr.msrb.gmra.mxu2 %v4900_v0 }
 0x610   : > { %5988 = vmatmul.f32.gmra.mxu0 %v4803_v33  ;;  %6056 = vmatmul.f32.gmra.mxu1 %v10667_v16  ;;  %v4967_v33 = vld [vmem:[#allocation2 + $0x3a] sm:$0xff] }
 0x612   : > { %v5718_v42 = vpop.f32.mrf.mxu2  ;;  %6237 = vmatmul.f32.gmra.mxu3 %v4965_v9  ;;  %v11041_v9 = vld [vmem:[#allocation2 + $0x39] sm:$0xff] }
 0x613   : > { %v11009_v46 = vadd.f32 %v5831_v10, %v5718_v42  ;;  %v7142_v10 = vld [vmem:[%s11817_s1 + $0xce0] sm:$0xff] }
 0x614   : > { %6447 = vmatpush.msra.mxu1 %v7142_v10 }
 0x615   : > { %12202 = vst [vmem:[#allocation34_spill] sm:$0xff] %v11009_v46  ;;  %v11014_v13 = vpop.f32.mrf.mxu0  ;;  %v11016_v47 = vpop.f32.mrf.mxu1 }
 0x616   : > { %12203 = vst [vmem:[#allocation32_spill] sm:$0xff] %v11014_v13  ;;  %v5834_v26 = vpop.f32.mrf.mxu3  ;;  %v5040_v13 = vld [vmem:[#allocation2 + $0xc0] sm:$0xff] }
 0x617   : > { %6124 = vmatmul.f32.gmra.mxu2 %v4901_v51 }
 0x618   : > { %6347 = vmatmul.f32.vlgmr.msra.gmra.mxu0 %v5028_v44  ;;  %6059 = vmatmul.f32.gmra.mxu1 %v10682_v14  ;;  %v7158_v14 = vld [vmem:[%s11817_s1 + $0xd60] sm:$0xff]  ;;  %v4968_v44 = vld [vmem:[#allocation2 + $0x4a] sm:$0xff] }
 0x619   : > { %6560 = vmatpush.msra.mxu2 %v7158_v14 }
 0x61a   : > { %v5721_v16 = vpop.f32.mrf.mxu2  ;;  %6240 = vmatmul.f32.gmra.mxu3 %v4966_v12 }
 0x61b   : > { %v11019_v56 = vadd.f32 %v5834_v26, %v5721_v16 }
 0x61d   : > { %12204 = vst [vmem:[#allocation43_spill] sm:$0xff] %v11019_v56  ;;  %v11021_v45 = vpop.f32.mrf.mxu0  ;;  %v11023_v20 = vpop.f32.mrf.mxu1 }
 0x61e   : > { %12205 = vst [vmem:[#allocation21_spill] sm:$0xff] %v11021_v45  ;;  %v5837_v61 = vpop.f32.mrf.mxu3  ;;  %v5039_v45 = vld [vmem:[#allocation2 + $0xb0] sm:$0xff] }
 0x61f   : > { %6127 = vmatmul.f32.gmra.mxu2 %v11025_v34 }
 0x620   : > { %6350 = vmatmul.f32.gmra.mxu0 %v5029_v41  ;;  %6062 = vmatmul.f32.gmra.mxu1 %v10700_v15  ;;  %v11051_v41 = vld [vmem:[#allocation2 + $0x49] sm:$0xff] }
 0x622   : > { %v5724_v38 = vpop.f32.mrf.mxu2  ;;  %6243 = vmatmul.f32.gmra.mxu3 %v4967_v33  ;;  %v11058_v33 = vld [vmem:[#allocation2 + $0x52] sm:$0xff] }
 0x623   : > { %v11032_v0 = vadd.f32 %v5837_v61, %v5724_v38  ;;  %v5031_v61 = vld [vmem:[#allocation2 + $0x50] sm:$0xff]  ;;  %12210 = vst [vmem:[#allocation12_spill] sm:$0xff] %v11058_v33 }
 0x625   : > { %12206 = vst [vmem:[#allocation22_spill] sm:$0xff] %v11032_v0  ;;  %v11037_v21 = vpop.f32.mrf.mxu0  ;;  %v11039_v42 = vpop.f32.mrf.mxu1 }
 0x626   : > { %12207 = vst [vmem:[#allocation35_spill] sm:$0xff] %v11037_v21  ;;  %v5840_v51 = vpop.f32.mrf.mxu3  ;;  %v5037_v21 = vld [vmem:[#allocation2 + $0x98] sm:$0xff] }
 0x627   : > { %6130 = vmatmul.f32.gmra.mxu2 %v11041_v9 }
 0x628   : > { %6353 = vmatmul.f32.gmra.mxu0 %v5030_v50  ;;  %6065 = vmatmul.f32.gmra.mxu1 %v10715_v53  ;;  %v7157_v53 = vld [vmem:[%s11817_s1 + $0xd58] sm:$0xff] }
 0x629   : > { %6561 = vmatpush.msra.mxu2 %v7157_v53  ;;  %v7141_v50 = vld [vmem:[%s11817_s1 + $0xcd8] sm:$0xff]  ;;  %v11074_v53 = vld [vmem:[#allocation2 + $0x62] sm:$0xff] }
 0x62a   : > { %v5727_v15 = vpop.f32.mrf.mxu2  ;;  %6246 = vmatmul.f32.gmra.mxu3 %v4968_v44  ;;  %6448 = vmatpush.msra.mxu1 %v7141_v50  ;;  %v11070_v44 = vld [vmem:[#allocation2 + $0x51] sm:$0xff]  ;;  %12213 = vst [vmem:[#allocation42_spill] sm:$0xff] %v11074_v53  ;;  %v11081_v50 = vld [vmem:[#allocation2 + $0x61] sm:$0xff] }
 0x62b   : > { %v11045_v26 = vadd.f32 %v5840_v51, %v5727_v15 }
 0x62d   : > { %12208 = vst [vmem:[#allocation41_spill] sm:$0xff] %v11045_v26  ;;  %v11047_v16 = vpop.f32.mrf.mxu0  ;;  %v11049_v12 = vpop.f32.mrf.mxu1 }
 0x62e   : > { %12209 = vst [vmem:[#allocation45_spill] sm:$0xff] %v11047_v16  ;;  %v5843_v14 = vpop.f32.mrf.mxu3 }
 0x62f   : > { %6133 = vmatmul.f32.gmra.mxu2 %v11051_v41 }
 0x630   : > { %6356 = vmatmul.f32.gmra.mxu0 %v5031_v61  ;;  %6068 = vmatmul.f32.gmra.mxu1 %v10733_v11  ;;  %v5032_v61 = vld [vmem:[#allocation2 + $0x60] sm:$0xff] }
 0x632   : > { %v5730_v38 = vpop.f32.mrf.mxu2  ;;  %6249 = vmatmul.f32.gmra.mxu3 %v11058_v33 }
 0x633   : > { %v11060_v10 = vadd.f32 %v5843_v14, %v5730_v38 }
 0x635   : > { %12211 = vst [vmem:[#allocation25_spill] sm:$0xff] %v11060_v10  ;;  %v11066_v51 = vpop.f32.mrf.mxu0  ;;  %v11068_v15 = vpop.f32.mrf.mxu1  ;;  %v5033_v10 = vld [vmem:[#allocation2 + $0x68] sm:$0xff] }
 0x636   : > { %12212 = vst [vmem:[#allocation38_spill] sm:$0xff] %v11066_v51  ;;  %v5846_v11 = vpop.f32.mrf.mxu3 }
 0x637   : > { %6136 = vmatmul.f32.gmra.mxu2 %v11070_v44 }
 0x638   : > { %6359 = vmatmul.f32.gmra.mxu0 %v5032_v61  ;;  %6071 = vmatmul.f32.gmra.mxu1 %v10748_v63  ;;  %v7156_v63 = vld [vmem:[%s11817_s1 + $0xd50] sm:$0xff] }
 0x639   : > { %6562 = vmatpush.msra.mxu2 %v7156_v63 }
 0x63a   : > { %v5733_v14 = vpop.f32.mrf.mxu2  ;;  %6252 = vmatmul.f32.gmra.mxu3 %v11074_v53  ;;  %v5034_v53 = vld [vmem:[#allocation2 + $0x78] sm:$0xff] }
 0x63b   : > { %v11076_v38 = vadd.f32 %v5846_v11, %v5733_v14  ;;  %v11090_v11 = vld [vmem:[#allocation2 + $0x6a] sm:$0xff] }
 0x63c   : > { %12216 = vst [vmem:[#allocation27_spill] sm:$0xff] %v11090_v11 }
 0x63d   : > { %12214 = vst [vmem:[#allocation51_spill] sm:$0xff] %v11076_v38  ;;  %v11079_v51 = vpop.f32.mrf.mxu0  ;;  %v11083_v16 = vpop.f32.mrf.mxu1 }
 0x63e   : > { %12215 = vst [vmem:[#allocation33_spill] sm:$0xff] %v11079_v51  ;;  %v5849_v33 = vpop.f32.mrf.mxu3  ;;  %v7140_v51 = vld [vmem:[%s11817_s1 + $0xcd0] sm:$0xff] }
 0x63f   : > { %6139 = vmatmul.f32.gmra.mxu2 %v11081_v50  ;;  %6449 = vmatpush.msra.mxu1 %v7140_v51  ;;  %v11113_v51 = vld [vmem:[#allocation2 + $0x79] sm:$0xff] }
 0x640   : > { %6362 = vmatmul.f32.gmra.mxu0 %v5033_v10  ;;  %6074 = vmatmul.f32.gmra.mxu1 %v10766_v55  ;;  %v11100_v10 = vld [vmem:[#allocation2 + $0x69] sm:$0xff] }
 0x642   : > { %v5736_v61 = vpop.f32.mrf.mxu2  ;;  %6255 = vmatmul.f32.gmra.mxu3 %v11090_v11  ;;  %v5035_v11 = vld [vmem:[#allocation2 + $0x80] sm:$0xff] }
 0x643   : > { %v11092_v14 = vadd.f32 %v5849_v33, %v5736_v61  ;;  %v11106_v61 = vld [vmem:[#allocation2 + $0x7a] sm:$0xff] }
 0x644   : > { %12219 = vst [vmem:[#allocation48_spill] sm:$0xff] %v11106_v61 }
 0x645   : > { %12217 = vst [vmem:[#allocation40_spill] sm:$0xff] %v11092_v14  ;;  %v11098_v38 = vpop.f32.mrf.mxu0  ;;  %v11103_v55 = vpop.f32.mrf.mxu1 }
 0x646   : > { %12218 = vst [vmem:[#allocation44_spill] sm:$0xff] %v11098_v38  ;;  %v5852_v63 = vpop.f32.mrf.mxu3 }
 0x647   : > { %6142 = vmatmul.f32.gmra.mxu2 %v11100_v10 }
 0x648   : > { %6365 = vmatmul.f32.gmra.mxu0 %v5034_v53  ;;  %6077 = vmatmul.f32.gmra.mxu1 %v10793_v28  ;;  %v7155_v28 = vld [vmem:[%s11817_s1 + $0xd48] sm:$0xff] }
 0x649   : > { %6563 = vmatpush.msra.mxu2 %v7155_v28  ;;  %v5036_v28 = vld [vmem:[#allocation2 + $0x90] sm:$0xff] }
 0x64a   : > { %v5739_v33 = vpop.f32.mrf.mxu2  ;;  %6258 = vmatmul.f32.gmra.mxu3 %v11106_v61  ;;  %v11132_v61 = vld [vmem:[#allocation2 + $0x81] sm:$0xff] }
 0x64b   : > { %v11108_v14 = vadd.f32 %v5852_v63, %v5739_v33  ;;  %v11120_v63 = vld [vmem:[#allocation2 + $0x82] sm:$0xff] }
 0x64c   : > { %12222 = vst [vmem:[#allocation46_spill] sm:$0xff] %v11120_v63 }
 0x64d   : > { %12220 = vst [vmem:[#allocation30_spill] sm:$0xff] %v11108_v14  ;;  %v11111_v38 = vpop.f32.mrf.mxu0  ;;  %v11122_v33 = vpop.f32.mrf.mxu1 }
 0x64e   : > { %12221 = vst [vmem:[#allocation29_spill] sm:$0xff] %v11111_v38  ;;  %v5855_v26 = vpop.f32.mrf.mxu3 }
 0x64f   : > { %6145 = vmatmul.f32.gmra.mxu2 %v11113_v51 }
 0x650   : > { %6368 = vmatmul.f32.gmra.mxu0 %v5035_v11  ;;  %6080 = vmatmul.f32.gmra.mxu1 %v10839_v37  ;;  %v7139_v11 = vld [vmem:[%s11817_s1 + $0xcc8] sm:$0xff] }
 0x651   : > { %6450 = vmatpush.msra.mxu1 %v7139_v11  ;;  %v11145_v11 = vld [vmem:[#allocation2 + $0x91] sm:$0xff] }
 0x652   : > { %v5742_v53 = vpop.f32.mrf.mxu2  ;;  %6261 = vmatmul.f32.gmra.mxu3 %v11120_v63 }
 0x653   : > { %v11124_v38 = vadd.f32 %v5855_v26, %v5742_v53  ;;  %v11136_v53 = vld [vmem:[#allocation2 + $0x92] sm:$0xff] }
 0x654   : > { %12225 = vst [vmem:[#allocation39_spill] sm:$0xff] %v11136_v53 }
 0x655   : > { %12223 = vst [vmem:[#allocation50_spill] sm:$0xff] %v11124_v38  ;;  %v11130_v14 = vpop.f32.mrf.mxu0 }
 0x656   : > { %12224 = vst [vmem:[#allocation18_spill] sm:$0xff] %v11130_v14  ;;  %v5858_v37 = vpop.f32.mrf.mxu3  ;;  %v11143_v14 = vpop.f32.mrf.mxu1 }
 0x657   : > { %6148 = vmatmul.f32.gmra.mxu2 %v11132_v61 }
 0x658   : > { %6371 = vmatmul.f32.gmra.mxu0 %v5036_v28  ;;  %6083 = vmatmul.f32.gmra.mxu1 %v10878_v60  ;;  %v7154_v60 = vld [vmem:[%s11817_s1 + $0xd40] sm:$0xff] }
 0x659   : > { %v7138_v28 = vld [vmem:[%s11817_s1 + $0xcc0] sm:$0xff]  ;;  %6564 = vmatpush.msra.mxu2 %v7154_v60  ;;  %v7136_v60 = vld [vmem:[%s11817_s1 + $0xcb0] sm:$0xff] }
 0x65a   : > { %v5745_v26 = vpop.f32.mrf.mxu2  ;;  %6264 = vmatmul.f32.gmra.mxu3 %v11136_v53  ;;  %6451 = vmatpush.msra.mxu1 %v7138_v28  ;;  %v11168_v28 = vld [vmem:[#allocation2 + $0x99] sm:$0xff] }
 0x65b   : > { %v11138_v38 = vadd.f32 %v5858_v37, %v5745_v26  ;;  %v11155_v26 = vld [vmem:[#allocation2 + $0x9a] sm:$0xff] }
 0x65c   : > { %12228 = vst [vmem:[#allocation55_spill] sm:$0xff] %v11155_v26 }
 0x65d   : > { %12226 = vst [vmem:[#allocation36_spill] sm:$0xff] %v11138_v38  ;;  %v11141_v63 = vpop.f32.mrf.mxu0 }
 0x65e   : > { %12227 = vst [vmem:[#allocation52_spill] sm:$0xff] %v11141_v63  ;;  %v5861_v0 = vpop.f32.mrf.mxu3 }
 0x65f   : > { %6151 = vmatmul.f32.gmra.mxu2 %v11145_v11 }
 0x660   : > { %6374 = vmatmul.f32.gmra.mxu0 %v5037_v21  ;;  %6086 = vmatmul.f32.gmra.mxu1 %v10920_v52  ;;  %v7137_v21 = vld [vmem:[%s11817_s1 + $0xcb8] sm:$0xff]  ;;  %v5038_v52 = vld [vmem:[#allocation2 + $0xa8] sm:$0xff] }
 0x661   : > { %6452 = vmatpush.msra.mxu1 %v7137_v21  ;;  %v7134_v21 = vld [vmem:[%s11817_s1 + $0xca0] sm:$0xff] }
 0x662   : > { %v5748_v37 = vpop.f32.mrf.mxu2  ;;  %6267 = vmatmul.f32.gmra.mxu3 %v11155_v26 }
 0x663   : > { %v11157_v63 = vadd.f32 %v5861_v0, %v5748_v37  ;;  %6453 = vmatpush.msra.mxu1 %v7136_v60  ;;  %v11170_v0 = vpop.f32.mrf.mxu1  ;;  %v7135_v37 = vld [vmem:[%s11817_s1 + $0xca8] sm:$0xff] }
 0x665   : > { %12229 = vst [vmem:[#allocation53_spill] sm:$0xff] %v11157_v63  ;;  %v11163_v38 = vpop.f32.mrf.mxu0  ;;  %6454 = vmatpush.msra.mxu1 %v7135_v37  ;;  %v11180_v63 = vld [vmem:[#allocation2 + $0xaa] sm:$0xff] }
 0x666   : > { %12230 = vst [vmem:[#allocation17_spill] sm:$0xff] %v11163_v38  ;;  %v5864_v53 = vpop.f32.mrf.mxu3  ;;  %v7132_v37 = vld [vmem:[%s11817_s1 + $0xc90] sm:$0xff] }
 0x667   : > { %6154 = vmatmul.f32.gmra.mxu2 %v11168_v28  ;;  %12231 = vst [vmem:[#allocation7_spill] sm:$0xff] %v11180_v63  ;;  %6455 = vmatpush.msra.mxu1 %v7134_v21  ;;  %v7130_v21 = vld [vmem:[%s11817_s1 + $0xc80] sm:$0xff] }
 0x668   : > { %6377 = vmatmul.f32.gmra.mxu0 %v5038_v52  ;;  %6089 = vmatmul.f32.gmra.mxu1 %v10956_v5  ;;  %v7133_v52 = vld [vmem:[%s11817_s1 + $0xc98] sm:$0xff]  ;;  %v11193_v5 = vld [vmem:[#allocation2 + $0xa9] sm:$0xff] }
 0x669   : > { %6456 = vmatpush.msra.mxu1 %v7133_v52 }
 0x66a   : > { %v5751_v38 = vpop.f32.mrf.mxu2  ;;  %6270 = vmatmul.f32.gmra.mxu3 %v11180_v63  ;;  %v11215_v63 = vld [vmem:[#allocation2 + $0xb1] sm:$0xff] }
 0x66b   : > { %v11182_v60 = vadd.f32 %v5864_v53, %v5751_v38  ;;  %6457 = vmatpush.msra.mxu1 %v7132_v37  ;;  %v7131_v38 = vld [vmem:[%s11817_s1 + $0xc88] sm:$0xff]  ;;  %v7153_v53 = vld [vmem:[%s11817_s1 + $0xd38] sm:$0xff]  ;;  %v11205_v52 = vpop.f32.mrf.mxu1 }
 0x66c   : > { %6565 = vmatpush.msra.mxu2 %v7153_v53 }
 0x66d   : > { %12232 = vst [vmem:[#allocation59_spill] sm:$0xff] %v11182_v60  ;;  %v11188_v26 = vpop.f32.mrf.mxu0  ;;  %6458 = vmatpush.msra.mxu1 %v7131_v38  ;;  %v11219_v38 = vld [vmem:[#allocation2 + $0xc2] sm:$0xff] }
 0x66e   : > { %12233 = vst [vmem:[#allocation57_spill] sm:$0xff] %v11188_v26  ;;  %v5867_v56 = vpop.f32.mrf.mxu3 }
 0x66f   : > { %6157 = vmatmul.f32.gmra.mxu2 %v11193_v5  ;;  %6459 = vmatpush.msra.mxu1 %v7130_v21  ;;  %12237 = vst [vmem:[#allocation49_spill] sm:$0xff] %v11219_v38 }
 0x670   : > { %6380 = vmatmul.f32.gmra.mxu0 %v5039_v45  ;;  %6092 = vmatmul.f32.gmra.mxu1 %v10974_v23  ;;  %v11208_v45 = vld [vmem:[#allocation2 + $0xb2] sm:$0xff] }
 0x671   : > { %12234 = vst [vmem:[#allocation4_spill] sm:$0xff] %v11208_v45 }
 0x672   : > { %v5754_v37 = vpop.f32.mrf.mxu2  ;;  %6273 = vmatmul.f32.gmra.mxu3 %v11208_v45  ;;  %v5042_v45 = vld [vmem:[#allocation2 + $0xd8] sm:$0xff] }
 0x673   : > { %v11210_v26 = vadd.f32 %v5867_v56, %v5754_v37  ;;  %v11221_v53 = vpop.f32.mrf.mxu1  ;;  %v11228_v37 = vld [vmem:[#allocation2 + $0xc1] sm:$0xff] }
 0x675   : > { %12235 = vst [vmem:[#allocation8_spill] sm:$0xff] %v11210_v26  ;;  %v11213_v60 = vpop.f32.mrf.mxu0 }
 0x676   : > { %12236 = vst [vmem:[#allocation10_spill] sm:$0xff] %v11213_v60  ;;  %v5870_v46 = vpop.f32.mrf.mxu3  ;;  %v5041_v60 = vld [vmem:[#allocation2 + $0xc8] sm:$0xff] }
 0x677   : > { %6160 = vmatmul.f32.gmra.mxu2 %v11215_v63 }
 0x678   : > { %6383 = vmatmul.f32.gmra.mxu0 %v5040_v13  ;;  %6095 = vmatmul.f32.gmra.mxu1 %v10993_v31  ;;  %v7152_v31 = vld [vmem:[%s11817_s1 + $0xd30] sm:$0xff]  ;;  %v11234_v13 = vld [vmem:[#allocation2 + $0x180] sm:$0xff] }
 0x679   : > { %6566 = vmatpush.msra.mxu2 %v7152_v31  ;;  %v11249_v31 = vld [vmem:[#allocation2 + $0x188] sm:$0xff] }
 0x67a   : > { %v5757_v23 = vpop.f32.mrf.mxu2  ;;  %6276 = vmatmul.f32.gmra.mxu3 %v11219_v38 }
 0x67b   : > { %v11223_v56 = vadd.f32 %v5870_v46, %v5757_v23  ;;  %v11237_v23 = vld [vmem:[#allocation2 + $0xca] sm:$0xff]  ;;  %v11244_v38 = vpop.f32.mrf.mxu1 }
 0x67c   : > { %12240 = vst [vmem:[#allocation9_spill] sm:$0xff] %v11237_v23 }
 0x67d   : > { %12238 = vst [vmem:[#allocation20_spill] sm:$0xff] %v11223_v56  ;;  %v11226_v21 = vpop.f32.mrf.mxu0 }
 0x67e   : > { %12239 = vst [vmem:[#allocation11_spill] sm:$0xff] %v11226_v21  ;;  %v5873_v26 = vpop.f32.mrf.mxu3 }
 0x67f   : > { %6163 = vmatmul.f32.gmra.mxu2 %v11228_v37 }
 0x680   : > { %6386 = vmatmul.f32.gmra.mxu0 %v5041_v60  ;;  %6098 = vmatmul.f32.gmra.mxu1 %v11234_v13  ;;  %v11246_v60 = vld [vmem:[#allocation2 + $0xc9] sm:$0xff] }
 0x681   : > { %12243 = vst [vmem:[#allocation5_spill] sm:$0xff] %v11246_v60 }
 0x682   : > { %v5760_v46 = vpop.f32.mrf.mxu2  ;;  %6279 = vmatmul.f32.gmra.mxu3 %v11237_v23  ;;  %v11261_v23 = vld [vmem:[#allocation2 + $0xd9] sm:$0xff] }
 0x683   : > { %v11239_v21 = vadd.f32 %v5873_v26, %v5760_v46  ;;  %v11252_v26 = vld [vmem:[#allocation2 + $0xda] sm:$0xff]  ;;  %v5784_v46 = vadd.f32 %v10636_v49, %v10628_v29  ;;  %12247 = vst [vmem:[#allocation6_spill] sm:$0xff] %v11261_v23  ;;  %v7151_v29 = vld [vmem:[%s11817_s1 + $0xd28] sm:$0xff] }
 0x684   : > { %12244 = vst [vmem:[#allocation13_spill] sm:$0xff] %v11252_v26  ;;  %6567 = vmatpush.msra.mxu2 %v7151_v29 }
 0x685   : > { %12241 = vst [vmem:[#allocation16_spill] sm:$0xff] %v11239_v21  ;;  %v11242_v56 = vpop.f32.mrf.mxu0  ;;  %v5897_v8 = vadd.f32 %v10640_v54, %v5784_v46 }
 0x686   : > { %12242 = vst [vmem:[#allocation31_spill] sm:$0xff] %v11242_v56  ;;  %v5876_v43 = vpop.f32.mrf.mxu3 }
 0x687   : > { %6166 = vmatmul.f32.gmra.mxu2 %v11246_v60  ;;  %v11264_v60 = vpop.f32.mrf.mxu1  ;;  %v6010_v49 = vadd.f32 %v11003_v25, %v5897_v8 }
 0x688   : > { %6389 = vmatmul.f32.gmra.mxu0 %v5042_v45  ;;  %6101 = vmatmul.f32.gmra.mxu1 %v11249_v31 }
 0x68a   : > { %v5763_v4 = vpop.f32.mrf.mxu2  ;;  %6282 = vmatmul.f32.gmra.mxu3 %v11252_v26 }
 0x68b   : > { %v11256_v56 = vadd.f32 %v5876_v43, %v5763_v4  ;;  %v11272_v43 = vld [vmem:[#allocation2 + $0xe2] sm:$0xff] }
 0x68d   : > { %12245 = vst [vmem:[#allocation23_spill] sm:$0xff] %v11256_v56  ;;  %v11259_v21 = vpop.f32.mrf.mxu0  ;;  %v11275_v56 = vld [vmem:[#allocation2 + $0xe1] sm:$0xff] }
 0x68e   : > { %12246 = vst [vmem:[#allocation37_spill] sm:$0xff] %v11259_v21  ;;  %v6235_v45 = vpop.f32.mrf.mxu3 }
 0x68f   : > { %6169 = vmatmul.f32.gmra.mxu2 %v11261_v23  ;;  %v5900_v23 = vadd.f32 %v10661_v3, %v10653_v17  ;;  %v11283_v25 = vpop.f32.mrf.mxu1  ;;  %v11289_v17 = vld [vmem:[#allocation2 + $0xf1] sm:$0xff] }
 0x690   : > { %6392 = vmatmul.f32.gmra.mxu0 %v5043_v39  ;;  %6460 = vmatmul.f32.vlgmr.msra.gmra.mxu1 %v11025_v34  ;;  %v5044_v39 = vld [vmem:[#allocation2 + $0xf0] sm:$0xff]  ;;  %v5045_v3 = vld [vmem:[#allocation2 + $0xf8] sm:$0xff] }
 0x691   : > { %v6013_v8 = vadd.f32 %v11016_v47, %v5900_v23 }
 0x692   : > { %v6122_v4 = vpop.f32.mrf.mxu2  ;;  %6285 = vmatmul.f32.gmra.mxu3 %v11272_v43 }
 0x693   : > { %v6123_v21 = vadd.f32 %v6122_v4, %v6010_v49 }
 0x695   : > { %v6348_v54 = vpop.f32.mrf.mxu0  ;;  %v6236_v46 = vadd.f32 %v6235_v45, %v6123_v21  ;;  %v11286_v21 = vld [vmem:[#allocation2 + $0xf2] sm:$0xff] }
 0x696   : > { %v6238_v26 = vpop.f32.mrf.mxu3 }
 0x697   : > { %v11279_v29 = vadd.f32 %v6348_v54, %v6236_v46  ;;  %6172 = vmatmul.f32.gmra.mxu2 %v11275_v56  ;;  %v5903_v46 = vadd.f32 %v10679_v27, %v10677_v22 }
 0x698   : > { %6395 = vmatmul.f32.gmra.mxu0 %v5044_v39  ;;  %6463 = vmatmul.f32.gmra.mxu1 %v11041_v9  ;;  %v7150_v9 = vld [vmem:[%s11817_s1 + $0xd20] sm:$0xff] }
 0x699   : > { %6568 = vmatpush.msra.mxu2 %v7150_v9  ;;  %v6016_v23 = vadd.f32 %v11023_v20, %v5903_v46  ;;  %v11301_v39 = vld [vmem:[#allocation2 + $0xfa] sm:$0xff]  ;;  %v11315_v9 = vld [vmem:[#allocation2 + $0x10a] sm:$0xff] }
 0x69a   : > { %v6125_v34 = vpop.f32.mrf.mxu2  ;;  %6288 = vmatmul.f32.gmra.mxu3 %v11286_v21 }
 0x69b   : > { %v6126_v45 = vadd.f32 %v6125_v34, %v6013_v8  ;;  %v11303_v8 = vpop.f32.mrf.mxu1 }
 0x69d   : > { %v6351_v49 = vpop.f32.mrf.mxu0  ;;  %v6239_v4 = vadd.f32 %v6238_v26, %v6126_v45  ;;  %v11306_v45 = vld [vmem:[#allocation2 + $0xf9] sm:$0xff] }
 0x69e   : > { %v6241_v54 = vpop.f32.mrf.mxu3 }
 0x69f   : > { %v11293_v47 = vadd.f32 %v6351_v49, %v6239_v4  ;;  %6175 = vmatmul.f32.gmra.mxu2 %v11289_v17  ;;  %v5046_v49 = vld [vmem:[#allocation2 + $0x108] sm:$0xff] }
 0x6a0   : > { %6398 = vmatmul.f32.gmra.mxu0 %v5045_v3  ;;  %6466 = vmatmul.f32.gmra.mxu1 %v11051_v41  ;;  %v5906_v3 = vadd.f32 %v10697_v18, %v10695_v32  ;;  %v11320_v32 = vld [vmem:[#allocation2 + $0x109] sm:$0xff] }
 0x6a1   : > { %v5047_v18 = vld [vmem:[#allocation2 + $0x110] sm:$0xff] }
 0x6a2   : > { %v6128_v26 = vpop.f32.mrf.mxu2  ;;  %6291 = vmatmul.f32.gmra.mxu3 %v11301_v39  ;;  %v6019_v41 = vadd.f32 %v11039_v42, %v5906_v3 }
 0x6a3   : > { %v6129_v22 = vadd.f32 %v6128_v26, %v6016_v23  ;;  %v11318_v26 = vpop.f32.mrf.mxu1 }
 0x6a5   : > { %v6354_v27 = vpop.f32.mrf.mxu0  ;;  %v6242_v34 = vadd.f32 %v6241_v54, %v6129_v22 }
 0x6a6   : > { %v6244_v4 = vpop.f32.mrf.mxu3 }
 0x6a7   : > { %v11310_v20 = vadd.f32 %v6354_v27, %v6242_v34  ;;  %6178 = vmatmul.f32.gmra.mxu2 %v11306_v45  ;;  %v12249_v34 = vld [vmem:[#allocation19_spill] sm:$0xff] }
 0x6a8   : > { %6401 = vmatmul.f32.gmra.mxu0 %v5046_v49  ;;  %6469 = vmatmul.f32.gmra.mxu1 %v11070_v44  ;;  %v5909_v49 = vadd.f32 %v12249_v34, %v10710_v2  ;;  %v7149_v44 = vld [vmem:[%s11817_s1 + $0xd18] sm:$0xff]  ;;  %v12252_v34 = vld [vmem:[#allocation58_spill] sm:$0xff] }
 0x6a9   : > { %12248 = vst [vmem:[#allocation28_spill] sm:$0xff] %v11310_v20  ;;  %6569 = vmatpush.msra.mxu2 %v7149_v44 }
 0x6aa   : > { %v6131_v46 = vpop.f32.mrf.mxu2  ;;  %6294 = vmatmul.f32.gmra.mxu3 %v11315_v9  ;;  %v6022_v3 = vadd.f32 %v11049_v12, %v5909_v49 }
 0x6ab   : > { %v6132_v54 = vadd.f32 %v6131_v46, %v6019_v41  ;;  %v11332_v41 = vld [vmem:[#allocation2 + $0x112] sm:$0xff]  ;;  %v11339_v20 = vpop.f32.mrf.mxu1 }
 0x6ad   : > { %v6357_v23 = vpop.f32.mrf.mxu0  ;;  %v6245_v22 = vadd.f32 %v6244_v4, %v6132_v54 }
 0x6ae   : > { %v6247_v27 = vpop.f32.mrf.mxu3 }
 0x6af   : > { %v11324_v42 = vadd.f32 %v6357_v23, %v6245_v22  ;;  %6181 = vmatmul.f32.gmra.mxu2 %v11320_v32  ;;  %v11335_v23 = vld [vmem:[#allocation2 + $0x111] sm:$0xff]  ;;  %v5048_v22 = vld [vmem:[#allocation2 + $0x120] sm:$0xff] }
 0x6b0   : > { %6404 = vmatmul.f32.gmra.mxu0 %v5047_v18  ;;  %6472 = vmatmul.f32.gmra.mxu1 %v11081_v50  ;;  %v12251_v18 = vld [vmem:[#allocation54_spill] sm:$0xff] }
 0x6b1   : > { %12250 = vst [vmem:[#allocation19_spill] sm:$0xff] %v11324_v42  ;;  %v5912_v42 = vadd.f32 %v12252_v34, %v12251_v18  ;;  %v11349_v18 = vld [vmem:[#allocation2 + $0x121] sm:$0xff]  ;;  %v12255_v34 = vld [vmem:[#allocation56_spill] sm:$0xff] }
 0x6b2   : > { %v6134_v4 = vpop.f32.mrf.mxu2  ;;  %6297 = vmatmul.f32.gmra.mxu3 %v11332_v41 }
 0x6b3   : > { %v6135_v46 = vadd.f32 %v6134_v4, %v6022_v3  ;;  %v6025_v50 = vadd.f32 %v11068_v15, %v5912_v42  ;;  %v7148_v15 = vld [vmem:[%s11817_s1 + $0xd10] sm:$0xff]  ;;  %v11360_v42 = vpop.f32.mrf.mxu1 }
 0x6b4   : > { %6570 = vmatpush.msra.mxu2 %v7148_v15  ;;  %v11375_v15 = vld [vmem:[#allocation2 + $0x13a] sm:$0xff] }
 0x6b5   : > { %v6360_v2 = vpop.f32.mrf.mxu0  ;;  %v6248_v54 = vadd.f32 %v6247_v27, %v6135_v46  ;;  %v11346_v27 = vld [vmem:[#allocation2 + $0x122] sm:$0xff] }
 0x6b6   : > { %v6250_v12 = vpop.f32.mrf.mxu3 }
 0x6b7   : > { %v11341_v44 = vadd.f32 %v6360_v2, %v6248_v54  ;;  %6184 = vmatmul.f32.gmra.mxu2 %v11335_v23  ;;  %v5049_v2 = vld [vmem:[#allocation2 + $0x128] sm:$0xff] }
 0x6b8   : > { %6407 = vmatmul.f32.gmra.mxu0 %v5048_v22  ;;  %6475 = vmatmul.f32.gmra.mxu1 %v11100_v10  ;;  %v12254_v54 = vld [vmem:[#allocation47_spill] sm:$0xff] }
 0x6b9   : > { %12253 = vst [vmem:[#allocation54_spill] sm:$0xff] %v11341_v44  ;;  %v5915_v44 = vadd.f32 %v12255_v34, %v12254_v54  ;;  %v5050_v54 = vld [vmem:[#allocation2 + $0x138] sm:$0xff]  ;;  %v5918_v34 = vadd.f32 %v10763_v36, %v10761_v59 }
 0x6ba   : > { %v6137_v49 = vpop.f32.mrf.mxu2  ;;  %6300 = vmatmul.f32.gmra.mxu3 %v11346_v27  ;;  %v11380_v36 = vld [vmem:[#allocation2 + $0x139] sm:$0xff] }
 0x6bb   : > { %v6138_v3 = vadd.f32 %v6137_v49, %v6025_v50  ;;  %v6028_v10 = vadd.f32 %v11083_v16, %v5915_v44  ;;  %v11363_v49 = vld [vmem:[#allocation2 + $0x12a] sm:$0xff] }
 0x6bd   : > { %v6363_v4 = vpop.f32.mrf.mxu0  ;;  %v6251_v46 = vadd.f32 %v6250_v12, %v6138_v3 }
 0x6be   : > { %v6253_v50 = vpop.f32.mrf.mxu3 }
 0x6bf   : > { %v11353_v22 = vadd.f32 %v6363_v4, %v6251_v46  ;;  %6187 = vmatmul.f32.gmra.mxu2 %v11349_v18 }
 0x6c0   : > { %6410 = vmatmul.f32.gmra.mxu0 %v5049_v2  ;;  %6478 = vmatmul.f32.gmra.mxu1 %v11113_v51  ;;  %v11366_v2 = vld [vmem:[#allocation2 + $0x129] sm:$0xff]  ;;  %v6031_v51 = vadd.f32 %v11103_v55, %v5918_v34 }
 0x6c2   : > { %v6140_v12 = vpop.f32.mrf.mxu2  ;;  %6303 = vmatmul.f32.gmra.mxu3 %v11363_v49 }
 0x6c3   : > { %v6141_v3 = vadd.f32 %v6140_v12, %v6028_v10  ;;  %v11377_v10 = vpop.f32.mrf.mxu1 }
 0x6c5   : > { %v6366_v4 = vpop.f32.mrf.mxu0  ;;  %v6254_v46 = vadd.f32 %v6253_v50, %v6141_v3 }
 0x6c6   : > { %v6256_v50 = vpop.f32.mrf.mxu3 }
 0x6c7   : > { %v11370_v16 = vadd.f32 %v6366_v4, %v6254_v46  ;;  %6190 = vmatmul.f32.gmra.mxu2 %v11366_v2  ;;  %v5051_v4 = vld [vmem:[#allocation2 + $0x140] sm:$0xff]  ;;  %v5921_v46 = vadd.f32 %v10787_v58, %v10782_v35 }
 0x6c8   : > { %6413 = vmatmul.f32.gmra.mxu0 %v5050_v54  ;;  %6481 = vmatmul.f32.gmra.mxu1 %v11132_v61  ;;  %v7147_v61 = vld [vmem:[%s11817_s1 + $0xd08] sm:$0xff] }
 0x6c9   : > { %6571 = vmatpush.msra.mxu2 %v7147_v61  ;;  %v6034_v54 = vadd.f32 %v11122_v33, %v5921_v46  ;;  %v11399_v58 = vld [vmem:[#allocation2 + $0x141] sm:$0xff]  ;;  %v5053_v46 = vld [vmem:[#allocation2 + $0x158] sm:$0xff] }
 0x6ca   : > { %v6143_v44 = vpop.f32.mrf.mxu2  ;;  %6306 = vmatmul.f32.gmra.mxu3 %v11375_v15 }
 0x6cb   : > { %v6144_v12 = vadd.f32 %v6143_v44, %v6031_v51  ;;  %v11392_v51 = vld [vmem:[#allocation2 + $0x142] sm:$0xff]  ;;  %v11397_v35 = vpop.f32.mrf.mxu1 }
 0x6cd   : > { %v6257_v3 = vadd.f32 %v6256_v50, %v6144_v12  ;;  %v6369_v59 = vpop.f32.mrf.mxu0  ;;  %v5052_v12 = vld [vmem:[#allocation2 + $0x150] sm:$0xff]  ;;  %v5924_v50 = vadd.f32 %v10830_v48, %v10822_v7  ;;  %v5927_v7 = vadd.f32 %v10869_v30, %v10861_v40  ;;  %v11428_v40 = vld [vmem:[#allocation2 + $0x159] sm:$0xff]  ;;  %v5054_v30 = vld [vmem:[#allocation2 + $0x168] sm:$0xff] }
 0x6cf   : > { %v11384_v55 = vadd.f32 %v6369_v59, %v6257_v3  ;;  %6193 = vmatmul.f32.gmra.mxu2 %v11380_v36  ;;  %v6037_v33 = vadd.f32 %v11143_v14, %v5924_v50  ;;  %v11406_v3 = vld [vmem:[#allocation2 + $0x152] sm:$0xff]  ;;  %v7146_v14 = vld [vmem:[%s11817_s1 + $0xd00] sm:$0xff] }
 0x6d0   : > { %6416 = vmatmul.f32.gmra.mxu0 %v5051_v4  ;;  %6484 = vmatmul.f32.gmra.mxu1 %v11145_v11  ;;  %v11411_v4 = vld [vmem:[#allocation2 + $0x151] sm:$0xff] }
 0x6d1   : > { %6572 = vmatpush.msra.mxu2 %v7146_v14 }
 0x6d2   : > { %v6146_v34 = vpop.f32.mrf.mxu2  ;;  %6309 = vmatmul.f32.gmra.mxu3 %v11392_v51 }
 0x6d3   : > { %v11394_v44 = vadd.f32 %v6146_v34, %v6034_v54  ;;  %v11415_v48 = vpop.f32.mrf.mxu1  ;;  %v11423_v54 = vld [vmem:[#allocation2 + $0x15a] sm:$0xff] }
 0x6d7   : > { %6196 = vmatmul.f32.gmra.mxu2 %v11399_v58 }
 0x6d8   : > { %6419 = vmatmul.f32.gmra.mxu0 %v5052_v12  ;;  %6487 = vmatmul.f32.gmra.mxu1 %v11168_v28  ;;  %v6040_v28 = vadd.f32 %v11170_v0, %v5927_v7  ;;  %v5930_v12 = vadd.f32 %v10911_v24, %v10903_v1  ;;  %v5055_v7 = vld [vmem:[#allocation2 + $0x170] sm:$0xff]  ;;  %v5933_v1 = vadd.f32 %v10950_v57, %v10942_v62 }
 0x6d9   : > { %v5936_v62 = vadd.f32 %v10971_v6, %v10969_v19  ;;  %v12258_v19 = vld [vmem:[#allocation14_spill] sm:$0xff]  ;;  %v12259_v6 = vld [vmem:[#allocation15_spill] sm:$0xff] }
 0x6da   : > { %v6149_v11 = vpop.f32.mrf.mxu2  ;;  %6312 = vmatmul.f32.gmra.mxu3 %v11406_v3  ;;  %v6043_v0 = vadd.f32 %v11205_v52, %v5930_v12  ;;  %v6046_v24 = vadd.f32 %v11221_v53, %v5933_v1  ;;  %v11449_v52 = vld [vmem:[#allocation2 + $0x172] sm:$0xff] }
 0x6db   : > { %v11408_v59 = vadd.f32 %v6149_v11, %v6037_v33  ;;  %v11434_v50 = vpop.f32.mrf.mxu1  ;;  %v11437_v33 = vld [vmem:[#allocation2 + $0x16a] sm:$0xff]  ;;  %v6049_v57 = vadd.f32 %v11244_v38, %v5936_v62  ;;  %v12256_v53 = vld [vmem:[#allocation5_spill] sm:$0xff] }
 0x6dc   : > { %v11484_v62 = vld [vmem:[#allocation2 + $0x189] sm:$0xff] }
 0x6df   : > { %6199 = vmatmul.f32.gmra.mxu2 %v11411_v4 }
 0x6e0   : > { %6422 = vmatmul.f32.gmra.mxu0 %v5053_v46  ;;  %6490 = vmatmul.f32.gmra.mxu1 %v11193_v5  ;;  %v11442_v46 = vld [vmem:[#allocation2 + $0x169] sm:$0xff] }
 0x6e2   : > { %v6152_v61 = vpop.f32.mrf.mxu2  ;;  %6315 = vmatmul.f32.gmra.mxu3 %v11423_v54 }
 0x6e3   : > { %v11425_v34 = vadd.f32 %v6152_v61, %v6040_v28  ;;  %v11451_v14 = vpop.f32.mrf.mxu1  ;;  %v11456_v61 = vld [vmem:[#allocation2 + $0x171] sm:$0xff] }
 0x6e7   : > { %6202 = vmatmul.f32.gmra.mxu2 %v11428_v40 }
 0x6e8   : > { %6425 = vmatmul.f32.gmra.mxu0 %v5054_v30  ;;  %6493 = vmatmul.f32.gmra.mxu1 %v11215_v63  ;;  %v11464_v30 = vld [vmem:[#allocation2 + $0x182] sm:$0xff] }
 0x6ea   : > { %v6155_v5 = vpop.f32.mrf.mxu2  ;;  %6318 = vmatmul.f32.gmra.mxu3 %v11437_v33 }
 0x6eb   : > { %v11439_v11 = vadd.f32 %v6155_v5, %v6043_v0  ;;  %v11469_v0 = vpop.f32.mrf.mxu1  ;;  %v11471_v5 = vld [vmem:[#allocation2 + $0x181] sm:$0xff] }
 0x6ef   : > { %6205 = vmatmul.f32.gmra.mxu2 %v11442_v46 }
 0x6f0   : > { %6428 = vmatmul.f32.gmra.mxu0 %v5055_v7  ;;  %6496 = vmatmul.f32.gmra.mxu1 %v11228_v37  ;;  %v5939_v7 = vadd.f32 %v12259_v6, %v12258_v19 }
 0x6f2   : > { %v6158_v63 = vpop.f32.mrf.mxu2  ;;  %6321 = vmatmul.f32.gmra.mxu3 %v11449_v52  ;;  %v6052_v38 = vadd.f32 %v11264_v60, %v5939_v7 }
 0x6f3   : > { %v11453_v28 = vadd.f32 %v6158_v63, %v6046_v24  ;;  %v11479_v24 = vld [vmem:[#allocation2 + $0x18a] sm:$0xff]  ;;  %v11488_v19 = vpop.f32.mrf.mxu1 }
 0x6f4   : > { %12261 = vst [vmem:[#allocation47_spill] sm:$0xff] %v11479_v24 }
 0x6f7   : > { %6208 = vmatmul.f32.gmra.mxu2 %v11456_v61 }
 0x6f8   : > { %6431 = vmatmul.f32.gmra.mxu0 %v11234_v13  ;;  %6499 = vmatmul.f32.gmra.mxu1 %v12256_v53  ;;  %v12260_v13 = vld [vmem:[#allocation6_spill] sm:$0xff] }
 0x6f9   : > { %v12264_v53 = vld [vmem:[#allocation26_spill] sm:$0xff] }
 0x6fa   : > { %v6161_v37 = vpop.f32.mrf.mxu2  ;;  %6324 = vmatmul.f32.gmra.mxu3 %v11464_v30 }
 0x6fb   : > { %v11466_v12 = vadd.f32 %v6161_v37, %v6049_v57  ;;  %v12263_v57 = vld [vmem:[#allocation24_spill] sm:$0xff] }
 0x6fc   : > { %v5942_v37 = vadd.f32 %v12264_v53, %v12263_v57  ;;  %v11498_v53 = vpop.f32.mrf.mxu1 }
 0x6fd   : > { %12257 = vst [vmem:[#allocation58_spill] sm:$0xff] %v11466_v12 }
 0x6fe   : > { %v6055_v60 = vadd.f32 %v11283_v25, %v5942_v37  ;;  %v5157_v25 = vld [vmem:[#allocation2 + $0x3a] sm:$0xff] }
 0x6ff   : > { %6211 = vmatmul.f32.gmra.mxu2 %v11471_v5  ;;  %v12268_v37 = vld [vmem:[#allocation21_spill] sm:$0xff] }
 0x700   : > { %6434 = vmatmul.f32.gmra.mxu0 %v11249_v31  ;;  %6502 = vmatmul.f32.gmra.mxu1 %v12260_v13  ;;  %v7237_v31 = vld [vmem:[#allocation2] sm:$0xff] }
 0x701   : > { %v12265_v13 = vld [vmem:[#allocation34_spill] sm:$0xff] }
 0x702   : > { %v6164_v1 = vpop.f32.mrf.mxu2  ;;  %6327 = vmatmul.f32.gmra.mxu3 %v11479_v24 }
 0x703   : > { %v11481_v63 = vadd.f32 %v6164_v1, %v6052_v38  ;;  %v5156_v38 = vld [vmem:[#allocation2 + $0x32] sm:$0xff] }
 0x704   : > { %v12266_v1 = vld [vmem:[#allocation32_spill] sm:$0xff] }
 0x705   : > { %12262 = vst [vmem:[#allocation56_spill] sm:$0xff] %v11481_v63  ;;  %v5945_v63 = vadd.f32 %v12266_v1, %v12265_v13  ;;  %v12269_v13 = vld [vmem:[#allocation22_spill] sm:$0xff] }
 0x707   : > { %6214 = vmatmul.f32.gmra.mxu2 %v11484_v62  ;;  %v6058_v57 = vadd.f32 %v11303_v8, %v5945_v63  ;;  %v5158_v63 = vld [vmem:[#allocation2 + $0x4a] sm:$0xff] }
 0x708   : > { %6437 = vmatmul.f32.gmra.mxu0 %v7237_v31  ;;  %6505 = vmatmul.f32.gmra.mxu1 %v11275_v56  ;;  %v12267_v56 = vld [vmem:[#allocation43_spill] sm:$0xff] }
 0x70a   : > { %v6167_v6 = vpop.f32.mrf.mxu2 }
 0x70b   : > { %v11493_v7 = vadd.f32 %v6167_v6, %v6055_v60  ;;  %v5948_v60 = vadd.f32 %v12268_v37, %v12267_v56  ;;  %v12272_v56 = vld [vmem:[#allocation45_spill] sm:$0xff] }
 0x70d   : > { %v6061_v6 = vadd.f32 %v11318_v26, %v5948_v60  ;;  %v12273_v60 = vld [vmem:[#allocation12_spill] sm:$0xff] }
 0x70f   : > { %6573 = vmatmul.f32.vlgmr.msra.gmra.mxu2 %v5156_v38 }
 0x710   : > { %6440 = vmatmul.f32.gmra.mxu0 %v7237_v31  ;;  %6508 = vmatmul.f32.gmra.mxu1 %v11289_v17  ;;  %v11507_v31 = vpop.f32.mrf.mxu1  ;;  %v12270_v17 = vld [vmem:[#allocation35_spill] sm:$0xff] }
 0x711   : > { %v5951_v1 = vadd.f32 %v12270_v17, %v12269_v13  ;;  %v12275_v13 = vld [vmem:[#allocation38_spill] sm:$0xff] }
 0x712   : > { %v6170_v24 = vpop.f32.mrf.mxu2 }
 0x713   : > { %v11501_v12 = vadd.f32 %v6170_v24, %v6058_v57  ;;  %v6064_v24 = vadd.f32 %v11339_v20, %v5951_v1  ;;  %v12274_v20 = vld [vmem:[#allocation25_spill] sm:$0xff]  ;;  %v12276_v1 = vld [vmem:[#allocation42_spill] sm:$0xff] }
 0x717   : > { %6576 = vmatmul.f32.gmra.mxu2 %v5157_v25 }
 0x718   : > { %6511 = vmatmul.f32.gmra.mxu1 %v11306_v45  ;;  %v11517_v26 = vpop.f32.mrf.mxu1  ;;  %v12271_v45 = vld [vmem:[#allocation41_spill] sm:$0xff] }
 0x719   : > { %v5954_v37 = vadd.f32 %v12272_v56, %v12271_v45  ;;  %v12278_v56 = vld [vmem:[#allocation33_spill] sm:$0xff] }
 0x71a   : > { %v6173_v38 = vpop.f32.mrf.mxu2 }
 0x71b   : > { %v11509_v8 = vadd.f32 %v6173_v38, %v6061_v6  ;;  %v6067_v6 = vadd.f32 %v11360_v42, %v5954_v37  ;;  %v12277_v42 = vld [vmem:[#allocation51_spill] sm:$0xff] }
 0x71c   : > { %v12279_v37 = vld [vmem:[#allocation27_spill] sm:$0xff] }
 0x71f   : > { %6579 = vmatmul.f32.gmra.mxu2 %v5158_v63 }
 0x720   : > { %6514 = vmatmul.f32.gmra.mxu1 %v11320_v32  ;;  %v5957_v32 = vadd.f32 %v12275_v13, %v12274_v20  ;;  %v11528_v17 = vpop.f32.mrf.mxu1  ;;  %v12281_v13 = vld [vmem:[#allocation44_spill] sm:$0xff] }
 0x722   : > { %v6176_v57 = vpop.f32.mrf.mxu2 }
 0x723   : > { %v11515_v25 = vadd.f32 %v6176_v57, %v6064_v24  ;;  %v6070_v24 = vadd.f32 %v11377_v10, %v5957_v32  ;;  %v12280_v10 = vld [vmem:[#allocation40_spill] sm:$0xff] }
 0x724   : > { %v12282_v32 = vld [vmem:[#allocation48_spill] sm:$0xff] }
 0x727   : > { %6582 = vmatmul.f32.gmra.mxu2 %v12273_v60 }
 0x728   : > { %6517 = vmatmul.f32.gmra.mxu1 %v11335_v23  ;;  %v5960_v23 = vadd.f32 %v12278_v56, %v12277_v42  ;;  %v12283_v42 = vld [vmem:[#allocation30_spill] sm:$0xff]  ;;  %v12284_v56 = vld [vmem:[#allocation29_spill] sm:$0xff] }
 0x72a   : > { %v6179_v38 = vpop.f32.mrf.mxu2  ;;  %v6073_v60 = vadd.f32 %v11397_v35, %v5960_v23  ;;  %v12285_v23 = vld [vmem:[#allocation46_spill] sm:$0xff] }
 0x72b   : > { %v11524_v63 = vadd.f32 %v6179_v38, %v6067_v6  ;;  %v11539_v6 = vpop.f32.mrf.mxu1 }
 0x72f   : > { %6585 = vmatmul.f32.gmra.mxu2 %v12276_v1 }
 0x730   : > { %6520 = vmatmul.f32.gmra.mxu1 %v11349_v18  ;;  %v5963_v18 = vadd.f32 %v12281_v13, %v12280_v10  ;;  %v12287_v10 = vld [vmem:[#allocation18_spill] sm:$0xff] }
 0x732   : > { %v6182_v57 = vpop.f32.mrf.mxu2  ;;  %v6076_v1 = vadd.f32 %v11415_v48, %v5963_v18  ;;  %v12288_v18 = vld [vmem:[#allocation39_spill] sm:$0xff] }
 0x733   : > { %v11533_v45 = vadd.f32 %v6182_v57, %v6070_v24  ;;  %v11549_v57 = vpop.f32.mrf.mxu1 }
 0x737   : > { %6588 = vmatmul.f32.gmra.mxu2 %v12279_v37 }
 0x738   : > { %6523 = vmatmul.f32.gmra.mxu1 %v11366_v2  ;;  %v5966_v2 = vadd.f32 %v12284_v56, %v12283_v42  ;;  %v12290_v42 = vld [vmem:[#allocation52_spill] sm:$0xff] }
 0x73a   : > { %v6185_v38 = vpop.f32.mrf.mxu2  ;;  %v6079_v37 = vadd.f32 %v11434_v50, %v5966_v2  ;;  %v12289_v50 = vld [vmem:[#allocation36_spill] sm:$0xff]  ;;  %v12291_v2 = vld [vmem:[#allocation55_spill] sm:$0xff] }
 0x73b   : > { %v11542_v20 = vadd.f32 %v6185_v38, %v6073_v60  ;;  %v11560_v48 = vpop.f32.mrf.mxu1 }
 0x73f   : > { %6591 = vmatmul.f32.gmra.mxu2 %v12282_v32 }
 0x740   : > { %6526 = vmatmul.f32.gmra.mxu1 %v11380_v36  ;;  %v12286_v36 = vld [vmem:[#allocation50_spill] sm:$0xff] }
 0x741   : > { %v5969_v13 = vadd.f32 %v12287_v10, %v12286_v36  ;;  %v12293_v36 = vld [vmem:[#allocation17_spill] sm:$0xff]  ;;  %v12294_v10 = vld [vmem:[#allocation7_spill] sm:$0xff] }
 0x742   : > { %v6188_v24 = vpop.f32.mrf.mxu2 }
 0x743   : > { %v11551_v35 = vadd.f32 %v6188_v24, %v6076_v1  ;;  %v6082_v32 = vadd.f32 %v11451_v14, %v5969_v13  ;;  %v11571_v56 = vpop.f32.mrf.mxu1  ;;  %v12292_v14 = vld [vmem:[#allocation53_spill] sm:$0xff] }
 0x747   : > { %6594 = vmatmul.f32.gmra.mxu2 %v12285_v23 }
 0x748   : > { %6529 = vmatmul.f32.gmra.mxu1 %v11399_v58  ;;  %v5972_v58 = vadd.f32 %v12290_v42, %v12289_v50  ;;  %v12296_v50 = vld [vmem:[#allocation57_spill] sm:$0xff]  ;;  %v12297_v42 = vld [vmem:[#allocation4_spill] sm:$0xff] }
 0x74a   : > { %v6191_v60 = vpop.f32.mrf.mxu2  ;;  %v6085_v23 = vadd.f32 %v11469_v0, %v5972_v58  ;;  %v12295_v0 = vld [vmem:[#allocation59_spill] sm:$0xff] }
 0x74b   : > { %v11558_v38 = vadd.f32 %v6191_v60, %v6079_v37 }
 0x74f   : > { %6597 = vmatmul.f32.gmra.mxu2 %v12288_v18  ;;  %v11582_v18 = vpop.f32.mrf.mxu1 }
 0x750   : > { %6532 = vmatmul.f32.gmra.mxu1 %v11411_v4  ;;  %v5975_v4 = vadd.f32 %v12293_v36, %v12292_v14  ;;  %v12299_v14 = vld [vmem:[#allocation10_spill] sm:$0xff]  ;;  %v12300_v36 = vld [vmem:[#allocation49_spill] sm:$0xff] }
 0x752   : > { %v6194_v1 = vpop.f32.mrf.mxu2  ;;  %v6088_v13 = vadd.f32 %v11488_v19, %v5975_v4 }
 0x753   : > { %v11567_v24 = vadd.f32 %v6194_v1, %v6082_v32 }
 0x757   : > { %6600 = vmatmul.f32.gmra.mxu2 %v12291_v2 }
 0x758   : > { %6535 = vmatmul.f32.gmra.mxu1 %v11428_v40  ;;  %v5978_v40 = vadd.f32 %v12296_v50, %v12295_v0  ;;  %v12303_v50 = vld [vmem:[#allocation9_spill] sm:$0xff] }
 0x75a   : > { %v6197_v37 = vpop.f32.mrf.mxu2  ;;  %v6091_v58 = vadd.f32 %v11498_v53, %v5978_v40 }
 0x75b   : > { %v11576_v60 = vadd.f32 %v6197_v37, %v6085_v23  ;;  %v11592_v23 = vpop.f32.mrf.mxu1  ;;  %v12298_v37 = vld [vmem:[#allocation8_spill] sm:$0xff] }
 0x75f   : > { %6603 = vmatmul.f32.gmra.mxu2 %v12294_v10 }
 0x760   : > { %6538 = vmatmul.f32.gmra.mxu1 %v11442_v46  ;;  %v5981_v46 = vadd.f32 %v12299_v14, %v12298_v37 }
 0x762   : > { %v6200_v32 = vpop.f32.mrf.mxu2  ;;  %v6094_v4 = vadd.f32 %v11507_v31, %v5981_v46  ;;  %v5122_v31 = vld [vmem:[#allocation2 + $0x199] sm:$0xff] }
 0x763   : > { %v11585_v1 = vadd.f32 %v6200_v32, %v6088_v13  ;;  %v11603_v53 = vpop.f32.mrf.mxu1  ;;  %v12302_v32 = vld [vmem:[#allocation11_spill] sm:$0xff]  ;;  %v12306_v46 = vld [vmem:[#allocation13_spill] sm:$0xff] }
 0x767   : > { %6606 = vmatmul.f32.gmra.mxu2 %v12297_v42 }
 0x768   : > { %6541 = vmatmul.f32.gmra.mxu1 %v11456_v61  ;;  %v12301_v61 = vld [vmem:[#allocation20_spill] sm:$0xff] }
 0x769   : > { %v5984_v0 = vadd.f32 %v12302_v32, %v12301_v61  ;;  %v12307_v61 = vld [vmem:[#allocation23_spill] sm:$0xff] }
 0x76a   : > { %v6203_v2 = vpop.f32.mrf.mxu2 }
 0x76b   : > { %v11594_v19 = vadd.f32 %v6203_v2, %v6091_v58  ;;  %v6097_v40 = vadd.f32 %v11517_v26, %v5984_v0  ;;  %v12304_v2 = vld [vmem:[#allocation16_spill] sm:$0xff]  ;;  %v11614_v14 = vpop.f32.mrf.mxu1  ;;  %v5123_v26 = vld [vmem:[#allocation2 + $0x1a1] sm:$0xff] }
 0x76f   : > { %6609 = vmatmul.f32.gmra.mxu2 %v12300_v36 }
 0x770   : > { %6544 = vmatmul.f32.gmra.mxu1 %v11471_v5  ;;  %v12305_v5 = vld [vmem:[#allocation31_spill] sm:$0xff] }
 0x771   : > { %v5987_v37 = vadd.f32 %v12305_v5, %v12304_v2 }
 0x772   : > { %v6206_v10 = vpop.f32.mrf.mxu2 }
 0x773   : > { %v11601_v13 = vadd.f32 %v6206_v10, %v6094_v4  ;;  %v6100_v36 = vadd.f32 %v11528_v17, %v5987_v37  ;;  %v6462_v17 = vadd.f32 %v11549_v57, %v11279_v29  ;;  %v6465_v29 = vadd.f32 %v11560_v48, %v11293_v47 }
 0x777   : > { %6612 = vmatmul.f32.gmra.mxu2 %v12303_v50  ;;  %v11624_v50 = vpop.f32.mrf.mxu1 }
 0x778   : > { %6547 = vmatmul.f32.gmra.mxu1 %v11484_v62  ;;  %v12308_v62 = vld [vmem:[#allocation37_spill] sm:$0xff] }
 0x779   : > { %v5990_v32 = vadd.f32 %v12308_v62, %v12307_v61  ;;  %v12309_v62 = vld [vmem:[#allocation28_spill] sm:$0xff] }
 0x77a   : > { %v6209_v42 = vpop.f32.mrf.mxu2 }
 0x77b   : > { %v11610_v58 = vadd.f32 %v6209_v42, %v6097_v40  ;;  %v6103_v0 = vadd.f32 %v11539_v6, %v5990_v32  ;;  %v11639_v6 = vld [vmem:[%s11819_s3 + $0x2] ss:$0 sm:$0xff]  ;;  %v6468_v32 = vadd.f32 %v11571_v56, %v12309_v62 }
 0x77f   : > { %6615 = vmatmul.f32.gmra.mxu2 %v12306_v46  ;;  %v11659_v61 = vpop.f32.mrf.mxu1 }
 0x780   : > { %6550 = vmatmul.f32.gmra.mxu1 %v5122_v31  ;;  %v11634_v31 = vld [vmem:[%s11818_s2 + $0x2] ss:$0 sm:$0xff] }
 0x782   : > { %v6212_v4 = vpop.f32.mrf.mxu2 }
 0x783   : > { %v11618_v10 = vadd.f32 %v6212_v4, %v6100_v36  ;;  %v6259_v36 = vpop.f32.mrf.mxu3 }
 0x787   : > { %6618 = vmatmul.f32.gmra.mxu2 %v11272_v43 }
 0x788   : > { %6553 = vmatmul.f32.gmra.mxu1 %v5123_v26  ;;  %v11655_v26 = vpop.f32.mrf.mxu0 }
 0x78a   : > { %v6215_v40 = vpop.f32.mrf.mxu2 }
 0x78b   : > { %v11626_v42 = vadd.f32 %v6215_v40, %v6103_v0 }
 0x78f   : > { %6621 = vmatmul.f32.gmra.mxu2 %v11286_v21 }
 0x792   : > { %v6574_v2 = vpop.f32.mrf.mxu2 }
 0x793   : > { %v6575_v43 = vadd.f32 %v6574_v2, %v6462_v17  ;;  %v6262_v17 = vpop.f32.mrf.mxu3 }
 0x795   : > { %v6675_v5 = vmul.f32 %v11634_v31, %v6575_v43  ;;  %v11667_v43 = vpop.f32.mrf.mxu0 }
 0x797   : > { %v6712_v37 = vadd.f32 %v11639_v6, %v6675_v5  ;;  %6624 = vmatmul.f32.gmra.mxu2 %v11301_v39 }
 0x799   : > { %v6744_v21 = vmax.f32 %v6712_v37, 0.0 }
 0x79a   : > { %v6577_v57 = vpop.f32.mrf.mxu2 }
 0x79b   : > { %6776 = vst [vmem:[%s11649_s12] sm:$0xff] %v6744_v21  ;;  %v6578_v46 = vadd.f32 %v6577_v57, %v6465_v29  ;;  %v11671_v29 = vpop.f32.mrf.mxu1 }
 0x79d   : > { %v6676_v4 = vmul.f32 %v11634_v31, %v6578_v46 }
 0x79f   : > { %v6713_v39 = vadd.f32 %v11639_v6, %v6676_v4  ;;  %6627 = vmatmul.f32.gmra.mxu2 %v11315_v9  ;;  %v12310_v9 = vld [vmem:[#allocation19_spill] sm:$0xff]  ;;  %v12311_v4 = vld [vmem:[#allocation54_spill] sm:$0xff] }
 0x7a0   : > { %v6471_v5 = vadd.f32 %v11582_v18, %v12310_v9  ;;  %v6378_v18 = vpop.f32.mrf.mxu0 }
 0x7a1   : > { %v6745_v47 = vmax.f32 %v6713_v39, 0.0  ;;  %v6474_v39 = vadd.f32 %v11592_v23, %v12311_v4 }
 0x7a2   : > { %v6580_v48 = vpop.f32.mrf.mxu2 }
 0x7a3   : > { %6777 = vst [vmem:[%s11649_s12 + $0x8] sm:$0xff] %v6745_v47  ;;  %v6581_v0 = vadd.f32 %v6580_v48, %v6468_v32  ;;  %v6491_v48 = vpop.f32.mrf.mxu1 }
 0x7a5   : > { %v6677_v40 = vmul.f32 %v11634_v31, %v6581_v0 }
 0x7a7   : > { %v6714_v2 = vadd.f32 %v11639_v6, %v6677_v40  ;;  %6630 = vmatmul.f32.gmra.mxu2 %v11332_v41  ;;  %v6265_v41 = vpop.f32.mrf.mxu3 }
 0x7a9   : > { %v6746_v37 = vmax.f32 %v6714_v2, 0.0 }
 0x7aa   : > { %v6583_v56 = vpop.f32.mrf.mxu2 }
 0x7ab   : > { %6778 = vst [vmem:[%s11649_s12 + $0x10] sm:$0xff] %v6746_v37  ;;  %v6584_v21 = vadd.f32 %v6583_v56, %v6471_v5  ;;  %v6381_v37 = vpop.f32.mrf.mxu0 }
 0x7ad   : > { %v6678_v57 = vmul.f32 %v11634_v31, %v6584_v21  ;;  %v11687_v21 = vpop.f32.mrf.mxu1 }
 0x7af   : > { %v6715_v46 = vadd.f32 %v11639_v6, %v6678_v57  ;;  %6633 = vmatmul.f32.gmra.mxu2 %v11346_v27  ;;  %v6477_v27 = vadd.f32 %v11603_v53, %v11353_v22  ;;  %v6268_v9 = vpop.f32.mrf.mxu3 }
 0x7b1   : > { %v6747_v62 = vmax.f32 %v6715_v46, 0.0 }
 0x7b2   : > { %v6586_v32 = vpop.f32.mrf.mxu2 }
 0x7b3   : > { %6779 = vst [vmem:[%s11649_s12 + $0x18] sm:$0xff] %v6747_v62  ;;  %v6587_v47 = vadd.f32 %v6586_v32, %v6474_v39  ;;  %v6384_v62 = vpop.f32.mrf.mxu0 }
 0x7b5   : > { %v6679_v0 = vmul.f32 %v11634_v31, %v6587_v47  ;;  %v11697_v47 = vpop.f32.mrf.mxu1 }
 0x7b7   : > { %v6716_v40 = vadd.f32 %v11639_v6, %v6679_v0  ;;  %6636 = vmatmul.f32.gmra.mxu2 %v11363_v49  ;;  %v6480_v49 = vadd.f32 %v11614_v14, %v11370_v16  ;;  %v6271_v4 = vpop.f32.mrf.mxu3  ;;  %v6260_v14 = vadd.f32 %v6259_v36, %v11394_v44  ;;  %v6263_v44 = vadd.f32 %v6262_v17, %v11408_v59 }
 0x7b9   : > { %v6748_v2 = vmax.f32 %v6716_v40, 0.0 }
 0x7ba   : > { %v6589_v5 = vpop.f32.mrf.mxu2 }
 0x7bb   : > { %6780 = vst [vmem:[%s11649_s12 + $0x20] sm:$0xff] %v6748_v2  ;;  %v6590_v23 = vadd.f32 %v6589_v5, %v6477_v27  ;;  %v6373_v5 = vadd.f32 %v11655_v26, %v6260_v14 }
 0x7bd   : > { %v6680_v56 = vmul.f32 %v11634_v31, %v6590_v23 }
 0x7bf   : > { %v6717_v57 = vadd.f32 %v11639_v6, %v6680_v56  ;;  %6639 = vmatmul.f32.gmra.mxu2 %v11375_v15  ;;  %v6483_v15 = vadd.f32 %v11624_v50, %v11384_v55  ;;  %v6274_v2 = vpop.f32.mrf.mxu3  ;;  %v6486_v56 = vadd.f32 %v11659_v61, %v6373_v5  ;;  %v6500_v50 = vpop.f32.mrf.mxu1 }
 0x7c1   : > { %v6749_v46 = vmax.f32 %v6717_v57, 0.0 }
 0x7c2   : > { %v6592_v22 = vpop.f32.mrf.mxu2 }
 0x7c3   : > { %6781 = vst [vmem:[%s11649_s12 + $0x28] sm:$0xff] %v6749_v46  ;;  %v6593_v53 = vadd.f32 %v6592_v22, %v6480_v49  ;;  %v6376_v46 = vadd.f32 %v11667_v43, %v6263_v44 }
 0x7c5   : > { %v6681_v39 = vmul.f32 %v11634_v31, %v6593_v53  ;;  %v6489_v22 = vadd.f32 %v11671_v29, %v6376_v46 }
 0x7c7   : > { %v6718_v32 = vadd.f32 %v11639_v6, %v6681_v39  ;;  %6642 = vmatmul.f32.gmra.mxu2 %v11392_v51  ;;  %v6387_v51 = vpop.f32.mrf.mxu0  ;;  %v6266_v39 = vadd.f32 %v6265_v41, %v11425_v34  ;;  %v6503_v17 = vpop.f32.mrf.mxu1 }
 0x7c9   : > { %v6750_v0 = vmax.f32 %v6718_v32, 0.0 }
 0x7ca   : > { %v6595_v16 = vpop.f32.mrf.mxu2 }
 0x7cb   : > { %6782 = vst [vmem:[%s11649_s12 + $0x30] sm:$0xff] %v6750_v0  ;;  %v6596_v40 = vadd.f32 %v6595_v16, %v6483_v15  ;;  %v6379_v0 = vadd.f32 %v6378_v18, %v6266_v39  ;;  %v12313_v39 = vld [vmem:[#allocation47_spill] sm:$0xff] }
 0x7cd   : > { %v6682_v27 = vmul.f32 %v11634_v31, %v6596_v40  ;;  %v6269_v40 = vadd.f32 %v6268_v9, %v11439_v11 }
 0x7cf   : > { %v6719_v23 = vadd.f32 %v11639_v6, %v6682_v27  ;;  %6645 = vmatmul.f32.gmra.mxu2 %v11406_v3  ;;  %v6277_v3 = vpop.f32.mrf.mxu3  ;;  %v6390_v32 = vpop.f32.mrf.mxu0 }
 0x7d0   : > { %v6506_v5 = vpop.f32.mrf.mxu1 }
 0x7d1   : > { %v6751_v55 = vmax.f32 %v6719_v23, 0.0  ;;  %v6382_v23 = vadd.f32 %v6381_v37, %v6269_v40 }
 0x7d2   : > { %v6598_v57 = vpop.f32.mrf.mxu2 }
 0x7d3   : > { %6783 = vst [vmem:[%s11649_s12 + $0x38] sm:$0xff] %v6751_v55  ;;  %v6599_v36 = vadd.f32 %v6598_v57, %v6486_v56  ;;  %v6272_v55 = vadd.f32 %v6271_v4, %v11453_v28 }
 0x7d5   : > { %v6683_v49 = vmul.f32 %v11634_v31, %v6599_v36  ;;  %v6385_v44 = vadd.f32 %v6384_v62, %v6272_v55 }
 0x7d7   : > { %v6720_v26 = vadd.f32 %v11639_v6, %v6683_v49  ;;  %6648 = vmatmul.f32.gmra.mxu2 %v11423_v54  ;;  %v6492_v54 = vadd.f32 %v6491_v48, %v6379_v0  ;;  %v6280_v29 = vpop.f32.mrf.mxu3  ;;  %v6393_v41 = vpop.f32.mrf.mxu0 }
 0x7d8   : > { %v6509_v49 = vpop.f32.mrf.mxu1 }
 0x7d9   : > { %v6752_v61 = vmax.f32 %v6720_v26, 0.0  ;;  %v12312_v26 = vld [vmem:[#allocation58_spill] sm:$0xff] }
 0x7da   : > { %v6601_v53 = vpop.f32.mrf.mxu2 }
 0x7db   : > { %6784 = vst [vmem:[%s11649_s12 + $0x40] sm:$0xff] %v6752_v61  ;;  %v6602_v59 = vadd.f32 %v6601_v53, %v6489_v22  ;;  %v6275_v22 = vadd.f32 %v6274_v2, %v12312_v26 }
 0x7dd   : > { %v6684_v15 = vmul.f32 %v11634_v31, %v6602_v59  ;;  %v6388_v53 = vadd.f32 %v6387_v51, %v6275_v22 }
 0x7df   : > { %v6721_v43 = vadd.f32 %v11639_v6, %v6684_v15  ;;  %6651 = vmatmul.f32.gmra.mxu2 %v11437_v33  ;;  %v6495_v33 = vadd.f32 %v11687_v21, %v6382_v23  ;;  %v6283_v9 = vpop.f32.mrf.mxu3  ;;  %v6396_v36 = vpop.f32.mrf.mxu0 }
 0x7e0   : > { %v6512_v0 = vpop.f32.mrf.mxu1 }
 0x7e1   : > { %v6753_v16 = vmax.f32 %v6721_v43, 0.0  ;;  %v12314_v43 = vld [vmem:[#allocation56_spill] sm:$0xff] }
 0x7e2   : > { %v6604_v14 = vpop.f32.mrf.mxu2 }
 0x7e3   : > { %6785 = vst [vmem:[%s11649_s12 + $0x48] sm:$0xff] %v6753_v16  ;;  %v6605_v34 = vadd.f32 %v6604_v14, %v6492_v54  ;;  %v6278_v54 = vadd.f32 %v6277_v3, %v12314_v43  ;;  %v5186_v16 = vld [vmem:[#allocation2 + $0x19a] sm:$0xff] }
 0x7e5   : > { %v6685_v27 = vmul.f32 %v11634_v31, %v6605_v34  ;;  %v6391_v40 = vadd.f32 %v6390_v32, %v6278_v54 }
 0x7e7   : > { %v6722_v18 = vadd.f32 %v11639_v6, %v6685_v27  ;;  %6654 = vmatmul.f32.gmra.mxu2 %v11449_v52  ;;  %v6498_v52 = vadd.f32 %v11697_v47, %v6385_v44  ;;  %v6286_v61 = vpop.f32.mrf.mxu3  ;;  %v6399_v59 = vpop.f32.mrf.mxu0  ;;  %v6504_v27 = vadd.f32 %v6503_v17, %v6391_v40 }
 0x7e8   : > { %v6515_v3 = vpop.f32.mrf.mxu1 }
 0x7e9   : > { %v6754_v48 = vmax.f32 %v6722_v18, 0.0 }
 0x7ea   : > { %v6607_v56 = vpop.f32.mrf.mxu2 }
 0x7eb   : > { %6786 = vst [vmem:[%s11649_s12 + $0x50] sm:$0xff] %v6754_v48  ;;  %v6608_v11 = vadd.f32 %v6607_v56, %v6495_v33  ;;  %v5187_v56 = vld [vmem:[#allocation2 + $0x1a2] sm:$0xff] }
 0x7ed   : > { %v6686_v57 = vmul.f32 %v11634_v31, %v6608_v11 }
 0x7ef   : > { %v6723_v37 = vadd.f32 %v11639_v6, %v6686_v57  ;;  %6657 = vmatmul.f32.gmra.mxu2 %v11464_v30  ;;  %v6501_v30 = vadd.f32 %v6500_v50, %v6388_v53  ;;  %v6289_v34 = vpop.f32.mrf.mxu3  ;;  %v6281_v50 = vadd.f32 %v6280_v29, %v11493_v7  ;;  %v6402_v33 = vpop.f32.mrf.mxu0 }
 0x7f1   : > { %v6755_v21 = vmax.f32 %v6723_v37, 0.0  ;;  %v6394_v11 = vadd.f32 %v6393_v41, %v6281_v50 }
 0x7f2   : > { %v6610_v46 = vpop.f32.mrf.mxu2 }
 0x7f3   : > { %6787 = vst [vmem:[%s11649_s12 + $0x58] sm:$0xff] %v6755_v21  ;;  %v6611_v28 = vadd.f32 %v6610_v46, %v6498_v52  ;;  %v6507_v57 = vadd.f32 %v6506_v5, %v6394_v11  ;;  %v6284_v52 = vadd.f32 %v6283_v9, %v11501_v12  ;;  %v6518_v46 = vpop.f32.mrf.mxu1  ;;  %v6287_v5 = vadd.f32 %v6286_v61, %v11509_v8 }
 0x7f5   : > { %v6687_v4 = vmul.f32 %v11634_v31, %v6611_v28  ;;  %v6397_v26 = vadd.f32 %v6396_v36, %v6284_v52  ;;  %v6400_v9 = vadd.f32 %v6399_v59, %v6287_v5 }
 0x7f7   : > { %v6724_v62 = vadd.f32 %v11639_v6, %v6687_v4  ;;  %6660 = vmatmul.f32.gmra.mxu2 %v12313_v39  ;;  %v6292_v17 = vpop.f32.mrf.mxu3  ;;  %v6405_v29 = vpop.f32.mrf.mxu0  ;;  %v6510_v41 = vadd.f32 %v6509_v49, %v6397_v26  ;;  %v6290_v49 = vadd.f32 %v6289_v34, %v11515_v25 }
 0x7f9   : > { %v6756_v15 = vmax.f32 %v6724_v62, 0.0 }
 0x7fa   : > { %v6613_v47 = vpop.f32.mrf.mxu2 }
 0x7fb   : > { %6788 = vst [vmem:[%s11649_s12 + $0x60] sm:$0xff] %v6756_v15  ;;  %v6614_v2 = vadd.f32 %v6613_v47, %v6501_v30  ;;  %v6521_v15 = vpop.f32.mrf.mxu1  ;;  %v6513_v47 = vadd.f32 %v6512_v0, %v6400_v9  ;;  %v6293_v0 = vadd.f32 %v6292_v17, %v11524_v63 }
 0x7fd   : > { %v6688_v14 = vmul.f32 %v11634_v31, %v6614_v2  ;;  %v6403_v2 = vadd.f32 %v6402_v33, %v6290_v49  ;;  %v6406_v34 = vadd.f32 %v6405_v29, %v6293_v0 }
 0x7ff   : > { %v6725_v51 = vadd.f32 %v11639_v6, %v6688_v14  ;;  %6663 = vmatmul.f32.gmra.mxu2 %v5186_v16  ;;  %v6295_v62 = vpop.f32.mrf.mxu3  ;;  %v6408_v39 = vpop.f32.mrf.mxu0  ;;  %v6516_v59 = vadd.f32 %v6515_v3, %v6403_v2 }
 0x800   : > { %v6296_v3 = vadd.f32 %v6295_v62, %v11533_v45 }
 0x801   : > { %v6757_v23 = vmax.f32 %v6725_v51, 0.0 }
 0x802   : > { %v6616_v18 = vpop.f32.mrf.mxu2 }
 0x803   : > { %6789 = vst [vmem:[%s11649_s12 + $0x68] sm:$0xff] %v6757_v23  ;;  %v6617_v48 = vadd.f32 %v6616_v18, %v6504_v27  ;;  %v6524_v51 = vpop.f32.mrf.mxu1 }
 0x805   : > { %v6689_v55 = vmul.f32 %v11634_v31, %v6617_v48  ;;  %v6519_v48 = vadd.f32 %v6518_v46, %v6406_v34 }
 0x807   : > { %v6726_v32 = vadd.f32 %v11639_v6, %v6689_v55  ;;  %6666 = vmatmul.f32.gmra.mxu2 %v5187_v56  ;;  %v6298_v61 = vpop.f32.mrf.mxu3  ;;  %v6411_v14 = vpop.f32.mrf.mxu0 }
 0x808   : > { %v6299_v29 = vadd.f32 %v6298_v61, %v11542_v20 }
 0x809   : > { %v6758_v44 = vmax.f32 %v6726_v32, 0.0 }
 0x80a   : > { %v6619_v37 = vpop.f32.mrf.mxu2 }
 0x80b   : > { %6790 = vst [vmem:[%s11649_s12 + $0x70] sm:$0xff] %v6758_v44  ;;  %v6620_v7 = vadd.f32 %v6619_v37, %v6507_v57  ;;  %v6527_v32 = vpop.f32.mrf.mxu1  ;;  %v6409_v57 = vadd.f32 %v6408_v39, %v6296_v3 }
 0x80d   : > { %v6690_v21 = vmul.f32 %v11634_v31, %v6620_v7  ;;  %v6522_v17 = vadd.f32 %v6521_v15, %v6409_v57 }
 0x80f   : > { %v6727_v22 = vadd.f32 %v11639_v6, %v6690_v21  ;;  %v6301_v50 = vpop.f32.mrf.mxu3  ;;  %v6414_v55 = vpop.f32.mrf.mxu0 }
 0x811   : > { %v6759_v28 = vmax.f32 %v6727_v22, 0.0  ;;  %v6412_v22 = vadd.f32 %v6411_v14, %v6299_v29 }
 0x812   : > { %v6622_v4 = vpop.f32.mrf.mxu2 }
 0x813   : > { %6791 = vst [vmem:[%s11649_s12 + $0x78] sm:$0xff] %v6759_v28  ;;  %v6623_v53 = vadd.f32 %v6622_v4, %v6510_v41  ;;  %v6530_v26 = vpop.f32.mrf.mxu1  ;;  %v6525_v28 = vadd.f32 %v6524_v51, %v6412_v22 }
 0x815   : > { %v6691_v12 = vmul.f32 %v11634_v31, %v6623_v53  ;;  %v6302_v53 = vadd.f32 %v6301_v50, %v11551_v35 }
 0x817   : > { %v6728_v30 = vadd.f32 %v11639_v6, %v6691_v12  ;;  %v6304_v52 = vpop.f32.mrf.mxu3  ;;  %v6417_v46 = vpop.f32.mrf.mxu0  ;;  %v6415_v9 = vadd.f32 %v6414_v55, %v6302_v53 }
 0x818   : > { %v6305_v49 = vadd.f32 %v6304_v52, %v11558_v38 }
 0x819   : > { %v6760_v36 = vmax.f32 %v6728_v30, 0.0 }
 0x81a   : > { %v6625_v43 = vpop.f32.mrf.mxu2  ;;  %v6418_v61 = vadd.f32 %v6417_v46, %v6305_v49 }
 0x81b   : > { %6792 = vst [vmem:[%s11649_s12 + $0x80] sm:$0xff] %v6760_v36  ;;  %v6626_v54 = vadd.f32 %v6625_v43, %v6513_v47  ;;  %v6533_v15 = vpop.f32.mrf.mxu1  ;;  %v6528_v47 = vadd.f32 %v6527_v32, %v6415_v9 }
 0x81c   : > { %v6531_v14 = vadd.f32 %v6530_v26, %v6418_v61 }
 0x81d   : > { %v6692_v8 = vmul.f32 %v11634_v31, %v6626_v54 }
 0x81f   : > { %v6729_v16 = vadd.f32 %v11639_v6, %v6692_v8  ;;  %v6307_v12 = vpop.f32.mrf.mxu3  ;;  %v6420_v39 = vpop.f32.mrf.mxu0 }
 0x821   : > { %v6761_v40 = vmax.f32 %v6729_v16, 0.0 }
 0x822   : > { %v6628_v27 = vpop.f32.mrf.mxu2 }
 0x823   : > { %6793 = vst [vmem:[%s11649_s12 + $0x88] sm:$0xff] %v6761_v40  ;;  %v6629_v23 = vadd.f32 %v6628_v27, %v6516_v59  ;;  %v6536_v40 = vpop.f32.mrf.mxu1  ;;  %v6308_v27 = vadd.f32 %v6307_v12, %v11567_v24 }
 0x825   : > { %v6693_v25 = vmul.f32 %v11634_v31, %v6629_v23  ;;  %v6421_v23 = vadd.f32 %v6420_v39, %v6308_v27 }
 0x827   : > { %v6730_v18 = vadd.f32 %v11639_v6, %v6693_v25  ;;  %v6310_v8 = vpop.f32.mrf.mxu3  ;;  %v6423_v16 = vpop.f32.mrf.mxu0 }
 0x829   : > { %v6762_v33 = vmax.f32 %v6730_v18, 0.0  ;;  %v6534_v18 = vadd.f32 %v6533_v15, %v6421_v23 }
 0x82a   : > { %v6631_v56 = vpop.f32.mrf.mxu2 }
 0x82b   : > { %6794 = vst [vmem:[%s11649_s12 + $0x90] sm:$0xff] %v6762_v33  ;;  %v6632_v11 = vadd.f32 %v6631_v56, %v6519_v48  ;;  %v6311_v33 = vadd.f32 %v6310_v8, %v11576_v60  ;;  %v6539_v55 = vpop.f32.mrf.mxu1 }
 0x82d   : > { %v6694_v63 = vmul.f32 %v11634_v31, %v6632_v11  ;;  %v6424_v11 = vadd.f32 %v6423_v16, %v6311_v33 }
 0x82f   : > { %v6731_v44 = vadd.f32 %v11639_v6, %v6694_v63  ;;  %v6313_v34 = vpop.f32.mrf.mxu3  ;;  %v6426_v56 = vpop.f32.mrf.mxu0  ;;  %v6537_v63 = vadd.f32 %v6536_v40, %v6424_v11 }
 0x831   : > { %v6763_v37 = vmax.f32 %v6731_v44, 0.0 }
 0x832   : > { %v6634_v7 = vpop.f32.mrf.mxu2 }
 0x833   : > { %6795 = vst [vmem:[%s11649_s12 + $0x98] sm:$0xff] %v6763_v37  ;;  %v6635_v21 = vadd.f32 %v6634_v7, %v6522_v17  ;;  %v6314_v37 = vadd.f32 %v6313_v34, %v11585_v1  ;;  %v6542_v29 = vpop.f32.mrf.mxu1 }
 0x835   : > { %v6695_v45 = vmul.f32 %v11634_v31, %v6635_v21  ;;  %v6427_v21 = vadd.f32 %v6426_v56, %v6314_v37 }
 0x837   : > { %v6732_v41 = vadd.f32 %v11639_v6, %v6695_v45  ;;  %v6316_v44 = vpop.f32.mrf.mxu3  ;;  %v6429_v7 = vpop.f32.mrf.mxu0  ;;  %v6540_v45 = vadd.f32 %v6539_v55, %v6427_v21 }
 0x839   : > { %v6764_v4 = vmax.f32 %v6732_v41, 0.0  ;;  %v6317_v41 = vadd.f32 %v6316_v44, %v11594_v19 }
 0x83a   : > { %v6637_v5 = vpop.f32.mrf.mxu2 }
 0x83b   : > { %6796 = vst [vmem:[%s11649_s12 + $0xa0] sm:$0xff] %v6764_v4  ;;  %v6638_v62 = vadd.f32 %v6637_v5, %v6525_v28  ;;  %v6430_v5 = vadd.f32 %v6429_v7, %v6317_v41  ;;  %v6545_v12 = vpop.f32.mrf.mxu1 }
 0x83d   : > { %v6696_v20 = vmul.f32 %v11634_v31, %v6638_v62 }
 0x83f   : > { %v6733_v30 = vadd.f32 %v11639_v6, %v6696_v20  ;;  %v6319_v4 = vpop.f32.mrf.mxu3  ;;  %v6432_v53 = vpop.f32.mrf.mxu0  ;;  %v6543_v20 = vadd.f32 %v6542_v29, %v6430_v5 }
 0x841   : > { %v6765_v36 = vmax.f32 %v6733_v30, 0.0  ;;  %v6320_v30 = vadd.f32 %v6319_v4, %v11601_v13 }
 0x842   : > { %v6640_v43 = vpop.f32.mrf.mxu2 }
 0x843   : > { %6797 = vst [vmem:[%s11649_s12 + $0xa8] sm:$0xff] %v6765_v36  ;;  %v6641_v54 = vadd.f32 %v6640_v43, %v6528_v47  ;;  %v6433_v36 = vadd.f32 %v6432_v53, %v6320_v30  ;;  %v6548_v8 = vpop.f32.mrf.mxu1 }
 0x845   : > { %v6697_v35 = vmul.f32 %v11634_v31, %v6641_v54  ;;  %v6546_v54 = vadd.f32 %v6545_v12, %v6433_v36 }
 0x847   : > { %v6734_v2 = vadd.f32 %v11639_v6, %v6697_v35  ;;  %v6322_v47 = vpop.f32.mrf.mxu3  ;;  %v6435_v49 = vpop.f32.mrf.mxu0 }
 0x849   : > { %v6766_v59 = vmax.f32 %v6734_v2, 0.0  ;;  %v6323_v2 = vadd.f32 %v6322_v47, %v11610_v58 }
 0x84a   : > { %v6643_v51 = vpop.f32.mrf.mxu2 }
 0x84b   : > { %6798 = vst [vmem:[%s11649_s12 + $0xb0] sm:$0xff] %v6766_v59  ;;  %v6644_v0 = vadd.f32 %v6643_v51, %v6531_v14  ;;  %v6436_v14 = vadd.f32 %v6435_v49, %v6323_v2  ;;  %v6551_v34 = vpop.f32.mrf.mxu1 }
 0x84d   : > { %v6698_v38 = vmul.f32 %v11634_v31, %v6644_v0  ;;  %v6549_v51 = vadd.f32 %v6548_v8, %v6436_v14 }
 0x84f   : > { %v6735_v25 = vadd.f32 %v11639_v6, %v6698_v38  ;;  %v6325_v40 = vpop.f32.mrf.mxu3  ;;  %v6438_v0 = vpop.f32.mrf.mxu0 }
 0x850   : > { %v6326_v23 = vadd.f32 %v6325_v40, %v11618_v10 }
 0x851   : > { %v6767_v50 = vmax.f32 %v6735_v25, 0.0 }
 0x852   : > { %v6646_v48 = vpop.f32.mrf.mxu2 }
 0x853   : > { %6799 = vst [vmem:[%s11649_s12 + $0xb8] sm:$0xff] %v6767_v50  ;;  %v6647_v3 = vadd.f32 %v6646_v48, %v6534_v18  ;;  %v6439_v18 = vadd.f32 %v6438_v0, %v6326_v23 }
 0x855   : > { %v6699_v24 = vmul.f32 %v11634_v31, %v6647_v3  ;;  %v6552_v48 = vadd.f32 %v6551_v34, %v6439_v18 }
 0x857   : > { %v6736_v32 = vadd.f32 %v11639_v6, %v6699_v24  ;;  %v6328_v56 = vpop.f32.mrf.mxu3  ;;  %v6441_v11 = vpop.f32.mrf.mxu0 }
 0x858   : > { %v6329_v55 = vadd.f32 %v6328_v56, %v11626_v42 }
 0x859   : > { %v6768_v57 = vmax.f32 %v6736_v32, 0.0  ;;  %v6554_v32 = vpop.f32.mrf.mxu1 }
 0x85a   : > { %v6649_v17 = vpop.f32.mrf.mxu2 }
 0x85b   : > { %6800 = vst [vmem:[%s11649_s12 + $0xc0] sm:$0xff] %v6768_v57  ;;  %v6650_v52 = vadd.f32 %v6649_v17, %v6537_v63  ;;  %v6442_v63 = vadd.f32 %v6441_v11, %v6329_v55 }
 0x85d   : > { %v6700_v60 = vmul.f32 %v11634_v31, %v6650_v52  ;;  %v6555_v44 = vadd.f32 %v6554_v32, %v6442_v63 }
 0x85f   : > { %v6737_v46 = vadd.f32 %v11639_v6, %v6700_v60 }
 0x861   : > { %v6769_v26 = vmax.f32 %v6737_v46, 0.0 }
 0x862   : > { %v6652_v22 = vpop.f32.mrf.mxu2 }
 0x863   : > { %6801 = vst [vmem:[%s11649_s12 + $0xc8] sm:$0xff] %v6769_v26  ;;  %v6653_v28 = vadd.f32 %v6652_v22, %v6540_v45 }
 0x865   : > { %v6701_v1 = vmul.f32 %v11634_v31, %v6653_v28 }
 0x867   : > { %v6738_v62 = vadd.f32 %v11639_v6, %v6701_v1 }
 0x869   : > { %v6770_v9 = vmax.f32 %v6738_v62, 0.0 }
 0x86a   : > { %v6655_v39 = vpop.f32.mrf.mxu2 }
 0x86b   : > { %6802 = vst [vmem:[%s11649_s12 + $0xd0] sm:$0xff] %v6770_v9  ;;  %v6656_v15 = vadd.f32 %v6655_v39, %v6543_v20 }
 0x86d   : > { %v6702_v19 = vmul.f32 %v11634_v31, %v6656_v15 }
 0x86f   : > { %v6739_v43 = vadd.f32 %v11639_v6, %v6702_v19 }
 0x871   : > { %v6771_v35 = vmax.f32 %v6739_v43, 0.0 }
 0x872   : > { %v6658_v61 = vpop.f32.mrf.mxu2 }
 0x873   : > { %6803 = vst [vmem:[%s11649_s12 + $0xd8] sm:$0xff] %v6771_v35  ;;  %v6659_v16 = vadd.f32 %v6658_v61, %v6546_v54 }
 0x875   : > { %v6703_v13 = vmul.f32 %v11634_v31, %v6659_v16 }
 0x877   : > { %v6740_v59 = vadd.f32 %v11639_v6, %v6703_v13 }
 0x879   : > { %v6772_v27 = vmax.f32 %v6740_v59, 0.0 }
 0x87a   : > { %v6661_v38 = vpop.f32.mrf.mxu2 }
 0x87b   : > { %6804 = vst [vmem:[%s11649_s12 + $0xe0] sm:$0xff] %v6772_v27  ;;  %v6662_v25 = vadd.f32 %v6661_v38, %v6549_v51 }
 0x87d   : > { %v6704_v58 = vmul.f32 %v11634_v31, %v6662_v25 }
 0x87f   : > { %v6741_v50 = vadd.f32 %v11639_v6, %v6704_v58 }
 0x881   : > { %v6773_v33 = vmax.f32 %v6741_v50, 0.0 }
 0x882   : > { %v6664_v3 = vpop.f32.mrf.mxu2 }
 0x883   : > { %6805 = vst [vmem:[%s11649_s12 + $0xe8] sm:$0xff] %v6773_v33  ;;  %v6665_v24 = vadd.f32 %v6664_v3, %v6552_v48 }
 0x885   : > { %v6705_v10 = vmul.f32 %v11634_v31, %v6665_v24 }
 0x887   : > { %v6742_v57 = vadd.f32 %v11639_v6, %v6705_v10 }
 0x889   : > { %v6774_v17 = vmax.f32 %v6742_v57, 0.0 }
 0x88a   : > { %v6667_v37 = vpop.f32.mrf.mxu2 }
 0x88b   : > { %6806 = vst [vmem:[%s11649_s12 + $0xf0] sm:$0xff] %v6774_v17  ;;  %v6668_v52 = vadd.f32 %v6667_v37, %v6555_v44 }
 0x88d   : > { %v6706_v7 = vmul.f32 %v11634_v31, %v6668_v52 }
 0x88f   : > { %v6743_v60 = vadd.f32 %v11639_v6, %v6706_v7 }
 0x891   : > { %v6775_v42 = vmax.f32 %v6743_v60, 0.0 }
 0x893   : > { %6807 = vst [vmem:[%s11649_s12 + $0xf8] sm:$0xff] %v6775_v42 }
 0x894 PF: > { %s14_s15 = sadd.s32 1, %s7244_s15  }
 0x895   : > { %p11_p4 = scmp.ge.s32.totalorder %s14_s15, 4  }
 0x897   :  { %13 = sbr.rel (!%p11_p4) target bundleno = 1 (0x1), region = 74 }

</bundles_post_ra>
